<compile_context>
chip_gen: v7x
topology: tpu7x:2x2x1
jax: 0.10.0
libtpu: 0.0.40
codegen_flags: <defaults>
</compile_context>

<pallas_src>
import functools

import jax
import jax.numpy as jnp
from jax.experimental import pallas as pl
from jax.experimental.pallas import tpu as pltpu


# ----------------------------------------------------------------------------
# generic single-block linear kernel: [M, K] @ [K, N] + b
# ----------------------------------------------------------------------------
def _linear_kernel(x_ref, w_ref, b_ref, o_ref):
    o_ref[...] = (jnp.dot(x_ref[...], w_ref[...],
                          preferred_element_type=jnp.float32) + b_ref[...])


def linear(x, w, b):
    M, K = x.shape
    N = w.shape[1]
    return pl.pallas_call(
        _linear_kernel,
        out_shape=jax.ShapeDtypeStruct((M, N), jnp.float32),
    )(x.astype(jnp.float32), w.astype(jnp.float32),
      b.reshape(1, N).astype(jnp.float32))


# ----------------------------------------------------------------------------
# fused STLayer kernel: one pallas_call per layer, everything stays in VMEM
# ----------------------------------------------------------------------------
def _st_layer_kernel(x_ref, skip_ref, adjt_ref, w0_ref, w1_ref, bfg_ref,
                     wsg_ref, bsg_ref, al_ref, ar_ref, aggw_ref, aggb_ref,
                     bns_ref, bnb_ref,
                     xout_ref, skipout_ref, rst_ref,
                     *, n_nodes, t_in, dilation, n_heads, n_dil, n_res,
                     n_skips, neg_slope):
    tout = t_in - dilation
    rows = tout * n_nodes
    shift = dilation * n_nodes

    xa = x_ref[0:rows, :]                 # taps at t      (time steps [0, tout))
    xb = x_ref[shift:shift + rows, :]     # taps at t+dil  == residual slice

    # fused (filter | gate) dilated conv, kernel_size == 2  -> 32 output lanes
    fg = (jnp.dot(xa, w0_ref[...], preferred_element_type=jnp.float32)
          + jnp.dot(xb, w1_ref[...], preferred_element_type=jnp.float32)
          + bfg_ref[...])
    xg = jnp.tanh(fg[:, :n_dil]) * jax.nn.sigmoid(fg[:, n_dil:])   # [rows, n_dil]

    # fused skip 1x1 conv + GAT input projection (single 64-lane matmul)
    sg = jnp.dot(xg, wsg_ref[...], preferred_element_type=jnp.float32) + bsg_ref[...]
    s = sg[:, :n_skips]                   # skip branch
    ft = sg[:, n_skips:]                  # GAT features, head-major columns

    skipout_ref[...] = skip_ref[shift:, :] + s

    # GAT edge-softmax attention; rows for time step t are ft[t*N:(t+1)*N].
    adjt = adjt_ref[...]                  # adjt[v, u] = 1  iff  edge u -> v
    mask = adjt > 0.0
    al = al_ref[...]
    ar = ar_ref[...]
    for t in range(tout):
        slab = ft[t * n_nodes:(t + 1) * n_nodes, :]
        heads = []
        for h in range(n_heads):
            ft_h = slab[:, h * n_res:(h + 1) * n_res]                    # [N, F]
            el = jnp.sum(ft_h * al[h:h + 1, :], axis=-1, keepdims=True)  # src score
            er = jnp.sum(ft_h * ar[h:h + 1, :], axis=-1, keepdims=True)  # dst score
            e = er + jnp.transpose(el)                                   # e[v, u]
            e = jnp.where(e >= 0.0, e, neg_slope * e)                    # LeakyReLU
            z = jnp.where(mask, e, -1e30)
            m = jnp.max(z, axis=-1, keepdims=True)                       # lane reduce
            p = jnp.where(mask, jnp.exp(z - m), 0.0)
            a = p / (jnp.sum(p, axis=-1, keepdims=True) + 1e-20)         # 0-deg safe
            heads.append(jnp.dot(a, ft_h, preferred_element_type=jnp.float32))
        rst_ref[t * n_nodes:(t + 1) * n_nodes, :] = jnp.concatenate(heads, axis=-1)

    # per-head aggregation + residual + BatchNorm1d (eval mode)
    xo = (jnp.dot(rst_ref[...], aggw_ref[...], preferred_element_type=jnp.float32)
          + aggb_ref[...])
    xout_ref[...] = (xo + xb) * bns_ref[...] + bnb_ref[...]


def st_layer(x2d, skip2d, adj_t, lp, dilation, t_in, n_nodes, cfg):
    n_res, n_dil = cfg['n_residuals'], cfg['n_dilations']
    n_skips, n_heads = cfg['n_skips'], cfg['n_heads']
    tout = t_in - dilation
    rows = tout * n_nodes
    kern = functools.partial(
        _st_layer_kernel, n_nodes=n_nodes, t_in=t_in, dilation=dilation,
        n_heads=n_heads, n_dil=n_dil, n_res=n_res, n_skips=n_skips,
        neg_slope=0.2)
    return pl.pallas_call(
        kern,
        out_shape=(jax.ShapeDtypeStruct((rows, n_res), jnp.float32),
                   jax.ShapeDtypeStruct((rows, n_skips), jnp.float32)),
        scratch_shapes=[pltpu.VMEM((rows, n_heads * n_res), jnp.float32)],
    )(x2d, skip2d, adj_t,
      lp['w0'], lp['w1'], lp['bfg'], lp['wsg'], lp['bsg'],
      lp['attn_l'], lp['attn_r'], lp['agg_wT'], lp['agg_b'],
      lp['bn_scale'], lp['bn_bias'])


# ----------------------------------------------------------------------------
# fused attribute-modulation bmm + output head (one pallas_call)
# ----------------------------------------------------------------------------
def _head_kernel(skip_ref, w3_ref, b2_ref, w1_ref, b1_ref, w2_ref, bo_ref,
                 o_ref, mm_ref, *, n_nodes, t_f):
    # per-node modulation:  relu(skip_n) @ W(attr_n) + b(attr_n)
    for n in range(n_nodes):
        sk = jnp.maximum(skip_ref[n * t_f:(n + 1) * t_f, :], 0.0)
        mm_ref[n * t_f:(n + 1) * t_f, :] = (
            jnp.dot(sk, w3_ref[n], preferred_element_type=jnp.float32)
            + b2_ref[n:n + 1, :])
    # output head: ReLU -> 1x1 conv -> ReLU -> 1x1 conv on one [N*t_f, S] slab
    y = jnp.maximum(mm_ref[...], 0.0)
    y = jnp.maximum(jnp.dot(y, w1_ref[...], preferred_element_type=jnp.float32)
                    + b1_ref[...], 0.0)
    o_ref[...] = (jnp.dot(y, w2_ref[...], preferred_element_type=jnp.float32)
                  + bo_ref[...])


# ----------------------------------------------------------------------------
# forward pass (layout plumbing in plain JAX, all hot paths in Pallas)
# ----------------------------------------------------------------------------
def ours_forward(prep, attr, inputs, adj_t, cfg):
    """inputs: [N, T, F]; adj_t[v, u] = 1 iff edge u -> v."""
    n_nodes, T, _ = inputs.shape
    rf = cfg['receptive_field']
    x = jnp.transpose(inputs, (1, 0, 2)).astype(jnp.float32)     # [T, N, F]
    if T < rf:
        x = jnp.pad(x, ((rf - T, 0), (0, 0), (0, 0)))
    t = x.shape[0]
    x2d = linear(x.reshape(t * n_nodes, cfg['n_in']),
                 prep['enter_wT'], prep['enter_b'])              # [t*N, n_res]
    skip2d = jnp.zeros((t * n_nodes, cfg['n_skips']), jnp.float32)

    for block in prep['blocks']:
        for li, lp in enumerate(block):
            dilation = 2 ** li
            x2d, skip2d = st_layer(x2d, skip2d, adj_t, lp, dilation,
                                   t, n_nodes, cfg)
            t -= dilation

    # attribute modulation weights: one fused linear producing [W(attr)|b(attr)]
    S = cfg['n_skips']
    wb = linear(attr, prep['attr_wT'], prep['attr_b'])           # [N, S*S + S]
    w3 = wb[:, :S * S].reshape(n_nodes, S, S)
    b2 = wb[:, S * S:]

    # reorder skip rows to node-major for the per-node bmm, then fused head
    skip_nm = jnp.transpose(skip2d.reshape(t, n_nodes, S),
                            (1, 0, 2)).reshape(n_nodes * t, S)
    po = cfg['n_pred'] * cfg['n_out']
    y2d = pl.pallas_call(
        functools.partial(_head_kernel, n_nodes=n_nodes, t_f=t),
        out_shape=jax.ShapeDtypeStruct((n_nodes * t, po), jnp.float32),
        scratch_shapes=[pltpu.VMEM((n_nodes * t, S), jnp.float32)],
    )(skip_nm, w3, b2, prep['out1_wT'], prep['out1_b'],
      prep['out2_wT'], prep['out2_b'])
    y = jnp.transpose(y2d.reshape(n_nodes, t, po), (0, 2, 1))    # [N, P*O, t_f]
    return y.reshape(n_nodes, cfg['n_pred'], -1)


# ----------------------------------------------------------------------------
# parameter init (shapes follow the PyTorch module) + one-time weight fusion
# ----------------------------------------------------------------------------
def init_params(key, cfg):
    gain = 2.0 ** 0.5

    def xavier(k, shape, fan_in, fan_out):
        std = gain * (2.0 / (fan_in + fan_out)) ** 0.5
        return std * jax.random.normal(k, shape, jnp.float32)

    keys = iter(jax.random.split(key, 256))
    nk = lambda: next(keys)
    n_res, n_dil, n_skips = cfg['n_residuals'], cfg['n_dilations'], cfg['n_skips']
    n_heads, n_ends, n_attr = cfg['n_heads'], cfg['n_ends'], cfg['n_attr']
    K = cfg['kernel_size']
    p = {}
    p['enter_w'] = xavier(nk(), (n_res, cfg['n_in']), cfg['n_in'], n_res)
    p['enter_b'] = 0.01 * jax.random.normal(nk(), (n_res,), jnp.float32)
    blocks = []
    for _ in range(cfg['n_blocks']):
        layers = []
        for _ in range(cfg['n_layers']):
            layers.append({
                'filter_w': xavier(nk(), (n_dil, n_res, K), n_res * K, n_dil),
                'filter_b': 0.01 * jax.random.normal(nk(), (n_dil,), jnp.float32),
                'gate_w': xavier(nk(), (n_dil, n_res, K), n_res * K, n_dil),
                'gate_b': 0.01 * jax.random.normal(nk(), (n_dil,), jnp.float32),
                'gat_fc_w': xavier(nk(), (n_heads * n_res, n_dil), n_dil, n_heads * n_res),
                'attn_l': xavier(nk(), (n_heads, n_res), n_res, 1),
                'attn_r': xavier(nk(), (n_heads, n_res), n_res, 1),
                'agg_w': xavier(nk(), (n_res, n_res * n_heads), n_res * n_heads, n_res),
                'agg_b': 0.01 * jax.random.normal(nk(), (n_res,), jnp.float32),
                'skip_w': xavier(nk(), (n_skips, n_dil), n_dil, n_skips),
                'skip_b': 0.01 * jax.random.normal(nk(), (n_skips,), jnp.float32),
                'bn_scale': jnp.full((n_res,), 1.0 / (1.0 + 1e-5) ** 0.5, jnp.float32),
                'bn_bias': jnp.zeros((n_res,), jnp.float32),
            })
        blocks.append(layers)
    p['blocks'] = blocks
    p['attr_w_w'] = xavier(nk(), (n_skips * n_skips, n_attr), n_attr, n_skips * n_skips)
    p['attr_w_b'] = 0.01 * jax.random.normal(nk(), (n_skips * n_skips,), jnp.float32)
    p['attr_b_w'] = xavier(nk(), (n_skips, n_attr), n_attr, n_skips)
    p['attr_b_b'] = 0.01 * jax.random.normal(nk(), (n_skips,), jnp.float32)
    p['out1_w'] = xavier(nk(), (n_ends, n_skips), n_skips, n_ends)
    p['out1_b'] = 0.01 * jax.random.normal(nk(), (n_ends,), jnp.float32)
    n_y = cfg['n_pred'] * cfg['n_out']
    p['out2_w'] = xavier(nk(), (n_y, n_ends), n_ends, n_y)
    p['out2_b'] = 0.01 * jax.random.normal(nk(), (n_y,), jnp.float32)
    return p


def prepare_params(params, cfg):
    """One-time weight fusion/transposition so forward kernels see fat, lane-dense weights."""
    n_res, n_dil = cfg['n_residuals'], cfg['n_dilations']
    n_skips, n_heads = cfg['n_skips'], cfg['n_heads']
    prep = {'enter_wT': params['enter_w'].T, 'enter_b': params['enter_b']}
    blocks = []
    for block in params['blocks']:
        lps = []
        for p in block:
            lps.append(dict(
                # concat (filter | gate) taps -> [C, 2D]
                w0=jnp.concatenate([p['filter_w'][:, :, 0].T, p['gate_w'][:, :, 0].T], axis=1),
                w1=jnp.concatenate([p['filter_w'][:, :, 1].T, p['gate_w'][:, :, 1].T], axis=1),
                bfg=jnp.concatenate([p['filter_b'], p['gate_b']]).reshape(1, 2 * n_dil),
                # concat (skip 1x1 | GAT fc) -> [D, n_skips + H*n_res]
                wsg=jnp.concatenate([p['skip_w'].T, p['gat_fc_w'].T], axis=1),
                bsg=jnp.concatenate(
                    [p['skip_b'], jnp.zeros((n_heads * n_res,), jnp.float32)]).reshape(1, -1),
                attn_l=p['attn_l'], attn_r=p['attn_r'],
                agg_wT=p['agg_w'].T, agg_b=p['agg_b'].reshape(1, n_res),
                bn_scale=p['bn_scale'].reshape(1, n_res),
                bn_bias=p['bn_bias'].reshape(1, n_res)))
        blocks.append(lps)
    prep['blocks'] = blocks
    prep['attr_wT'] = jnp.concatenate([params['attr_w_w'].T, params['attr_b_w'].T], axis=1)
    prep['attr_b'] = jnp.concatenate([params['attr_w_b'], params['attr_b_b']])
    prep['out1_wT'] = params['out1_w'].T
    prep['out1_b'] = params['out1_b'].reshape(1, -1)
    prep['out2_wT'] = params['out2_w'].T
    prep['out2_b'] = params['out2_b'].reshape(1, -1)
    return prep


# ----------------------------------------------------------------------------

if __name__ == "__main__":
    cfg = dict(n_in=3, n_out=2, n_pred=4, n_residuals=16, n_dilations=16,
               n_skips=32, n_ends=64, kernel_size=2, n_blocks=2, n_layers=2,
               n_heads=2, n_attr=16)
    cfg['receptive_field'] = (cfg['n_blocks'] * (cfg['kernel_size'] - 1)
                              * (2 ** cfg['n_layers'] - 1) + 1)

    Nn, T = 8, 8   # 8 graph nodes, 8 input time steps (>= receptive field 7)

    key = jax.random.PRNGKey(0)
    k_attr, k_in, k_params = jax.random.split(key, 3)
    attr = jax.random.normal(k_attr, (Nn, cfg['n_attr']), jnp.float32)
    inputs = jax.random.normal(k_in, (Nn, T, cfg['n_in']), jnp.float32)

    # deterministic ring graph with self-loops; adj[u, v] = 1 iff edge u -> v
    ids = jnp.arange(Nn)
    adj = ((ids[:, None] == ids[None, :])
           | (((ids[:, None] + 1) % Nn) == ids[None, :])
           | (((ids[:, None] - 1) % Nn) == ids[None, :])).astype(jnp.float32)
    adj_t = adj.T                     # adj_t[v, u] = 1 iff edge u -> v

    params = init_params(k_params, cfg)
    prep = prepare_params(params, cfg)

    fwd = jax.jit(functools.partial(ours_forward, cfg=cfg))
    y = jax.block_until_ready(fwd(prep, attr, inputs, adj_t))

    t_final = T - cfg['n_blocks'] * (2 ** cfg['n_layers'] - 1)    # = 2
    assert y.shape == (Nn, cfg['n_pred'], cfg['n_out'] * t_final), y.shape
    assert bool(jnp.all(jnp.isfinite(y)))
    print("KERNEL_OK")
</pallas_src>

<mosaic_0001>
module attributes {stable_mosaic.version = 11 : i64} {
  func.func @_linear_kernel(%arg0: memref<64x3xf32, #tpu.memory_space<vmem>>, %arg1: memref<3x16xf32, #tpu.memory_space<vmem>>, %arg2: memref<1x16xf32, #tpu.memory_space<vmem>>, %arg3: memref<64x16xf32, #tpu.memory_space<vmem>>) attributes {dimension_semantics = [], scalar_prefetch = 0 : i64, scratch_operands = 0 : i64, tpu.core_type = #tpu.core_type<tc>} {
    %c0 = arith.constant 0 : index
    %c0_0 = arith.constant 0 : index
    %0 = vector.load %arg0[%c0, %c0_0] : memref<64x3xf32, #tpu.memory_space<vmem>>, vector<64x3xf32>
    %c0_1 = arith.constant 0 : index
    %c0_2 = arith.constant 0 : index
    %1 = vector.load %arg1[%c0_1, %c0_2] : memref<3x16xf32, #tpu.memory_space<vmem>>, vector<3x16xf32>
    %cst = arith.constant dense<0.000000e+00> : vector<64x16xf32>
    %2 = tpu.matmul %0, %1, %cst {dimension_numbers = #tpu.dot_dimension_numbers<[1], [0], [0], [1], [0, 0, 1, 1], [], []>} : vector<64x3xf32>, vector<3x16xf32>, vector<64x16xf32> -> vector<64x16xf32>
    %c0_3 = arith.constant 0 : index
    %c0_4 = arith.constant 0 : index
    %3 = vector.load %arg2[%c0_3, %c0_4] : memref<1x16xf32, #tpu.memory_space<vmem>>, vector<1x16xf32>
    %4 = vector.broadcast %3 : vector<1x16xf32> to vector<64x16xf32>
    %5 = arith.addf %2, %4 : vector<64x16xf32>
    %c0_5 = arith.constant 0 : index
    %c0_6 = arith.constant 0 : index
    %6 = vector.load %arg3[%c0_5, %c0_6] : memref<64x16xf32, #tpu.memory_space<vmem>>, vector<64x16xf32>
    tpu.vector_store %arg3[%c0_5, %c0_6], %5 {strides = array<i32>} : memref<64x16xf32, #tpu.memory_space<vmem>>, vector<64x16xf32>,
    return
  }
}

module attributes {stable_mosaic.version = 11 : i64} {
  func.func @_st_layer_kernel(%arg0: memref<56x16xf32, #tpu.memory_space<vmem>>, %arg1: memref<56x32xf32, #tpu.memory_space<vmem>>, %arg2: memref<8x8xf32, #tpu.memory_space<vmem>>, %arg3: memref<16x32xf32, #tpu.memory_space<vmem>>, %arg4: memref<16x32xf32, #tpu.memory_space<vmem>>, %arg5: memref<1x32xf32, #tpu.memory_space<vmem>>, %arg6: memref<16x64xf32, #tpu.memory_space<vmem>>, %arg7: memref<1x64xf32, #tpu.memory_space<vmem>>, %arg8: memref<2x16xf32, #tpu.memory_space<vmem>>, %arg9: memref<2x16xf32, #tpu.memory_space<vmem>>, %arg10: memref<32x16xf32, #tpu.memory_space<vmem>>, %arg11: memref<1x16xf32, #tpu.memory_space<vmem>>, %arg12: memref<1x16xf32, #tpu.memory_space<vmem>>, %arg13: memref<1x16xf32, #tpu.memory_space<vmem>>, %arg14: memref<40x16xf32, #tpu.memory_space<vmem>>, %arg15: memref<40x32xf32, #tpu.memory_space<vmem>>, %arg16: memref<40x32xf32, #tpu.memory_space<vmem>>) attributes {dimension_semantics = [], scalar_prefetch = 0 : i64, scratch_operands = 1 : i64, tpu.core_type = #tpu.core_type<tc>} {
    %c0 = arith.constant 0 : index
    %c0_0 = arith.constant 0 : index
    %0 = vector.load %arg0[%c0, %c0_0] : memref<56x16xf32, #tpu.memory_space<vmem>>, vector<40x16xf32>
    %c16 = arith.constant 16 : index
    %c0_1 = arith.constant 0 : index
    %1 = vector.load %arg0[%c16, %c0_1] : memref<56x16xf32, #tpu.memory_space<vmem>>, vector<40x16xf32>
    %c0_2 = arith.constant 0 : index
    %c0_3 = arith.constant 0 : index
    %2 = vector.load %arg3[%c0_2, %c0_3] : memref<16x32xf32, #tpu.memory_space<vmem>>, vector<16x32xf32>
    %cst = arith.constant dense<0.000000e+00> : vector<40x32xf32>
    %3 = tpu.matmul %0, %2, %cst {dimension_numbers = #tpu.dot_dimension_numbers<[1], [0], [0], [1], [0, 0, 1, 1], [], []>} : vector<40x16xf32>, vector<16x32xf32>, vector<40x32xf32> -> vector<40x32xf32>
    %c0_4 = arith.constant 0 : index
    %c0_5 = arith.constant 0 : index
    %4 = vector.load %arg4[%c0_4, %c0_5] : memref<16x32xf32, #tpu.memory_space<vmem>>, vector<16x32xf32>
    %cst_6 = arith.constant dense<0.000000e+00> : vector<40x32xf32>
    %5 = tpu.matmul %1, %4, %cst_6 {dimension_numbers = #tpu.dot_dimension_numbers<[1], [0], [0], [1], [0, 0, 1, 1], [], []>} : vector<40x16xf32>, vector<16x32xf32>, vector<40x32xf32> -> vector<40x32xf32>
    %6 = arith.addf %3, %5 : vector<40x32xf32>
    %c0_7 = arith.constant 0 : index
    %c0_8 = arith.constant 0 : index
    %7 = vector.load %arg5[%c0_7, %c0_8] : memref<1x32xf32, #tpu.memory_space<vmem>>, vector<1x32xf32>
    %8 = vector.broadcast %7 : vector<1x32xf32> to vector<40x32xf32>
    %9 = arith.addf %6, %8 : vector<40x32xf32>
    %10 = vector.extract_strided_slice %9 {offsets = [0, 0], sizes = [40, 16], strides = [1, 1]} : vector<40x32xf32> to vector<40x16xf32>
    %11 = math.tanh %10 : vector<40x16xf32>
    %12 = vector.extract_strided_slice %9 {offsets = [0, 16], sizes = [40, 16], strides = [1, 1]} : vector<40x32xf32> to vector<40x16xf32>
    %13 = arith.negf %12 : vector<40x16xf32>
    %14 = math.exp %13 : vector<40x16xf32>
    %cst_9 = arith.constant 1.000000e+00 : f32
    %15 = vector.broadcast %cst_9 : f32 to vector<40x16xf32>
    %16 = arith.addf %15, %14 : vector<40x16xf32>
    %17 = arith.divf %15, %16 : vector<40x16xf32>
    %18 = arith.mulf %11, %17 : vector<40x16xf32>
    %c0_10 = arith.constant 0 : index
    %c0_11 = arith.constant 0 : index
    %19 = vector.load %arg6[%c0_10, %c0_11] : memref<16x64xf32, #tpu.memory_space<vmem>>, vector<16x64xf32>
    %cst_12 = arith.constant dense<0.000000e+00> : vector<40x64xf32>
    %20 = tpu.matmul %18, %19, %cst_12 {dimension_numbers = #tpu.dot_dimension_numbers<[1], [0], [0], [1], [0, 0, 1, 1], [], []>} : vector<40x16xf32>, vector<16x64xf32>, vector<40x64xf32> -> vector<40x64xf32>
    %c0_13 = arith.constant 0 : index
    %c0_14 = arith.constant 0 : index
    %21 = vector.load %arg7[%c0_13, %c0_14] : memref<1x64xf32, #tpu.memory_space<vmem>>, vector<1x64xf32>
    %22 = vector.broadcast %21 : vector<1x64xf32> to vector<40x64xf32>
    %23 = arith.addf %20, %22 : vector<40x64xf32>
    %24 = vector.extract_strided_slice %23 {offsets = [0, 0], sizes = [40, 32], strides = [1, 1]} : vector<40x64xf32> to vector<40x32xf32>
    %25 = vector.extract_strided_slice %23 {offsets = [0, 32], sizes = [40, 32], strides = [1, 1]} : vector<40x64xf32> to vector<40x32xf32>
    %c16_15 = arith.constant 16 : index
    %c0_16 = arith.constant 0 : index
    %26 = vector.load %arg1[%c16_15, %c0_16] : memref<56x32xf32, #tpu.memory_space<vmem>>, vector<40x32xf32>
    %27 = arith.addf %26, %24 : vector<40x32xf32>
    %c0_17 = arith.constant 0 : index
    %c0_18 = arith.constant 0 : index
    %28 = vector.load %arg15[%c0_17, %c0_18] : memref<40x32xf32, #tpu.memory_space<vmem>>, vector<40x32xf32>
    tpu.vector_store %arg15[%c0_17, %c0_18], %27 {strides = array<i32>} : memref<40x32xf32, #tpu.memory_space<vmem>>, vector<40x32xf32>,
    %c0_19 = arith.constant 0 : index
    %c0_20 = arith.constant 0 : index
    %29 = vector.load %arg2[%c0_19, %c0_20] : memref<8x8xf32, #tpu.memory_space<vmem>>, vector<8x8xf32>
    %cst_21 = arith.constant 0.000000e+00 : f32
    %30 = vector.broadcast %cst_21 : f32 to vector<8x8xf32>
    %31 = arith.cmpf ogt, %29, %30 : vector<8x8xf32>
    %c0_22 = arith.constant 0 : index
    %c0_23 = arith.constant 0 : index
    %32 = vector.load %arg8[%c0_22, %c0_23] : memref<2x16xf32, #tpu.memory_space<vmem>>, vector<2x16xf32>
    %c0_24 = arith.constant 0 : index
    %c0_25 = arith.constant 0 : index
    %33 = vector.load %arg9[%c0_24, %c0_25] : memref<2x16xf32, #tpu.memory_space<vmem>>, vector<2x16xf32>
    %34 = vector.extract_strided_slice %25 {offsets = [0, 0], sizes = [8, 32], strides = [1, 1]} : vector<40x32xf32> to vector<8x32xf32>
    %35 = vector.extract_strided_slice %34 {offsets = [0, 0], sizes = [8, 16], strides = [1, 1]} : vector<8x32xf32> to vector<8x16xf32>
    %36 = vector.extract_strided_slice %32 {offsets = [0, 0], sizes = [1, 16], strides = [1, 1]} : vector<2x16xf32> to vector<1x16xf32>
    %37 = vector.broadcast %36 : vector<1x16xf32> to vector<8x16xf32>
    %38 = arith.mulf %35, %37 : vector<8x16xf32>
    %cst_26 = arith.constant dense<0.000000e+00> : vector<8xf32>
    %39 = vector.multi_reduction <add>, %38, %cst_26 [1] : vector<8x16xf32> to vector<8xf32>
    %40 = vector.shape_cast %39 : vector<8xf32> to vector<8x1xf32>
    %41 = vector.extract_strided_slice %33 {offsets = [0, 0], sizes = [1, 16], strides = [1, 1]} : vector<2x16xf32> to vector<1x16xf32>
    %42 = vector.broadcast %41 : vector<1x16xf32> to vector<8x16xf32>
    %43 = arith.mulf %35, %42 : vector<8x16xf32>
    %cst_27 = arith.constant dense<0.000000e+00> : vector<8xf32>
    %44 = vector.multi_reduction <add>, %43, %cst_27 [1] : vector<8x16xf32> to vector<8xf32>
    %45 = vector.shape_cast %44 : vector<8xf32> to vector<8x1xf32>
    %46 = tpu.transpose %40, [1, 0] : vector<8x1xf32> -> vector<1x8xf32>
    %47 = vector.broadcast %45 : vector<8x1xf32> to vector<8x8xf32>
    %48 = vector.broadcast %46 : vector<1x8xf32> to vector<8x8xf32>
    %49 = arith.addf %47, %48 : vector<8x8xf32>
    %cst_28 = arith.constant 0.000000e+00 : f32
    %50 = vector.broadcast %cst_28 : f32 to vector<8x8xf32>
    %51 = arith.cmpf oge, %49, %50 : vector<8x8xf32>
    %cst_29 = arith.constant 2.000000e-01 : f32
    %52 = vector.broadcast %cst_29 : f32 to vector<8x8xf32>
    %53 = arith.mulf %52, %49 : vector<8x8xf32>
    %54 = arith.select %51, %49, %53 : vector<8x8xi1>, vector<8x8xf32>
    %cst_30 = arith.constant -1.000000e+30 : f32
    %55 = vector.broadcast %cst_30 : f32 to vector<8x8xf32>
    %56 = arith.select %31, %54, %55 : vector<8x8xi1>, vector<8x8xf32>
    %cst_31 = arith.constant dense<0xFF800000> : vector<8xf32>
    %57 = vector.multi_reduction <maximumf>, %56, %cst_31 [1] : vector<8x8xf32> to vector<8xf32>
    %58 = vector.shape_cast %57 : vector<8xf32> to vector<8x1xf32>
    %59 = vector.broadcast %58 : vector<8x1xf32> to vector<8x8xf32>
    %60 = arith.subf %56, %59 : vector<8x8xf32>
    %61 = math.exp %60 : vector<8x8xf32>
    %cst_32 = arith.constant 0.000000e+00 : f32
    %62 = vector.broadcast %cst_32 : f32 to vector<8x8xf32>
    %63 = arith.select %31, %61, %62 : vector<8x8xi1>, vector<8x8xf32>
    %cst_33 = arith.constant dense<0.000000e+00> : vector<8xf32>
    %64 = vector.multi_reduction <add>, %63, %cst_33 [1] : vector<8x8xf32> to vector<8xf32>
    %65 = vector.shape_cast %64 : vector<8xf32> to vector<8x1xf32>
    %cst_34 = arith.constant 9.99999968E-21 : f32
    %66 = vector.broadcast %cst_34 : f32 to vector<8x1xf32>
    %67 = arith.addf %65, %66 : vector<8x1xf32>
    %68 = vector.broadcast %67 : vector<8x1xf32> to vector<8x8xf32>
    %69 = arith.divf %63, %68 : vector<8x8xf32>
    %cst_35 = arith.constant dense<0.000000e+00> : vector<8x16xf32>
    %70 = tpu.matmul %69, %35, %cst_35 {dimension_numbers = #tpu.dot_dimension_numbers<[1], [0], [0], [1], [0, 0, 1, 1], [], []>} : vector<8x8xf32>, vector<8x16xf32>, vector<8x16xf32> -> vector<8x16xf32>
    %71 = vector.extract_strided_slice %34 {offsets = [0, 16], sizes = [8, 16], strides = [1, 1]} : vector<8x32xf32> to vector<8x16xf32>
    %72 = vector.extract_strided_slice %32 {offsets = [1, 0], sizes = [1, 16], strides = [1, 1]} : vector<2x16xf32> to vector<1x16xf32>
    %73 = vector.broadcast %72 : vector<1x16xf32> to vector<8x16xf32>
    %74 = arith.mulf %71, %73 : vector<8x16xf32>
    %cst_36 = arith.constant dense<0.000000e+00> : vector<8xf32>
    %75 = vector.multi_reduction <add>, %74, %cst_36 [1] : vector<8x16xf32> to vector<8xf32>
    %76 = vector.shape_cast %75 : vector<8xf32> to vector<8x1xf32>
    %77 = vector.extract_strided_slice %33 {offsets = [1, 0], sizes = [1, 16], strides = [1, 1]} : vector<2x16xf32> to vector<1x16xf32>
    %78 = vector.broadcast %77 : vector<1x16xf32> to vector<8x16xf32>
    %79 = arith.mulf %71, %78 : vector<8x16xf32>
    %cst_37 = arith.constant dense<0.000000e+00> : vector<8xf32>
    %80 = vector.multi_reduction <add>, %79, %cst_37 [1] : vector<8x16xf32> to vector<8xf32>
    %81 = vector.shape_cast %80 : vector<8xf32> to vector<8x1xf32>
    %82 = tpu.transpose %76, [1, 0] : vector<8x1xf32> -> vector<1x8xf32>
    %83 = vector.broadcast %81 : vector<8x1xf32> to vector<8x8xf32>
    %84 = vector.broadcast %82 : vector<1x8xf32> to vector<8x8xf32>
    %85 = arith.addf %83, %84 : vector<8x8xf32>
    %cst_38 = arith.constant 0.000000e+00 : f32
    %86 = vector.broadcast %cst_38 : f32 to vector<8x8xf32>
    %87 = arith.cmpf oge, %85, %86 : vector<8x8xf32>
    %cst_39 = arith.constant 2.000000e-01 : f32
    %88 = vector.broadcast %cst_39 : f32 to vector<8x8xf32>
    %89 = arith.mulf %88, %85 : vector<8x8xf32>
    %90 = arith.select %87, %85, %89 : vector<8x8xi1>, vector<8x8xf32>
    %cst_40 = arith.constant -1.000000e+30 : f32
    %91 = vector.broadcast %cst_40 : f32 to vector<8x8xf32>
    %92 = arith.select %31, %90, %91 : vector<8x8xi1>, vector<8x8xf32>
    %cst_41 = arith.constant dense<0xFF800000> : vector<8xf32>
    %93 = vector.multi_reduction <maximumf>, %92, %cst_41 [1] : vector<8x8xf32> to vector<8xf32>
    %94 = vector.shape_cast %93 : vector<8xf32> to vector<8x1xf32>
    %95 = vector.broadcast %94 : vector<8x1xf32> to vector<8x8xf32>
    %96 = arith.subf %92, %95 : vector<8x8xf32>
    %97 = math.exp %96 : vector<8x8xf32>
    %cst_42 = arith.constant 0.000000e+00 : f32
    %98 = vector.broadcast %cst_42 : f32 to vector<8x8xf32>
    %99 = arith.select %31, %97, %98 : vector<8x8xi1>, vector<8x8xf32>
    %cst_43 = arith.constant dense<0.000000e+00> : vector<8xf32>
    %100 = vector.multi_reduction <add>, %99, %cst_43 [1] : vector<8x8xf32> to vector<8xf32>
    %101 = vector.shape_cast %100 : vector<8xf32> to vector<8x1xf32>
    %cst_44 = arith.constant 9.99999968E-21 : f32
    %102 = vector.broadcast %cst_44 : f32 to vector<8x1xf32>
    %103 = arith.addf %101, %102 : vector<8x1xf32>
    %104 = vector.broadcast %103 : vector<8x1xf32> to vector<8x8xf32>
    %105 = arith.divf %99, %104 : vector<8x8xf32>
    %cst_45 = arith.constant dense<0.000000e+00> : vector<8x16xf32>
    %106 = tpu.matmul %105, %71, %cst_45 {dimension_numbers = #tpu.dot_dimension_numbers<[1], [0], [0], [1], [0, 0, 1, 1], [], []>} : vector<8x8xf32>, vector<8x16xf32>, vector<8x16xf32> -> vector<8x16xf32>
    %107 = tpu.concatenate %70, %106 in 1 : vector<8x16xf32>, vector<8x16xf32> -> vector<8x32xf32>
    %c0_46 = arith.constant 0 : index
    %c0_47 = arith.constant 0 : index
    %108 = vector.load %arg16[%c0_46, %c0_47] : memref<40x32xf32, #tpu.memory_space<vmem>>, vector<8x32xf32>
    tpu.vector_store %arg16[%c0_46, %c0_47], %107 {strides = array<i32>} : memref<40x32xf32, #tpu.memory_space<vmem>>, vector<8x32xf32>,
    %109 = vector.extract_strided_slice %25 {offsets = [8, 0], sizes = [8, 32], strides = [1, 1]} : vector<40x32xf32> to vector<8x32xf32>
    %110 = vector.extract_strided_slice %109 {offsets = [0, 0], sizes = [8, 16], strides = [1, 1]} : vector<8x32xf32> to vector<8x16xf32>
    %111 = vector.extract_strided_slice %32 {offsets = [0, 0], sizes = [1, 16], strides = [1, 1]} : vector<2x16xf32> to vector<1x16xf32>
    %112 = vector.broadcast %111 : vector<1x16xf32> to vector<8x16xf32>
    %113 = arith.mulf %110, %112 : vector<8x16xf32>
    %cst_48 = arith.constant dense<0.000000e+00> : vector<8xf32>
    %114 = vector.multi_reduction <add>, %113, %cst_48 [1] : vector<8x16xf32> to vector<8xf32>
    %115 = vector.shape_cast %114 : vector<8xf32> to vector<8x1xf32>
    %116 = vector.extract_strided_slice %33 {offsets = [0, 0], sizes = [1, 16], strides = [1, 1]} : vector<2x16xf32> to vector<1x16xf32>
    %117 = vector.broadcast %116 : vector<1x16xf32> to vector<8x16xf32>
    %118 = arith.mulf %110, %117 : vector<8x16xf32>
    %cst_49 = arith.constant dense<0.000000e+00> : vector<8xf32>
    %119 = vector.multi_reduction <add>, %118, %cst_49 [1] : vector<8x16xf32> to vector<8xf32>
    %120 = vector.shape_cast %119 : vector<8xf32> to vector<8x1xf32>
    %121 = tpu.transpose %115, [1, 0] : vector<8x1xf32> -> vector<1x8xf32>
    %122 = vector.broadcast %120 : vector<8x1xf32> to vector<8x8xf32>
    %123 = vector.broadcast %121 : vector<1x8xf32> to vector<8x8xf32>
    %124 = arith.addf %122, %123 : vector<8x8xf32>
    %cst_50 = arith.constant 0.000000e+00 : f32
    %125 = vector.broadcast %cst_50 : f32 to vector<8x8xf32>
    %126 = arith.cmpf oge, %124, %125 : vector<8x8xf32>
    %cst_51 = arith.constant 2.000000e-01 : f32
    %127 = vector.broadcast %cst_51 : f32 to vector<8x8xf32>
    %128 = arith.mulf %127, %124 : vector<8x8xf32>
    %129 = arith.select %126, %124, %128 : vector<8x8xi1>, vector<8x8xf32>
    %cst_52 = arith.constant -1.000000e+30 : f32
    %130 = vector.broadcast %cst_52 : f32 to vector<8x8xf32>
    %131 = arith.select %31, %129, %130 : vector<8x8xi1>, vector<8x8xf32>
    %cst_53 = arith.constant dense<0xFF800000> : vector<8xf32>
    %132 = vector.multi_reduction <maximumf>, %131, %cst_53 [1] : vector<8x8xf32> to vector<8xf32>
    %133 = vector.shape_cast %132 : vector<8xf32> to vector<8x1xf32>
    %134 = vector.broadcast %133 : vector<8x1xf32> to vector<8x8xf32>
    %135 = arith.subf %131, %134 : vector<8x8xf32>
    %136 = math.exp %135 : vector<8x8xf32>
    %cst_54 = arith.constant 0.000000e+00 : f32
    %137 = vector.broadcast %cst_54 : f32 to vector<8x8xf32>
    %138 = arith.select %31, %136, %137 : vector<8x8xi1>, vector<8x8xf32>
    %cst_55 = arith.constant dense<0.000000e+00> : vector<8xf32>
    %139 = vector.multi_reduction <add>, %138, %cst_55 [1] : vector<8x8xf32> to vector<8xf32>
    %140 = vector.shape_cast %139 : vector<8xf32> to vector<8x1xf32>
    %cst_56 = arith.constant 9.99999968E-21 : f32
    %141 = vector.broadcast %cst_56 : f32 to vector<8x1xf32>
    %142 = arith.addf %140, %141 : vector<8x1xf32>
    %143 = vector.broadcast %142 : vector<8x1xf32> to vector<8x8xf32>
    %144 = arith.divf %138, %143 : vector<8x8xf32>
    %cst_57 = arith.constant dense<0.000000e+00> : vector<8x16xf32>
    %145 = tpu.matmul %144, %110, %cst_57 {dimension_numbers = #tpu.dot_dimension_numbers<[1], [0], [0], [1], [0, 0, 1, 1], [], []>} : vector<8x8xf32>, vector<8x16xf32>, vector<8x16xf32> -> vector<8x16xf32>
    %146 = vector.extract_strided_slice %109 {offsets = [0, 16], sizes = [8, 16], strides = [1, 1]} : vector<8x32xf32> to vector<8x16xf32>
    %147 = vector.extract_strided_slice %32 {offsets = [1, 0], sizes = [1, 16], strides = [1, 1]} : vector<2x16xf32> to vector<1x16xf32>
    %148 = vector.broadcast %147 : vector<1x16xf32> to vector<8x16xf32>
    %149 = arith.mulf %146, %148 : vector<8x16xf32>
    %cst_58 = arith.constant dense<0.000000e+00> : vector<8xf32>
    %150 = vector.multi_reduction <add>, %149, %cst_58 [1] : vector<8x16xf32> to vector<8xf32>
    %151 = vector.shape_cast %150 : vector<8xf32> to vector<8x1xf32>
    %152 = vector.extract_strided_slice %33 {offsets = [1, 0], sizes = [1, 16], strides = [1, 1]} : vector<2x16xf32> to vector<1x16xf32>
    %153 = vector.broadcast %152 : vector<1x16xf32> to vector<8x16xf32>
    %154 = arith.mulf %146, %153 : vector<8x16xf32>
    %cst_59 = arith.constant dense<0.000000e+00> : vector<8xf32>
    %155 = vector.multi_reduction <add>, %154, %cst_59 [1] : vector<8x16xf32> to vector<8xf32>
    %156 = vector.shape_cast %155 : vector<8xf32> to vector<8x1xf32>
    %157 = tpu.transpose %151, [1, 0] : vector<8x1xf32> -> vector<1x8xf32>
    %158 = vector.broadcast %156 : vector<8x1xf32> to vector<8x8xf32>
    %159 = vector.broadcast %157 : vector<1x8xf32> to vector<8x8xf32>
    %160 = arith.addf %158, %159 : vector<8x8xf32>
    %cst_60 = arith.constant 0.000000e+00 : f32
    %161 = vector.broadcast %cst_60 : f32 to vector<8x8xf32>
    %162 = arith.cmpf oge, %160, %161 : vector<8x8xf32>
    %cst_61 = arith.constant 2.000000e-01 : f32
    %163 = vector.broadcast %cst_61 : f32 to vector<8x8xf32>
    %164 = arith.mulf %163, %160 : vector<8x8xf32>
    %165 = arith.select %162, %160, %164 : vector<8x8xi1>, vector<8x8xf32>
    %cst_62 = arith.constant -1.000000e+30 : f32
    %166 = vector.broadcast %cst_62 : f32 to vector<8x8xf32>
    %167 = arith.select %31, %165, %166 : vector<8x8xi1>, vector<8x8xf32>
    %cst_63 = arith.constant dense<0xFF800000> : vector<8xf32>
    %168 = vector.multi_reduction <maximumf>, %167, %cst_63 [1] : vector<8x8xf32> to vector<8xf32>
    %169 = vector.shape_cast %168 : vector<8xf32> to vector<8x1xf32>
    %170 = vector.broadcast %169 : vector<8x1xf32> to vector<8x8xf32>
    %171 = arith.subf %167, %170 : vector<8x8xf32>
    %172 = math.exp %171 : vector<8x8xf32>
    %cst_64 = arith.constant 0.000000e+00 : f32
    %173 = vector.broadcast %cst_64 : f32 to vector<8x8xf32>
    %174 = arith.select %31, %172, %173 : vector<8x8xi1>, vector<8x8xf32>
    %cst_65 = arith.constant dense<0.000000e+00> : vector<8xf32>
    %175 = vector.multi_reduction <add>, %174, %cst_65 [1] : vector<8x8xf32> to vector<8xf32>
    %176 = vector.shape_cast %175 : vector<8xf32> to vector<8x1xf32>
    %cst_66 = arith.constant 9.99999968E-21 : f32
    %177 = vector.broadcast %cst_66 : f32 to vector<8x1xf32>
    %178 = arith.addf %176, %177 : vector<8x1xf32>
    %179 = vector.broadcast %178 : vector<8x1xf32> to vector<8x8xf32>
    %180 = arith.divf %174, %179 : vector<8x8xf32>
    %cst_67 = arith.constant dense<0.000000e+00> : vector<8x16xf32>
    %181 = tpu.matmul %180, %146, %cst_67 {dimension_numbers = #tpu.dot_dimension_numbers<[1], [0], [0], [1], [0, 0, 1, 1], [], []>} : vector<8x8xf32>, vector<8x16xf32>, vector<8x16xf32> -> vector<8x16xf32>
    %182 = tpu.concatenate %145, %181 in 1 : vector<8x16xf32>, vector<8x16xf32> -> vector<8x32xf32>
    %c8 = arith.constant 8 : index
    %c0_68 = arith.constant 0 : index
    %183 = vector.load %arg16[%c8, %c0_68] : memref<40x32xf32, #tpu.memory_space<vmem>>, vector<8x32xf32>
    tpu.vector_store %arg16[%c8, %c0_68], %182 {strides = array<i32>} : memref<40x32xf32, #tpu.memory_space<vmem>>, vector<8x32xf32>,
    %184 = vector.extract_strided_slice %25 {offsets = [16, 0], sizes = [8, 32], strides = [1, 1]} : vector<40x32xf32> to vector<8x32xf32>
    %185 = vector.extract_strided_slice %184 {offsets = [0, 0], sizes = [8, 16], strides = [1, 1]} : vector<8x32xf32> to vector<8x16xf32>
    %186 = vector.extract_strided_slice %32 {offsets = [0, 0], sizes = [1, 16], strides = [1, 1]} : vector<2x16xf32> to vector<1x16xf32>
    %187 = vector.broadcast %186 : vector<1x16xf32> to vector<8x16xf32>
    %188 = arith.mulf %185, %187 : vector<8x16xf32>
    %cst_69 = arith.constant dense<0.000000e+00> : vector<8xf32>
    %189 = vector.multi_reduction <add>, %188, %cst_69 [1] : vector<8x16xf32> to vector<8xf32>
    %190 = vector.shape_cast %189 : vector<8xf32> to vector<8x1xf32>
    %191 = vector.extract_strided_slice %33 {offsets = [0, 0], sizes = [1, 16], strides = [1, 1]} : vector<2x16xf32> to vector<1x16xf32>
    %192 = vector.broadcast %191 : vector<1x16xf32> to vector<8x16xf32>
    %193 = arith.mulf %185, %192 : vector<8x16xf32>
    %cst_70 = arith.constant dense<0.000000e+00> : vector<8xf32>
    %194 = vector.multi_reduction <add>, %193, %cst_70 [1] : vector<8x16xf32> to vector<8xf32>
    %195 = vector.shape_cast %194 : vector<8xf32> to vector<8x1xf32>
    %196 = tpu.transpose %190, [1, 0] : vector<8x1xf32> -> vector<1x8xf32>
    %197 = vector.broadcast %195 : vector<8x1xf32> to vector<8x8xf32>
    %198 = vector.broadcast %196 : vector<1x8xf32> to vector<8x8xf32>
    %199 = arith.addf %197, %198 : vector<8x8xf32>
    %cst_71 = arith.constant 0.000000e+00 : f32
    %200 = vector.broadcast %cst_71 : f32 to vector<8x8xf32>
    %201 = arith.cmpf oge, %199, %200 : vector<8x8xf32>
    %cst_72 = arith.constant 2.000000e-01 : f32
    %202 = vector.broadcast %cst_72 : f32 to vector<8x8xf32>
    %203 = arith.mulf %202, %199 : vector<8x8xf32>
    %204 = arith.select %201, %199, %203 : vector<8x8xi1>, vector<8x8xf32>
    %cst_73 = arith.constant -1.000000e+30 : f32
    %205 = vector.broadcast %cst_73 : f32 to vector<8x8xf32>
    %206 = arith.select %31, %204, %205 : vector<8x8xi1>, vector<8x8xf32>
    %cst_74 = arith.constant dense<0xFF800000> : vector<8xf32>
    %207 = vector.multi_reduction <maximumf>, %206, %cst_74 [1] : vector<8x8xf32> to vector<8xf32>
    %208 = vector.shape_cast %207 : vector<8xf32> to vector<8x1xf32>
    %209 = vector.broadcast %208 : vector<8x1xf32> to vector<8x8xf32>
    %210 = arith.subf %206, %209 : vector<8x8xf32>
    %211 = math.exp %210 : vector<8x8xf32>
    %cst_75 = arith.constant 0.000000e+00 : f32
    %212 = vector.broadcast %cst_75 : f32 to vector<8x8xf32>
    %213 = arith.select %31, %211, %212 : vector<8x8xi1>, vector<8x8xf32>
    %cst_76 = arith.constant dense<0.000000e+00> : vector<8xf32>
    %214 = vector.multi_reduction <add>, %213, %cst_76 [1] : vector<8x8xf32> to vector<8xf32>
    %215 = vector.shape_cast %214 : vector<8xf32> to vector<8x1xf32>
    %cst_77 = arith.constant 9.99999968E-21 : f32
    %216 = vector.broadcast %cst_77 : f32 to vector<8x1xf32>
    %217 = arith.addf %215, %216 : vector<8x1xf32>
    %218 = vector.broadcast %217 : vector<8x1xf32> to vector<8x8xf32>
    %219 = arith.divf %213, %218 : vector<8x8xf32>
    %cst_78 = arith.constant dense<0.000000e+00> : vector<8x16xf32>
    %220 = tpu.matmul %219, %185, %cst_78 {dimension_numbers = #tpu.dot_dimension_numbers<[1], [0], [0], [1], [0, 0, 1, 1], [], []>} : vector<8x8xf32>, vector<8x16xf32>, vector<8x16xf32> -> vector<8x16xf32>
    %221 = vector.extract_strided_slice %184 {offsets = [0, 16], sizes = [8, 16], strides = [1, 1]} : vector<8x32xf32> to vector<8x16xf32>
    %222 = vector.extract_strided_slice %32 {offsets = [1, 0], sizes = [1, 16], strides = [1, 1]} : vector<2x16xf32> to vector<1x16xf32>
    %223 = vector.broadcast %222 : vector<1x16xf32> to vector<8x16xf32>
    %224 = arith.mulf %221, %223 : vector<8x16xf32>
    %cst_79 = arith.constant dense<0.000000e+00> : vector<8xf32>
    %225 = vector.multi_reduction <add>, %224, %cst_79 [1] : vector<8x16xf32> to vector<8xf32>
    %226 = vector.shape_cast %225 : vector<8xf32> to vector<8x1xf32>
    %227 = vector.extract_strided_slice %33 {offsets = [1, 0], sizes = [1, 16], strides = [1, 1]} : vector<2x16xf32> to vector<1x16xf32>
    %228 = vector.broadcast %227 : vector<1x16xf32> to vector<8x16xf32>
    %229 = arith.mulf %221, %228 : vector<8x16xf32>
    %cst_80 = arith.constant dense<0.000000e+00> : vector<8xf32>
    %230 = vector.multi_reduction <add>, %229, %cst_80 [1] : vector<8x16xf32> to vector<8xf32>
    %231 = vector.shape_cast %230 : vector<8xf32> to vector<8x1xf32>
    %232 = tpu.transpose %226, [1, 0] : vector<8x1xf32> -> vector<1x8xf32>
    %233 = vector.broadcast %231 : vector<8x1xf32> to vector<8x8xf32>
    %234 = vector.broadcast %232 : vector<1x8xf32> to vector<8x8xf32>
    %235 = arith.addf %233, %234 : vector<8x8xf32>
    %cst_81 = arith.constant 0.000000e+00 : f32
    %236 = vector.broadcast %cst_81 : f32 to vector<8x8xf32>
    %237 = arith.cmpf oge, %235, %236 : vector<8x8xf32>
    %cst_82 = arith.constant 2.000000e-01 : f32
    %238 = vector.broadcast %cst_82 : f32 to vector<8x8xf32>
    %239 = arith.mulf %238, %235 : vector<8x8xf32>
    %240 = arith.select %237, %235, %239 : vector<8x8xi1>, vector<8x8xf32>
    %cst_83 = arith.constant -1.000000e+30 : f32
    %241 = vector.broadcast %cst_83 : f32 to vector<8x8xf32>
    %242 = arith.select %31, %240, %241 : vector<8x8xi1>, vector<8x8xf32>
    %cst_84 = arith.constant dense<0xFF800000> : vector<8xf32>
    %243 = vector.multi_reduction <maximumf>, %242, %cst_84 [1] : vector<8x8xf32> to vector<8xf32>
    %244 = vector.shape_cast %243 : vector<8xf32> to vector<8x1xf32>
    %245 = vector.broadcast %244 : vector<8x1xf32> to vector<8x8xf32>
    %246 = arith.subf %242, %245 : vector<8x8xf32>
    %247 = math.exp %246 : vector<8x8xf32>
    %cst_85 = arith.constant 0.000000e+00 : f32
    %248 = vector.broadcast %cst_85 : f32 to vector<8x8xf32>
    %249 = arith.select %31, %247, %248 : vector<8x8xi1>, vector<8x8xf32>
    %cst_86 = arith.constant dense<0.000000e+00> : vector<8xf32>
    %250 = vector.multi_reduction <add>, %249, %cst_86 [1] : vector<8x8xf32> to vector<8xf32>
    %251 = vector.shape_cast %250 : vector<8xf32> to vector<8x1xf32>
    %cst_87 = arith.constant 9.99999968E-21 : f32
    %252 = vector.broadcast %cst_87 : f32 to vector<8x1xf32>
    %253 = arith.addf %251, %252 : vector<8x1xf32>
    %254 = vector.broadcast %253 : vector<8x1xf32> to vector<8x8xf32>
    %255 = arith.divf %249, %254 : vector<8x8xf32>
    %cst_88 = arith.constant dense<0.000000e+00> : vector<8x16xf32>
    %256 = tpu.matmul %255, %221, %cst_88 {dimension_numbers = #tpu.dot_dimension_numbers<[1], [0], [0], [1], [0, 0, 1, 1], [], []>} : vector<8x8xf32>, vector<8x16xf32>, vector<8x16xf32> -> vector<8x16xf32>
    %257 = tpu.concatenate %220, %256 in 1 : vector<8x16xf32>, vector<8x16xf32> -> vector<8x32xf32>
    %c16_89 = arith.constant 16 : index
    %c0_90 = arith.constant 0 : index
    %258 = vector.load %arg16[%c16_89, %c0_90] : memref<40x32xf32, #tpu.memory_space<vmem>>, vector<8x32xf32>
    tpu.vector_store %arg16[%c16_89, %c0_90], %257 {strides = array<i32>} : memref<40x32xf32, #tpu.memory_space<vmem>>, vector<8x32xf32>,
    %259 = vector.extract_strided_slice %25 {offsets = [24, 0], sizes = [8, 32], strides = [1, 1]} : vector<40x32xf32> to vector<8x32xf32>
    %260 = vector.extract_strided_slice %259 {offsets = [0, 0], sizes = [8, 16], strides = [1, 1]} : vector<8x32xf32> to vector<8x16xf32>
    %261 = vector.extract_strided_slice %32 {offsets = [0, 0], sizes = [1, 16], strides = [1, 1]} : vector<2x16xf32> to vector<1x16xf32>
    %262 = vector.broadcast %261 : vector<1x16xf32> to vector<8x16xf32>
    %263 = arith.mulf %260, %262 : vector<8x16xf32>
    %cst_91 = arith.constant dense<0.000000e+00> : vector<8xf32>
    %264 = vector.multi_reduction <add>, %263, %cst_91 [1] : vector<8x16xf32> to vector<8xf32>
    %265 = vector.shape_cast %264 : vector<8xf32> to vector<8x1xf32>
    %266 = vector.extract_strided_slice %33 {offsets = [0, 0], sizes = [1, 16], strides = [1, 1]} : vector<2x16xf32> to vector<1x16xf32>
    %267 = vector.broadcast %266 : vector<1x16xf32> to vector<8x16xf32>
    %268 = arith.mulf %260, %267 : vector<8x16xf32>
    %cst_92 = arith.constant dense<0.000000e+00> : vector<8xf32>
    %269 = vector.multi_reduction <add>, %268, %cst_92 [1] : vector<8x16xf32> to vector<8xf32>
    %270 = vector.shape_cast %269 : vector<8xf32> to vector<8x1xf32>
    %271 = tpu.transpose %265, [1, 0] : vector<8x1xf32> -> vector<1x8xf32>
    %272 = vector.broadcast %270 : vector<8x1xf32> to vector<8x8xf32>
    %273 = vector.broadcast %271 : vector<1x8xf32> to vector<8x8xf32>
    %274 = arith.addf %272, %273 : vector<8x8xf32>
    %cst_93 = arith.constant 0.000000e+00 : f32
    %275 = vector.broadcast %cst_93 : f32 to vector<8x8xf32>
    %276 = arith.cmpf oge, %274, %275 : vector<8x8xf32>
    %cst_94 = arith.constant 2.000000e-01 : f32
    %277 = vector.broadcast %cst_94 : f32 to vector<8x8xf32>
    %278 = arith.mulf %277, %274 : vector<8x8xf32>
    %279 = arith.select %276, %274, %278 : vector<8x8xi1>, vector<8x8xf32>
    %cst_95 = arith.constant -1.000000e+30 : f32
    %280 = vector.broadcast %cst_95 : f32 to vector<8x8xf32>
    %281 = arith.select %31, %279, %280 : vector<8x8xi1>, vector<8x8xf32>
    %cst_96 = arith.constant dense<0xFF800000> : vector<8xf32>
    %282 = vector.multi_reduction <maximumf>, %281, %cst_96 [1] : vector<8x8xf32> to vector<8xf32>
    %283 = vector.shape_cast %282 : vector<8xf32> to vector<8x1xf32>
    %284 = vector.broadcast %283 : vector<8x1xf32> to vector<8x8xf32>
    %285 = arith.subf %281, %284 : vector<8x8xf32>
    %286 = math.exp %285 : vector<8x8xf32>
    %cst_97 = arith.constant 0.000000e+00 : f32
    %287 = vector.broadcast %cst_97 : f32 to vector<8x8xf32>
    %288 = arith.select %31, %286, %287 : vector<8x8xi1>, vector<8x8xf32>
    %cst_98 = arith.constant dense<0.000000e+00> : vector<8xf32>
    %289 = vector.multi_reduction <add>, %288, %cst_98 [1] : vector<8x8xf32> to vector<8xf32>
    %290 = vector.shape_cast %289 : vector<8xf32> to vector<8x1xf32>
    %cst_99 = arith.constant 9.99999968E-21 : f32
    %291 = vector.broadcast %cst_99 : f32 to vector<8x1xf32>
    %292 = arith.addf %290, %291 : vector<8x1xf32>
    %293 = vector.broadcast %292 : vector<8x1xf32> to vector<8x8xf32>
    %294 = arith.divf %288, %293 : vector<8x8xf32>
    %cst_100 = arith.constant dense<0.000000e+00> : vector<8x16xf32>
    %295 = tpu.matmul %294, %260, %cst_100 {dimension_numbers = #tpu.dot_dimension_numbers<[1], [0], [0], [1], [0, 0, 1, 1], [], []>} : vector<8x8xf32>, vector<8x16xf32>, vector<8x16xf32> -> vector<8x16xf32>
    %296 = vector.extract_strided_slice %259 {offsets = [0, 16], sizes = [8, 16], strides = [1, 1]} : vector<8x32xf32> to vector<8x16xf32>
    %297 = vector.extract_strided_slice %32 {offsets = [1, 0], sizes = [1, 16], strides = [1, 1]} : vector<2x16xf32> to vector<1x16xf32>
    %298 = vector.broadcast %297 : vector<1x16xf32> to vector<8x16xf32>
    %299 = arith.mulf %296, %298 : vector<8x16xf32>
    %cst_101 = arith.constant dense<0.000000e+00> : vector<8xf32>
    %300 = vector.multi_reduction <add>, %299, %cst_101 [1] : vector<8x16xf32> to vector<8xf32>
    %301 = vector.shape_cast %300 : vector<8xf32> to vector<8x1xf32>
    %302 = vector.extract_strided_slice %33 {offsets = [1, 0], sizes = [1, 16], strides = [1, 1]} : vector<2x16xf32> to vector<1x16xf32>
    %303 = vector.broadcast %302 : vector<1x16xf32> to vector<8x16xf32>
    %304 = arith.mulf %296, %303 : vector<8x16xf32>
    %cst_102 = arith.constant dense<0.000000e+00> : vector<8xf32>
    %305 = vector.multi_reduction <add>, %304, %cst_102 [1] : vector<8x16xf32> to vector<8xf32>
    %306 = vector.shape_cast %305 : vector<8xf32> to vector<8x1xf32>
    %307 = tpu.transpose %301, [1, 0] : vector<8x1xf32> -> vector<1x8xf32>
    %308 = vector.broadcast %306 : vector<8x1xf32> to vector<8x8xf32>
    %309 = vector.broadcast %307 : vector<1x8xf32> to vector<8x8xf32>
    %310 = arith.addf %308, %309 : vector<8x8xf32>
    %cst_103 = arith.constant 0.000000e+00 : f32
    %311 = vector.broadcast %cst_103 : f32 to vector<8x8xf32>
    %312 = arith.cmpf oge, %310, %311 : vector<8x8xf32>
    %cst_104 = arith.constant 2.000000e-01 : f32
    %313 = vector.broadcast %cst_104 : f32 to vector<8x8xf32>
    %314 = arith.mulf %313, %310 : vector<8x8xf32>
    %315 = arith.select %312, %310, %314 : vector<8x8xi1>, vector<8x8xf32>
    %cst_105 = arith.constant -1.000000e+30 : f32
    %316 = vector.broadcast %cst_105 : f32 to vector<8x8xf32>
    %317 = arith.select %31, %315, %316 : vector<8x8xi1>, vector<8x8xf32>
    %cst_106 = arith.constant dense<0xFF800000> : vector<8xf32>
    %318 = vector.multi_reduction <maximumf>, %317, %cst_106 [1] : vector<8x8xf32> to vector<8xf32>
    %319 = vector.shape_cast %318 : vector<8xf32> to vector<8x1xf32>
    %320 = vector.broadcast %319 : vector<8x1xf32> to vector<8x8xf32>
    %321 = arith.subf %317, %320 : vector<8x8xf32>
    %322 = math.exp %321 : vector<8x8xf32>
    %cst_107 = arith.constant 0.000000e+00 : f32
    %323 = vector.broadcast %cst_107 : f32 to vector<8x8xf32>
    %324 = arith.select %31, %322, %323 : vector<8x8xi1>, vector<8x8xf32>
    %cst_108 = arith.constant dense<0.000000e+00> : vector<8xf32>
    %325 = vector.multi_reduction <add>, %324, %cst_108 [1] : vector<8x8xf32> to vector<8xf32>
    %326 = vector.shape_cast %325 : vector<8xf32> to vector<8x1xf32>
    %cst_109 = arith.constant 9.99999968E-21 : f32
    %327 = vector.broadcast %cst_109 : f32 to vector<8x1xf32>
    %328 = arith.addf %326, %327 : vector<8x1xf32>
    %329 = vector.broadcast %328 : vector<8x1xf32> to vector<8x8xf32>
    %330 = arith.divf %324, %329 : vector<8x8xf32>
    %cst_110 = arith.constant dense<0.000000e+00> : vector<8x16xf32>
    %331 = tpu.matmul %330, %296, %cst_110 {dimension_numbers = #tpu.dot_dimension_numbers<[1], [0], [0], [1], [0, 0, 1, 1], [], []>} : vector<8x8xf32>, vector<8x16xf32>, vector<8x16xf32> -> vector<8x16xf32>
    %332 = tpu.concatenate %295, %331 in 1 : vector<8x16xf32>, vector<8x16xf32> -> vector<8x32xf32>
    %c24 = arith.constant 24 : index
    %c0_111 = arith.constant 0 : index
    %333 = vector.load %arg16[%c24, %c0_111] : memref<40x32xf32, #tpu.memory_space<vmem>>, vector<8x32xf32>
    tpu.vector_store %arg16[%c24, %c0_111], %332 {strides = array<i32>} : memref<40x32xf32, #tpu.memory_space<vmem>>, vector<8x32xf32>,
    %334 = vector.extract_strided_slice %25 {offsets = [32, 0], sizes = [8, 32], strides = [1, 1]} : vector<40x32xf32> to vector<8x32xf32>
    %335 = vector.extract_strided_slice %334 {offsets = [0, 0], sizes = [8, 16], strides = [1, 1]} : vector<8x32xf32> to vector<8x16xf32>
    %336 = vector.extract_strided_slice %32 {offsets = [0, 0], sizes = [1, 16], strides = [1, 1]} : vector<2x16xf32> to vector<1x16xf32>
    %337 = vector.broadcast %336 : vector<1x16xf32> to vector<8x16xf32>
    %338 = arith.mulf %335, %337 : vector<8x16xf32>
    %cst_112 = arith.constant dense<0.000000e+00> : vector<8xf32>
    %339 = vector.multi_reduction <add>, %338, %cst_112 [1] : vector<8x16xf32> to vector<8xf32>
    %340 = vector.shape_cast %339 : vector<8xf32> to vector<8x1xf32>
    %341 = vector.extract_strided_slice %33 {offsets = [0, 0], sizes = [1, 16], strides = [1, 1]} : vector<2x16xf32> to vector<1x16xf32>
    %342 = vector.broadcast %341 : vector<1x16xf32> to vector<8x16xf32>
    %343 = arith.mulf %335, %342 : vector<8x16xf32>
    %cst_113 = arith.constant dense<0.000000e+00> : vector<8xf32>
    %344 = vector.multi_reduction <add>, %343, %cst_113 [1] : vector<8x16xf32> to vector<8xf32>
    %345 = vector.shape_cast %344 : vector<8xf32> to vector<8x1xf32>
    %346 = tpu.transpose %340, [1, 0] : vector<8x1xf32> -> vector<1x8xf32>
    %347 = vector.broadcast %345 : vector<8x1xf32> to vector<8x8xf32>
    %348 = vector.broadcast %346 : vector<1x8xf32> to vector<8x8xf32>
    %349 = arith.addf %347, %348 : vector<8x8xf32>
    %cst_114 = arith.constant 0.000000e+00 : f32
    %350 = vector.broadcast %cst_114 : f32 to vector<8x8xf32>
    %351 = arith.cmpf oge, %349, %350 : vector<8x8xf32>
    %cst_115 = arith.constant 2.000000e-01 : f32
    %352 = vector.broadcast %cst_115 : f32 to vector<8x8xf32>
    %353 = arith.mulf %352, %349 : vector<8x8xf32>
    %354 = arith.select %351, %349, %353 : vector<8x8xi1>, vector<8x8xf32>
    %cst_116 = arith.constant -1.000000e+30 : f32
    %355 = vector.broadcast %cst_116 : f32 to vector<8x8xf32>
    %356 = arith.select %31, %354, %355 : vector<8x8xi1>, vector<8x8xf32>
    %cst_117 = arith.constant dense<0xFF800000> : vector<8xf32>
    %357 = vector.multi_reduction <maximumf>, %356, %cst_117 [1] : vector<8x8xf32> to vector<8xf32>
    %358 = vector.shape_cast %357 : vector<8xf32> to vector<8x1xf32>
    %359 = vector.broadcast %358 : vector<8x1xf32> to vector<8x8xf32>
    %360 = arith.subf %356, %359 : vector<8x8xf32>
    %361 = math.exp %360 : vector<8x8xf32>
    %cst_118 = arith.constant 0.000000e+00 : f32
    %362 = vector.broadcast %cst_118 : f32 to vector<8x8xf32>
    %363 = arith.select %31, %361, %362 : vector<8x8xi1>, vector<8x8xf32>
    %cst_119 = arith.constant dense<0.000000e+00> : vector<8xf32>
    %364 = vector.multi_reduction <add>, %363, %cst_119 [1] : vector<8x8xf32> to vector<8xf32>
    %365 = vector.shape_cast %364 : vector<8xf32> to vector<8x1xf32>
    %cst_120 = arith.constant 9.99999968E-21 : f32
    %366 = vector.broadcast %cst_120 : f32 to vector<8x1xf32>
    %367 = arith.addf %365, %366 : vector<8x1xf32>
    %368 = vector.broadcast %367 : vector<8x1xf32> to vector<8x8xf32>
    %369 = arith.divf %363, %368 : vector<8x8xf32>
    %cst_121 = arith.constant dense<0.000000e+00> : vector<8x16xf32>
    %370 = tpu.matmul %369, %335, %cst_121 {dimension_numbers = #tpu.dot_dimension_numbers<[1], [0], [0], [1], [0, 0, 1, 1], [], []>} : vector<8x8xf32>, vector<8x16xf32>, vector<8x16xf32> -> vector<8x16xf32>
    %371 = vector.extract_strided_slice %334 {offsets = [0, 16], sizes = [8, 16], strides = [1, 1]} : vector<8x32xf32> to vector<8x16xf32>
    %372 = vector.extract_strided_slice %32 {offsets = [1, 0], sizes = [1, 16], strides = [1, 1]} : vector<2x16xf32> to vector<1x16xf32>
    %373 = vector.broadcast %372 : vector<1x16xf32> to vector<8x16xf32>
    %374 = arith.mulf %371, %373 : vector<8x16xf32>
    %cst_122 = arith.constant dense<0.000000e+00> : vector<8xf32>
    %375 = vector.multi_reduction <add>, %374, %cst_122 [1] : vector<8x16xf32> to vector<8xf32>
    %376 = vector.shape_cast %375 : vector<8xf32> to vector<8x1xf32>
    %377 = vector.extract_strided_slice %33 {offsets = [1, 0], sizes = [1, 16], strides = [1, 1]} : vector<2x16xf32> to vector<1x16xf32>
    %378 = vector.broadcast %377 : vector<1x16xf32> to vector<8x16xf32>
    %379 = arith.mulf %371, %378 : vector<8x16xf32>
    %cst_123 = arith.constant dense<0.000000e+00> : vector<8xf32>
    %380 = vector.multi_reduction <add>, %379, %cst_123 [1] : vector<8x16xf32> to vector<8xf32>
    %381 = vector.shape_cast %380 : vector<8xf32> to vector<8x1xf32>
    %382 = tpu.transpose %376, [1, 0] : vector<8x1xf32> -> vector<1x8xf32>
    %383 = vector.broadcast %381 : vector<8x1xf32> to vector<8x8xf32>
    %384 = vector.broadcast %382 : vector<1x8xf32> to vector<8x8xf32>
    %385 = arith.addf %383, %384 : vector<8x8xf32>
    %cst_124 = arith.constant 0.000000e+00 : f32
    %386 = vector.broadcast %cst_124 : f32 to vector<8x8xf32>
    %387 = arith.cmpf oge, %385, %386 : vector<8x8xf32>
    %cst_125 = arith.constant 2.000000e-01 : f32
    %388 = vector.broadcast %cst_125 : f32 to vector<8x8xf32>
    %389 = arith.mulf %388, %385 : vector<8x8xf32>
    %390 = arith.select %387, %385, %389 : vector<8x8xi1>, vector<8x8xf32>
    %cst_126 = arith.constant -1.000000e+30 : f32
    %391 = vector.broadcast %cst_126 : f32 to vector<8x8xf32>
    %392 = arith.select %31, %390, %391 : vector<8x8xi1>, vector<8x8xf32>
    %cst_127 = arith.constant dense<0xFF800000> : vector<8xf32>
    %393 = vector.multi_reduction <maximumf>, %392, %cst_127 [1] : vector<8x8xf32> to vector<8xf32>
    %394 = vector.shape_cast %393 : vector<8xf32> to vector<8x1xf32>
    %395 = vector.broadcast %394 : vector<8x1xf32> to vector<8x8xf32>
    %396 = arith.subf %392, %395 : vector<8x8xf32>
    %397 = math.exp %396 : vector<8x8xf32>
    %cst_128 = arith.constant 0.000000e+00 : f32
    %398 = vector.broadcast %cst_128 : f32 to vector<8x8xf32>
    %399 = arith.select %31, %397, %398 : vector<8x8xi1>, vector<8x8xf32>
    %cst_129 = arith.constant dense<0.000000e+00> : vector<8xf32>
    %400 = vector.multi_reduction <add>, %399, %cst_129 [1] : vector<8x8xf32> to vector<8xf32>
    %401 = vector.shape_cast %400 : vector<8xf32> to vector<8x1xf32>
    %cst_130 = arith.constant 9.99999968E-21 : f32
    %402 = vector.broadcast %cst_130 : f32 to vector<8x1xf32>
    %403 = arith.addf %401, %402 : vector<8x1xf32>
    %404 = vector.broadcast %403 : vector<8x1xf32> to vector<8x8xf32>
    %405 = arith.divf %399, %404 : vector<8x8xf32>
    %cst_131 = arith.constant dense<0.000000e+00> : vector<8x16xf32>
    %406 = tpu.matmul %405, %371, %cst_131 {dimension_numbers = #tpu.dot_dimension_numbers<[1], [0], [0], [1], [0, 0, 1, 1], [], []>} : vector<8x8xf32>, vector<8x16xf32>, vector<8x16xf32> -> vector<8x16xf32>
    %407 = tpu.concatenate %370, %406 in 1 : vector<8x16xf32>, vector<8x16xf32> -> vector<8x32xf32>
    %c32 = arith.constant 32 : index
    %c0_132 = arith.constant 0 : index
    %408 = vector.load %arg16[%c32, %c0_132] : memref<40x32xf32, #tpu.memory_space<vmem>>, vector<8x32xf32>
    tpu.vector_store %arg16[%c32, %c0_132], %407 {strides = array<i32>} : memref<40x32xf32, #tpu.memory_space<vmem>>, vector<8x32xf32>,
    %c0_133 = arith.constant 0 : index
    %c0_134 = arith.constant 0 : index
    %409 = vector.load %arg16[%c0_133, %c0_134] : memref<40x32xf32, #tpu.memory_space<vmem>>, vector<40x32xf32>
    %c0_135 = arith.constant 0 : index
    %c0_136 = arith.constant 0 : index
    %410 = vector.load %arg10[%c0_135, %c0_136] : memref<32x16xf32, #tpu.memory_space<vmem>>, vector<32x16xf32>
    %cst_137 = arith.constant dense<0.000000e+00> : vector<40x16xf32>
    %411 = tpu.matmul %409, %410, %cst_137 {dimension_numbers = #tpu.dot_dimension_numbers<[1], [0], [0], [1], [0, 0, 1, 1], [], []>} : vector<40x32xf32>, vector<32x16xf32>, vector<40x16xf32> -> vector<40x16xf32>
    %c0_138 = arith.constant 0 : index
    %c0_139 = arith.constant 0 : index
    %412 = vector.load %arg11[%c0_138, %c0_139] : memref<1x16xf32, #tpu.memory_space<vmem>>, vector<1x16xf32>
    %413 = vector.broadcast %412 : vector<1x16xf32> to vector<40x16xf32>
    %414 = arith.addf %411, %413 : vector<40x16xf32>
    %415 = arith.addf %414, %1 : vector<40x16xf32>
    %c0_140 = arith.constant 0 : index
    %c0_141 = arith.constant 0 : index
    %416 = vector.load %arg12[%c0_140, %c0_141] : memref<1x16xf32, #tpu.memory_space<vmem>>, vector<1x16xf32>
    %417 = vector.broadcast %416 : vector<1x16xf32> to vector<40x16xf32>
    %418 = arith.mulf %415, %417 : vector<40x16xf32>
    %c0_142 = arith.constant 0 : index
    %c0_143 = arith.constant 0 : index
    %419 = vector.load %arg13[%c0_142, %c0_143] : memref<1x16xf32, #tpu.memory_space<vmem>>, vector<1x16xf32>
    %420 = vector.broadcast %419 : vector<1x16xf32> to vector<40x16xf32>
    %421 = arith.addf %418, %420 : vector<40x16xf32>
    %c0_144 = arith.constant 0 : index
    %c0_145 = arith.constant 0 : index
    %422 = vector.load %arg14[%c0_144, %c0_145] : memref<40x16xf32, #tpu.memory_space<vmem>>, vector<40x16xf32>
    tpu.vector_store %arg14[%c0_144, %c0_145], %421 {strides = array<i32>} : memref<40x16xf32, #tpu.memory_space<vmem>>, vector<40x16xf32>,
    return
  }
}

module attributes {stable_mosaic.version = 11 : i64} {
  func.func @_st_layer_kernel(%arg0: memref<64x16xf32, #tpu.memory_space<vmem>>, %arg1: memref<64x32xf32, #tpu.memory_space<vmem>>, %arg2: memref<8x8xf32, #tpu.memory_space<vmem>>, %arg3: memref<16x32xf32, #tpu.memory_space<vmem>>, %arg4: memref<16x32xf32, #tpu.memory_space<vmem>>, %arg5: memref<1x32xf32, #tpu.memory_space<vmem>>, %arg6: memref<16x64xf32, #tpu.memory_space<vmem>>, %arg7: memref<1x64xf32, #tpu.memory_space<vmem>>, %arg8: memref<2x16xf32, #tpu.memory_space<vmem>>, %arg9: memref<2x16xf32, #tpu.memory_space<vmem>>, %arg10: memref<32x16xf32, #tpu.memory_space<vmem>>, %arg11: memref<1x16xf32, #tpu.memory_space<vmem>>, %arg12: memref<1x16xf32, #tpu.memory_space<vmem>>, %arg13: memref<1x16xf32, #tpu.memory_space<vmem>>, %arg14: memref<56x16xf32, #tpu.memory_space<vmem>>, %arg15: memref<56x32xf32, #tpu.memory_space<vmem>>, %arg16: memref<56x32xf32, #tpu.memory_space<vmem>>) attributes {dimension_semantics = [], scalar_prefetch = 0 : i64, scratch_operands = 1 : i64, tpu.core_type = #tpu.core_type<tc>} {
    %c0 = arith.constant 0 : index
    %c0_0 = arith.constant 0 : index
    %0 = vector.load %arg0[%c0, %c0_0] : memref<64x16xf32, #tpu.memory_space<vmem>>, vector<56x16xf32>
    %c8 = arith.constant 8 : index
    %c0_1 = arith.constant 0 : index
    %1 = vector.load %arg0[%c8, %c0_1] : memref<64x16xf32, #tpu.memory_space<vmem>>, vector<56x16xf32>
    %c0_2 = arith.constant 0 : index
    %c0_3 = arith.constant 0 : index
    %2 = vector.load %arg3[%c0_2, %c0_3] : memref<16x32xf32, #tpu.memory_space<vmem>>, vector<16x32xf32>
    %cst = arith.constant dense<0.000000e+00> : vector<56x32xf32>
    %3 = tpu.matmul %0, %2, %cst {dimension_numbers = #tpu.dot_dimension_numbers<[1], [0], [0], [1], [0, 0, 1, 1], [], []>} : vector<56x16xf32>, vector<16x32xf32>, vector<56x32xf32> -> vector<56x32xf32>
    %c0_4 = arith.constant 0 : index
    %c0_5 = arith.constant 0 : index
    %4 = vector.load %arg4[%c0_4, %c0_5] : memref<16x32xf32, #tpu.memory_space<vmem>>, vector<16x32xf32>
    %cst_6 = arith.constant dense<0.000000e+00> : vector<56x32xf32>
    %5 = tpu.matmul %1, %4, %cst_6 {dimension_numbers = #tpu.dot_dimension_numbers<[1], [0], [0], [1], [0, 0, 1, 1], [], []>} : vector<56x16xf32>, vector<16x32xf32>, vector<56x32xf32> -> vector<56x32xf32>
    %6 = arith.addf %3, %5 : vector<56x32xf32>
    %c0_7 = arith.constant 0 : index
    %c0_8 = arith.constant 0 : index
    %7 = vector.load %arg5[%c0_7, %c0_8] : memref<1x32xf32, #tpu.memory_space<vmem>>, vector<1x32xf32>
    %8 = vector.broadcast %7 : vector<1x32xf32> to vector<56x32xf32>
    %9 = arith.addf %6, %8 : vector<56x32xf32>
    %10 = vector.extract_strided_slice %9 {offsets = [0, 0], sizes = [56, 16], strides = [1, 1]} : vector<56x32xf32> to vector<56x16xf32>
    %11 = math.tanh %10 : vector<56x16xf32>
    %12 = vector.extract_strided_slice %9 {offsets = [0, 16], sizes = [56, 16], strides = [1, 1]} : vector<56x32xf32> to vector<56x16xf32>
    %13 = arith.negf %12 : vector<56x16xf32>
    %14 = math.exp %13 : vector<56x16xf32>
    %cst_9 = arith.constant 1.000000e+00 : f32
    %15 = vector.broadcast %cst_9 : f32 to vector<56x16xf32>
    %16 = arith.addf %15, %14 : vector<56x16xf32>
    %17 = arith.divf %15, %16 : vector<56x16xf32>
    %18 = arith.mulf %11, %17 : vector<56x16xf32>
    %c0_10 = arith.constant 0 : index
    %c0_11 = arith.constant 0 : index
    %19 = vector.load %arg6[%c0_10, %c0_11] : memref<16x64xf32, #tpu.memory_space<vmem>>, vector<16x64xf32>
    %cst_12 = arith.constant dense<0.000000e+00> : vector<56x64xf32>
    %20 = tpu.matmul %18, %19, %cst_12 {dimension_numbers = #tpu.dot_dimension_numbers<[1], [0], [0], [1], [0, 0, 1, 1], [], []>} : vector<56x16xf32>, vector<16x64xf32>, vector<56x64xf32> -> vector<56x64xf32>
    %c0_13 = arith.constant 0 : index
    %c0_14 = arith.constant 0 : index
    %21 = vector.load %arg7[%c0_13, %c0_14] : memref<1x64xf32, #tpu.memory_space<vmem>>, vector<1x64xf32>
    %22 = vector.broadcast %21 : vector<1x64xf32> to vector<56x64xf32>
    %23 = arith.addf %20, %22 : vector<56x64xf32>
    %24 = vector.extract_strided_slice %23 {offsets = [0, 0], sizes = [56, 32], strides = [1, 1]} : vector<56x64xf32> to vector<56x32xf32>
    %25 = vector.extract_strided_slice %23 {offsets = [0, 32], sizes = [56, 32], strides = [1, 1]} : vector<56x64xf32> to vector<56x32xf32>
    %c8_15 = arith.constant 8 : index
    %c0_16 = arith.constant 0 : index
    %26 = vector.load %arg1[%c8_15, %c0_16] : memref<64x32xf32, #tpu.memory_space<vmem>>, vector<56x32xf32>
    %27 = arith.addf %26, %24 : vector<56x32xf32>
    %c0_17 = arith.constant 0 : index
    %c0_18 = arith.constant 0 : index
    %28 = vector.load %arg15[%c0_17, %c0_18] : memref<56x32xf32, #tpu.memory_space<vmem>>, vector<56x32xf32>
    tpu.vector_store %arg15[%c0_17, %c0_18], %27 {strides = array<i32>} : memref<56x32xf32, #tpu.memory_space<vmem>>, vector<56x32xf32>,
    %c0_19 = arith.constant 0 : index
    %c0_20 = arith.constant 0 : index
    %29 = vector.load %arg2[%c0_19, %c0_20] : memref<8x8xf32, #tpu.memory_space<vmem>>, vector<8x8xf32>
    %cst_21 = arith.constant 0.000000e+00 : f32
    %30 = vector.broadcast %cst_21 : f32 to vector<8x8xf32>
    %31 = arith.cmpf ogt, %29, %30 : vector<8x8xf32>
    %c0_22 = arith.constant 0 : index
    %c0_23 = arith.constant 0 : index
    %32 = vector.load %arg8[%c0_22, %c0_23] : memref<2x16xf32, #tpu.memory_space<vmem>>, vector<2x16xf32>
    %c0_24 = arith.constant 0 : index
    %c0_25 = arith.constant 0 : index
    %33 = vector.load %arg9[%c0_24, %c0_25] : memref<2x16xf32, #tpu.memory_space<vmem>>, vector<2x16xf32>
    %34 = vector.extract_strided_slice %25 {offsets = [0, 0], sizes = [8, 32], strides = [1, 1]} : vector<56x32xf32> to vector<8x32xf32>
    %35 = vector.extract_strided_slice %34 {offsets = [0, 0], sizes = [8, 16], strides = [1, 1]} : vector<8x32xf32> to vector<8x16xf32>
    %36 = vector.extract_strided_slice %32 {offsets = [0, 0], sizes = [1, 16], strides = [1, 1]} : vector<2x16xf32> to vector<1x16xf32>
    %37 = vector.broadcast %36 : vector<1x16xf32> to vector<8x16xf32>
    %38 = arith.mulf %35, %37 : vector<8x16xf32>
    %cst_26 = arith.constant dense<0.000000e+00> : vector<8xf32>
    %39 = vector.multi_reduction <add>, %38, %cst_26 [1] : vector<8x16xf32> to vector<8xf32>
    %40 = vector.shape_cast %39 : vector<8xf32> to vector<8x1xf32>
    %41 = vector.extract_strided_slice %33 {offsets = [0, 0], sizes = [1, 16], strides = [1, 1]} : vector<2x16xf32> to vector<1x16xf32>
    %42 = vector.broadcast %41 : vector<1x16xf32> to vector<8x16xf32>
    %43 = arith.mulf %35, %42 : vector<8x16xf32>
    %cst_27 = arith.constant dense<0.000000e+00> : vector<8xf32>
    %44 = vector.multi_reduction <add>, %43, %cst_27 [1] : vector<8x16xf32> to vector<8xf32>
    %45 = vector.shape_cast %44 : vector<8xf32> to vector<8x1xf32>
    %46 = tpu.transpose %40, [1, 0] : vector<8x1xf32> -> vector<1x8xf32>
    %47 = vector.broadcast %45 : vector<8x1xf32> to vector<8x8xf32>
    %48 = vector.broadcast %46 : vector<1x8xf32> to vector<8x8xf32>
    %49 = arith.addf %47, %48 : vector<8x8xf32>
    %cst_28 = arith.constant 0.000000e+00 : f32
    %50 = vector.broadcast %cst_28 : f32 to vector<8x8xf32>
    %51 = arith.cmpf oge, %49, %50 : vector<8x8xf32>
    %cst_29 = arith.constant 2.000000e-01 : f32
    %52 = vector.broadcast %cst_29 : f32 to vector<8x8xf32>
    %53 = arith.mulf %52, %49 : vector<8x8xf32>
    %54 = arith.select %51, %49, %53 : vector<8x8xi1>, vector<8x8xf32>
    %cst_30 = arith.constant -1.000000e+30 : f32
    %55 = vector.broadcast %cst_30 : f32 to vector<8x8xf32>
    %56 = arith.select %31, %54, %55 : vector<8x8xi1>, vector<8x8xf32>
    %cst_31 = arith.constant dense<0xFF800000> : vector<8xf32>
    %57 = vector.multi_reduction <maximumf>, %56, %cst_31 [1] : vector<8x8xf32> to vector<8xf32>
    %58 = vector.shape_cast %57 : vector<8xf32> to vector<8x1xf32>
    %59 = vector.broadcast %58 : vector<8x1xf32> to vector<8x8xf32>
    %60 = arith.subf %56, %59 : vector<8x8xf32>
    %61 = math.exp %60 : vector<8x8xf32>
    %cst_32 = arith.constant 0.000000e+00 : f32
    %62 = vector.broadcast %cst_32 : f32 to vector<8x8xf32>
    %63 = arith.select %31, %61, %62 : vector<8x8xi1>, vector<8x8xf32>
    %cst_33 = arith.constant dense<0.000000e+00> : vector<8xf32>
    %64 = vector.multi_reduction <add>, %63, %cst_33 [1] : vector<8x8xf32> to vector<8xf32>
    %65 = vector.shape_cast %64 : vector<8xf32> to vector<8x1xf32>
    %cst_34 = arith.constant 9.99999968E-21 : f32
    %66 = vector.broadcast %cst_34 : f32 to vector<8x1xf32>
    %67 = arith.addf %65, %66 : vector<8x1xf32>
    %68 = vector.broadcast %67 : vector<8x1xf32> to vector<8x8xf32>
    %69 = arith.divf %63, %68 : vector<8x8xf32>
    %cst_35 = arith.constant dense<0.000000e+00> : vector<8x16xf32>
    %70 = tpu.matmul %69, %35, %cst_35 {dimension_numbers = #tpu.dot_dimension_numbers<[1], [0], [0], [1], [0, 0, 1, 1], [], []>} : vector<8x8xf32>, vector<8x16xf32>, vector<8x16xf32> -> vector<8x16xf32>
    %71 = vector.extract_strided_slice %34 {offsets = [0, 16], sizes = [8, 16], strides = [1, 1]} : vector<8x32xf32> to vector<8x16xf32>
    %72 = vector.extract_strided_slice %32 {offsets = [1, 0], sizes = [1, 16], strides = [1, 1]} : vector<2x16xf32> to vector<1x16xf32>
    %73 = vector.broadcast %72 : vector<1x16xf32> to vector<8x16xf32>
    %74 = arith.mulf %71, %73 : vector<8x16xf32>
    %cst_36 = arith.constant dense<0.000000e+00> : vector<8xf32>
    %75 = vector.multi_reduction <add>, %74, %cst_36 [1] : vector<8x16xf32> to vector<8xf32>
    %76 = vector.shape_cast %75 : vector<8xf32> to vector<8x1xf32>
    %77 = vector.extract_strided_slice %33 {offsets = [1, 0], sizes = [1, 16], strides = [1, 1]} : vector<2x16xf32> to vector<1x16xf32>
    %78 = vector.broadcast %77 : vector<1x16xf32> to vector<8x16xf32>
    %79 = arith.mulf %71, %78 : vector<8x16xf32>
    %cst_37 = arith.constant dense<0.000000e+00> : vector<8xf32>
    %80 = vector.multi_reduction <add>, %79, %cst_37 [1] : vector<8x16xf32> to vector<8xf32>
    %81 = vector.shape_cast %80 : vector<8xf32> to vector<8x1xf32>
    %82 = tpu.transpose %76, [1, 0] : vector<8x1xf32> -> vector<1x8xf32>
    %83 = vector.broadcast %81 : vector<8x1xf32> to vector<8x8xf32>
    %84 = vector.broadcast %82 : vector<1x8xf32> to vector<8x8xf32>
    %85 = arith.addf %83, %84 : vector<8x8xf32>
    %cst_38 = arith.constant 0.000000e+00 : f32
    %86 = vector.broadcast %cst_38 : f32 to vector<8x8xf32>
    %87 = arith.cmpf oge, %85, %86 : vector<8x8xf32>
    %cst_39 = arith.constant 2.000000e-01 : f32
    %88 = vector.broadcast %cst_39 : f32 to vector<8x8xf32>
    %89 = arith.mulf %88, %85 : vector<8x8xf32>
    %90 = arith.select %87, %85, %89 : vector<8x8xi1>, vector<8x8xf32>
    %cst_40 = arith.constant -1.000000e+30 : f32
    %91 = vector.broadcast %cst_40 : f32 to vector<8x8xf32>
    %92 = arith.select %31, %90, %91 : vector<8x8xi1>, vector<8x8xf32>
    %cst_41 = arith.constant dense<0xFF800000> : vector<8xf32>
    %93 = vector.multi_reduction <maximumf>, %92, %cst_41 [1] : vector<8x8xf32> to vector<8xf32>
    %94 = vector.shape_cast %93 : vector<8xf32> to vector<8x1xf32>
    %95 = vector.broadcast %94 : vector<8x1xf32> to vector<8x8xf32>
    %96 = arith.subf %92, %95 : vector<8x8xf32>
    %97 = math.exp %96 : vector<8x8xf32>
    %cst_42 = arith.constant 0.000000e+00 : f32
    %98 = vector.broadcast %cst_42 : f32 to vector<8x8xf32>
    %99 = arith.select %31, %97, %98 : vector<8x8xi1>, vector<8x8xf32>
    %cst_43 = arith.constant dense<0.000000e+00> : vector<8xf32>
    %100 = vector.multi_reduction <add>, %99, %cst_43 [1] : vector<8x8xf32> to vector<8xf32>
    %101 = vector.shape_cast %100 : vector<8xf32> to vector<8x1xf32>
    %cst_44 = arith.constant 9.99999968E-21 : f32
    %102 = vector.broadcast %cst_44 : f32 to vector<8x1xf32>
    %103 = arith.addf %101, %102 : vector<8x1xf32>
    %104 = vector.broadcast %103 : vector<8x1xf32> to vector<8x8xf32>
    %105 = arith.divf %99, %104 : vector<8x8xf32>
    %cst_45 = arith.constant dense<0.000000e+00> : vector<8x16xf32>
    %106 = tpu.matmul %105, %71, %cst_45 {dimension_numbers = #tpu.dot_dimension_numbers<[1], [0], [0], [1], [0, 0, 1, 1], [], []>} : vector<8x8xf32>, vector<8x16xf32>, vector<8x16xf32> -> vector<8x16xf32>
    %107 = tpu.concatenate %70, %106 in 1 : vector<8x16xf32>, vector<8x16xf32> -> vector<8x32xf32>
    %c0_46 = arith.constant 0 : index
    %c0_47 = arith.constant 0 : index
    %108 = vector.load %arg16[%c0_46, %c0_47] : memref<56x32xf32, #tpu.memory_space<vmem>>, vector<8x32xf32>
    tpu.vector_store %arg16[%c0_46, %c0_47], %107 {strides = array<i32>} : memref<56x32xf32, #tpu.memory_space<vmem>>, vector<8x32xf32>,
    %109 = vector.extract_strided_slice %25 {offsets = [8, 0], sizes = [8, 32], strides = [1, 1]} : vector<56x32xf32> to vector<8x32xf32>
    %110 = vector.extract_strided_slice %109 {offsets = [0, 0], sizes = [8, 16], strides = [1, 1]} : vector<8x32xf32> to vector<8x16xf32>
    %111 = vector.extract_strided_slice %32 {offsets = [0, 0], sizes = [1, 16], strides = [1, 1]} : vector<2x16xf32> to vector<1x16xf32>
    %112 = vector.broadcast %111 : vector<1x16xf32> to vector<8x16xf32>
    %113 = arith.mulf %110, %112 : vector<8x16xf32>
    %cst_48 = arith.constant dense<0.000000e+00> : vector<8xf32>
    %114 = vector.multi_reduction <add>, %113, %cst_48 [1] : vector<8x16xf32> to vector<8xf32>
    %115 = vector.shape_cast %114 : vector<8xf32> to vector<8x1xf32>
    %116 = vector.extract_strided_slice %33 {offsets = [0, 0], sizes = [1, 16], strides = [1, 1]} : vector<2x16xf32> to vector<1x16xf32>
    %117 = vector.broadcast %116 : vector<1x16xf32> to vector<8x16xf32>
    %118 = arith.mulf %110, %117 : vector<8x16xf32>
    %cst_49 = arith.constant dense<0.000000e+00> : vector<8xf32>
    %119 = vector.multi_reduction <add>, %118, %cst_49 [1] : vector<8x16xf32> to vector<8xf32>
    %120 = vector.shape_cast %119 : vector<8xf32> to vector<8x1xf32>
    %121 = tpu.transpose %115, [1, 0] : vector<8x1xf32> -> vector<1x8xf32>
    %122 = vector.broadcast %120 : vector<8x1xf32> to vector<8x8xf32>
    %123 = vector.broadcast %121 : vector<1x8xf32> to vector<8x8xf32>
    %124 = arith.addf %122, %123 : vector<8x8xf32>
    %cst_50 = arith.constant 0.000000e+00 : f32
    %125 = vector.broadcast %cst_50 : f32 to vector<8x8xf32>
    %126 = arith.cmpf oge, %124, %125 : vector<8x8xf32>
    %cst_51 = arith.constant 2.000000e-01 : f32
    %127 = vector.broadcast %cst_51 : f32 to vector<8x8xf32>
    %128 = arith.mulf %127, %124 : vector<8x8xf32>
    %129 = arith.select %126, %124, %128 : vector<8x8xi1>, vector<8x8xf32>
    %cst_52 = arith.constant -1.000000e+30 : f32
    %130 = vector.broadcast %cst_52 : f32 to vector<8x8xf32>
    %131 = arith.select %31, %129, %130 : vector<8x8xi1>, vector<8x8xf32>
    %cst_53 = arith.constant dense<0xFF800000> : vector<8xf32>
    %132 = vector.multi_reduction <maximumf>, %131, %cst_53 [1] : vector<8x8xf32> to vector<8xf32>
    %133 = vector.shape_cast %132 : vector<8xf32> to vector<8x1xf32>
    %134 = vector.broadcast %133 : vector<8x1xf32> to vector<8x8xf32>
    %135 = arith.subf %131, %134 : vector<8x8xf32>
    %136 = math.exp %135 : vector<8x8xf32>
    %cst_54 = arith.constant 0.000000e+00 : f32
    %137 = vector.broadcast %cst_54 : f32 to vector<8x8xf32>
    %138 = arith.select %31, %136, %137 : vector<8x8xi1>, vector<8x8xf32>
    %cst_55 = arith.constant dense<0.000000e+00> : vector<8xf32>
    %139 = vector.multi_reduction <add>, %138, %cst_55 [1] : vector<8x8xf32> to vector<8xf32>
    %140 = vector.shape_cast %139 : vector<8xf32> to vector<8x1xf32>
    %cst_56 = arith.constant 9.99999968E-21 : f32
    %141 = vector.broadcast %cst_56 : f32 to vector<8x1xf32>
    %142 = arith.addf %140, %141 : vector<8x1xf32>
    %143 = vector.broadcast %142 : vector<8x1xf32> to vector<8x8xf32>
    %144 = arith.divf %138, %143 : vector<8x8xf32>
    %cst_57 = arith.constant dense<0.000000e+00> : vector<8x16xf32>
    %145 = tpu.matmul %144, %110, %cst_57 {dimension_numbers = #tpu.dot_dimension_numbers<[1], [0], [0], [1], [0, 0, 1, 1], [], []>} : vector<8x8xf32>, vector<8x16xf32>, vector<8x16xf32> -> vector<8x16xf32>
    %146 = vector.extract_strided_slice %109 {offsets = [0, 16], sizes = [8, 16], strides = [1, 1]} : vector<8x32xf32> to vector<8x16xf32>
    %147 = vector.extract_strided_slice %32 {offsets = [1, 0], sizes = [1, 16], strides = [1, 1]} : vector<2x16xf32> to vector<1x16xf32>
    %148 = vector.broadcast %147 : vector<1x16xf32> to vector<8x16xf32>
    %149 = arith.mulf %146, %148 : vector<8x16xf32>
    %cst_58 = arith.constant dense<0.000000e+00> : vector<8xf32>
    %150 = vector.multi_reduction <add>, %149, %cst_58 [1] : vector<8x16xf32> to vector<8xf32>
    %151 = vector.shape_cast %150 : vector<8xf32> to vector<8x1xf32>
    %152 = vector.extract_strided_slice %33 {offsets = [1, 0], sizes = [1, 16], strides = [1, 1]} : vector<2x16xf32> to vector<1x16xf32>
    %153 = vector.broadcast %152 : vector<1x16xf32> to vector<8x16xf32>
    %154 = arith.mulf %146, %153 : vector<8x16xf32>
    %cst_59 = arith.constant dense<0.000000e+00> : vector<8xf32>
    %155 = vector.multi_reduction <add>, %154, %cst_59 [1] : vector<8x16xf32> to vector<8xf32>
    %156 = vector.shape_cast %155 : vector<8xf32> to vector<8x1xf32>
    %157 = tpu.transpose %151, [1, 0] : vector<8x1xf32> -> vector<1x8xf32>
    %158 = vector.broadcast %156 : vector<8x1xf32> to vector<8x8xf32>
    %159 = vector.broadcast %157 : vector<1x8xf32> to vector<8x8xf32>
    %160 = arith.addf %158, %159 : vector<8x8xf32>
    %cst_60 = arith.constant 0.000000e+00 : f32
    %161 = vector.broadcast %cst_60 : f32 to vector<8x8xf32>
    %162 = arith.cmpf oge, %160, %161 : vector<8x8xf32>
    %cst_61 = arith.constant 2.000000e-01 : f32
    %163 = vector.broadcast %cst_61 : f32 to vector<8x8xf32>
    %164 = arith.mulf %163, %160 : vector<8x8xf32>
    %165 = arith.select %162, %160, %164 : vector<8x8xi1>, vector<8x8xf32>
    %cst_62 = arith.constant -1.000000e+30 : f32
    %166 = vector.broadcast %cst_62 : f32 to vector<8x8xf32>
    %167 = arith.select %31, %165, %166 : vector<8x8xi1>, vector<8x8xf32>
    %cst_63 = arith.constant dense<0xFF800000> : vector<8xf32>
    %168 = vector.multi_reduction <maximumf>, %167, %cst_63 [1] : vector<8x8xf32> to vector<8xf32>
    %169 = vector.shape_cast %168 : vector<8xf32> to vector<8x1xf32>
    %170 = vector.broadcast %169 : vector<8x1xf32> to vector<8x8xf32>
    %171 = arith.subf %167, %170 : vector<8x8xf32>
    %172 = math.exp %171 : vector<8x8xf32>
    %cst_64 = arith.constant 0.000000e+00 : f32
    %173 = vector.broadcast %cst_64 : f32 to vector<8x8xf32>
    %174 = arith.select %31, %172, %173 : vector<8x8xi1>, vector<8x8xf32>
    %cst_65 = arith.constant dense<0.000000e+00> : vector<8xf32>
    %175 = vector.multi_reduction <add>, %174, %cst_65 [1] : vector<8x8xf32> to vector<8xf32>
    %176 = vector.shape_cast %175 : vector<8xf32> to vector<8x1xf32>
    %cst_66 = arith.constant 9.99999968E-21 : f32
    %177 = vector.broadcast %cst_66 : f32 to vector<8x1xf32>
    %178 = arith.addf %176, %177 : vector<8x1xf32>
    %179 = vector.broadcast %178 : vector<8x1xf32> to vector<8x8xf32>
    %180 = arith.divf %174, %179 : vector<8x8xf32>
    %cst_67 = arith.constant dense<0.000000e+00> : vector<8x16xf32>
    %181 = tpu.matmul %180, %146, %cst_67 {dimension_numbers = #tpu.dot_dimension_numbers<[1], [0], [0], [1], [0, 0, 1, 1], [], []>} : vector<8x8xf32>, vector<8x16xf32>, vector<8x16xf32> -> vector<8x16xf32>
    %182 = tpu.concatenate %145, %181 in 1 : vector<8x16xf32>, vector<8x16xf32> -> vector<8x32xf32>
    %c8_68 = arith.constant 8 : index
    %c0_69 = arith.constant 0 : index
    %183 = vector.load %arg16[%c8_68, %c0_69] : memref<56x32xf32, #tpu.memory_space<vmem>>, vector<8x32xf32>
    tpu.vector_store %arg16[%c8_68, %c0_69], %182 {strides = array<i32>} : memref<56x32xf32, #tpu.memory_space<vmem>>, vector<8x32xf32>,
    %184 = vector.extract_strided_slice %25 {offsets = [16, 0], sizes = [8, 32], strides = [1, 1]} : vector<56x32xf32> to vector<8x32xf32>
    %185 = vector.extract_strided_slice %184 {offsets = [0, 0], sizes = [8, 16], strides = [1, 1]} : vector<8x32xf32> to vector<8x16xf32>
    %186 = vector.extract_strided_slice %32 {offsets = [0, 0], sizes = [1, 16], strides = [1, 1]} : vector<2x16xf32> to vector<1x16xf32>
    %187 = vector.broadcast %186 : vector<1x16xf32> to vector<8x16xf32>
    %188 = arith.mulf %185, %187 : vector<8x16xf32>
    %cst_70 = arith.constant dense<0.000000e+00> : vector<8xf32>
    %189 = vector.multi_reduction <add>, %188, %cst_70 [1] : vector<8x16xf32> to vector<8xf32>
    %190 = vector.shape_cast %189 : vector<8xf32> to vector<8x1xf32>
    %191 = vector.extract_strided_slice %33 {offsets = [0, 0], sizes = [1, 16], strides = [1, 1]} : vector<2x16xf32> to vector<1x16xf32>
    %192 = vector.broadcast %191 : vector<1x16xf32> to vector<8x16xf32>
    %193 = arith.mulf %185, %192 : vector<8x16xf32>
    %cst_71 = arith.constant dense<0.000000e+00> : vector<8xf32>
    %194 = vector.multi_reduction <add>, %193, %cst_71 [1] : vector<8x16xf32> to vector<8xf32>
    %195 = vector.shape_cast %194 : vector<8xf32> to vector<8x1xf32>
    %196 = tpu.transpose %190, [1, 0] : vector<8x1xf32> -> vector<1x8xf32>
    %197 = vector.broadcast %195 : vector<8x1xf32> to vector<8x8xf32>
    %198 = vector.broadcast %196 : vector<1x8xf32> to vector<8x8xf32>
    %199 = arith.addf %197, %198 : vector<8x8xf32>
    %cst_72 = arith.constant 0.000000e+00 : f32
    %200 = vector.broadcast %cst_72 : f32 to vector<8x8xf32>
    %201 = arith.cmpf oge, %199, %200 : vector<8x8xf32>
    %cst_73 = arith.constant 2.000000e-01 : f32
    %202 = vector.broadcast %cst_73 : f32 to vector<8x8xf32>
    %203 = arith.mulf %202, %199 : vector<8x8xf32>
    %204 = arith.select %201, %199, %203 : vector<8x8xi1>, vector<8x8xf32>
    %cst_74 = arith.constant -1.000000e+30 : f32
    %205 = vector.broadcast %cst_74 : f32 to vector<8x8xf32>
    %206 = arith.select %31, %204, %205 : vector<8x8xi1>, vector<8x8xf32>
    %cst_75 = arith.constant dense<0xFF800000> : vector<8xf32>
    %207 = vector.multi_reduction <maximumf>, %206, %cst_75 [1] : vector<8x8xf32> to vector<8xf32>
    %208 = vector.shape_cast %207 : vector<8xf32> to vector<8x1xf32>
    %209 = vector.broadcast %208 : vector<8x1xf32> to vector<8x8xf32>
    %210 = arith.subf %206, %209 : vector<8x8xf32>
    %211 = math.exp %210 : vector<8x8xf32>
    %cst_76 = arith.constant 0.000000e+00 : f32
    %212 = vector.broadcast %cst_76 : f32 to vector<8x8xf32>
    %213 = arith.select %31, %211, %212 : vector<8x8xi1>, vector<8x8xf32>
    %cst_77 = arith.constant dense<0.000000e+00> : vector<8xf32>
    %214 = vector.multi_reduction <add>, %213, %cst_77 [1] : vector<8x8xf32> to vector<8xf32>
    %215 = vector.shape_cast %214 : vector<8xf32> to vector<8x1xf32>
    %cst_78 = arith.constant 9.99999968E-21 : f32
    %216 = vector.broadcast %cst_78 : f32 to vector<8x1xf32>
    %217 = arith.addf %215, %216 : vector<8x1xf32>
    %218 = vector.broadcast %217 : vector<8x1xf32> to vector<8x8xf32>
    %219 = arith.divf %213, %218 : vector<8x8xf32>
    %cst_79 = arith.constant dense<0.000000e+00> : vector<8x16xf32>
    %220 = tpu.matmul %219, %185, %cst_79 {dimension_numbers = #tpu.dot_dimension_numbers<[1], [0], [0], [1], [0, 0, 1, 1], [], []>} : vector<8x8xf32>, vector<8x16xf32>, vector<8x16xf32> -> vector<8x16xf32>
    %221 = vector.extract_strided_slice %184 {offsets = [0, 16], sizes = [8, 16], strides = [1, 1]} : vector<8x32xf32> to vector<8x16xf32>
    %222 = vector.extract_strided_slice %32 {offsets = [1, 0], sizes = [1, 16], strides = [1, 1]} : vector<2x16xf32> to vector<1x16xf32>
    %223 = vector.broadcast %222 : vector<1x16xf32> to vector<8x16xf32>
    %224 = arith.mulf %221, %223 : vector<8x16xf32>
    %cst_80 = arith.constant dense<0.000000e+00> : vector<8xf32>
    %225 = vector.multi_reduction <add>, %224, %cst_80 [1] : vector<8x16xf32> to vector<8xf32>
    %226 = vector.shape_cast %225 : vector<8xf32> to vector<8x1xf32>
    %227 = vector.extract_strided_slice %33 {offsets = [1, 0], sizes = [1, 16], strides = [1, 1]} : vector<2x16xf32> to vector<1x16xf32>
    %228 = vector.broadcast %227 : vector<1x16xf32> to vector<8x16xf32>
    %229 = arith.mulf %221, %228 : vector<8x16xf32>
    %cst_81 = arith.constant dense<0.000000e+00> : vector<8xf32>
    %230 = vector.multi_reduction <add>, %229, %cst_81 [1] : vector<8x16xf32> to vector<8xf32>
    %231 = vector.shape_cast %230 : vector<8xf32> to vector<8x1xf32>
    %232 = tpu.transpose %226, [1, 0] : vector<8x1xf32> -> vector<1x8xf32>
    %233 = vector.broadcast %231 : vector<8x1xf32> to vector<8x8xf32>
    %234 = vector.broadcast %232 : vector<1x8xf32> to vector<8x8xf32>
    %235 = arith.addf %233, %234 : vector<8x8xf32>
    %cst_82 = arith.constant 0.000000e+00 : f32
    %236 = vector.broadcast %cst_82 : f32 to vector<8x8xf32>
    %237 = arith.cmpf oge, %235, %236 : vector<8x8xf32>
    %cst_83 = arith.constant 2.000000e-01 : f32
    %238 = vector.broadcast %cst_83 : f32 to vector<8x8xf32>
    %239 = arith.mulf %238, %235 : vector<8x8xf32>
    %240 = arith.select %237, %235, %239 : vector<8x8xi1>, vector<8x8xf32>
    %cst_84 = arith.constant -1.000000e+30 : f32
    %241 = vector.broadcast %cst_84 : f32 to vector<8x8xf32>
    %242 = arith.select %31, %240, %241 : vector<8x8xi1>, vector<8x8xf32>
    %cst_85 = arith.constant dense<0xFF800000> : vector<8xf32>
    %243 = vector.multi_reduction <maximumf>, %242, %cst_85 [1] : vector<8x8xf32> to vector<8xf32>
    %244 = vector.shape_cast %243 : vector<8xf32> to vector<8x1xf32>
    %245 = vector.broadcast %244 : vector<8x1xf32> to vector<8x8xf32>
    %246 = arith.subf %242, %245 : vector<8x8xf32>
    %247 = math.exp %246 : vector<8x8xf32>
    %cst_86 = arith.constant 0.000000e+00 : f32
    %248 = vector.broadcast %cst_86 : f32 to vector<8x8xf32>
    %249 = arith.select %31, %247, %248 : vector<8x8xi1>, vector<8x8xf32>
    %cst_87 = arith.constant dense<0.000000e+00> : vector<8xf32>
    %250 = vector.multi_reduction <add>, %249, %cst_87 [1] : vector<8x8xf32> to vector<8xf32>
    %251 = vector.shape_cast %250 : vector<8xf32> to vector<8x1xf32>
    %cst_88 = arith.constant 9.99999968E-21 : f32
    %252 = vector.broadcast %cst_88 : f32 to vector<8x1xf32>
    %253 = arith.addf %251, %252 : vector<8x1xf32>
    %254 = vector.broadcast %253 : vector<8x1xf32> to vector<8x8xf32>
    %255 = arith.divf %249, %254 : vector<8x8xf32>
    %cst_89 = arith.constant dense<0.000000e+00> : vector<8x16xf32>
    %256 = tpu.matmul %255, %221, %cst_89 {dimension_numbers = #tpu.dot_dimension_numbers<[1], [0], [0], [1], [0, 0, 1, 1], [], []>} : vector<8x8xf32>, vector<8x16xf32>, vector<8x16xf32> -> vector<8x16xf32>
    %257 = tpu.concatenate %220, %256 in 1 : vector<8x16xf32>, vector<8x16xf32> -> vector<8x32xf32>
    %c16 = arith.constant 16 : index
    %c0_90 = arith.constant 0 : index
    %258 = vector.load %arg16[%c16, %c0_90] : memref<56x32xf32, #tpu.memory_space<vmem>>, vector<8x32xf32>
    tpu.vector_store %arg16[%c16, %c0_90], %257 {strides = array<i32>} : memref<56x32xf32, #tpu.memory_space<vmem>>, vector<8x32xf32>,
    %259 = vector.extract_strided_slice %25 {offsets = [24, 0], sizes = [8, 32], strides = [1, 1]} : vector<56x32xf32> to vector<8x32xf32>
    %260 = vector.extract_strided_slice %259 {offsets = [0, 0], sizes = [8, 16], strides = [1, 1]} : vector<8x32xf32> to vector<8x16xf32>
    %261 = vector.extract_strided_slice %32 {offsets = [0, 0], sizes = [1, 16], strides = [1, 1]} : vector<2x16xf32> to vector<1x16xf32>
    %262 = vector.broadcast %261 : vector<1x16xf32> to vector<8x16xf32>
    %263 = arith.mulf %260, %262 : vector<8x16xf32>
    %cst_91 = arith.constant dense<0.000000e+00> : vector<8xf32>
    %264 = vector.multi_reduction <add>, %263, %cst_91 [1] : vector<8x16xf32> to vector<8xf32>
    %265 = vector.shape_cast %264 : vector<8xf32> to vector<8x1xf32>
    %266 = vector.extract_strided_slice %33 {offsets = [0, 0], sizes = [1, 16], strides = [1, 1]} : vector<2x16xf32> to vector<1x16xf32>
    %267 = vector.broadcast %266 : vector<1x16xf32> to vector<8x16xf32>
    %268 = arith.mulf %260, %267 : vector<8x16xf32>
    %cst_92 = arith.constant dense<0.000000e+00> : vector<8xf32>
    %269 = vector.multi_reduction <add>, %268, %cst_92 [1] : vector<8x16xf32> to vector<8xf32>
    %270 = vector.shape_cast %269 : vector<8xf32> to vector<8x1xf32>
    %271 = tpu.transpose %265, [1, 0] : vector<8x1xf32> -> vector<1x8xf32>
    %272 = vector.broadcast %270 : vector<8x1xf32> to vector<8x8xf32>
    %273 = vector.broadcast %271 : vector<1x8xf32> to vector<8x8xf32>
    %274 = arith.addf %272, %273 : vector<8x8xf32>
    %cst_93 = arith.constant 0.000000e+00 : f32
    %275 = vector.broadcast %cst_93 : f32 to vector<8x8xf32>
    %276 = arith.cmpf oge, %274, %275 : vector<8x8xf32>
    %cst_94 = arith.constant 2.000000e-01 : f32
    %277 = vector.broadcast %cst_94 : f32 to vector<8x8xf32>
    %278 = arith.mulf %277, %274 : vector<8x8xf32>
    %279 = arith.select %276, %274, %278 : vector<8x8xi1>, vector<8x8xf32>
    %cst_95 = arith.constant -1.000000e+30 : f32
    %280 = vector.broadcast %cst_95 : f32 to vector<8x8xf32>
    %281 = arith.select %31, %279, %280 : vector<8x8xi1>, vector<8x8xf32>
    %cst_96 = arith.constant dense<0xFF800000> : vector<8xf32>
    %282 = vector.multi_reduction <maximumf>, %281, %cst_96 [1] : vector<8x8xf32> to vector<8xf32>
    %283 = vector.shape_cast %282 : vector<8xf32> to vector<8x1xf32>
    %284 = vector.broadcast %283 : vector<8x1xf32> to vector<8x8xf32>
    %285 = arith.subf %281, %284 : vector<8x8xf32>
    %286 = math.exp %285 : vector<8x8xf32>
    %cst_97 = arith.constant 0.000000e+00 : f32
    %287 = vector.broadcast %cst_97 : f32 to vector<8x8xf32>
    %288 = arith.select %31, %286, %287 : vector<8x8xi1>, vector<8x8xf32>
    %cst_98 = arith.constant dense<0.000000e+00> : vector<8xf32>
    %289 = vector.multi_reduction <add>, %288, %cst_98 [1] : vector<8x8xf32> to vector<8xf32>
    %290 = vector.shape_cast %289 : vector<8xf32> to vector<8x1xf32>
    %cst_99 = arith.constant 9.99999968E-21 : f32
    %291 = vector.broadcast %cst_99 : f32 to vector<8x1xf32>
    %292 = arith.addf %290, %291 : vector<8x1xf32>
    %293 = vector.broadcast %292 : vector<8x1xf32> to vector<8x8xf32>
    %294 = arith.divf %288, %293 : vector<8x8xf32>
    %cst_100 = arith.constant dense<0.000000e+00> : vector<8x16xf32>
    %295 = tpu.matmul %294, %260, %cst_100 {dimension_numbers = #tpu.dot_dimension_numbers<[1], [0], [0], [1], [0, 0, 1, 1], [], []>} : vector<8x8xf32>, vector<8x16xf32>, vector<8x16xf32> -> vector<8x16xf32>
    %296 = vector.extract_strided_slice %259 {offsets = [0, 16], sizes = [8, 16], strides = [1, 1]} : vector<8x32xf32> to vector<8x16xf32>
    %297 = vector.extract_strided_slice %32 {offsets = [1, 0], sizes = [1, 16], strides = [1, 1]} : vector<2x16xf32> to vector<1x16xf32>
    %298 = vector.broadcast %297 : vector<1x16xf32> to vector<8x16xf32>
    %299 = arith.mulf %296, %298 : vector<8x16xf32>
    %cst_101 = arith.constant dense<0.000000e+00> : vector<8xf32>
    %300 = vector.multi_reduction <add>, %299, %cst_101 [1] : vector<8x16xf32> to vector<8xf32>
    %301 = vector.shape_cast %300 : vector<8xf32> to vector<8x1xf32>
    %302 = vector.extract_strided_slice %33 {offsets = [1, 0], sizes = [1, 16], strides = [1, 1]} : vector<2x16xf32> to vector<1x16xf32>
    %303 = vector.broadcast %302 : vector<1x16xf32> to vector<8x16xf32>
    %304 = arith.mulf %296, %303 : vector<8x16xf32>
    %cst_102 = arith.constant dense<0.000000e+00> : vector<8xf32>
    %305 = vector.multi_reduction <add>, %304, %cst_102 [1] : vector<8x16xf32> to vector<8xf32>
    %306 = vector.shape_cast %305 : vector<8xf32> to vector<8x1xf32>
    %307 = tpu.transpose %301, [1, 0] : vector<8x1xf32> -> vector<1x8xf32>
    %308 = vector.broadcast %306 : vector<8x1xf32> to vector<8x8xf32>
    %309 = vector.broadcast %307 : vector<1x8xf32> to vector<8x8xf32>
    %310 = arith.addf %308, %309 : vector<8x8xf32>
    %cst_103 = arith.constant 0.000000e+00 : f32
    %311 = vector.broadcast %cst_103 : f32 to vector<8x8xf32>
    %312 = arith.cmpf oge, %310, %311 : vector<8x8xf32>
    %cst_104 = arith.constant 2.000000e-01 : f32
    %313 = vector.broadcast %cst_104 : f32 to vector<8x8xf32>
    %314 = arith.mulf %313, %310 : vector<8x8xf32>
    %315 = arith.select %312, %310, %314 : vector<8x8xi1>, vector<8x8xf32>
    %cst_105 = arith.constant -1.000000e+30 : f32
    %316 = vector.broadcast %cst_105 : f32 to vector<8x8xf32>
    %317 = arith.select %31, %315, %316 : vector<8x8xi1>, vector<8x8xf32>
    %cst_106 = arith.constant dense<0xFF800000> : vector<8xf32>
    %318 = vector.multi_reduction <maximumf>, %317, %cst_106 [1] : vector<8x8xf32> to vector<8xf32>
    %319 = vector.shape_cast %318 : vector<8xf32> to vector<8x1xf32>
    %320 = vector.broadcast %319 : vector<8x1xf32> to vector<8x8xf32>
    %321 = arith.subf %317, %320 : vector<8x8xf32>
    %322 = math.exp %321 : vector<8x8xf32>
    %cst_107 = arith.constant 0.000000e+00 : f32
    %323 = vector.broadcast %cst_107 : f32 to vector<8x8xf32>
    %324 = arith.select %31, %322, %323 : vector<8x8xi1>, vector<8x8xf32>
    %cst_108 = arith.constant dense<0.000000e+00> : vector<8xf32>
    %325 = vector.multi_reduction <add>, %324, %cst_108 [1] : vector<8x8xf32> to vector<8xf32>
    %326 = vector.shape_cast %325 : vector<8xf32> to vector<8x1xf32>
    %cst_109 = arith.constant 9.99999968E-21 : f32
    %327 = vector.broadcast %cst_109 : f32 to vector<8x1xf32>
    %328 = arith.addf %326, %327 : vector<8x1xf32>
    %329 = vector.broadcast %328 : vector<8x1xf32> to vector<8x8xf32>
    %330 = arith.divf %324, %329 : vector<8x8xf32>
    %cst_110 = arith.constant dense<0.000000e+00> : vector<8x16xf32>
    %331 = tpu.matmul %330, %296, %cst_110 {dimension_numbers = #tpu.dot_dimension_numbers<[1], [0], [0], [1], [0, 0, 1, 1], [], []>} : vector<8x8xf32>, vector<8x16xf32>, vector<8x16xf32> -> vector<8x16xf32>
    %332 = tpu.concatenate %295, %331 in 1 : vector<8x16xf32>, vector<8x16xf32> -> vector<8x32xf32>
    %c24 = arith.constant 24 : index
    %c0_111 = arith.constant 0 : index
    %333 = vector.load %arg16[%c24, %c0_111] : memref<56x32xf32, #tpu.memory_space<vmem>>, vector<8x32xf32>
    tpu.vector_store %arg16[%c24, %c0_111], %332 {strides = array<i32>} : memref<56x32xf32, #tpu.memory_space<vmem>>, vector<8x32xf32>,
    %334 = vector.extract_strided_slice %25 {offsets = [32, 0], sizes = [8, 32], strides = [1, 1]} : vector<56x32xf32> to vector<8x32xf32>
    %335 = vector.extract_strided_slice %334 {offsets = [0, 0], sizes = [8, 16], strides = [1, 1]} : vector<8x32xf32> to vector<8x16xf32>
    %336 = vector.extract_strided_slice %32 {offsets = [0, 0], sizes = [1, 16], strides = [1, 1]} : vector<2x16xf32> to vector<1x16xf32>
    %337 = vector.broadcast %336 : vector<1x16xf32> to vector<8x16xf32>
    %338 = arith.mulf %335, %337 : vector<8x16xf32>
    %cst_112 = arith.constant dense<0.000000e+00> : vector<8xf32>
    %339 = vector.multi_reduction <add>, %338, %cst_112 [1] : vector<8x16xf32> to vector<8xf32>
    %340 = vector.shape_cast %339 : vector<8xf32> to vector<8x1xf32>
    %341 = vector.extract_strided_slice %33 {offsets = [0, 0], sizes = [1, 16], strides = [1, 1]} : vector<2x16xf32> to vector<1x16xf32>
    %342 = vector.broadcast %341 : vector<1x16xf32> to vector<8x16xf32>
    %343 = arith.mulf %335, %342 : vector<8x16xf32>
    %cst_113 = arith.constant dense<0.000000e+00> : vector<8xf32>
    %344 = vector.multi_reduction <add>, %343, %cst_113 [1] : vector<8x16xf32> to vector<8xf32>
    %345 = vector.shape_cast %344 : vector<8xf32> to vector<8x1xf32>
    %346 = tpu.transpose %340, [1, 0] : vector<8x1xf32> -> vector<1x8xf32>
    %347 = vector.broadcast %345 : vector<8x1xf32> to vector<8x8xf32>
    %348 = vector.broadcast %346 : vector<1x8xf32> to vector<8x8xf32>
    %349 = arith.addf %347, %348 : vector<8x8xf32>
    %cst_114 = arith.constant 0.000000e+00 : f32
    %350 = vector.broadcast %cst_114 : f32 to vector<8x8xf32>
    %351 = arith.cmpf oge, %349, %350 : vector<8x8xf32>
    %cst_115 = arith.constant 2.000000e-01 : f32
    %352 = vector.broadcast %cst_115 : f32 to vector<8x8xf32>
    %353 = arith.mulf %352, %349 : vector<8x8xf32>
    %354 = arith.select %351, %349, %353 : vector<8x8xi1>, vector<8x8xf32>
    %cst_116 = arith.constant -1.000000e+30 : f32
    %355 = vector.broadcast %cst_116 : f32 to vector<8x8xf32>
    %356 = arith.select %31, %354, %355 : vector<8x8xi1>, vector<8x8xf32>
    %cst_117 = arith.constant dense<0xFF800000> : vector<8xf32>
    %357 = vector.multi_reduction <maximumf>, %356, %cst_117 [1] : vector<8x8xf32> to vector<8xf32>
    %358 = vector.shape_cast %357 : vector<8xf32> to vector<8x1xf32>
    %359 = vector.broadcast %358 : vector<8x1xf32> to vector<8x8xf32>
    %360 = arith.subf %356, %359 : vector<8x8xf32>
    %361 = math.exp %360 : vector<8x8xf32>
    %cst_118 = arith.constant 0.000000e+00 : f32
    %362 = vector.broadcast %cst_118 : f32 to vector<8x8xf32>
    %363 = arith.select %31, %361, %362 : vector<8x8xi1>, vector<8x8xf32>
    %cst_119 = arith.constant dense<0.000000e+00> : vector<8xf32>
    %364 = vector.multi_reduction <add>, %363, %cst_119 [1] : vector<8x8xf32> to vector<8xf32>
    %365 = vector.shape_cast %364 : vector<8xf32> to vector<8x1xf32>
    %cst_120 = arith.constant 9.99999968E-21 : f32
    %366 = vector.broadcast %cst_120 : f32 to vector<8x1xf32>
    %367 = arith.addf %365, %366 : vector<8x1xf32>
    %368 = vector.broadcast %367 : vector<8x1xf32> to vector<8x8xf32>
    %369 = arith.divf %363, %368 : vector<8x8xf32>
    %cst_121 = arith.constant dense<0.000000e+00> : vector<8x16xf32>
    %370 = tpu.matmul %369, %335, %cst_121 {dimension_numbers = #tpu.dot_dimension_numbers<[1], [0], [0], [1], [0, 0, 1, 1], [], []>} : vector<8x8xf32>, vector<8x16xf32>, vector<8x16xf32> -> vector<8x16xf32>
    %371 = vector.extract_strided_slice %334 {offsets = [0, 16], sizes = [8, 16], strides = [1, 1]} : vector<8x32xf32> to vector<8x16xf32>
    %372 = vector.extract_strided_slice %32 {offsets = [1, 0], sizes = [1, 16], strides = [1, 1]} : vector<2x16xf32> to vector<1x16xf32>
    %373 = vector.broadcast %372 : vector<1x16xf32> to vector<8x16xf32>
    %374 = arith.mulf %371, %373 : vector<8x16xf32>
    %cst_122 = arith.constant dense<0.000000e+00> : vector<8xf32>
    %375 = vector.multi_reduction <add>, %374, %cst_122 [1] : vector<8x16xf32> to vector<8xf32>
    %376 = vector.shape_cast %375 : vector<8xf32> to vector<8x1xf32>
    %377 = vector.extract_strided_slice %33 {offsets = [1, 0], sizes = [1, 16], strides = [1, 1]} : vector<2x16xf32> to vector<1x16xf32>
    %378 = vector.broadcast %377 : vector<1x16xf32> to vector<8x16xf32>
    %379 = arith.mulf %371, %378 : vector<8x16xf32>
    %cst_123 = arith.constant dense<0.000000e+00> : vector<8xf32>
    %380 = vector.multi_reduction <add>, %379, %cst_123 [1] : vector<8x16xf32> to vector<8xf32>
    %381 = vector.shape_cast %380 : vector<8xf32> to vector<8x1xf32>
    %382 = tpu.transpose %376, [1, 0] : vector<8x1xf32> -> vector<1x8xf32>
    %383 = vector.broadcast %381 : vector<8x1xf32> to vector<8x8xf32>
    %384 = vector.broadcast %382 : vector<1x8xf32> to vector<8x8xf32>
    %385 = arith.addf %383, %384 : vector<8x8xf32>
    %cst_124 = arith.constant 0.000000e+00 : f32
    %386 = vector.broadcast %cst_124 : f32 to vector<8x8xf32>
    %387 = arith.cmpf oge, %385, %386 : vector<8x8xf32>
    %cst_125 = arith.constant 2.000000e-01 : f32
    %388 = vector.broadcast %cst_125 : f32 to vector<8x8xf32>
    %389 = arith.mulf %388, %385 : vector<8x8xf32>
    %390 = arith.select %387, %385, %389 : vector<8x8xi1>, vector<8x8xf32>
    %cst_126 = arith.constant -1.000000e+30 : f32
    %391 = vector.broadcast %cst_126 : f32 to vector<8x8xf32>
    %392 = arith.select %31, %390, %391 : vector<8x8xi1>, vector<8x8xf32>
    %cst_127 = arith.constant dense<0xFF800000> : vector<8xf32>
    %393 = vector.multi_reduction <maximumf>, %392, %cst_127 [1] : vector<8x8xf32> to vector<8xf32>
    %394 = vector.shape_cast %393 : vector<8xf32> to vector<8x1xf32>
    %395 = vector.broadcast %394 : vector<8x1xf32> to vector<8x8xf32>
    %396 = arith.subf %392, %395 : vector<8x8xf32>
    %397 = math.exp %396 : vector<8x8xf32>
    %cst_128 = arith.constant 0.000000e+00 : f32
    %398 = vector.broadcast %cst_128 : f32 to vector<8x8xf32>
    %399 = arith.select %31, %397, %398 : vector<8x8xi1>, vector<8x8xf32>
    %cst_129 = arith.constant dense<0.000000e+00> : vector<8xf32>
    %400 = vector.multi_reduction <add>, %399, %cst_129 [1] : vector<8x8xf32> to vector<8xf32>
    %401 = vector.shape_cast %400 : vector<8xf32> to vector<8x1xf32>
    %cst_130 = arith.constant 9.99999968E-21 : f32
    %402 = vector.broadcast %cst_130 : f32 to vector<8x1xf32>
    %403 = arith.addf %401, %402 : vector<8x1xf32>
    %404 = vector.broadcast %403 : vector<8x1xf32> to vector<8x8xf32>
    %405 = arith.divf %399, %404 : vector<8x8xf32>
    %cst_131 = arith.constant dense<0.000000e+00> : vector<8x16xf32>
    %406 = tpu.matmul %405, %371, %cst_131 {dimension_numbers = #tpu.dot_dimension_numbers<[1], [0], [0], [1], [0, 0, 1, 1], [], []>} : vector<8x8xf32>, vector<8x16xf32>, vector<8x16xf32> -> vector<8x16xf32>
    %407 = tpu.concatenate %370, %406 in 1 : vector<8x16xf32>, vector<8x16xf32> -> vector<8x32xf32>
    %c32 = arith.constant 32 : index
    %c0_132 = arith.constant 0 : index
    %408 = vector.load %arg16[%c32, %c0_132] : memref<56x32xf32, #tpu.memory_space<vmem>>, vector<8x32xf32>
    tpu.vector_store %arg16[%c32, %c0_132], %407 {strides = array<i32>} : memref<56x32xf32, #tpu.memory_space<vmem>>, vector<8x32xf32>,
    %409 = vector.extract_strided_slice %25 {offsets = [40, 0], sizes = [8, 32], strides = [1, 1]} : vector<56x32xf32> to vector<8x32xf32>
    %410 = vector.extract_strided_slice %409 {offsets = [0, 0], sizes = [8, 16], strides = [1, 1]} : vector<8x32xf32> to vector<8x16xf32>
    %411 = vector.extract_strided_slice %32 {offsets = [0, 0], sizes = [1, 16], strides = [1, 1]} : vector<2x16xf32> to vector<1x16xf32>
    %412 = vector.broadcast %411 : vector<1x16xf32> to vector<8x16xf32>
    %413 = arith.mulf %410, %412 : vector<8x16xf32>
    %cst_133 = arith.constant dense<0.000000e+00> : vector<8xf32>
    %414 = vector.multi_reduction <add>, %413, %cst_133 [1] : vector<8x16xf32> to vector<8xf32>
    %415 = vector.shape_cast %414 : vector<8xf32> to vector<8x1xf32>
    %416 = vector.extract_strided_slice %33 {offsets = [0, 0], sizes = [1, 16], strides = [1, 1]} : vector<2x16xf32> to vector<1x16xf32>
    %417 = vector.broadcast %416 : vector<1x16xf32> to vector<8x16xf32>
    %418 = arith.mulf %410, %417 : vector<8x16xf32>
    %cst_134 = arith.constant dense<0.000000e+00> : vector<8xf32>
    %419 = vector.multi_reduction <add>, %418, %cst_134 [1] : vector<8x16xf32> to vector<8xf32>
    %420 = vector.shape_cast %419 : vector<8xf32> to vector<8x1xf32>
    %421 = tpu.transpose %415, [1, 0] : vector<8x1xf32> -> vector<1x8xf32>
    %422 = vector.broadcast %420 : vector<8x1xf32> to vector<8x8xf32>
    %423 = vector.broadcast %421 : vector<1x8xf32> to vector<8x8xf32>
    %424 = arith.addf %422, %423 : vector<8x8xf32>
    %cst_135 = arith.constant 0.000000e+00 : f32
    %425 = vector.broadcast %cst_135 : f32 to vector<8x8xf32>
    %426 = arith.cmpf oge, %424, %425 : vector<8x8xf32>
    %cst_136 = arith.constant 2.000000e-01 : f32
    %427 = vector.broadcast %cst_136 : f32 to vector<8x8xf32>
    %428 = arith.mulf %427, %424 : vector<8x8xf32>
    %429 = arith.select %426, %424, %428 : vector<8x8xi1>, vector<8x8xf32>
    %cst_137 = arith.constant -1.000000e+30 : f32
    %430 = vector.broadcast %cst_137 : f32 to vector<8x8xf32>
    %431 = arith.select %31, %429, %430 : vector<8x8xi1>, vector<8x8xf32>
    %cst_138 = arith.constant dense<0xFF800000> : vector<8xf32>
    %432 = vector.multi_reduction <maximumf>, %431, %cst_138 [1] : vector<8x8xf32> to vector<8xf32>
    %433 = vector.shape_cast %432 : vector<8xf32> to vector<8x1xf32>
    %434 = vector.broadcast %433 : vector<8x1xf32> to vector<8x8xf32>
    %435 = arith.subf %431, %434 : vector<8x8xf32>
    %436 = math.exp %435 : vector<8x8xf32>
    %cst_139 = arith.constant 0.000000e+00 : f32
    %437 = vector.broadcast %cst_139 : f32 to vector<8x8xf32>
    %438 = arith.select %31, %436, %437 : vector<8x8xi1>, vector<8x8xf32>
    %cst_140 = arith.constant dense<0.000000e+00> : vector<8xf32>
    %439 = vector.multi_reduction <add>, %438, %cst_140 [1] : vector<8x8xf32> to vector<8xf32>
    %440 = vector.shape_cast %439 : vector<8xf32> to vector<8x1xf32>
    %cst_141 = arith.constant 9.99999968E-21 : f32
    %441 = vector.broadcast %cst_141 : f32 to vector<8x1xf32>
    %442 = arith.addf %440, %441 : vector<8x1xf32>
    %443 = vector.broadcast %442 : vector<8x1xf32> to vector<8x8xf32>
    %444 = arith.divf %438, %443 : vector<8x8xf32>
    %cst_142 = arith.constant dense<0.000000e+00> : vector<8x16xf32>
    %445 = tpu.matmul %444, %410, %cst_142 {dimension_numbers = #tpu.dot_dimension_numbers<[1], [0], [0], [1], [0, 0, 1, 1], [], []>} : vector<8x8xf32>, vector<8x16xf32>, vector<8x16xf32> -> vector<8x16xf32>
    %446 = vector.extract_strided_slice %409 {offsets = [0, 16], sizes = [8, 16], strides = [1, 1]} : vector<8x32xf32> to vector<8x16xf32>
    %447 = vector.extract_strided_slice %32 {offsets = [1, 0], sizes = [1, 16], strides = [1, 1]} : vector<2x16xf32> to vector<1x16xf32>
    %448 = vector.broadcast %447 : vector<1x16xf32> to vector<8x16xf32>
    %449 = arith.mulf %446, %448 : vector<8x16xf32>
    %cst_143 = arith.constant dense<0.000000e+00> : vector<8xf32>
    %450 = vector.multi_reduction <add>, %449, %cst_143 [1] : vector<8x16xf32> to vector<8xf32>
    %451 = vector.shape_cast %450 : vector<8xf32> to vector<8x1xf32>
    %452 = vector.extract_strided_slice %33 {offsets = [1, 0], sizes = [1, 16], strides = [1, 1]} : vector<2x16xf32> to vector<1x16xf32>
    %453 = vector.broadcast %452 : vector<1x16xf32> to vector<8x16xf32>
    %454 = arith.mulf %446, %453 : vector<8x16xf32>
    %cst_144 = arith.constant dense<0.000000e+00> : vector<8xf32>
    %455 = vector.multi_reduction <add>, %454, %cst_144 [1] : vector<8x16xf32> to vector<8xf32>
    %456 = vector.shape_cast %455 : vector<8xf32> to vector<8x1xf32>
    %457 = tpu.transpose %451, [1, 0] : vector<8x1xf32> -> vector<1x8xf32>
    %458 = vector.broadcast %456 : vector<8x1xf32> to vector<8x8xf32>
    %459 = vector.broadcast %457 : vector<1x8xf32> to vector<8x8xf32>
    %460 = arith.addf %458, %459 : vector<8x8xf32>
    %cst_145 = arith.constant 0.000000e+00 : f32
    %461 = vector.broadcast %cst_145 : f32 to vector<8x8xf32>
    %462 = arith.cmpf oge, %460, %461 : vector<8x8xf32>
    %cst_146 = arith.constant 2.000000e-01 : f32
    %463 = vector.broadcast %cst_146 : f32 to vector<8x8xf32>
    %464 = arith.mulf %463, %460 : vector<8x8xf32>
    %465 = arith.select %462, %460, %464 : vector<8x8xi1>, vector<8x8xf32>
    %cst_147 = arith.constant -1.000000e+30 : f32
    %466 = vector.broadcast %cst_147 : f32 to vector<8x8xf32>
    %467 = arith.select %31, %465, %466 : vector<8x8xi1>, vector<8x8xf32>
    %cst_148 = arith.constant dense<0xFF800000> : vector<8xf32>
    %468 = vector.multi_reduction <maximumf>, %467, %cst_148 [1] : vector<8x8xf32> to vector<8xf32>
    %469 = vector.shape_cast %468 : vector<8xf32> to vector<8x1xf32>
    %470 = vector.broadcast %469 : vector<8x1xf32> to vector<8x8xf32>
    %471 = arith.subf %467, %470 : vector<8x8xf32>
    %472 = math.exp %471 : vector<8x8xf32>
    %cst_149 = arith.constant 0.000000e+00 : f32
    %473 = vector.broadcast %cst_149 : f32 to vector<8x8xf32>
    %474 = arith.select %31, %472, %473 : vector<8x8xi1>, vector<8x8xf32>
    %cst_150 = arith.constant dense<0.000000e+00> : vector<8xf32>
    %475 = vector.multi_reduction <add>, %474, %cst_150 [1] : vector<8x8xf32> to vector<8xf32>
    %476 = vector.shape_cast %475 : vector<8xf32> to vector<8x1xf32>
    %cst_151 = arith.constant 9.99999968E-21 : f32
    %477 = vector.broadcast %cst_151 : f32 to vector<8x1xf32>
    %478 = arith.addf %476, %477 : vector<8x1xf32>
    %479 = vector.broadcast %478 : vector<8x1xf32> to vector<8x8xf32>
    %480 = arith.divf %474, %479 : vector<8x8xf32>
    %cst_152 = arith.constant dense<0.000000e+00> : vector<8x16xf32>
    %481 = tpu.matmul %480, %446, %cst_152 {dimension_numbers = #tpu.dot_dimension_numbers<[1], [0], [0], [1], [0, 0, 1, 1], [], []>} : vector<8x8xf32>, vector<8x16xf32>, vector<8x16xf32> -> vector<8x16xf32>
    %482 = tpu.concatenate %445, %481 in 1 : vector<8x16xf32>, vector<8x16xf32> -> vector<8x32xf32>
    %c40 = arith.constant 40 : index
    %c0_153 = arith.constant 0 : index
    %483 = vector.load %arg16[%c40, %c0_153] : memref<56x32xf32, #tpu.memory_space<vmem>>, vector<8x32xf32>
    tpu.vector_store %arg16[%c40, %c0_153], %482 {strides = array<i32>} : memref<56x32xf32, #tpu.memory_space<vmem>>, vector<8x32xf32>,
    %484 = vector.extract_strided_slice %25 {offsets = [48, 0], sizes = [8, 32], strides = [1, 1]} : vector<56x32xf32> to vector<8x32xf32>
    %485 = vector.extract_strided_slice %484 {offsets = [0, 0], sizes = [8, 16], strides = [1, 1]} : vector<8x32xf32> to vector<8x16xf32>
    %486 = vector.extract_strided_slice %32 {offsets = [0, 0], sizes = [1, 16], strides = [1, 1]} : vector<2x16xf32> to vector<1x16xf32>
    %487 = vector.broadcast %486 : vector<1x16xf32> to vector<8x16xf32>
    %488 = arith.mulf %485, %487 : vector<8x16xf32>
    %cst_154 = arith.constant dense<0.000000e+00> : vector<8xf32>
    %489 = vector.multi_reduction <add>, %488, %cst_154 [1] : vector<8x16xf32> to vector<8xf32>
    %490 = vector.shape_cast %489 : vector<8xf32> to vector<8x1xf32>
    %491 = vector.extract_strided_slice %33 {offsets = [0, 0], sizes = [1, 16], strides = [1, 1]} : vector<2x16xf32> to vector<1x16xf32>
    %492 = vector.broadcast %491 : vector<1x16xf32> to vector<8x16xf32>
    %493 = arith.mulf %485, %492 : vector<8x16xf32>
    %cst_155 = arith.constant dense<0.000000e+00> : vector<8xf32>
    %494 = vector.multi_reduction <add>, %493, %cst_155 [1] : vector<8x16xf32> to vector<8xf32>
    %495 = vector.shape_cast %494 : vector<8xf32> to vector<8x1xf32>
    %496 = tpu.transpose %490, [1, 0] : vector<8x1xf32> -> vector<1x8xf32>
    %497 = vector.broadcast %495 : vector<8x1xf32> to vector<8x8xf32>
    %498 = vector.broadcast %496 : vector<1x8xf32> to vector<8x8xf32>
    %499 = arith.addf %497, %498 : vector<8x8xf32>
    %cst_156 = arith.constant 0.000000e+00 : f32
    %500 = vector.broadcast %cst_156 : f32 to vector<8x8xf32>
    %501 = arith.cmpf oge, %499, %500 : vector<8x8xf32>
    %cst_157 = arith.constant 2.000000e-01 : f32
    %502 = vector.broadcast %cst_157 : f32 to vector<8x8xf32>
    %503 = arith.mulf %502, %499 : vector<8x8xf32>
    %504 = arith.select %501, %499, %503 : vector<8x8xi1>, vector<8x8xf32>
    %cst_158 = arith.constant -1.000000e+30 : f32
    %505 = vector.broadcast %cst_158 : f32 to vector<8x8xf32>
    %506 = arith.select %31, %504, %505 : vector<8x8xi1>, vector<8x8xf32>
    %cst_159 = arith.constant dense<0xFF800000> : vector<8xf32>
    %507 = vector.multi_reduction <maximumf>, %506, %cst_159 [1] : vector<8x8xf32> to vector<8xf32>
    %508 = vector.shape_cast %507 : vector<8xf32> to vector<8x1xf32>
    %509 = vector.broadcast %508 : vector<8x1xf32> to vector<8x8xf32>
    %510 = arith.subf %506, %509 : vector<8x8xf32>
    %511 = math.exp %510 : vector<8x8xf32>
    %cst_160 = arith.constant 0.000000e+00 : f32
    %512 = vector.broadcast %cst_160 : f32 to vector<8x8xf32>
    %513 = arith.select %31, %511, %512 : vector<8x8xi1>, vector<8x8xf32>
    %cst_161 = arith.constant dense<0.000000e+00> : vector<8xf32>
    %514 = vector.multi_reduction <add>, %513, %cst_161 [1] : vector<8x8xf32> to vector<8xf32>
    %515 = vector.shape_cast %514 : vector<8xf32> to vector<8x1xf32>
    %cst_162 = arith.constant 9.99999968E-21 : f32
    %516 = vector.broadcast %cst_162 : f32 to vector<8x1xf32>
    %517 = arith.addf %515, %516 : vector<8x1xf32>
    %518 = vector.broadcast %517 : vector<8x1xf32> to vector<8x8xf32>
    %519 = arith.divf %513, %518 : vector<8x8xf32>
    %cst_163 = arith.constant dense<0.000000e+00> : vector<8x16xf32>
    %520 = tpu.matmul %519, %485, %cst_163 {dimension_numbers = #tpu.dot_dimension_numbers<[1], [0], [0], [1], [0, 0, 1, 1], [], []>} : vector<8x8xf32>, vector<8x16xf32>, vector<8x16xf32> -> vector<8x16xf32>
    %521 = vector.extract_strided_slice %484 {offsets = [0, 16], sizes = [8, 16], strides = [1, 1]} : vector<8x32xf32> to vector<8x16xf32>
    %522 = vector.extract_strided_slice %32 {offsets = [1, 0], sizes = [1, 16], strides = [1, 1]} : vector<2x16xf32> to vector<1x16xf32>
    %523 = vector.broadcast %522 : vector<1x16xf32> to vector<8x16xf32>
    %524 = arith.mulf %521, %523 : vector<8x16xf32>
    %cst_164 = arith.constant dense<0.000000e+00> : vector<8xf32>
    %525 = vector.multi_reduction <add>, %524, %cst_164 [1] : vector<8x16xf32> to vector<8xf32>
    %526 = vector.shape_cast %525 : vector<8xf32> to vector<8x1xf32>
    %527 = vector.extract_strided_slice %33 {offsets = [1, 0], sizes = [1, 16], strides = [1, 1]} : vector<2x16xf32> to vector<1x16xf32>
    %528 = vector.broadcast %527 : vector<1x16xf32> to vector<8x16xf32>
    %529 = arith.mulf %521, %528 : vector<8x16xf32>
    %cst_165 = arith.constant dense<0.000000e+00> : vector<8xf32>
    %530 = vector.multi_reduction <add>, %529, %cst_165 [1] : vector<8x16xf32> to vector<8xf32>
    %531 = vector.shape_cast %530 : vector<8xf32> to vector<8x1xf32>
    %532 = tpu.transpose %526, [1, 0] : vector<8x1xf32> -> vector<1x8xf32>
    %533 = vector.broadcast %531 : vector<8x1xf32> to vector<8x8xf32>
    %534 = vector.broadcast %532 : vector<1x8xf32> to vector<8x8xf32>
    %535 = arith.addf %533, %534 : vector<8x8xf32>
    %cst_166 = arith.constant 0.000000e+00 : f32
    %536 = vector.broadcast %cst_166 : f32 to vector<8x8xf32>
    %537 = arith.cmpf oge, %535, %536 : vector<8x8xf32>
    %cst_167 = arith.constant 2.000000e-01 : f32
    %538 = vector.broadcast %cst_167 : f32 to vector<8x8xf32>
    %539 = arith.mulf %538, %535 : vector<8x8xf32>
    %540 = arith.select %537, %535, %539 : vector<8x8xi1>, vector<8x8xf32>
    %cst_168 = arith.constant -1.000000e+30 : f32
    %541 = vector.broadcast %cst_168 : f32 to vector<8x8xf32>
    %542 = arith.select %31, %540, %541 : vector<8x8xi1>, vector<8x8xf32>
    %cst_169 = arith.constant dense<0xFF800000> : vector<8xf32>
    %543 = vector.multi_reduction <maximumf>, %542, %cst_169 [1] : vector<8x8xf32> to vector<8xf32>
    %544 = vector.shape_cast %543 : vector<8xf32> to vector<8x1xf32>
    %545 = vector.broadcast %544 : vector<8x1xf32> to vector<8x8xf32>
    %546 = arith.subf %542, %545 : vector<8x8xf32>
    %547 = math.exp %546 : vector<8x8xf32>
    %cst_170 = arith.constant 0.000000e+00 : f32
    %548 = vector.broadcast %cst_170 : f32 to vector<8x8xf32>
    %549 = arith.select %31, %547, %548 : vector<8x8xi1>, vector<8x8xf32>
    %cst_171 = arith.constant dense<0.000000e+00> : vector<8xf32>
    %550 = vector.multi_reduction <add>, %549, %cst_171 [1] : vector<8x8xf32> to vector<8xf32>
    %551 = vector.shape_cast %550 : vector<8xf32> to vector<8x1xf32>
    %cst_172 = arith.constant 9.99999968E-21 : f32
    %552 = vector.broadcast %cst_172 : f32 to vector<8x1xf32>
    %553 = arith.addf %551, %552 : vector<8x1xf32>
    %554 = vector.broadcast %553 : vector<8x1xf32> to vector<8x8xf32>
    %555 = arith.divf %549, %554 : vector<8x8xf32>
    %cst_173 = arith.constant dense<0.000000e+00> : vector<8x16xf32>
    %556 = tpu.matmul %555, %521, %cst_173 {dimension_numbers = #tpu.dot_dimension_numbers<[1], [0], [0], [1], [0, 0, 1, 1], [], []>} : vector<8x8xf32>, vector<8x16xf32>, vector<8x16xf32> -> vector<8x16xf32>
    %557 = tpu.concatenate %520, %556 in 1 : vector<8x16xf32>, vector<8x16xf32> -> vector<8x32xf32>
    %c48 = arith.constant 48 : index
    %c0_174 = arith.constant 0 : index
    %558 = vector.load %arg16[%c48, %c0_174] : memref<56x32xf32, #tpu.memory_space<vmem>>, vector<8x32xf32>
    tpu.vector_store %arg16[%c48, %c0_174], %557 {strides = array<i32>} : memref<56x32xf32, #tpu.memory_space<vmem>>, vector<8x32xf32>,
    %c0_175 = arith.constant 0 : index
    %c0_176 = arith.constant 0 : index
    %559 = vector.load %arg16[%c0_175, %c0_176] : memref<56x32xf32, #tpu.memory_space<vmem>>, vector<56x32xf32>
    %c0_177 = arith.constant 0 : index
    %c0_178 = arith.constant 0 : index
    %560 = vector.load %arg10[%c0_177, %c0_178] : memref<32x16xf32, #tpu.memory_space<vmem>>, vector<32x16xf32>
    %cst_179 = arith.constant dense<0.000000e+00> : vector<56x16xf32>
    %561 = tpu.matmul %559, %560, %cst_179 {dimension_numbers = #tpu.dot_dimension_numbers<[1], [0], [0], [1], [0, 0, 1, 1], [], []>} : vector<56x32xf32>, vector<32x16xf32>, vector<56x16xf32> -> vector<56x16xf32>
    %c0_180 = arith.constant 0 : index
    %c0_181 = arith.constant 0 : index
    %562 = vector.load %arg11[%c0_180, %c0_181] : memref<1x16xf32, #tpu.memory_space<vmem>>, vector<1x16xf32>
    %563 = vector.broadcast %562 : vector<1x16xf32> to vector<56x16xf32>
    %564 = arith.addf %561, %563 : vector<56x16xf32>
    %565 = arith.addf %564, %1 : vector<56x16xf32>
    %c0_182 = arith.constant 0 : index
    %c0_183 = arith.constant 0 : index
    %566 = vector.load %arg12[%c0_182, %c0_183] : memref<1x16xf32, #tpu.memory_space<vmem>>, vector<1x16xf32>
    %567 = vector.broadcast %566 : vector<1x16xf32> to vector<56x16xf32>
    %568 = arith.mulf %565, %567 : vector<56x16xf32>
    %c0_184 = arith.constant 0 : index
    %c0_185 = arith.constant 0 : index
    %569 = vector.load %arg13[%c0_184, %c0_185] : memref<1x16xf32, #tpu.memory_space<vmem>>, vector<1x16xf32>
    %570 = vector.broadcast %569 : vector<1x16xf32> to vector<56x16xf32>
    %571 = arith.addf %568, %570 : vector<56x16xf32>
    %c0_186 = arith.constant 0 : index
    %c0_187 = arith.constant 0 : index
    %572 = vector.load %arg14[%c0_186, %c0_187] : memref<56x16xf32, #tpu.memory_space<vmem>>, vector<56x16xf32>
    tpu.vector_store %arg14[%c0_186, %c0_187], %571 {strides = array<i32>} : memref<56x16xf32, #tpu.memory_space<vmem>>, vector<56x16xf32>,
    return
  }
}

module attributes {stable_mosaic.version = 11 : i64} {
  func.func @_st_layer_kernel(%arg0: memref<40x16xf32, #tpu.memory_space<vmem>>, %arg1: memref<40x32xf32, #tpu.memory_space<vmem>>, %arg2: memref<8x8xf32, #tpu.memory_space<vmem>>, %arg3: memref<16x32xf32, #tpu.memory_space<vmem>>, %arg4: memref<16x32xf32, #tpu.memory_space<vmem>>, %arg5: memref<1x32xf32, #tpu.memory_space<vmem>>, %arg6: memref<16x64xf32, #tpu.memory_space<vmem>>, %arg7: memref<1x64xf32, #tpu.memory_space<vmem>>, %arg8: memref<2x16xf32, #tpu.memory_space<vmem>>, %arg9: memref<2x16xf32, #tpu.memory_space<vmem>>, %arg10: memref<32x16xf32, #tpu.memory_space<vmem>>, %arg11: memref<1x16xf32, #tpu.memory_space<vmem>>, %arg12: memref<1x16xf32, #tpu.memory_space<vmem>>, %arg13: memref<1x16xf32, #tpu.memory_space<vmem>>, %arg14: memref<32x16xf32, #tpu.memory_space<vmem>>, %arg15: memref<32x32xf32, #tpu.memory_space<vmem>>, %arg16: memref<32x32xf32, #tpu.memory_space<vmem>>) attributes {dimension_semantics = [], scalar_prefetch = 0 : i64, scratch_operands = 1 : i64, tpu.core_type = #tpu.core_type<tc>} {
    %c0 = arith.constant 0 : index
    %c0_0 = arith.constant 0 : index
    %0 = vector.load %arg0[%c0, %c0_0] : memref<40x16xf32, #tpu.memory_space<vmem>>, vector<32x16xf32>
    %c8 = arith.constant 8 : index
    %c0_1 = arith.constant 0 : index
    %1 = vector.load %arg0[%c8, %c0_1] : memref<40x16xf32, #tpu.memory_space<vmem>>, vector<32x16xf32>
    %c0_2 = arith.constant 0 : index
    %c0_3 = arith.constant 0 : index
    %2 = vector.load %arg3[%c0_2, %c0_3] : memref<16x32xf32, #tpu.memory_space<vmem>>, vector<16x32xf32>
    %cst = arith.constant dense<0.000000e+00> : vector<32x32xf32>
    %3 = tpu.matmul %0, %2, %cst {dimension_numbers = #tpu.dot_dimension_numbers<[1], [0], [0], [1], [0, 0, 1, 1], [], []>} : vector<32x16xf32>, vector<16x32xf32>, vector<32x32xf32> -> vector<32x32xf32>
    %c0_4 = arith.constant 0 : index
    %c0_5 = arith.constant 0 : index
    %4 = vector.load %arg4[%c0_4, %c0_5] : memref<16x32xf32, #tpu.memory_space<vmem>>, vector<16x32xf32>
    %cst_6 = arith.constant dense<0.000000e+00> : vector<32x32xf32>
    %5 = tpu.matmul %1, %4, %cst_6 {dimension_numbers = #tpu.dot_dimension_numbers<[1], [0], [0], [1], [0, 0, 1, 1], [], []>} : vector<32x16xf32>, vector<16x32xf32>, vector<32x32xf32> -> vector<32x32xf32>
    %6 = arith.addf %3, %5 : vector<32x32xf32>
    %c0_7 = arith.constant 0 : index
    %c0_8 = arith.constant 0 : index
    %7 = vector.load %arg5[%c0_7, %c0_8] : memref<1x32xf32, #tpu.memory_space<vmem>>, vector<1x32xf32>
    %8 = vector.broadcast %7 : vector<1x32xf32> to vector<32x32xf32>
    %9 = arith.addf %6, %8 : vector<32x32xf32>
    %10 = vector.extract_strided_slice %9 {offsets = [0, 0], sizes = [32, 16], strides = [1, 1]} : vector<32x32xf32> to vector<32x16xf32>
    %11 = math.tanh %10 : vector<32x16xf32>
    %12 = vector.extract_strided_slice %9 {offsets = [0, 16], sizes = [32, 16], strides = [1, 1]} : vector<32x32xf32> to vector<32x16xf32>
    %13 = arith.negf %12 : vector<32x16xf32>
    %14 = math.exp %13 : vector<32x16xf32>
    %cst_9 = arith.constant 1.000000e+00 : f32
    %15 = vector.broadcast %cst_9 : f32 to vector<32x16xf32>
    %16 = arith.addf %15, %14 : vector<32x16xf32>
    %17 = arith.divf %15, %16 : vector<32x16xf32>
    %18 = arith.mulf %11, %17 : vector<32x16xf32>
    %c0_10 = arith.constant 0 : index
    %c0_11 = arith.constant 0 : index
    %19 = vector.load %arg6[%c0_10, %c0_11] : memref<16x64xf32, #tpu.memory_space<vmem>>, vector<16x64xf32>
    %cst_12 = arith.constant dense<0.000000e+00> : vector<32x64xf32>
    %20 = tpu.matmul %18, %19, %cst_12 {dimension_numbers = #tpu.dot_dimension_numbers<[1], [0], [0], [1], [0, 0, 1, 1], [], []>} : vector<32x16xf32>, vector<16x64xf32>, vector<32x64xf32> -> vector<32x64xf32>
    %c0_13 = arith.constant 0 : index
    %c0_14 = arith.constant 0 : index
    %21 = vector.load %arg7[%c0_13, %c0_14] : memref<1x64xf32, #tpu.memory_space<vmem>>, vector<1x64xf32>
    %22 = vector.broadcast %21 : vector<1x64xf32> to vector<32x64xf32>
    %23 = arith.addf %20, %22 : vector<32x64xf32>
    %24 = vector.extract_strided_slice %23 {offsets = [0, 0], sizes = [32, 32], strides = [1, 1]} : vector<32x64xf32> to vector<32x32xf32>
    %25 = vector.extract_strided_slice %23 {offsets = [0, 32], sizes = [32, 32], strides = [1, 1]} : vector<32x64xf32> to vector<32x32xf32>
    %c8_15 = arith.constant 8 : index
    %c0_16 = arith.constant 0 : index
    %26 = vector.load %arg1[%c8_15, %c0_16] : memref<40x32xf32, #tpu.memory_space<vmem>>, vector<32x32xf32>
    %27 = arith.addf %26, %24 : vector<32x32xf32>
    %c0_17 = arith.constant 0 : index
    %c0_18 = arith.constant 0 : index
    %28 = vector.load %arg15[%c0_17, %c0_18] : memref<32x32xf32, #tpu.memory_space<vmem>>, vector<32x32xf32>
    tpu.vector_store %arg15[%c0_17, %c0_18], %27 {strides = array<i32>} : memref<32x32xf32, #tpu.memory_space<vmem>>, vector<32x32xf32>,
    %c0_19 = arith.constant 0 : index
    %c0_20 = arith.constant 0 : index
    %29 = vector.load %arg2[%c0_19, %c0_20] : memref<8x8xf32, #tpu.memory_space<vmem>>, vector<8x8xf32>
    %cst_21 = arith.constant 0.000000e+00 : f32
    %30 = vector.broadcast %cst_21 : f32 to vector<8x8xf32>
    %31 = arith.cmpf ogt, %29, %30 : vector<8x8xf32>
    %c0_22 = arith.constant 0 : index
    %c0_23 = arith.constant 0 : index
    %32 = vector.load %arg8[%c0_22, %c0_23] : memref<2x16xf32, #tpu.memory_space<vmem>>, vector<2x16xf32>
    %c0_24 = arith.constant 0 : index
    %c0_25 = arith.constant 0 : index
    %33 = vector.load %arg9[%c0_24, %c0_25] : memref<2x16xf32, #tpu.memory_space<vmem>>, vector<2x16xf32>
    %34 = vector.extract_strided_slice %25 {offsets = [0, 0], sizes = [8, 32], strides = [1, 1]} : vector<32x32xf32> to vector<8x32xf32>
    %35 = vector.extract_strided_slice %34 {offsets = [0, 0], sizes = [8, 16], strides = [1, 1]} : vector<8x32xf32> to vector<8x16xf32>
    %36 = vector.extract_strided_slice %32 {offsets = [0, 0], sizes = [1, 16], strides = [1, 1]} : vector<2x16xf32> to vector<1x16xf32>
    %37 = vector.broadcast %36 : vector<1x16xf32> to vector<8x16xf32>
    %38 = arith.mulf %35, %37 : vector<8x16xf32>
    %cst_26 = arith.constant dense<0.000000e+00> : vector<8xf32>
    %39 = vector.multi_reduction <add>, %38, %cst_26 [1] : vector<8x16xf32> to vector<8xf32>
    %40 = vector.shape_cast %39 : vector<8xf32> to vector<8x1xf32>
    %41 = vector.extract_strided_slice %33 {offsets = [0, 0], sizes = [1, 16], strides = [1, 1]} : vector<2x16xf32> to vector<1x16xf32>
    %42 = vector.broadcast %41 : vector<1x16xf32> to vector<8x16xf32>
    %43 = arith.mulf %35, %42 : vector<8x16xf32>
    %cst_27 = arith.constant dense<0.000000e+00> : vector<8xf32>
    %44 = vector.multi_reduction <add>, %43, %cst_27 [1] : vector<8x16xf32> to vector<8xf32>
    %45 = vector.shape_cast %44 : vector<8xf32> to vector<8x1xf32>
    %46 = tpu.transpose %40, [1, 0] : vector<8x1xf32> -> vector<1x8xf32>
    %47 = vector.broadcast %45 : vector<8x1xf32> to vector<8x8xf32>
    %48 = vector.broadcast %46 : vector<1x8xf32> to vector<8x8xf32>
    %49 = arith.addf %47, %48 : vector<8x8xf32>
    %cst_28 = arith.constant 0.000000e+00 : f32
    %50 = vector.broadcast %cst_28 : f32 to vector<8x8xf32>
    %51 = arith.cmpf oge, %49, %50 : vector<8x8xf32>
    %cst_29 = arith.constant 2.000000e-01 : f32
    %52 = vector.broadcast %cst_29 : f32 to vector<8x8xf32>
    %53 = arith.mulf %52, %49 : vector<8x8xf32>
    %54 = arith.select %51, %49, %53 : vector<8x8xi1>, vector<8x8xf32>
    %cst_30 = arith.constant -1.000000e+30 : f32
    %55 = vector.broadcast %cst_30 : f32 to vector<8x8xf32>
    %56 = arith.select %31, %54, %55 : vector<8x8xi1>, vector<8x8xf32>
    %cst_31 = arith.constant dense<0xFF800000> : vector<8xf32>
    %57 = vector.multi_reduction <maximumf>, %56, %cst_31 [1] : vector<8x8xf32> to vector<8xf32>
    %58 = vector.shape_cast %57 : vector<8xf32> to vector<8x1xf32>
    %59 = vector.broadcast %58 : vector<8x1xf32> to vector<8x8xf32>
    %60 = arith.subf %56, %59 : vector<8x8xf32>
    %61 = math.exp %60 : vector<8x8xf32>
    %cst_32 = arith.constant 0.000000e+00 : f32
    %62 = vector.broadcast %cst_32 : f32 to vector<8x8xf32>
    %63 = arith.select %31, %61, %62 : vector<8x8xi1>, vector<8x8xf32>
    %cst_33 = arith.constant dense<0.000000e+00> : vector<8xf32>
    %64 = vector.multi_reduction <add>, %63, %cst_33 [1] : vector<8x8xf32> to vector<8xf32>
    %65 = vector.shape_cast %64 : vector<8xf32> to vector<8x1xf32>
    %cst_34 = arith.constant 9.99999968E-21 : f32
    %66 = vector.broadcast %cst_34 : f32 to vector<8x1xf32>
    %67 = arith.addf %65, %66 : vector<8x1xf32>
    %68 = vector.broadcast %67 : vector<8x1xf32> to vector<8x8xf32>
    %69 = arith.divf %63, %68 : vector<8x8xf32>
    %cst_35 = arith.constant dense<0.000000e+00> : vector<8x16xf32>
    %70 = tpu.matmul %69, %35, %cst_35 {dimension_numbers = #tpu.dot_dimension_numbers<[1], [0], [0], [1], [0, 0, 1, 1], [], []>} : vector<8x8xf32>, vector<8x16xf32>, vector<8x16xf32> -> vector<8x16xf32>
    %71 = vector.extract_strided_slice %34 {offsets = [0, 16], sizes = [8, 16], strides = [1, 1]} : vector<8x32xf32> to vector<8x16xf32>
    %72 = vector.extract_strided_slice %32 {offsets = [1, 0], sizes = [1, 16], strides = [1, 1]} : vector<2x16xf32> to vector<1x16xf32>
    %73 = vector.broadcast %72 : vector<1x16xf32> to vector<8x16xf32>
    %74 = arith.mulf %71, %73 : vector<8x16xf32>
    %cst_36 = arith.constant dense<0.000000e+00> : vector<8xf32>
    %75 = vector.multi_reduction <add>, %74, %cst_36 [1] : vector<8x16xf32> to vector<8xf32>
    %76 = vector.shape_cast %75 : vector<8xf32> to vector<8x1xf32>
    %77 = vector.extract_strided_slice %33 {offsets = [1, 0], sizes = [1, 16], strides = [1, 1]} : vector<2x16xf32> to vector<1x16xf32>
    %78 = vector.broadcast %77 : vector<1x16xf32> to vector<8x16xf32>
    %79 = arith.mulf %71, %78 : vector<8x16xf32>
    %cst_37 = arith.constant dense<0.000000e+00> : vector<8xf32>
    %80 = vector.multi_reduction <add>, %79, %cst_37 [1] : vector<8x16xf32> to vector<8xf32>
    %81 = vector.shape_cast %80 : vector<8xf32> to vector<8x1xf32>
    %82 = tpu.transpose %76, [1, 0] : vector<8x1xf32> -> vector<1x8xf32>
    %83 = vector.broadcast %81 : vector<8x1xf32> to vector<8x8xf32>
    %84 = vector.broadcast %82 : vector<1x8xf32> to vector<8x8xf32>
    %85 = arith.addf %83, %84 : vector<8x8xf32>
    %cst_38 = arith.constant 0.000000e+00 : f32
    %86 = vector.broadcast %cst_38 : f32 to vector<8x8xf32>
    %87 = arith.cmpf oge, %85, %86 : vector<8x8xf32>
    %cst_39 = arith.constant 2.000000e-01 : f32
    %88 = vector.broadcast %cst_39 : f32 to vector<8x8xf32>
    %89 = arith.mulf %88, %85 : vector<8x8xf32>
    %90 = arith.select %87, %85, %89 : vector<8x8xi1>, vector<8x8xf32>
    %cst_40 = arith.constant -1.000000e+30 : f32
    %91 = vector.broadcast %cst_40 : f32 to vector<8x8xf32>
    %92 = arith.select %31, %90, %91 : vector<8x8xi1>, vector<8x8xf32>
    %cst_41 = arith.constant dense<0xFF800000> : vector<8xf32>
    %93 = vector.multi_reduction <maximumf>, %92, %cst_41 [1] : vector<8x8xf32> to vector<8xf32>
    %94 = vector.shape_cast %93 : vector<8xf32> to vector<8x1xf32>
    %95 = vector.broadcast %94 : vector<8x1xf32> to vector<8x8xf32>
    %96 = arith.subf %92, %95 : vector<8x8xf32>
    %97 = math.exp %96 : vector<8x8xf32>
    %cst_42 = arith.constant 0.000000e+00 : f32
    %98 = vector.broadcast %cst_42 : f32 to vector<8x8xf32>
    %99 = arith.select %31, %97, %98 : vector<8x8xi1>, vector<8x8xf32>
    %cst_43 = arith.constant dense<0.000000e+00> : vector<8xf32>
    %100 = vector.multi_reduction <add>, %99, %cst_43 [1] : vector<8x8xf32> to vector<8xf32>
    %101 = vector.shape_cast %100 : vector<8xf32> to vector<8x1xf32>
    %cst_44 = arith.constant 9.99999968E-21 : f32
    %102 = vector.broadcast %cst_44 : f32 to vector<8x1xf32>
    %103 = arith.addf %101, %102 : vector<8x1xf32>
    %104 = vector.broadcast %103 : vector<8x1xf32> to vector<8x8xf32>
    %105 = arith.divf %99, %104 : vector<8x8xf32>
    %cst_45 = arith.constant dense<0.000000e+00> : vector<8x16xf32>
    %106 = tpu.matmul %105, %71, %cst_45 {dimension_numbers = #tpu.dot_dimension_numbers<[1], [0], [0], [1], [0, 0, 1, 1], [], []>} : vector<8x8xf32>, vector<8x16xf32>, vector<8x16xf32> -> vector<8x16xf32>
    %107 = tpu.concatenate %70, %106 in 1 : vector<8x16xf32>, vector<8x16xf32> -> vector<8x32xf32>
    %c0_46 = arith.constant 0 : index
    %c0_47 = arith.constant 0 : index
    %108 = vector.load %arg16[%c0_46, %c0_47] : memref<32x32xf32, #tpu.memory_space<vmem>>, vector<8x32xf32>
    tpu.vector_store %arg16[%c0_46, %c0_47], %107 {strides = array<i32>} : memref<32x32xf32, #tpu.memory_space<vmem>>, vector<8x32xf32>,
    %109 = vector.extract_strided_slice %25 {offsets = [8, 0], sizes = [8, 32], strides = [1, 1]} : vector<32x32xf32> to vector<8x32xf32>
    %110 = vector.extract_strided_slice %109 {offsets = [0, 0], sizes = [8, 16], strides = [1, 1]} : vector<8x32xf32> to vector<8x16xf32>
    %111 = vector.extract_strided_slice %32 {offsets = [0, 0], sizes = [1, 16], strides = [1, 1]} : vector<2x16xf32> to vector<1x16xf32>
    %112 = vector.broadcast %111 : vector<1x16xf32> to vector<8x16xf32>
    %113 = arith.mulf %110, %112 : vector<8x16xf32>
    %cst_48 = arith.constant dense<0.000000e+00> : vector<8xf32>
    %114 = vector.multi_reduction <add>, %113, %cst_48 [1] : vector<8x16xf32> to vector<8xf32>
    %115 = vector.shape_cast %114 : vector<8xf32> to vector<8x1xf32>
    %116 = vector.extract_strided_slice %33 {offsets = [0, 0], sizes = [1, 16], strides = [1, 1]} : vector<2x16xf32> to vector<1x16xf32>
    %117 = vector.broadcast %116 : vector<1x16xf32> to vector<8x16xf32>
    %118 = arith.mulf %110, %117 : vector<8x16xf32>
    %cst_49 = arith.constant dense<0.000000e+00> : vector<8xf32>
    %119 = vector.multi_reduction <add>, %118, %cst_49 [1] : vector<8x16xf32> to vector<8xf32>
    %120 = vector.shape_cast %119 : vector<8xf32> to vector<8x1xf32>
    %121 = tpu.transpose %115, [1, 0] : vector<8x1xf32> -> vector<1x8xf32>
    %122 = vector.broadcast %120 : vector<8x1xf32> to vector<8x8xf32>
    %123 = vector.broadcast %121 : vector<1x8xf32> to vector<8x8xf32>
    %124 = arith.addf %122, %123 : vector<8x8xf32>
    %cst_50 = arith.constant 0.000000e+00 : f32
    %125 = vector.broadcast %cst_50 : f32 to vector<8x8xf32>
    %126 = arith.cmpf oge, %124, %125 : vector<8x8xf32>
    %cst_51 = arith.constant 2.000000e-01 : f32
    %127 = vector.broadcast %cst_51 : f32 to vector<8x8xf32>
    %128 = arith.mulf %127, %124 : vector<8x8xf32>
    %129 = arith.select %126, %124, %128 : vector<8x8xi1>, vector<8x8xf32>
    %cst_52 = arith.constant -1.000000e+30 : f32
    %130 = vector.broadcast %cst_52 : f32 to vector<8x8xf32>
    %131 = arith.select %31, %129, %130 : vector<8x8xi1>, vector<8x8xf32>
    %cst_53 = arith.constant dense<0xFF800000> : vector<8xf32>
    %132 = vector.multi_reduction <maximumf>, %131, %cst_53 [1] : vector<8x8xf32> to vector<8xf32>
    %133 = vector.shape_cast %132 : vector<8xf32> to vector<8x1xf32>
    %134 = vector.broadcast %133 : vector<8x1xf32> to vector<8x8xf32>
    %135 = arith.subf %131, %134 : vector<8x8xf32>
    %136 = math.exp %135 : vector<8x8xf32>
    %cst_54 = arith.constant 0.000000e+00 : f32
    %137 = vector.broadcast %cst_54 : f32 to vector<8x8xf32>
    %138 = arith.select %31, %136, %137 : vector<8x8xi1>, vector<8x8xf32>
    %cst_55 = arith.constant dense<0.000000e+00> : vector<8xf32>
    %139 = vector.multi_reduction <add>, %138, %cst_55 [1] : vector<8x8xf32> to vector<8xf32>
    %140 = vector.shape_cast %139 : vector<8xf32> to vector<8x1xf32>
    %cst_56 = arith.constant 9.99999968E-21 : f32
    %141 = vector.broadcast %cst_56 : f32 to vector<8x1xf32>
    %142 = arith.addf %140, %141 : vector<8x1xf32>
    %143 = vector.broadcast %142 : vector<8x1xf32> to vector<8x8xf32>
    %144 = arith.divf %138, %143 : vector<8x8xf32>
    %cst_57 = arith.constant dense<0.000000e+00> : vector<8x16xf32>
    %145 = tpu.matmul %144, %110, %cst_57 {dimension_numbers = #tpu.dot_dimension_numbers<[1], [0], [0], [1], [0, 0, 1, 1], [], []>} : vector<8x8xf32>, vector<8x16xf32>, vector<8x16xf32> -> vector<8x16xf32>
    %146 = vector.extract_strided_slice %109 {offsets = [0, 16], sizes = [8, 16], strides = [1, 1]} : vector<8x32xf32> to vector<8x16xf32>
    %147 = vector.extract_strided_slice %32 {offsets = [1, 0], sizes = [1, 16], strides = [1, 1]} : vector<2x16xf32> to vector<1x16xf32>
    %148 = vector.broadcast %147 : vector<1x16xf32> to vector<8x16xf32>
    %149 = arith.mulf %146, %148 : vector<8x16xf32>
    %cst_58 = arith.constant dense<0.000000e+00> : vector<8xf32>
    %150 = vector.multi_reduction <add>, %149, %cst_58 [1] : vector<8x16xf32> to vector<8xf32>
    %151 = vector.shape_cast %150 : vector<8xf32> to vector<8x1xf32>
    %152 = vector.extract_strided_slice %33 {offsets = [1, 0], sizes = [1, 16], strides = [1, 1]} : vector<2x16xf32> to vector<1x16xf32>
    %153 = vector.broadcast %152 : vector<1x16xf32> to vector<8x16xf32>
    %154 = arith.mulf %146, %153 : vector<8x16xf32>
    %cst_59 = arith.constant dense<0.000000e+00> : vector<8xf32>
    %155 = vector.multi_reduction <add>, %154, %cst_59 [1] : vector<8x16xf32> to vector<8xf32>
    %156 = vector.shape_cast %155 : vector<8xf32> to vector<8x1xf32>
    %157 = tpu.transpose %151, [1, 0] : vector<8x1xf32> -> vector<1x8xf32>
    %158 = vector.broadcast %156 : vector<8x1xf32> to vector<8x8xf32>
    %159 = vector.broadcast %157 : vector<1x8xf32> to vector<8x8xf32>
    %160 = arith.addf %158, %159 : vector<8x8xf32>
    %cst_60 = arith.constant 0.000000e+00 : f32
    %161 = vector.broadcast %cst_60 : f32 to vector<8x8xf32>
    %162 = arith.cmpf oge, %160, %161 : vector<8x8xf32>
    %cst_61 = arith.constant 2.000000e-01 : f32
    %163 = vector.broadcast %cst_61 : f32 to vector<8x8xf32>
    %164 = arith.mulf %163, %160 : vector<8x8xf32>
    %165 = arith.select %162, %160, %164 : vector<8x8xi1>, vector<8x8xf32>
    %cst_62 = arith.constant -1.000000e+30 : f32
    %166 = vector.broadcast %cst_62 : f32 to vector<8x8xf32>
    %167 = arith.select %31, %165, %166 : vector<8x8xi1>, vector<8x8xf32>
    %cst_63 = arith.constant dense<0xFF800000> : vector<8xf32>
    %168 = vector.multi_reduction <maximumf>, %167, %cst_63 [1] : vector<8x8xf32> to vector<8xf32>
    %169 = vector.shape_cast %168 : vector<8xf32> to vector<8x1xf32>
    %170 = vector.broadcast %169 : vector<8x1xf32> to vector<8x8xf32>
    %171 = arith.subf %167, %170 : vector<8x8xf32>
    %172 = math.exp %171 : vector<8x8xf32>
    %cst_64 = arith.constant 0.000000e+00 : f32
    %173 = vector.broadcast %cst_64 : f32 to vector<8x8xf32>
    %174 = arith.select %31, %172, %173 : vector<8x8xi1>, vector<8x8xf32>
    %cst_65 = arith.constant dense<0.000000e+00> : vector<8xf32>
    %175 = vector.multi_reduction <add>, %174, %cst_65 [1] : vector<8x8xf32> to vector<8xf32>
    %176 = vector.shape_cast %175 : vector<8xf32> to vector<8x1xf32>
    %cst_66 = arith.constant 9.99999968E-21 : f32
    %177 = vector.broadcast %cst_66 : f32 to vector<8x1xf32>
    %178 = arith.addf %176, %177 : vector<8x1xf32>
    %179 = vector.broadcast %178 : vector<8x1xf32> to vector<8x8xf32>
    %180 = arith.divf %174, %179 : vector<8x8xf32>
    %cst_67 = arith.constant dense<0.000000e+00> : vector<8x16xf32>
    %181 = tpu.matmul %180, %146, %cst_67 {dimension_numbers = #tpu.dot_dimension_numbers<[1], [0], [0], [1], [0, 0, 1, 1], [], []>} : vector<8x8xf32>, vector<8x16xf32>, vector<8x16xf32> -> vector<8x16xf32>
    %182 = tpu.concatenate %145, %181 in 1 : vector<8x16xf32>, vector<8x16xf32> -> vector<8x32xf32>
    %c8_68 = arith.constant 8 : index
    %c0_69 = arith.constant 0 : index
    %183 = vector.load %arg16[%c8_68, %c0_69] : memref<32x32xf32, #tpu.memory_space<vmem>>, vector<8x32xf32>
    tpu.vector_store %arg16[%c8_68, %c0_69], %182 {strides = array<i32>} : memref<32x32xf32, #tpu.memory_space<vmem>>, vector<8x32xf32>,
    %184 = vector.extract_strided_slice %25 {offsets = [16, 0], sizes = [8, 32], strides = [1, 1]} : vector<32x32xf32> to vector<8x32xf32>
    %185 = vector.extract_strided_slice %184 {offsets = [0, 0], sizes = [8, 16], strides = [1, 1]} : vector<8x32xf32> to vector<8x16xf32>
    %186 = vector.extract_strided_slice %32 {offsets = [0, 0], sizes = [1, 16], strides = [1, 1]} : vector<2x16xf32> to vector<1x16xf32>
    %187 = vector.broadcast %186 : vector<1x16xf32> to vector<8x16xf32>
    %188 = arith.mulf %185, %187 : vector<8x16xf32>
    %cst_70 = arith.constant dense<0.000000e+00> : vector<8xf32>
    %189 = vector.multi_reduction <add>, %188, %cst_70 [1] : vector<8x16xf32> to vector<8xf32>
    %190 = vector.shape_cast %189 : vector<8xf32> to vector<8x1xf32>
    %191 = vector.extract_strided_slice %33 {offsets = [0, 0], sizes = [1, 16], strides = [1, 1]} : vector<2x16xf32> to vector<1x16xf32>
    %192 = vector.broadcast %191 : vector<1x16xf32> to vector<8x16xf32>
    %193 = arith.mulf %185, %192 : vector<8x16xf32>
    %cst_71 = arith.constant dense<0.000000e+00> : vector<8xf32>
    %194 = vector.multi_reduction <add>, %193, %cst_71 [1] : vector<8x16xf32> to vector<8xf32>
    %195 = vector.shape_cast %194 : vector<8xf32> to vector<8x1xf32>
    %196 = tpu.transpose %190, [1, 0] : vector<8x1xf32> -> vector<1x8xf32>
    %197 = vector.broadcast %195 : vector<8x1xf32> to vector<8x8xf32>
    %198 = vector.broadcast %196 : vector<1x8xf32> to vector<8x8xf32>
    %199 = arith.addf %197, %198 : vector<8x8xf32>
    %cst_72 = arith.constant 0.000000e+00 : f32
    %200 = vector.broadcast %cst_72 : f32 to vector<8x8xf32>
    %201 = arith.cmpf oge, %199, %200 : vector<8x8xf32>
    %cst_73 = arith.constant 2.000000e-01 : f32
    %202 = vector.broadcast %cst_73 : f32 to vector<8x8xf32>
    %203 = arith.mulf %202, %199 : vector<8x8xf32>
    %204 = arith.select %201, %199, %203 : vector<8x8xi1>, vector<8x8xf32>
    %cst_74 = arith.constant -1.000000e+30 : f32
    %205 = vector.broadcast %cst_74 : f32 to vector<8x8xf32>
    %206 = arith.select %31, %204, %205 : vector<8x8xi1>, vector<8x8xf32>
    %cst_75 = arith.constant dense<0xFF800000> : vector<8xf32>
    %207 = vector.multi_reduction <maximumf>, %206, %cst_75 [1] : vector<8x8xf32> to vector<8xf32>
    %208 = vector.shape_cast %207 : vector<8xf32> to vector<8x1xf32>
    %209 = vector.broadcast %208 : vector<8x1xf32> to vector<8x8xf32>
    %210 = arith.subf %206, %209 : vector<8x8xf32>
    %211 = math.exp %210 : vector<8x8xf32>
    %cst_76 = arith.constant 0.000000e+00 : f32
    %212 = vector.broadcast %cst_76 : f32 to vector<8x8xf32>
    %213 = arith.select %31, %211, %212 : vector<8x8xi1>, vector<8x8xf32>
    %cst_77 = arith.constant dense<0.000000e+00> : vector<8xf32>
    %214 = vector.multi_reduction <add>, %213, %cst_77 [1] : vector<8x8xf32> to vector<8xf32>
    %215 = vector.shape_cast %214 : vector<8xf32> to vector<8x1xf32>
    %cst_78 = arith.constant 9.99999968E-21 : f32
    %216 = vector.broadcast %cst_78 : f32 to vector<8x1xf32>
    %217 = arith.addf %215, %216 : vector<8x1xf32>
    %218 = vector.broadcast %217 : vector<8x1xf32> to vector<8x8xf32>
    %219 = arith.divf %213, %218 : vector<8x8xf32>
    %cst_79 = arith.constant dense<0.000000e+00> : vector<8x16xf32>
    %220 = tpu.matmul %219, %185, %cst_79 {dimension_numbers = #tpu.dot_dimension_numbers<[1], [0], [0], [1], [0, 0, 1, 1], [], []>} : vector<8x8xf32>, vector<8x16xf32>, vector<8x16xf32> -> vector<8x16xf32>
    %221 = vector.extract_strided_slice %184 {offsets = [0, 16], sizes = [8, 16], strides = [1, 1]} : vector<8x32xf32> to vector<8x16xf32>
    %222 = vector.extract_strided_slice %32 {offsets = [1, 0], sizes = [1, 16], strides = [1, 1]} : vector<2x16xf32> to vector<1x16xf32>
    %223 = vector.broadcast %222 : vector<1x16xf32> to vector<8x16xf32>
    %224 = arith.mulf %221, %223 : vector<8x16xf32>
    %cst_80 = arith.constant dense<0.000000e+00> : vector<8xf32>
    %225 = vector.multi_reduction <add>, %224, %cst_80 [1] : vector<8x16xf32> to vector<8xf32>
    %226 = vector.shape_cast %225 : vector<8xf32> to vector<8x1xf32>
    %227 = vector.extract_strided_slice %33 {offsets = [1, 0], sizes = [1, 16], strides = [1, 1]} : vector<2x16xf32> to vector<1x16xf32>
    %228 = vector.broadcast %227 : vector<1x16xf32> to vector<8x16xf32>
    %229 = arith.mulf %221, %228 : vector<8x16xf32>
    %cst_81 = arith.constant dense<0.000000e+00> : vector<8xf32>
    %230 = vector.multi_reduction <add>, %229, %cst_81 [1] : vector<8x16xf32> to vector<8xf32>
    %231 = vector.shape_cast %230 : vector<8xf32> to vector<8x1xf32>
    %232 = tpu.transpose %226, [1, 0] : vector<8x1xf32> -> vector<1x8xf32>
    %233 = vector.broadcast %231 : vector<8x1xf32> to vector<8x8xf32>
    %234 = vector.broadcast %232 : vector<1x8xf32> to vector<8x8xf32>
    %235 = arith.addf %233, %234 : vector<8x8xf32>
    %cst_82 = arith.constant 0.000000e+00 : f32
    %236 = vector.broadcast %cst_82 : f32 to vector<8x8xf32>
    %237 = arith.cmpf oge, %235, %236 : vector<8x8xf32>
    %cst_83 = arith.constant 2.000000e-01 : f32
    %238 = vector.broadcast %cst_83 : f32 to vector<8x8xf32>
    %239 = arith.mulf %238, %235 : vector<8x8xf32>
    %240 = arith.select %237, %235, %239 : vector<8x8xi1>, vector<8x8xf32>
    %cst_84 = arith.constant -1.000000e+30 : f32
    %241 = vector.broadcast %cst_84 : f32 to vector<8x8xf32>
    %242 = arith.select %31, %240, %241 : vector<8x8xi1>, vector<8x8xf32>
    %cst_85 = arith.constant dense<0xFF800000> : vector<8xf32>
    %243 = vector.multi_reduction <maximumf>, %242, %cst_85 [1] : vector<8x8xf32> to vector<8xf32>
    %244 = vector.shape_cast %243 : vector<8xf32> to vector<8x1xf32>
    %245 = vector.broadcast %244 : vector<8x1xf32> to vector<8x8xf32>
    %246 = arith.subf %242, %245 : vector<8x8xf32>
    %247 = math.exp %246 : vector<8x8xf32>
    %cst_86 = arith.constant 0.000000e+00 : f32
    %248 = vector.broadcast %cst_86 : f32 to vector<8x8xf32>
    %249 = arith.select %31, %247, %248 : vector<8x8xi1>, vector<8x8xf32>
    %cst_87 = arith.constant dense<0.000000e+00> : vector<8xf32>
    %250 = vector.multi_reduction <add>, %249, %cst_87 [1] : vector<8x8xf32> to vector<8xf32>
    %251 = vector.shape_cast %250 : vector<8xf32> to vector<8x1xf32>
    %cst_88 = arith.constant 9.99999968E-21 : f32
    %252 = vector.broadcast %cst_88 : f32 to vector<8x1xf32>
    %253 = arith.addf %251, %252 : vector<8x1xf32>
    %254 = vector.broadcast %253 : vector<8x1xf32> to vector<8x8xf32>
    %255 = arith.divf %249, %254 : vector<8x8xf32>
    %cst_89 = arith.constant dense<0.000000e+00> : vector<8x16xf32>
    %256 = tpu.matmul %255, %221, %cst_89 {dimension_numbers = #tpu.dot_dimension_numbers<[1], [0], [0], [1], [0, 0, 1, 1], [], []>} : vector<8x8xf32>, vector<8x16xf32>, vector<8x16xf32> -> vector<8x16xf32>
    %257 = tpu.concatenate %220, %256 in 1 : vector<8x16xf32>, vector<8x16xf32> -> vector<8x32xf32>
    %c16 = arith.constant 16 : index
    %c0_90 = arith.constant 0 : index
    %258 = vector.load %arg16[%c16, %c0_90] : memref<32x32xf32, #tpu.memory_space<vmem>>, vector<8x32xf32>
    tpu.vector_store %arg16[%c16, %c0_90], %257 {strides = array<i32>} : memref<32x32xf32, #tpu.memory_space<vmem>>, vector<8x32xf32>,
    %259 = vector.extract_strided_slice %25 {offsets = [24, 0], sizes = [8, 32], strides = [1, 1]} : vector<32x32xf32> to vector<8x32xf32>
    %260 = vector.extract_strided_slice %259 {offsets = [0, 0], sizes = [8, 16], strides = [1, 1]} : vector<8x32xf32> to vector<8x16xf32>
    %261 = vector.extract_strided_slice %32 {offsets = [0, 0], sizes = [1, 16], strides = [1, 1]} : vector<2x16xf32> to vector<1x16xf32>
    %262 = vector.broadcast %261 : vector<1x16xf32> to vector<8x16xf32>
    %263 = arith.mulf %260, %262 : vector<8x16xf32>
    %cst_91 = arith.constant dense<0.000000e+00> : vector<8xf32>
    %264 = vector.multi_reduction <add>, %263, %cst_91 [1] : vector<8x16xf32> to vector<8xf32>
    %265 = vector.shape_cast %264 : vector<8xf32> to vector<8x1xf32>
    %266 = vector.extract_strided_slice %33 {offsets = [0, 0], sizes = [1, 16], strides = [1, 1]} : vector<2x16xf32> to vector<1x16xf32>
    %267 = vector.broadcast %266 : vector<1x16xf32> to vector<8x16xf32>
    %268 = arith.mulf %260, %267 : vector<8x16xf32>
    %cst_92 = arith.constant dense<0.000000e+00> : vector<8xf32>
    %269 = vector.multi_reduction <add>, %268, %cst_92 [1] : vector<8x16xf32> to vector<8xf32>
    %270 = vector.shape_cast %269 : vector<8xf32> to vector<8x1xf32>
    %271 = tpu.transpose %265, [1, 0] : vector<8x1xf32> -> vector<1x8xf32>
    %272 = vector.broadcast %270 : vector<8x1xf32> to vector<8x8xf32>
    %273 = vector.broadcast %271 : vector<1x8xf32> to vector<8x8xf32>
    %274 = arith.addf %272, %273 : vector<8x8xf32>
    %cst_93 = arith.constant 0.000000e+00 : f32
    %275 = vector.broadcast %cst_93 : f32 to vector<8x8xf32>
    %276 = arith.cmpf oge, %274, %275 : vector<8x8xf32>
    %cst_94 = arith.constant 2.000000e-01 : f32
    %277 = vector.broadcast %cst_94 : f32 to vector<8x8xf32>
    %278 = arith.mulf %277, %274 : vector<8x8xf32>
    %279 = arith.select %276, %274, %278 : vector<8x8xi1>, vector<8x8xf32>
    %cst_95 = arith.constant -1.000000e+30 : f32
    %280 = vector.broadcast %cst_95 : f32 to vector<8x8xf32>
    %281 = arith.select %31, %279, %280 : vector<8x8xi1>, vector<8x8xf32>
    %cst_96 = arith.constant dense<0xFF800000> : vector<8xf32>
    %282 = vector.multi_reduction <maximumf>, %281, %cst_96 [1] : vector<8x8xf32> to vector<8xf32>
    %283 = vector.shape_cast %282 : vector<8xf32> to vector<8x1xf32>
    %284 = vector.broadcast %283 : vector<8x1xf32> to vector<8x8xf32>
    %285 = arith.subf %281, %284 : vector<8x8xf32>
    %286 = math.exp %285 : vector<8x8xf32>
    %cst_97 = arith.constant 0.000000e+00 : f32
    %287 = vector.broadcast %cst_97 : f32 to vector<8x8xf32>
    %288 = arith.select %31, %286, %287 : vector<8x8xi1>, vector<8x8xf32>
    %cst_98 = arith.constant dense<0.000000e+00> : vector<8xf32>
    %289 = vector.multi_reduction <add>, %288, %cst_98 [1] : vector<8x8xf32> to vector<8xf32>
    %290 = vector.shape_cast %289 : vector<8xf32> to vector<8x1xf32>
    %cst_99 = arith.constant 9.99999968E-21 : f32
    %291 = vector.broadcast %cst_99 : f32 to vector<8x1xf32>
    %292 = arith.addf %290, %291 : vector<8x1xf32>
    %293 = vector.broadcast %292 : vector<8x1xf32> to vector<8x8xf32>
    %294 = arith.divf %288, %293 : vector<8x8xf32>
    %cst_100 = arith.constant dense<0.000000e+00> : vector<8x16xf32>
    %295 = tpu.matmul %294, %260, %cst_100 {dimension_numbers = #tpu.dot_dimension_numbers<[1], [0], [0], [1], [0, 0, 1, 1], [], []>} : vector<8x8xf32>, vector<8x16xf32>, vector<8x16xf32> -> vector<8x16xf32>
    %296 = vector.extract_strided_slice %259 {offsets = [0, 16], sizes = [8, 16], strides = [1, 1]} : vector<8x32xf32> to vector<8x16xf32>
    %297 = vector.extract_strided_slice %32 {offsets = [1, 0], sizes = [1, 16], strides = [1, 1]} : vector<2x16xf32> to vector<1x16xf32>
    %298 = vector.broadcast %297 : vector<1x16xf32> to vector<8x16xf32>
    %299 = arith.mulf %296, %298 : vector<8x16xf32>
    %cst_101 = arith.constant dense<0.000000e+00> : vector<8xf32>
    %300 = vector.multi_reduction <add>, %299, %cst_101 [1] : vector<8x16xf32> to vector<8xf32>
    %301 = vector.shape_cast %300 : vector<8xf32> to vector<8x1xf32>
    %302 = vector.extract_strided_slice %33 {offsets = [1, 0], sizes = [1, 16], strides = [1, 1]} : vector<2x16xf32> to vector<1x16xf32>
    %303 = vector.broadcast %302 : vector<1x16xf32> to vector<8x16xf32>
    %304 = arith.mulf %296, %303 : vector<8x16xf32>
    %cst_102 = arith.constant dense<0.000000e+00> : vector<8xf32>
    %305 = vector.multi_reduction <add>, %304, %cst_102 [1] : vector<8x16xf32> to vector<8xf32>
    %306 = vector.shape_cast %305 : vector<8xf32> to vector<8x1xf32>
    %307 = tpu.transpose %301, [1, 0] : vector<8x1xf32> -> vector<1x8xf32>
    %308 = vector.broadcast %306 : vector<8x1xf32> to vector<8x8xf32>
    %309 = vector.broadcast %307 : vector<1x8xf32> to vector<8x8xf32>
    %310 = arith.addf %308, %309 : vector<8x8xf32>
    %cst_103 = arith.constant 0.000000e+00 : f32
    %311 = vector.broadcast %cst_103 : f32 to vector<8x8xf32>
    %312 = arith.cmpf oge, %310, %311 : vector<8x8xf32>
    %cst_104 = arith.constant 2.000000e-01 : f32
    %313 = vector.broadcast %cst_104 : f32 to vector<8x8xf32>
    %314 = arith.mulf %313, %310 : vector<8x8xf32>
    %315 = arith.select %312, %310, %314 : vector<8x8xi1>, vector<8x8xf32>
    %cst_105 = arith.constant -1.000000e+30 : f32
    %316 = vector.broadcast %cst_105 : f32 to vector<8x8xf32>
    %317 = arith.select %31, %315, %316 : vector<8x8xi1>, vector<8x8xf32>
    %cst_106 = arith.constant dense<0xFF800000> : vector<8xf32>
    %318 = vector.multi_reduction <maximumf>, %317, %cst_106 [1] : vector<8x8xf32> to vector<8xf32>
    %319 = vector.shape_cast %318 : vector<8xf32> to vector<8x1xf32>
    %320 = vector.broadcast %319 : vector<8x1xf32> to vector<8x8xf32>
    %321 = arith.subf %317, %320 : vector<8x8xf32>
    %322 = math.exp %321 : vector<8x8xf32>
    %cst_107 = arith.constant 0.000000e+00 : f32
    %323 = vector.broadcast %cst_107 : f32 to vector<8x8xf32>
    %324 = arith.select %31, %322, %323 : vector<8x8xi1>, vector<8x8xf32>
    %cst_108 = arith.constant dense<0.000000e+00> : vector<8xf32>
    %325 = vector.multi_reduction <add>, %324, %cst_108 [1] : vector<8x8xf32> to vector<8xf32>
    %326 = vector.shape_cast %325 : vector<8xf32> to vector<8x1xf32>
    %cst_109 = arith.constant 9.99999968E-21 : f32
    %327 = vector.broadcast %cst_109 : f32 to vector<8x1xf32>
    %328 = arith.addf %326, %327 : vector<8x1xf32>
    %329 = vector.broadcast %328 : vector<8x1xf32> to vector<8x8xf32>
    %330 = arith.divf %324, %329 : vector<8x8xf32>
    %cst_110 = arith.constant dense<0.000000e+00> : vector<8x16xf32>
    %331 = tpu.matmul %330, %296, %cst_110 {dimension_numbers = #tpu.dot_dimension_numbers<[1], [0], [0], [1], [0, 0, 1, 1], [], []>} : vector<8x8xf32>, vector<8x16xf32>, vector<8x16xf32> -> vector<8x16xf32>
    %332 = tpu.concatenate %295, %331 in 1 : vector<8x16xf32>, vector<8x16xf32> -> vector<8x32xf32>
    %c24 = arith.constant 24 : index
    %c0_111 = arith.constant 0 : index
    %333 = vector.load %arg16[%c24, %c0_111] : memref<32x32xf32, #tpu.memory_space<vmem>>, vector<8x32xf32>
    tpu.vector_store %arg16[%c24, %c0_111], %332 {strides = array<i32>} : memref<32x32xf32, #tpu.memory_space<vmem>>, vector<8x32xf32>,
    %c0_112 = arith.constant 0 : index
    %c0_113 = arith.constant 0 : index
    %334 = vector.load %arg16[%c0_112, %c0_113] : memref<32x32xf32, #tpu.memory_space<vmem>>, vector<32x32xf32>
    %c0_114 = arith.constant 0 : index
    %c0_115 = arith.constant 0 : index
    %335 = vector.load %arg10[%c0_114, %c0_115] : memref<32x16xf32, #tpu.memory_space<vmem>>, vector<32x16xf32>
    %cst_116 = arith.constant dense<0.000000e+00> : vector<32x16xf32>
    %336 = tpu.matmul %334, %335, %cst_116 {dimension_numbers = #tpu.dot_dimension_numbers<[1], [0], [0], [1], [0, 0, 1, 1], [], []>} : vector<32x32xf32>, vector<32x16xf32>, vector<32x16xf32> -> vector<32x16xf32>
    %c0_117 = arith.constant 0 : index
    %c0_118 = arith.constant 0 : index
    %337 = vector.load %arg11[%c0_117, %c0_118] : memref<1x16xf32, #tpu.memory_space<vmem>>, vector<1x16xf32>
    %338 = vector.broadcast %337 : vector<1x16xf32> to vector<32x16xf32>
    %339 = arith.addf %336, %338 : vector<32x16xf32>
    %340 = arith.addf %339, %1 : vector<32x16xf32>
    %c0_119 = arith.constant 0 : index
    %c0_120 = arith.constant 0 : index
    %341 = vector.load %arg12[%c0_119, %c0_120] : memref<1x16xf32, #tpu.memory_space<vmem>>, vector<1x16xf32>
    %342 = vector.broadcast %341 : vector<1x16xf32> to vector<32x16xf32>
    %343 = arith.mulf %340, %342 : vector<32x16xf32>
    %c0_121 = arith.constant 0 : index
    %c0_122 = arith.constant 0 : index
    %344 = vector.load %arg13[%c0_121, %c0_122] : memref<1x16xf32, #tpu.memory_space<vmem>>, vector<1x16xf32>
    %345 = vector.broadcast %344 : vector<1x16xf32> to vector<32x16xf32>
    %346 = arith.addf %343, %345 : vector<32x16xf32>
    %c0_123 = arith.constant 0 : index
    %c0_124 = arith.constant 0 : index
    %347 = vector.load %arg14[%c0_123, %c0_124] : memref<32x16xf32, #tpu.memory_space<vmem>>, vector<32x16xf32>
    tpu.vector_store %arg14[%c0_123, %c0_124], %346 {strides = array<i32>} : memref<32x16xf32, #tpu.memory_space<vmem>>, vector<32x16xf32>,
    return
  }
}

module attributes {stable_mosaic.version = 11 : i64} {
  func.func @_st_layer_kernel(%arg0: memref<32x16xf32, #tpu.memory_space<vmem>>, %arg1: memref<32x32xf32, #tpu.memory_space<vmem>>, %arg2: memref<8x8xf32, #tpu.memory_space<vmem>>, %arg3: memref<16x32xf32, #tpu.memory_space<vmem>>, %arg4: memref<16x32xf32, #tpu.memory_space<vmem>>, %arg5: memref<1x32xf32, #tpu.memory_space<vmem>>, %arg6: memref<16x64xf32, #tpu.memory_space<vmem>>, %arg7: memref<1x64xf32, #tpu.memory_space<vmem>>, %arg8: memref<2x16xf32, #tpu.memory_space<vmem>>, %arg9: memref<2x16xf32, #tpu.memory_space<vmem>>, %arg10: memref<32x16xf32, #tpu.memory_space<vmem>>, %arg11: memref<1x16xf32, #tpu.memory_space<vmem>>, %arg12: memref<1x16xf32, #tpu.memory_space<vmem>>, %arg13: memref<1x16xf32, #tpu.memory_space<vmem>>, %arg14: memref<16x16xf32, #tpu.memory_space<vmem>>, %arg15: memref<16x32xf32, #tpu.memory_space<vmem>>, %arg16: memref<16x32xf32, #tpu.memory_space<vmem>>) attributes {dimension_semantics = [], scalar_prefetch = 0 : i64, scratch_operands = 1 : i64, tpu.core_type = #tpu.core_type<tc>} {
    %c0 = arith.constant 0 : index
    %c0_0 = arith.constant 0 : index
    %0 = vector.load %arg0[%c0, %c0_0] : memref<32x16xf32, #tpu.memory_space<vmem>>, vector<16x16xf32>
    %c16 = arith.constant 16 : index
    %c0_1 = arith.constant 0 : index
    %1 = vector.load %arg0[%c16, %c0_1] : memref<32x16xf32, #tpu.memory_space<vmem>>, vector<16x16xf32>
    %c0_2 = arith.constant 0 : index
    %c0_3 = arith.constant 0 : index
    %2 = vector.load %arg3[%c0_2, %c0_3] : memref<16x32xf32, #tpu.memory_space<vmem>>, vector<16x32xf32>
    %cst = arith.constant dense<0.000000e+00> : vector<16x32xf32>
    %3 = tpu.matmul %0, %2, %cst {dimension_numbers = #tpu.dot_dimension_numbers<[1], [0], [0], [1], [0, 0, 1, 1], [], []>} : vector<16x16xf32>, vector<16x32xf32>, vector<16x32xf32> -> vector<16x32xf32>
    %c0_4 = arith.constant 0 : index
    %c0_5 = arith.constant 0 : index
    %4 = vector.load %arg4[%c0_4, %c0_5] : memref<16x32xf32, #tpu.memory_space<vmem>>, vector<16x32xf32>
    %cst_6 = arith.constant dense<0.000000e+00> : vector<16x32xf32>
    %5 = tpu.matmul %1, %4, %cst_6 {dimension_numbers = #tpu.dot_dimension_numbers<[1], [0], [0], [1], [0, 0, 1, 1], [], []>} : vector<16x16xf32>, vector<16x32xf32>, vector<16x32xf32> -> vector<16x32xf32>
    %6 = arith.addf %3, %5 : vector<16x32xf32>
    %c0_7 = arith.constant 0 : index
    %c0_8 = arith.constant 0 : index
    %7 = vector.load %arg5[%c0_7, %c0_8] : memref<1x32xf32, #tpu.memory_space<vmem>>, vector<1x32xf32>
    %8 = vector.broadcast %7 : vector<1x32xf32> to vector<16x32xf32>
    %9 = arith.addf %6, %8 : vector<16x32xf32>
    %10 = vector.extract_strided_slice %9 {offsets = [0, 0], sizes = [16, 16], strides = [1, 1]} : vector<16x32xf32> to vector<16x16xf32>
    %11 = math.tanh %10 : vector<16x16xf32>
    %12 = vector.extract_strided_slice %9 {offsets = [0, 16], sizes = [16, 16], strides = [1, 1]} : vector<16x32xf32> to vector<16x16xf32>
    %13 = arith.negf %12 : vector<16x16xf32>
    %14 = math.exp %13 : vector<16x16xf32>
    %cst_9 = arith.constant 1.000000e+00 : f32
    %15 = vector.broadcast %cst_9 : f32 to vector<16x16xf32>
    %16 = arith.addf %15, %14 : vector<16x16xf32>
    %17 = arith.divf %15, %16 : vector<16x16xf32>
    %18 = arith.mulf %11, %17 : vector<16x16xf32>
    %c0_10 = arith.constant 0 : index
    %c0_11 = arith.constant 0 : index
    %19 = vector.load %arg6[%c0_10, %c0_11] : memref<16x64xf32, #tpu.memory_space<vmem>>, vector<16x64xf32>
    %cst_12 = arith.constant dense<0.000000e+00> : vector<16x64xf32>
    %20 = tpu.matmul %18, %19, %cst_12 {dimension_numbers = #tpu.dot_dimension_numbers<[1], [0], [0], [1], [0, 0, 1, 1], [], []>} : vector<16x16xf32>, vector<16x64xf32>, vector<16x64xf32> -> vector<16x64xf32>
    %c0_13 = arith.constant 0 : index
    %c0_14 = arith.constant 0 : index
    %21 = vector.load %arg7[%c0_13, %c0_14] : memref<1x64xf32, #tpu.memory_space<vmem>>, vector<1x64xf32>
    %22 = vector.broadcast %21 : vector<1x64xf32> to vector<16x64xf32>
    %23 = arith.addf %20, %22 : vector<16x64xf32>
    %24 = vector.extract_strided_slice %23 {offsets = [0, 0], sizes = [16, 32], strides = [1, 1]} : vector<16x64xf32> to vector<16x32xf32>
    %25 = vector.extract_strided_slice %23 {offsets = [0, 32], sizes = [16, 32], strides = [1, 1]} : vector<16x64xf32> to vector<16x32xf32>
    %c16_15 = arith.constant 16 : index
    %c0_16 = arith.constant 0 : index
    %26 = vector.load %arg1[%c16_15, %c0_16] : memref<32x32xf32, #tpu.memory_space<vmem>>, vector<16x32xf32>
    %27 = arith.addf %26, %24 : vector<16x32xf32>
    %c0_17 = arith.constant 0 : index
    %c0_18 = arith.constant 0 : index
    %28 = vector.load %arg15[%c0_17, %c0_18] : memref<16x32xf32, #tpu.memory_space<vmem>>, vector<16x32xf32>
    tpu.vector_store %arg15[%c0_17, %c0_18], %27 {strides = array<i32>} : memref<16x32xf32, #tpu.memory_space<vmem>>, vector<16x32xf32>,
    %c0_19 = arith.constant 0 : index
    %c0_20 = arith.constant 0 : index
    %29 = vector.load %arg2[%c0_19, %c0_20] : memref<8x8xf32, #tpu.memory_space<vmem>>, vector<8x8xf32>
    %cst_21 = arith.constant 0.000000e+00 : f32
    %30 = vector.broadcast %cst_21 : f32 to vector<8x8xf32>
    %31 = arith.cmpf ogt, %29, %30 : vector<8x8xf32>
    %c0_22 = arith.constant 0 : index
    %c0_23 = arith.constant 0 : index
    %32 = vector.load %arg8[%c0_22, %c0_23] : memref<2x16xf32, #tpu.memory_space<vmem>>, vector<2x16xf32>
    %c0_24 = arith.constant 0 : index
    %c0_25 = arith.constant 0 : index
    %33 = vector.load %arg9[%c0_24, %c0_25] : memref<2x16xf32, #tpu.memory_space<vmem>>, vector<2x16xf32>
    %34 = vector.extract_strided_slice %25 {offsets = [0, 0], sizes = [8, 32], strides = [1, 1]} : vector<16x32xf32> to vector<8x32xf32>
    %35 = vector.extract_strided_slice %34 {offsets = [0, 0], sizes = [8, 16], strides = [1, 1]} : vector<8x32xf32> to vector<8x16xf32>
    %36 = vector.extract_strided_slice %32 {offsets = [0, 0], sizes = [1, 16], strides = [1, 1]} : vector<2x16xf32> to vector<1x16xf32>
    %37 = vector.broadcast %36 : vector<1x16xf32> to vector<8x16xf32>
    %38 = arith.mulf %35, %37 : vector<8x16xf32>
    %cst_26 = arith.constant dense<0.000000e+00> : vector<8xf32>
    %39 = vector.multi_reduction <add>, %38, %cst_26 [1] : vector<8x16xf32> to vector<8xf32>
    %40 = vector.shape_cast %39 : vector<8xf32> to vector<8x1xf32>
    %41 = vector.extract_strided_slice %33 {offsets = [0, 0], sizes = [1, 16], strides = [1, 1]} : vector<2x16xf32> to vector<1x16xf32>
    %42 = vector.broadcast %41 : vector<1x16xf32> to vector<8x16xf32>
    %43 = arith.mulf %35, %42 : vector<8x16xf32>
    %cst_27 = arith.constant dense<0.000000e+00> : vector<8xf32>
    %44 = vector.multi_reduction <add>, %43, %cst_27 [1] : vector<8x16xf32> to vector<8xf32>
    %45 = vector.shape_cast %44 : vector<8xf32> to vector<8x1xf32>
    %46 = tpu.transpose %40, [1, 0] : vector<8x1xf32> -> vector<1x8xf32>
    %47 = vector.broadcast %45 : vector<8x1xf32> to vector<8x8xf32>
    %48 = vector.broadcast %46 : vector<1x8xf32> to vector<8x8xf32>
    %49 = arith.addf %47, %48 : vector<8x8xf32>
    %cst_28 = arith.constant 0.000000e+00 : f32
    %50 = vector.broadcast %cst_28 : f32 to vector<8x8xf32>
    %51 = arith.cmpf oge, %49, %50 : vector<8x8xf32>
    %cst_29 = arith.constant 2.000000e-01 : f32
    %52 = vector.broadcast %cst_29 : f32 to vector<8x8xf32>
    %53 = arith.mulf %52, %49 : vector<8x8xf32>
    %54 = arith.select %51, %49, %53 : vector<8x8xi1>, vector<8x8xf32>
    %cst_30 = arith.constant -1.000000e+30 : f32
    %55 = vector.broadcast %cst_30 : f32 to vector<8x8xf32>
    %56 = arith.select %31, %54, %55 : vector<8x8xi1>, vector<8x8xf32>
    %cst_31 = arith.constant dense<0xFF800000> : vector<8xf32>
    %57 = vector.multi_reduction <maximumf>, %56, %cst_31 [1] : vector<8x8xf32> to vector<8xf32>
    %58 = vector.shape_cast %57 : vector<8xf32> to vector<8x1xf32>
    %59 = vector.broadcast %58 : vector<8x1xf32> to vector<8x8xf32>
    %60 = arith.subf %56, %59 : vector<8x8xf32>
    %61 = math.exp %60 : vector<8x8xf32>
    %cst_32 = arith.constant 0.000000e+00 : f32
    %62 = vector.broadcast %cst_32 : f32 to vector<8x8xf32>
    %63 = arith.select %31, %61, %62 : vector<8x8xi1>, vector<8x8xf32>
    %cst_33 = arith.constant dense<0.000000e+00> : vector<8xf32>
    %64 = vector.multi_reduction <add>, %63, %cst_33 [1] : vector<8x8xf32> to vector<8xf32>
    %65 = vector.shape_cast %64 : vector<8xf32> to vector<8x1xf32>
    %cst_34 = arith.constant 9.99999968E-21 : f32
    %66 = vector.broadcast %cst_34 : f32 to vector<8x1xf32>
    %67 = arith.addf %65, %66 : vector<8x1xf32>
    %68 = vector.broadcast %67 : vector<8x1xf32> to vector<8x8xf32>
    %69 = arith.divf %63, %68 : vector<8x8xf32>
    %cst_35 = arith.constant dense<0.000000e+00> : vector<8x16xf32>
    %70 = tpu.matmul %69, %35, %cst_35 {dimension_numbers = #tpu.dot_dimension_numbers<[1], [0], [0], [1], [0, 0, 1, 1], [], []>} : vector<8x8xf32>, vector<8x16xf32>, vector<8x16xf32> -> vector<8x16xf32>
    %71 = vector.extract_strided_slice %34 {offsets = [0, 16], sizes = [8, 16], strides = [1, 1]} : vector<8x32xf32> to vector<8x16xf32>
    %72 = vector.extract_strided_slice %32 {offsets = [1, 0], sizes = [1, 16], strides = [1, 1]} : vector<2x16xf32> to vector<1x16xf32>
    %73 = vector.broadcast %72 : vector<1x16xf32> to vector<8x16xf32>
    %74 = arith.mulf %71, %73 : vector<8x16xf32>
    %cst_36 = arith.constant dense<0.000000e+00> : vector<8xf32>
    %75 = vector.multi_reduction <add>, %74, %cst_36 [1] : vector<8x16xf32> to vector<8xf32>
    %76 = vector.shape_cast %75 : vector<8xf32> to vector<8x1xf32>
    %77 = vector.extract_strided_slice %33 {offsets = [1, 0], sizes = [1, 16], strides = [1, 1]} : vector<2x16xf32> to vector<1x16xf32>
    %78 = vector.broadcast %77 : vector<1x16xf32> to vector<8x16xf32>
    %79 = arith.mulf %71, %78 : vector<8x16xf32>
    %cst_37 = arith.constant dense<0.000000e+00> : vector<8xf32>
    %80 = vector.multi_reduction <add>, %79, %cst_37 [1] : vector<8x16xf32> to vector<8xf32>
    %81 = vector.shape_cast %80 : vector<8xf32> to vector<8x1xf32>
    %82 = tpu.transpose %76, [1, 0] : vector<8x1xf32> -> vector<1x8xf32>
    %83 = vector.broadcast %81 : vector<8x1xf32> to vector<8x8xf32>
    %84 = vector.broadcast %82 : vector<1x8xf32> to vector<8x8xf32>
    %85 = arith.addf %83, %84 : vector<8x8xf32>
    %cst_38 = arith.constant 0.000000e+00 : f32
    %86 = vector.broadcast %cst_38 : f32 to vector<8x8xf32>
    %87 = arith.cmpf oge, %85, %86 : vector<8x8xf32>
    %cst_39 = arith.constant 2.000000e-01 : f32
    %88 = vector.broadcast %cst_39 : f32 to vector<8x8xf32>
    %89 = arith.mulf %88, %85 : vector<8x8xf32>
    %90 = arith.select %87, %85, %89 : vector<8x8xi1>, vector<8x8xf32>
    %cst_40 = arith.constant -1.000000e+30 : f32
    %91 = vector.broadcast %cst_40 : f32 to vector<8x8xf32>
    %92 = arith.select %31, %90, %91 : vector<8x8xi1>, vector<8x8xf32>
    %cst_41 = arith.constant dense<0xFF800000> : vector<8xf32>
    %93 = vector.multi_reduction <maximumf>, %92, %cst_41 [1] : vector<8x8xf32> to vector<8xf32>
    %94 = vector.shape_cast %93 : vector<8xf32> to vector<8x1xf32>
    %95 = vector.broadcast %94 : vector<8x1xf32> to vector<8x8xf32>
    %96 = arith.subf %92, %95 : vector<8x8xf32>
    %97 = math.exp %96 : vector<8x8xf32>
    %cst_42 = arith.constant 0.000000e+00 : f32
    %98 = vector.broadcast %cst_42 : f32 to vector<8x8xf32>
    %99 = arith.select %31, %97, %98 : vector<8x8xi1>, vector<8x8xf32>
    %cst_43 = arith.constant dense<0.000000e+00> : vector<8xf32>
    %100 = vector.multi_reduction <add>, %99, %cst_43 [1] : vector<8x8xf32> to vector<8xf32>
    %101 = vector.shape_cast %100 : vector<8xf32> to vector<8x1xf32>
    %cst_44 = arith.constant 9.99999968E-21 : f32
    %102 = vector.broadcast %cst_44 : f32 to vector<8x1xf32>
    %103 = arith.addf %101, %102 : vector<8x1xf32>
    %104 = vector.broadcast %103 : vector<8x1xf32> to vector<8x8xf32>
    %105 = arith.divf %99, %104 : vector<8x8xf32>
    %cst_45 = arith.constant dense<0.000000e+00> : vector<8x16xf32>
    %106 = tpu.matmul %105, %71, %cst_45 {dimension_numbers = #tpu.dot_dimension_numbers<[1], [0], [0], [1], [0, 0, 1, 1], [], []>} : vector<8x8xf32>, vector<8x16xf32>, vector<8x16xf32> -> vector<8x16xf32>
    %107 = tpu.concatenate %70, %106 in 1 : vector<8x16xf32>, vector<8x16xf32> -> vector<8x32xf32>
    %c0_46 = arith.constant 0 : index
    %c0_47 = arith.constant 0 : index
    %108 = vector.load %arg16[%c0_46, %c0_47] : memref<16x32xf32, #tpu.memory_space<vmem>>, vector<8x32xf32>
    tpu.vector_store %arg16[%c0_46, %c0_47], %107 {strides = array<i32>} : memref<16x32xf32, #tpu.memory_space<vmem>>, vector<8x32xf32>,
    %109 = vector.extract_strided_slice %25 {offsets = [8, 0], sizes = [8, 32], strides = [1, 1]} : vector<16x32xf32> to vector<8x32xf32>
    %110 = vector.extract_strided_slice %109 {offsets = [0, 0], sizes = [8, 16], strides = [1, 1]} : vector<8x32xf32> to vector<8x16xf32>
    %111 = vector.extract_strided_slice %32 {offsets = [0, 0], sizes = [1, 16], strides = [1, 1]} : vector<2x16xf32> to vector<1x16xf32>
    %112 = vector.broadcast %111 : vector<1x16xf32> to vector<8x16xf32>
    %113 = arith.mulf %110, %112 : vector<8x16xf32>
    %cst_48 = arith.constant dense<0.000000e+00> : vector<8xf32>
    %114 = vector.multi_reduction <add>, %113, %cst_48 [1] : vector<8x16xf32> to vector<8xf32>
    %115 = vector.shape_cast %114 : vector<8xf32> to vector<8x1xf32>
    %116 = vector.extract_strided_slice %33 {offsets = [0, 0], sizes = [1, 16], strides = [1, 1]} : vector<2x16xf32> to vector<1x16xf32>
    %117 = vector.broadcast %116 : vector<1x16xf32> to vector<8x16xf32>
    %118 = arith.mulf %110, %117 : vector<8x16xf32>
    %cst_49 = arith.constant dense<0.000000e+00> : vector<8xf32>
    %119 = vector.multi_reduction <add>, %118, %cst_49 [1] : vector<8x16xf32> to vector<8xf32>
    %120 = vector.shape_cast %119 : vector<8xf32> to vector<8x1xf32>
    %121 = tpu.transpose %115, [1, 0] : vector<8x1xf32> -> vector<1x8xf32>
    %122 = vector.broadcast %120 : vector<8x1xf32> to vector<8x8xf32>
    %123 = vector.broadcast %121 : vector<1x8xf32> to vector<8x8xf32>
    %124 = arith.addf %122, %123 : vector<8x8xf32>
    %cst_50 = arith.constant 0.000000e+00 : f32
    %125 = vector.broadcast %cst_50 : f32 to vector<8x8xf32>
    %126 = arith.cmpf oge, %124, %125 : vector<8x8xf32>
    %cst_51 = arith.constant 2.000000e-01 : f32
    %127 = vector.broadcast %cst_51 : f32 to vector<8x8xf32>
    %128 = arith.mulf %127, %124 : vector<8x8xf32>
    %129 = arith.select %126, %124, %128 : vector<8x8xi1>, vector<8x8xf32>
    %cst_52 = arith.constant -1.000000e+30 : f32
    %130 = vector.broadcast %cst_52 : f32 to vector<8x8xf32>
    %131 = arith.select %31, %129, %130 : vector<8x8xi1>, vector<8x8xf32>
    %cst_53 = arith.constant dense<0xFF800000> : vector<8xf32>
    %132 = vector.multi_reduction <maximumf>, %131, %cst_53 [1] : vector<8x8xf32> to vector<8xf32>
    %133 = vector.shape_cast %132 : vector<8xf32> to vector<8x1xf32>
    %134 = vector.broadcast %133 : vector<8x1xf32> to vector<8x8xf32>
    %135 = arith.subf %131, %134 : vector<8x8xf32>
    %136 = math.exp %135 : vector<8x8xf32>
    %cst_54 = arith.constant 0.000000e+00 : f32
    %137 = vector.broadcast %cst_54 : f32 to vector<8x8xf32>
    %138 = arith.select %31, %136, %137 : vector<8x8xi1>, vector<8x8xf32>
    %cst_55 = arith.constant dense<0.000000e+00> : vector<8xf32>
    %139 = vector.multi_reduction <add>, %138, %cst_55 [1] : vector<8x8xf32> to vector<8xf32>
    %140 = vector.shape_cast %139 : vector<8xf32> to vector<8x1xf32>
    %cst_56 = arith.constant 9.99999968E-21 : f32
    %141 = vector.broadcast %cst_56 : f32 to vector<8x1xf32>
    %142 = arith.addf %140, %141 : vector<8x1xf32>
    %143 = vector.broadcast %142 : vector<8x1xf32> to vector<8x8xf32>
    %144 = arith.divf %138, %143 : vector<8x8xf32>
    %cst_57 = arith.constant dense<0.000000e+00> : vector<8x16xf32>
    %145 = tpu.matmul %144, %110, %cst_57 {dimension_numbers = #tpu.dot_dimension_numbers<[1], [0], [0], [1], [0, 0, 1, 1], [], []>} : vector<8x8xf32>, vector<8x16xf32>, vector<8x16xf32> -> vector<8x16xf32>
    %146 = vector.extract_strided_slice %109 {offsets = [0, 16], sizes = [8, 16], strides = [1, 1]} : vector<8x32xf32> to vector<8x16xf32>
    %147 = vector.extract_strided_slice %32 {offsets = [1, 0], sizes = [1, 16], strides = [1, 1]} : vector<2x16xf32> to vector<1x16xf32>
    %148 = vector.broadcast %147 : vector<1x16xf32> to vector<8x16xf32>
    %149 = arith.mulf %146, %148 : vector<8x16xf32>
    %cst_58 = arith.constant dense<0.000000e+00> : vector<8xf32>
    %150 = vector.multi_reduction <add>, %149, %cst_58 [1] : vector<8x16xf32> to vector<8xf32>
    %151 = vector.shape_cast %150 : vector<8xf32> to vector<8x1xf32>
    %152 = vector.extract_strided_slice %33 {offsets = [1, 0], sizes = [1, 16], strides = [1, 1]} : vector<2x16xf32> to vector<1x16xf32>
    %153 = vector.broadcast %152 : vector<1x16xf32> to vector<8x16xf32>
    %154 = arith.mulf %146, %153 : vector<8x16xf32>
    %cst_59 = arith.constant dense<0.000000e+00> : vector<8xf32>
    %155 = vector.multi_reduction <add>, %154, %cst_59 [1] : vector<8x16xf32> to vector<8xf32>
    %156 = vector.shape_cast %155 : vector<8xf32> to vector<8x1xf32>
    %157 = tpu.transpose %151, [1, 0] : vector<8x1xf32> -> vector<1x8xf32>
    %158 = vector.broadcast %156 : vector<8x1xf32> to vector<8x8xf32>
    %159 = vector.broadcast %157 : vector<1x8xf32> to vector<8x8xf32>
    %160 = arith.addf %158, %159 : vector<8x8xf32>
    %cst_60 = arith.constant 0.000000e+00 : f32
    %161 = vector.broadcast %cst_60 : f32 to vector<8x8xf32>
    %162 = arith.cmpf oge, %160, %161 : vector<8x8xf32>
    %cst_61 = arith.constant 2.000000e-01 : f32
    %163 = vector.broadcast %cst_61 : f32 to vector<8x8xf32>
    %164 = arith.mulf %163, %160 : vector<8x8xf32>
    %165 = arith.select %162, %160, %164 : vector<8x8xi1>, vector<8x8xf32>
    %cst_62 = arith.constant -1.000000e+30 : f32
    %166 = vector.broadcast %cst_62 : f32 to vector<8x8xf32>
    %167 = arith.select %31, %165, %166 : vector<8x8xi1>, vector<8x8xf32>
    %cst_63 = arith.constant dense<0xFF800000> : vector<8xf32>
    %168 = vector.multi_reduction <maximumf>, %167, %cst_63 [1] : vector<8x8xf32> to vector<8xf32>
    %169 = vector.shape_cast %168 : vector<8xf32> to vector<8x1xf32>
    %170 = vector.broadcast %169 : vector<8x1xf32> to vector<8x8xf32>
    %171 = arith.subf %167, %170 : vector<8x8xf32>
    %172 = math.exp %171 : vector<8x8xf32>
    %cst_64 = arith.constant 0.000000e+00 : f32
    %173 = vector.broadcast %cst_64 : f32 to vector<8x8xf32>
    %174 = arith.select %31, %172, %173 : vector<8x8xi1>, vector<8x8xf32>
    %cst_65 = arith.constant dense<0.000000e+00> : vector<8xf32>
    %175 = vector.multi_reduction <add>, %174, %cst_65 [1] : vector<8x8xf32> to vector<8xf32>
    %176 = vector.shape_cast %175 : vector<8xf32> to vector<8x1xf32>
    %cst_66 = arith.constant 9.99999968E-21 : f32
    %177 = vector.broadcast %cst_66 : f32 to vector<8x1xf32>
    %178 = arith.addf %176, %177 : vector<8x1xf32>
    %179 = vector.broadcast %178 : vector<8x1xf32> to vector<8x8xf32>
    %180 = arith.divf %174, %179 : vector<8x8xf32>
    %cst_67 = arith.constant dense<0.000000e+00> : vector<8x16xf32>
    %181 = tpu.matmul %180, %146, %cst_67 {dimension_numbers = #tpu.dot_dimension_numbers<[1], [0], [0], [1], [0, 0, 1, 1], [], []>} : vector<8x8xf32>, vector<8x16xf32>, vector<8x16xf32> -> vector<8x16xf32>
    %182 = tpu.concatenate %145, %181 in 1 : vector<8x16xf32>, vector<8x16xf32> -> vector<8x32xf32>
    %c8 = arith.constant 8 : index
    %c0_68 = arith.constant 0 : index
    %183 = vector.load %arg16[%c8, %c0_68] : memref<16x32xf32, #tpu.memory_space<vmem>>, vector<8x32xf32>
    tpu.vector_store %arg16[%c8, %c0_68], %182 {strides = array<i32>} : memref<16x32xf32, #tpu.memory_space<vmem>>, vector<8x32xf32>,
    %c0_69 = arith.constant 0 : index
    %c0_70 = arith.constant 0 : index
    %184 = vector.load %arg16[%c0_69, %c0_70] : memref<16x32xf32, #tpu.memory_space<vmem>>, vector<16x32xf32>
    %c0_71 = arith.constant 0 : index
    %c0_72 = arith.constant 0 : index
    %185 = vector.load %arg10[%c0_71, %c0_72] : memref<32x16xf32, #tpu.memory_space<vmem>>, vector<32x16xf32>
    %cst_73 = arith.constant dense<0.000000e+00> : vector<16x16xf32>
    %186 = tpu.matmul %184, %185, %cst_73 {dimension_numbers = #tpu.dot_dimension_numbers<[1], [0], [0], [1], [0, 0, 1, 1], [], []>} : vector<16x32xf32>, vector<32x16xf32>, vector<16x16xf32> -> vector<16x16xf32>
    %c0_74 = arith.constant 0 : index
    %c0_75 = arith.constant 0 : index
    %187 = vector.load %arg11[%c0_74, %c0_75] : memref<1x16xf32, #tpu.memory_space<vmem>>, vector<1x16xf32>
    %188 = vector.broadcast %187 : vector<1x16xf32> to vector<16x16xf32>
    %189 = arith.addf %186, %188 : vector<16x16xf32>
    %190 = arith.addf %189, %1 : vector<16x16xf32>
    %c0_76 = arith.constant 0 : index
    %c0_77 = arith.constant 0 : index
    %191 = vector.load %arg12[%c0_76, %c0_77] : memref<1x16xf32, #tpu.memory_space<vmem>>, vector<1x16xf32>
    %192 = vector.broadcast %191 : vector<1x16xf32> to vector<16x16xf32>
    %193 = arith.mulf %190, %192 : vector<16x16xf32>
    %c0_78 = arith.constant 0 : index
    %c0_79 = arith.constant 0 : index
    %194 = vector.load %arg13[%c0_78, %c0_79] : memref<1x16xf32, #tpu.memory_space<vmem>>, vector<1x16xf32>
    %195 = vector.broadcast %194 : vector<1x16xf32> to vector<16x16xf32>
    %196 = arith.addf %193, %195 : vector<16x16xf32>
    %c0_80 = arith.constant 0 : index
    %c0_81 = arith.constant 0 : index
    %197 = vector.load %arg14[%c0_80, %c0_81] : memref<16x16xf32, #tpu.memory_space<vmem>>, vector<16x16xf32>
    tpu.vector_store %arg14[%c0_80, %c0_81], %196 {strides = array<i32>} : memref<16x16xf32, #tpu.memory_space<vmem>>, vector<16x16xf32>,
    return
  }
}

module attributes {stable_mosaic.version = 11 : i64} {
  func.func @_linear_kernel(%arg0: memref<8x16xf32, #tpu.memory_space<vmem>>, %arg1: memref<16x1056xf32, #tpu.memory_space<vmem>>, %arg2: memref<1x1056xf32, #tpu.memory_space<vmem>>, %arg3: memref<8x1056xf32, #tpu.memory_space<vmem>>) attributes {dimension_semantics = [], scalar_prefetch = 0 : i64, scratch_operands = 0 : i64, tpu.core_type = #tpu.core_type<tc>} {
    %c0 = arith.constant 0 : index
    %c0_0 = arith.constant 0 : index
    %0 = vector.load %arg0[%c0, %c0_0] : memref<8x16xf32, #tpu.memory_space<vmem>>, vector<8x16xf32>
    %c0_1 = arith.constant 0 : index
    %c0_2 = arith.constant 0 : index
    %1 = vector.load %arg1[%c0_1, %c0_2] : memref<16x1056xf32, #tpu.memory_space<vmem>>, vector<16x1056xf32>
    %cst = arith.constant dense<0.000000e+00> : vector<8x1056xf32>
    %2 = tpu.matmul %0, %1, %cst {dimension_numbers = #tpu.dot_dimension_numbers<[1], [0], [0], [1], [0, 0, 1, 1], [], []>} : vector<8x16xf32>, vector<16x1056xf32>, vector<8x1056xf32> -> vector<8x1056xf32>
    %c0_3 = arith.constant 0 : index
    %c0_4 = arith.constant 0 : index
    %3 = vector.load %arg2[%c0_3, %c0_4] : memref<1x1056xf32, #tpu.memory_space<vmem>>, vector<1x1056xf32>
    %4 = vector.broadcast %3 : vector<1x1056xf32> to vector<8x1056xf32>
    %5 = arith.addf %2, %4 : vector<8x1056xf32>
    %c0_5 = arith.constant 0 : index
    %c0_6 = arith.constant 0 : index
    %6 = vector.load %arg3[%c0_5, %c0_6] : memref<8x1056xf32, #tpu.memory_space<vmem>>, vector<8x1056xf32>
    tpu.vector_store %arg3[%c0_5, %c0_6], %5 {strides = array<i32>} : memref<8x1056xf32, #tpu.memory_space<vmem>>, vector<8x1056xf32>,
    return
  }
}

module attributes {stable_mosaic.version = 11 : i64} {
  func.func @_head_kernel(%arg0: memref<16x32xf32, #tpu.memory_space<vmem>>, %arg1: memref<8x32x32xf32, #tpu.memory_space<vmem>>, %arg2: memref<8x32xf32, #tpu.memory_space<vmem>>, %arg3: memref<32x64xf32, #tpu.memory_space<vmem>>, %arg4: memref<1x64xf32, #tpu.memory_space<vmem>>, %arg5: memref<64x8xf32, #tpu.memory_space<vmem>>, %arg6: memref<1x8xf32, #tpu.memory_space<vmem>>, %arg7: memref<16x8xf32, #tpu.memory_space<vmem>>, %arg8: memref<16x32xf32, #tpu.memory_space<vmem>>) attributes {dimension_semantics = [], scalar_prefetch = 0 : i64, scratch_operands = 1 : i64, tpu.core_type = #tpu.core_type<tc>} {
    %c0 = arith.constant 0 : index
    %c0_0 = arith.constant 0 : index
    %0 = vector.load %arg0[%c0, %c0_0] : memref<16x32xf32, #tpu.memory_space<vmem>>, vector<2x32xf32>
    %cst = arith.constant 0.000000e+00 : f32
    %1 = vector.broadcast %cst : f32 to vector<2x32xf32>
    %2 = arith.maximumf %0, %1 : vector<2x32xf32>
    %c0_1 = arith.constant 0 : index
    %c0_2 = arith.constant 0 : index
    %c0_3 = arith.constant 0 : index
    %3 = vector.load %arg1[%c0_1, %c0_2, %c0_3] : memref<8x32x32xf32, #tpu.memory_space<vmem>>, vector<1x32x32xf32>
    %4 = vector.shape_cast %3 : vector<1x32x32xf32> to vector<32x32xf32>
    %cst_4 = arith.constant dense<0.000000e+00> : vector<2x32xf32>
    %5 = tpu.matmul %2, %4, %cst_4 {dimension_numbers = #tpu.dot_dimension_numbers<[1], [0], [0], [1], [0, 0, 1, 1], [], []>} : vector<2x32xf32>, vector<32x32xf32>, vector<2x32xf32> -> vector<2x32xf32>
    %c0_5 = arith.constant 0 : index
    %c0_6 = arith.constant 0 : index
    %6 = vector.load %arg2[%c0_5, %c0_6] : memref<8x32xf32, #tpu.memory_space<vmem>>, vector<1x32xf32>
    %7 = vector.broadcast %6 : vector<1x32xf32> to vector<2x32xf32>
    %8 = arith.addf %5, %7 : vector<2x32xf32>
    %c0_7 = arith.constant 0 : index
    %c0_8 = arith.constant 0 : index
    %9 = vector.load %arg8[%c0_7, %c0_8] : memref<16x32xf32, #tpu.memory_space<vmem>>, vector<2x32xf32>
    tpu.vector_store %arg8[%c0_7, %c0_8], %8 {strides = array<i32>} : memref<16x32xf32, #tpu.memory_space<vmem>>, vector<2x32xf32>,
    %c2 = arith.constant 2 : index
    %c0_9 = arith.constant 0 : index
    %10 = vector.load %arg0[%c2, %c0_9] : memref<16x32xf32, #tpu.memory_space<vmem>>, vector<2x32xf32>
    %cst_10 = arith.constant 0.000000e+00 : f32
    %11 = vector.broadcast %cst_10 : f32 to vector<2x32xf32>
    %12 = arith.maximumf %10, %11 : vector<2x32xf32>
    %c1 = arith.constant 1 : index
    %c0_11 = arith.constant 0 : index
    %c0_12 = arith.constant 0 : index
    %13 = vector.load %arg1[%c1, %c0_11, %c0_12] : memref<8x32x32xf32, #tpu.memory_space<vmem>>, vector<1x32x32xf32>
    %14 = vector.shape_cast %13 : vector<1x32x32xf32> to vector<32x32xf32>
    %cst_13 = arith.constant dense<0.000000e+00> : vector<2x32xf32>
    %15 = tpu.matmul %12, %14, %cst_13 {dimension_numbers = #tpu.dot_dimension_numbers<[1], [0], [0], [1], [0, 0, 1, 1], [], []>} : vector<2x32xf32>, vector<32x32xf32>, vector<2x32xf32> -> vector<2x32xf32>
    %c1_14 = arith.constant 1 : index
    %c0_15 = arith.constant 0 : index
    %16 = vector.load %arg2[%c1_14, %c0_15] : memref<8x32xf32, #tpu.memory_space<vmem>>, vector<1x32xf32>
    %17 = vector.broadcast %16 : vector<1x32xf32> to vector<2x32xf32>
    %18 = arith.addf %15, %17 : vector<2x32xf32>
    %c2_16 = arith.constant 2 : index
    %c0_17 = arith.constant 0 : index
    %19 = vector.load %arg8[%c2_16, %c0_17] : memref<16x32xf32, #tpu.memory_space<vmem>>, vector<2x32xf32>
    tpu.vector_store %arg8[%c2_16, %c0_17], %18 {strides = array<i32>} : memref<16x32xf32, #tpu.memory_space<vmem>>, vector<2x32xf32>,
    %c4 = arith.constant 4 : index
    %c0_18 = arith.constant 0 : index
    %20 = vector.load %arg0[%c4, %c0_18] : memref<16x32xf32, #tpu.memory_space<vmem>>, vector<2x32xf32>
    %cst_19 = arith.constant 0.000000e+00 : f32
    %21 = vector.broadcast %cst_19 : f32 to vector<2x32xf32>
    %22 = arith.maximumf %20, %21 : vector<2x32xf32>
    %c2_20 = arith.constant 2 : index
    %c0_21 = arith.constant 0 : index
    %c0_22 = arith.constant 0 : index
    %23 = vector.load %arg1[%c2_20, %c0_21, %c0_22] : memref<8x32x32xf32, #tpu.memory_space<vmem>>, vector<1x32x32xf32>
    %24 = vector.shape_cast %23 : vector<1x32x32xf32> to vector<32x32xf32>
    %cst_23 = arith.constant dense<0.000000e+00> : vector<2x32xf32>
    %25 = tpu.matmul %22, %24, %cst_23 {dimension_numbers = #tpu.dot_dimension_numbers<[1], [0], [0], [1], [0, 0, 1, 1], [], []>} : vector<2x32xf32>, vector<32x32xf32>, vector<2x32xf32> -> vector<2x32xf32>
    %c2_24 = arith.constant 2 : index
    %c0_25 = arith.constant 0 : index
    %26 = vector.load %arg2[%c2_24, %c0_25] : memref<8x32xf32, #tpu.memory_space<vmem>>, vector<1x32xf32>
    %27 = vector.broadcast %26 : vector<1x32xf32> to vector<2x32xf32>
    %28 = arith.addf %25, %27 : vector<2x32xf32>
    %c4_26 = arith.constant 4 : index
    %c0_27 = arith.constant 0 : index
    %29 = vector.load %arg8[%c4_26, %c0_27] : memref<16x32xf32, #tpu.memory_space<vmem>>, vector<2x32xf32>
    tpu.vector_store %arg8[%c4_26, %c0_27], %28 {strides = array<i32>} : memref<16x32xf32, #tpu.memory_space<vmem>>, vector<2x32xf32>,
    %c6 = arith.constant 6 : index
    %c0_28 = arith.constant 0 : index
    %30 = vector.load %arg0[%c6, %c0_28] : memref<16x32xf32, #tpu.memory_space<vmem>>, vector<2x32xf32>
    %cst_29 = arith.constant 0.000000e+00 : f32
    %31 = vector.broadcast %cst_29 : f32 to vector<2x32xf32>
    %32 = arith.maximumf %30, %31 : vector<2x32xf32>
    %c3 = arith.constant 3 : index
    %c0_30 = arith.constant 0 : index
    %c0_31 = arith.constant 0 : index
    %33 = vector.load %arg1[%c3, %c0_30, %c0_31] : memref<8x32x32xf32, #tpu.memory_space<vmem>>, vector<1x32x32xf32>
    %34 = vector.shape_cast %33 : vector<1x32x32xf32> to vector<32x32xf32>
    %cst_32 = arith.constant dense<0.000000e+00> : vector<2x32xf32>
    %35 = tpu.matmul %32, %34, %cst_32 {dimension_numbers = #tpu.dot_dimension_numbers<[1], [0], [0], [1], [0, 0, 1, 1], [], []>} : vector<2x32xf32>, vector<32x32xf32>, vector<2x32xf32> -> vector<2x32xf32>
    %c3_33 = arith.constant 3 : index
    %c0_34 = arith.constant 0 : index
    %36 = vector.load %arg2[%c3_33, %c0_34] : memref<8x32xf32, #tpu.memory_space<vmem>>, vector<1x32xf32>
    %37 = vector.broadcast %36 : vector<1x32xf32> to vector<2x32xf32>
    %38 = arith.addf %35, %37 : vector<2x32xf32>
    %c6_35 = arith.constant 6 : index
    %c0_36 = arith.constant 0 : index
    %39 = vector.load %arg8[%c6_35, %c0_36] : memref<16x32xf32, #tpu.memory_space<vmem>>, vector<2x32xf32>
    tpu.vector_store %arg8[%c6_35, %c0_36], %38 {strides = array<i32>} : memref<16x32xf32, #tpu.memory_space<vmem>>, vector<2x32xf32>,
    %c8 = arith.constant 8 : index
    %c0_37 = arith.constant 0 : index
    %40 = vector.load %arg0[%c8, %c0_37] : memref<16x32xf32, #tpu.memory_space<vmem>>, vector<2x32xf32>
    %cst_38 = arith.constant 0.000000e+00 : f32
    %41 = vector.broadcast %cst_38 : f32 to vector<2x32xf32>
    %42 = arith.maximumf %40, %41 : vector<2x32xf32>
    %c4_39 = arith.constant 4 : index
    %c0_40 = arith.constant 0 : index
    %c0_41 = arith.constant 0 : index
    %43 = vector.load %arg1[%c4_39, %c0_40, %c0_41] : memref<8x32x32xf32, #tpu.memory_space<vmem>>, vector<1x32x32xf32>
    %44 = vector.shape_cast %43 : vector<1x32x32xf32> to vector<32x32xf32>
    %cst_42 = arith.constant dense<0.000000e+00> : vector<2x32xf32>
    %45 = tpu.matmul %42, %44, %cst_42 {dimension_numbers = #tpu.dot_dimension_numbers<[1], [0], [0], [1], [0, 0, 1, 1], [], []>} : vector<2x32xf32>, vector<32x32xf32>, vector<2x32xf32> -> vector<2x32xf32>
    %c4_43 = arith.constant 4 : index
    %c0_44 = arith.constant 0 : index
    %46 = vector.load %arg2[%c4_43, %c0_44] : memref<8x32xf32, #tpu.memory_space<vmem>>, vector<1x32xf32>
    %47 = vector.broadcast %46 : vector<1x32xf32> to vector<2x32xf32>
    %48 = arith.addf %45, %47 : vector<2x32xf32>
    %c8_45 = arith.constant 8 : index
    %c0_46 = arith.constant 0 : index
    %49 = vector.load %arg8[%c8_45, %c0_46] : memref<16x32xf32, #tpu.memory_space<vmem>>, vector<2x32xf32>
    tpu.vector_store %arg8[%c8_45, %c0_46], %48 {strides = array<i32>} : memref<16x32xf32, #tpu.memory_space<vmem>>, vector<2x32xf32>,
    %c10 = arith.constant 10 : index
    %c0_47 = arith.constant 0 : index
    %50 = vector.load %arg0[%c10, %c0_47] : memref<16x32xf32, #tpu.memory_space<vmem>>, vector<2x32xf32>
    %cst_48 = arith.constant 0.000000e+00 : f32
    %51 = vector.broadcast %cst_48 : f32 to vector<2x32xf32>
    %52 = arith.maximumf %50, %51 : vector<2x32xf32>
    %c5 = arith.constant 5 : index
    %c0_49 = arith.constant 0 : index
    %c0_50 = arith.constant 0 : index
    %53 = vector.load %arg1[%c5, %c0_49, %c0_50] : memref<8x32x32xf32, #tpu.memory_space<vmem>>, vector<1x32x32xf32>
    %54 = vector.shape_cast %53 : vector<1x32x32xf32> to vector<32x32xf32>
    %cst_51 = arith.constant dense<0.000000e+00> : vector<2x32xf32>
    %55 = tpu.matmul %52, %54, %cst_51 {dimension_numbers = #tpu.dot_dimension_numbers<[1], [0], [0], [1], [0, 0, 1, 1], [], []>} : vector<2x32xf32>, vector<32x32xf32>, vector<2x32xf32> -> vector<2x32xf32>
    %c5_52 = arith.constant 5 : index
    %c0_53 = arith.constant 0 : index
    %56 = vector.load %arg2[%c5_52, %c0_53] : memref<8x32xf32, #tpu.memory_space<vmem>>, vector<1x32xf32>
    %57 = vector.broadcast %56 : vector<1x32xf32> to vector<2x32xf32>
    %58 = arith.addf %55, %57 : vector<2x32xf32>
    %c10_54 = arith.constant 10 : index
    %c0_55 = arith.constant 0 : index
    %59 = vector.load %arg8[%c10_54, %c0_55] : memref<16x32xf32, #tpu.memory_space<vmem>>, vector<2x32xf32>
    tpu.vector_store %arg8[%c10_54, %c0_55], %58 {strides = array<i32>} : memref<16x32xf32, #tpu.memory_space<vmem>>, vector<2x32xf32>,
    %c12 = arith.constant 12 : index
    %c0_56 = arith.constant 0 : index
    %60 = vector.load %arg0[%c12, %c0_56] : memref<16x32xf32, #tpu.memory_space<vmem>>, vector<2x32xf32>
    %cst_57 = arith.constant 0.000000e+00 : f32
    %61 = vector.broadcast %cst_57 : f32 to vector<2x32xf32>
    %62 = arith.maximumf %60, %61 : vector<2x32xf32>
    %c6_58 = arith.constant 6 : index
    %c0_59 = arith.constant 0 : index
    %c0_60 = arith.constant 0 : index
    %63 = vector.load %arg1[%c6_58, %c0_59, %c0_60] : memref<8x32x32xf32, #tpu.memory_space<vmem>>, vector<1x32x32xf32>
    %64 = vector.shape_cast %63 : vector<1x32x32xf32> to vector<32x32xf32>
    %cst_61 = arith.constant dense<0.000000e+00> : vector<2x32xf32>
    %65 = tpu.matmul %62, %64, %cst_61 {dimension_numbers = #tpu.dot_dimension_numbers<[1], [0], [0], [1], [0, 0, 1, 1], [], []>} : vector<2x32xf32>, vector<32x32xf32>, vector<2x32xf32> -> vector<2x32xf32>
    %c6_62 = arith.constant 6 : index
    %c0_63 = arith.constant 0 : index
    %66 = vector.load %arg2[%c6_62, %c0_63] : memref<8x32xf32, #tpu.memory_space<vmem>>, vector<1x32xf32>
    %67 = vector.broadcast %66 : vector<1x32xf32> to vector<2x32xf32>
    %68 = arith.addf %65, %67 : vector<2x32xf32>
    %c12_64 = arith.constant 12 : index
    %c0_65 = arith.constant 0 : index
    %69 = vector.load %arg8[%c12_64, %c0_65] : memref<16x32xf32, #tpu.memory_space<vmem>>, vector<2x32xf32>
    tpu.vector_store %arg8[%c12_64, %c0_65], %68 {strides = array<i32>} : memref<16x32xf32, #tpu.memory_space<vmem>>, vector<2x32xf32>,
    %c14 = arith.constant 14 : index
    %c0_66 = arith.constant 0 : index
    %70 = vector.load %arg0[%c14, %c0_66] : memref<16x32xf32, #tpu.memory_space<vmem>>, vector<2x32xf32>
    %cst_67 = arith.constant 0.000000e+00 : f32
    %71 = vector.broadcast %cst_67 : f32 to vector<2x32xf32>
    %72 = arith.maximumf %70, %71 : vector<2x32xf32>
    %c7 = arith.constant 7 : index
    %c0_68 = arith.constant 0 : index
    %c0_69 = arith.constant 0 : index
    %73 = vector.load %arg1[%c7, %c0_68, %c0_69] : memref<8x32x32xf32, #tpu.memory_space<vmem>>, vector<1x32x32xf32>
    %74 = vector.shape_cast %73 : vector<1x32x32xf32> to vector<32x32xf32>
    %cst_70 = arith.constant dense<0.000000e+00> : vector<2x32xf32>
    %75 = tpu.matmul %72, %74, %cst_70 {dimension_numbers = #tpu.dot_dimension_numbers<[1], [0], [0], [1], [0, 0, 1, 1], [], []>} : vector<2x32xf32>, vector<32x32xf32>, vector<2x32xf32> -> vector<2x32xf32>
    %c7_71 = arith.constant 7 : index
    %c0_72 = arith.constant 0 : index
    %76 = vector.load %arg2[%c7_71, %c0_72] : memref<8x32xf32, #tpu.memory_space<vmem>>, vector<1x32xf32>
    %77 = vector.broadcast %76 : vector<1x32xf32> to vector<2x32xf32>
    %78 = arith.addf %75, %77 : vector<2x32xf32>
    %c14_73 = arith.constant 14 : index
    %c0_74 = arith.constant 0 : index
    %79 = vector.load %arg8[%c14_73, %c0_74] : memref<16x32xf32, #tpu.memory_space<vmem>>, vector<2x32xf32>
    tpu.vector_store %arg8[%c14_73, %c0_74], %78 {strides = array<i32>} : memref<16x32xf32, #tpu.memory_space<vmem>>, vector<2x32xf32>,
    %c0_75 = arith.constant 0 : index
    %c0_76 = arith.constant 0 : index
    %80 = vector.load %arg8[%c0_75, %c0_76] : memref<16x32xf32, #tpu.memory_space<vmem>>, vector<16x32xf32>
    %cst_77 = arith.constant 0.000000e+00 : f32
    %81 = vector.broadcast %cst_77 : f32 to vector<16x32xf32>
    %82 = arith.maximumf %80, %81 : vector<16x32xf32>
    %c0_78 = arith.constant 0 : index
    %c0_79 = arith.constant 0 : index
    %83 = vector.load %arg3[%c0_78, %c0_79] : memref<32x64xf32, #tpu.memory_space<vmem>>, vector<32x64xf32>
    %cst_80 = arith.constant dense<0.000000e+00> : vector<16x64xf32>
    %84 = tpu.matmul %82, %83, %cst_80 {dimension_numbers = #tpu.dot_dimension_numbers<[1], [0], [0], [1], [0, 0, 1, 1], [], []>} : vector<16x32xf32>, vector<32x64xf32>, vector<16x64xf32> -> vector<16x64xf32>
    %c0_81 = arith.constant 0 : index
    %c0_82 = arith.constant 0 : index
    %85 = vector.load %arg4[%c0_81, %c0_82] : memref<1x64xf32, #tpu.memory_space<vmem>>, vector<1x64xf32>
    %86 = vector.broadcast %85 : vector<1x64xf32> to vector<16x64xf32>
    %87 = arith.addf %84, %86 : vector<16x64xf32>
    %cst_83 = arith.constant 0.000000e+00 : f32
    %88 = vector.broadcast %cst_83 : f32 to vector<16x64xf32>
    %89 = arith.maximumf %87, %88 : vector<16x64xf32>
    %c0_84 = arith.constant 0 : index
    %c0_85 = arith.constant 0 : index
    %90 = vector.load %arg5[%c0_84, %c0_85] : memref<64x8xf32, #tpu.memory_space<vmem>>, vector<64x8xf32>
    %cst_86 = arith.constant dense<0.000000e+00> : vector<16x8xf32>
    %91 = tpu.matmul %89, %90, %cst_86 {dimension_numbers = #tpu.dot_dimension_numbers<[1], [0], [0], [1], [0, 0, 1, 1], [], []>} : vector<16x64xf32>, vector<64x8xf32>, vector<16x8xf32> -> vector<16x8xf32>
    %c0_87 = arith.constant 0 : index
    %c0_88 = arith.constant 0 : index
    %92 = vector.load %arg6[%c0_87, %c0_88] : memref<1x8xf32, #tpu.memory_space<vmem>>, vector<1x8xf32>
    %93 = vector.broadcast %92 : vector<1x8xf32> to vector<16x8xf32>
    %94 = arith.addf %91, %93 : vector<16x8xf32>
    %c0_89 = arith.constant 0 : index
    %c0_90 = arith.constant 0 : index
    %95 = vector.load %arg7[%c0_89, %c0_90] : memref<16x8xf32, #tpu.memory_space<vmem>>, vector<16x8xf32>
    tpu.vector_store %arg7[%c0_89, %c0_90], %94 {strides = array<i32>} : memref<16x8xf32, #tpu.memory_space<vmem>>, vector<16x8xf32>,
    return
  }
}

</mosaic_0001>

<bundles_post_ra>
// kernel: ours_forward.7
= control target key start
LH: loop header
LB: loop body
LE: loop exit
PB: predicated region body
PF: predicated region fallthrough
CT: control target
= control target key end

     0   :  { %vm55_vm0 = vcmask 1042432   ;;  %vm30_vm1 = vcmask 23552   ;;  %vm164_vm2 = vcmask 130048   ;;  %s302_s1 = inlined_call_operand.vmem [shape: f32[3,16], index: 1, kind: input, shape index: {}]   ;;  %s303_s0 = inlined_call_operand.vmem [shape: f32[64,3], index: 0, kind: input, shape index: {}]   ;;  %s304_s2 = inlined_call_operand.vmem [shape: f32[1,16], index: 2, kind: input, shape index: {}]   ;;  %s305_s3 = inlined_call_operand.vmem [shape: f32[64,16], index: 3, kind: output, shape index: {}]  }
   0x1   :  { %v22_v0 = vld [vmem:[%s302_s1] sm:$0x7]  ;;  %v15_v3 = vld [vmem:[%s303_s0 + $0x8] sm:$0xff]  ;;  %v16_v5 = vld [vmem:[%s303_s0 + $0x10] sm:$0xff] }
   0x2   :  { %v14_v1 = vld [vmem:[%s303_s0] sm:$0xff]  ;;  %196 = vmatprep.subr.msk.mxu0 %vm55_vm0, %v22_v0  ;;  %210 = vmatprep.subr.msk.mxu1 %vm55_vm0, %v22_v0  ;;  %v19_v4 = vld [vmem:[%s303_s0 + $0x28] sm:$0xff]  ;;  %v20_v6 = vld [vmem:[%s303_s0 + $0x30] sm:$0xff] }
   0x3   :  { %v18_v2 = vld [vmem:[%s303_s0 + $0x20] sm:$0xff]  ;;  %197 = vmatpush3.msk.msra.mxu0 %vm55_vm0, %v22_v0  ;;  %211 = vmatpush3.msk.msra.mxu1 %vm55_vm0, %v22_v0  ;;  %v17_v7 = vld [vmem:[%s303_s0 + $0x18] sm:$0xff] }
   0x4   :  { %198 = vmatprep.mubr.msk.f32.mxu0 %vm30_vm1, %v14_v1  ;;  %204 = vmatprep.mubr.msk.f32.mxu1 %vm30_vm1, %v18_v2  ;;  %v21_v8 = vld [vmem:[%s303_s0 + $0x38] sm:$0xff]  ;;  %v177_v9 = vld [vmem:[%s304_s2] ss:$0 sm:$0xff] }
   0x5   :  { %199 = vmatmul.mubr.msk.f32.vlgmr.msra.gmra.mrb[0].mxu0 %vm30_vm1, %v15_v3  ;;  %205 = vmatmul.mubr.msk.f32.vlgmr.msra.gmra.mrb[0].mxu1 %vm30_vm1, %v19_v4 }
   0x6   :  { %201 = vmatprep.mubr.msk.f32.mxu0 %vm30_vm1, %v16_v5  ;;  %207 = vmatprep.mubr.msk.f32.mxu1 %vm30_vm1, %v20_v6 }
   0x9   :  { %202 = vmatmul.mubr.msk.f32.gmra.mrb[2].mxu0 %vm30_vm1, %v17_v7  ;;  %208 = vmatmul.mubr.msk.f32.gmra.mrb[2].mxu1 %vm30_vm1, %v21_v8 }
  0xd8   :  { %v200_v10 = vpop.f32.mrb[0].mxu0  ;;  %v206_v11 = vpop.f32.mrb[0].mxu1 }
  0xd9   :  { %v131_v12 = vadd.f32 %v200_v10, %v177_v9  ;;  %v151_v13 = vadd.f32 %v206_v11, %v177_v9  ;;  %v125_v14 = vpop.f32.mrb[1].mxu0  ;;  %v145_v15 = vpop.f32.mrb[1].mxu1 }
  0xda   :  { %v126_v16 = vadd.f32 %v177_v9, %v125_v14  ;;  %v146_v17 = vadd.f32 %v177_v9, %v145_v15 }
  0xdb   :  { %166 = vst.msk [vmem:[%s305_s3 + $0x8] sm:$0xff] %vm164_vm2, %v131_v12  ;;  %170 = vst.msk [vmem:[%s305_s3 + $0x28] sm:$0xff] %vm164_vm2, %v151_v13 }
  0xdc   :  { %165 = vst.msk [vmem:[%s305_s3] sm:$0xff] %vm164_vm2, %v126_v16  ;;  %169 = vst.msk [vmem:[%s305_s3 + $0x20] sm:$0xff] %vm164_vm2, %v146_v17  ;;  %v203_v18 = vpop.f32.mrb[2].mxu0  ;;  %v209_v19 = vpop.f32.mrb[2].mxu1 }
  0xdd   :  { %v141_v20 = vadd.f32 %v203_v18, %v177_v9  ;;  %v161_v21 = vadd.f32 %v209_v19, %v177_v9  ;;  %v135_v22 = vpop.f32.mrb[3].mxu0  ;;  %v155_v23 = vpop.f32.mrb[3].mxu1 }
  0xde   :  { %v136_v24 = vadd.f32 %v177_v9, %v135_v22  ;;  %v156_v25 = vadd.f32 %v177_v9, %v155_v23 }
  0xdf   :  { %168 = vst.msk [vmem:[%s305_s3 + $0x18] sm:$0xff] %vm164_vm2, %v141_v20  ;;  %172 = vst.msk [vmem:[%s305_s3 + $0x38] sm:$0xff] %vm164_vm2, %v161_v21 }
  0xe0   :  { %167 = vst.msk [vmem:[%s305_s3 + $0x10] sm:$0xff] %vm164_vm2, %v136_v24  ;;  %171 = vst.msk [vmem:[%s305_s3 + $0x30] sm:$0xff] %vm164_vm2, %v156_v25 }

// kernel: ours_forward.9
= control target key start
LH: loop header
LB: loop body
LE: loop exit
PB: predicated region body
PF: predicated region fallthrough
CT: control target
= control target key end

     0   :  { %v2480_v0 = vmov 0.0|0.0   ;;  %vm2481_vm0 = vmmov 0   ;;  %v2482_v3 = vmov 0.0   ;;  %vm60_vm1 = vcmask 130048   ;;  %s2484_s30 = smov 32   ;;  %s2485_s16 = smov 48   ;;  %s3112_s4 = inlined_call_operand.vmem [shape: f32[16,32], index: 4, kind: input, shape index: {}]   ;;  %s3113_s3 = inlined_call_operand.vmem [shape: f32[16,32], index: 3, kind: input, shape index: {}]   ;;  %s3114_s0 = inlined_call_operand.vmem [shape: f32[56,16], index: 0, kind: input, shape index: {}]   ;;  %s3115_s5 = inlined_call_operand.vmem [shape: f32[1,32], index: 5, kind: input, shape index: {}]   ;;  %s3116_s6 = inlined_call_operand.vmem [shape: f32[16,64], index: 6, kind: input, shape index: {}]   ;;  %s3117_s8 = inlined_call_operand.vmem [shape: f32[2,16], index: 8, kind: input, shape index: {}]   ;;  %s3118_s9 = inlined_call_operand.vmem [shape: f32[2,16], index: 9, kind: input, shape index: {}]   ;;  %s3119_s7 = inlined_call_operand.vmem [shape: f32[1,64], index: 7, kind: input, shape index: {}]   ;;  %s3120_s1 = inlined_call_operand.vmem [shape: f32[56,32], index: 1, kind: input, shape index: {}]   ;;  %s3121_s15 = inlined_call_operand.vmem [shape: f32[40,32], index: 15, kind: output, shape index: {1}]   ;;  %s3122_s2 = inlined_call_operand.vmem [shape: f32[8,8], index: 2, kind: input, shape index: {}]   ;;  %s3123_s10 = inlined_call_operand.vmem [shape: f32[32,16], index: 10, kind: input, shape index: {}]   ;;  %s3124_s11 = inlined_call_operand.vmem [shape: f32[1,16], index: 11, kind: input, shape index: {}]   ;;  %s3125_s12 = inlined_call_operand.vmem [shape: f32[1,16], index: 12, kind: input, shape index: {}]   ;;  %s3126_s13 = inlined_call_operand.vmem [shape: f32[1,16], index: 13, kind: input, shape index: {}]   ;;  %s3127_s14 = inlined_call_operand.vmem [shape: f32[40,16], index: 14, kind: output, shape index: {0}]  }
   0x1   :  { %2379 = vmatprep.subr.bf16.mxu0 %v2480_v0  ;;  %v58_v1 = vld [vmem:[%s3112_s4] sm:$0xff]  ;;  %v59_v2 = vld [vmem:[%s3112_s4 + $0x8] sm:$0xff]  ;;  %2253 = vmatprep.mubr.msk.f32.mxu0 %vm2481_vm0, %v2482_v3  ;;  %v51_v8 = vld [vmem:[%s3114_s0 + $0x10] sm:$0xff]  ;;  %vm458_vm2 = vcmask 261120   ;;  %s2486_s19 = smov 96   ;;  %s2487_s27 = smov 80  }
   0x2   :  { %v2380_v4 = vpack.c.bf16 %v59_v2, %v58_v1  ;;  %v56_v5 = vld [vmem:[%s3113_s3] sm:$0xff]  ;;  %v57_v6 = vld [vmem:[%s3113_s3 + $0x8] sm:$0xff]  ;;  %2394 = vmatprep.subr.bf16.mxu1 %v2480_v0  ;;  %2278 = vmatprep.mubr.msk.f32.mxu1 %vm2481_vm0, %v2482_v3  ;;  %v52_v9 = vld [vmem:[%s3114_s0 + $0x18] sm:$0xff]  ;;  %s2483_s3 = smov 112   ;;  %vm541_vm5 = vcmask 64512   ;;  %s2488_s23 = smov 16  }
   0x3   :  { %v2383_v7 = vpack.c.bf16 %v57_v6, %v56_v5  ;;  %v53_v10 = vld [vmem:[%s3114_s0 + $0x20] sm:$0xff]  ;;  %v54_v11 = vld [vmem:[%s3114_s0 + $0x28] sm:$0xff]  ;;  %v55_v12 = vld [vmem:[%s3114_s0 + $0x30] sm:$0xff]  ;;  %v468_v6 = vlaneseq }
   0x4   :  { %2381 = vmatpush3.bf16.msra.mxu0 %v2380_v4  ;;  %v49_v13 = vld [vmem:[%s3114_s0] sm:$0xff]  ;;  %v50_v14 = vld [vmem:[%s3114_s0 + $0x8] sm:$0xff] }
   0x5   :  { %2382 = vmatprep.subr.bf16.mxu0 %v2480_v0  ;;  %2395 = vmatpush3.bf16.msra.mxu1 %v2383_v7  ;;  %v2169_v24 = vld [vmem:[%s3115_s5] ss:$0 sm:$0xff]  ;;  %v335_v56 = vld [vmem:[%s3116_s6 + $0x8] sm:$0xff] }
   0x6   :  { %2306 = vmatprep.subr.mxu1 %v2482_v3  ;;  %v334_v55 = vld [vmem:[%s3116_s6] sm:$0xff] }
   0x7   :  { %2254 = vmatmul.mubr.msk.f32.vlgmr.msra.gmra.mrb[0].mxu0 %vm60_vm1, %v51_v8  ;;  %v2386_v57 = vpack.c.bf16 %v335_v56, %v334_v55  ;;  %v451_v56 = vld [vmem:[%s3120_s1 + $0x28] sm:$0xff] }
   0x8   :  { %2384 = vmatpush3.bf16.msra.mxu0 %v2383_v7  ;;  %2256 = vmatprep.mubr.msk.f32.mxu0 %vm2481_vm0, %v2482_v3 }
   0x9   :  { %2279 = vmatmul.mubr.msk.f32.vlgmr.msra.gmra.mrb[0].mxu1 %vm60_vm1, %v51_v8  ;;  %2385 = vmatprep.subr.bf16.mxu0 %v2480_v0  ;;  %v469_v8 = vshrl.u32 %v468_v6, 7 }
   0xa   :  { %2281 = vmatprep.mubr.msk.f32.mxu1 %vm2481_vm0, %v2482_v3 }
   0xb   :  { %2257 = vmatmul.mubr.msk.f32.gmra.mrb[2].mxu0 %vm60_vm1, %v52_v9 }
   0xc   :  { %2259 = vmatprep.mubr.msk.f32.mxu0 %vm2481_vm0, %v2482_v3 }
   0xd   :  { %2282 = vmatmul.mubr.msk.f32.gmra.mrb[2].mxu1 %vm60_vm1, %v52_v9  ;;  %v466_v9 = vld [vmem:[%s3117_s8] sm:$0x3] }
   0xe   :  { %2284 = vmatprep.mubr.msk.f32.mxu1 %vm2481_vm0, %v2482_v3 }
   0xf   :  { %2260 = vmatmul.mubr.msk.f32.gmra.mrb[4].mxu0 %vm60_vm1, %v53_v10 }
  0x10   :  { %2262 = vmatprep.mubr.msk.f32.mxu0 %vm2481_vm0, %v2482_v3 }
  0x11   :  { %2285 = vmatmul.mubr.msk.f32.gmra.mrb[4].mxu1 %vm60_vm1, %v53_v10  ;;  %v467_v10 = vld [vmem:[%s3118_s9] sm:$0x3] }
  0x12   :  { %2308 = vmatprep.mubr.msk.f32.mxu1 %vm2481_vm0, %v2482_v3 }
  0x13   :  { %2263 = vmatmul.mubr.msk.f32.gmra.mrb[6].mxu0 %vm60_vm1, %v54_v11  ;;  %v2666_v11 = vsub.s32 0, %v469_v8 }
  0x14   :  { %2265 = vmatprep.mubr.msk.f32.mxu0 %vm2481_vm0, %v2482_v3 }
  0x17   :  { %2266 = vmatmul.mubr.msk.f32.gmra.mrb[8].mxu0 %vm60_vm1, %v55_v12  ;;  %v634_v12 = vsub.s32 1, %v469_v8 }
  0x18   :  { %2272 = vmatprep.mubr.msk.f32.mxu0 %vm2481_vm0, %v2482_v3 }
  0x1b   :  { %2273 = vmatmul.mubr.msk.f32.vlgmr.msra.gmra.mrb[10].mxu0 %vm60_vm1, %v49_v13  ;;  %v471_v13 = vrot.slane %v466_v9, %v2666_v11 }
  0x1c   :  { %2275 = vmatprep.mubr.msk.f32.mxu0 %vm2481_vm0, %v2482_v3  ;;  %2387 = vmatpush3.bf16.msra.mxu0 %v2386_v57 }
  0x1d   :  { %2331 = vmatprep.subr.mxu0 %v2482_v3 }
  0x1f   :  { %2276 = vmatmul.mubr.msk.f32.gmra.mrb[12].mxu0 %vm60_vm1, %v50_v14  ;;  %v487_v14 = vrot.slane %v467_v10, %v2666_v11 }
  0x20   :  { %2291 = vmatprep.mubr.msk.f32.mxu0 %vm2481_vm0, %v2482_v3 }
  0xda   :  { %v142_v15 = vpop.f32.mrb[0].mxu0 }
  0xdb   :  { %v2255_v16 = vpop.f32.mrb[1].mxu0 }
  0xdc   :  { %v248_v17 = vpop.f32.mrb[0].mxu1  ;;  %v635_v16 = vrot.slane %v466_v9, %v634_v12 }
  0xdd   :  { %v2280_v18 = vpop.f32.mrb[1].mxu1 }
  0xde   :  { %v147_v19 = vpop.f32.mrb[2].mxu0 }
  0xdf   :  { %v2258_v20 = vpop.f32.mrb[3].mxu0 }
  0xe0   :  { %v253_v21 = vpop.f32.mrb[2].mxu1 }
  0xe1   :  { %v2283_v22 = vpop.f32.mrb[3].mxu1 }
  0xe2   :  { %v152_v23 = vpop.f32.mrb[4].mxu0 }
  0xe3   :  { %v249_v25 = vadd.f32 %v248_v17, %v152_v23  ;;  %v2261_v26 = vpop.f32.mrb[5].mxu0 }
  0xe4   :  { %v258_v27 = vpop.f32.mrb[4].mxu1 }
  0xe5   :  { %v2644_v28 = vadd.f32 %v2169_v24, %v249_v25  ;;  %v2286_v29 = vpop.f32.mrb[5].mxu1 }
  0xe6   :  { %v157_v30 = vpop.f32.mrb[6].mxu0 }
  0xe7   :  { %v2172_v31 = vmul.f32 -1.442695, %v2644_v28  ;;  %v254_v32 = vadd.f32 %v253_v21, %v157_v30  ;;  %v2264_v33 = vpop.f32.mrb[7].mxu0 }
  0xe9   :  { %2405 = vpow2.f32 %v2172_v31  ;;  %v2647_v34 = vadd.f32 %v2169_v24, %v254_v32  ;;  %v2175_v32 = vld [vmem:[%s3119_s7] ss:$0 sm:$0xff] }
  0xea   :  { %v162_v35 = vpop.f32.mrb[8].mxu0 }
  0xeb   :  { %v2173_v36 = vmul.f32 -1.442695, %v2647_v34  ;;  %v2267_v37 = vpop.f32.mrb[9].mxu0  ;;  %v259_v38 = vadd.f32 %v258_v27, %v162_v35 }
  0xed   :  { %2407 = vpow2.f32 %v2173_v36  ;;  %v2650_v42 = vadd.f32 %v2169_v24, %v259_v38 }
  0xee   :  { %v238_v39 = vpop.f32.mrb[10].mxu0 }
  0xef   :  { %v239_v40 = vadd.f32 %v238_v39, %v142_v15  ;;  %v2274_v41 = vpop.f32.mrb[11].mxu0  ;;  %v2174_v50 = vmul.f32 -1.442695, %v2650_v42  ;;  %v651_v15 = vrot.slane %v467_v10, %v634_v12 }
  0xf0   :  { %v449_v41 = vld [vmem:[%s3120_s1 + $0x18] sm:$0xff] }
  0xf1   :  { %v269_v43 = vadd.f32 %v2169_v24, %v239_v40 }
  0xf2   :  { %v243_v44 = vpop.f32.mrb[12].mxu0 }
  0xf3   :  { %v2406_v45 = vpop.eup %2405  ;;  %v2170_v46 = vmul.f32 -1.442695, %v269_v43  ;;  %v244_v47 = vadd.f32 %v243_v44, %v147_v19  ;;  %v2277_v48 = vpop.f32.mrb[13].mxu0 }
  0xf4   :  { %v296_v49 = vadd.f32 1.0, %v2406_v45  ;;  %v450_v48 = vld [vmem:[%s3120_s1 + $0x20] sm:$0xff] }
  0xf5   :  { %2409 = vpow2.f32 %v2170_v46  ;;  %v270_v51 = vadd.f32 %v2169_v24, %v244_v47 }
  0xf6   :  { %2411 = vrcp.f32 %v296_v49 }
  0xf7   :  { %v2408_v52 = vpop.eup %2407  ;;  %v2171_v53 = vmul.f32 -1.442695, %v270_v51  ;;  %2413 = vpow2.f32 %v2174_v50 }
  0xf8   :  { %v297_v54 = vadd.f32 1.0, %v2408_v52 }
  0xf9   :  { %2415 = vpow2.f32 %v2171_v53 }
  0xfa   :  { %2417 = vrcp.f32 %v297_v54 }
  0xff   :  { %v2410_v58 = vpop.eup %2409 }
 0x100   :  { %v2412_v59 = vpop.eup %2411  ;;  %v294_v60 = vadd.f32 1.0, %v2410_v58 }
 0x101   :  { %318 = vrot.lane.b32.xlu1 %v2412_v59, %s2483_s3  ;;  %v2414_v61 = vpop.eup %2413 }
 0x102   :  { %2419 = vrcp.f32 %v294_v60  ;;  %v298_v2 = vadd.f32 1.0, %v2414_v61 }
 0x103   :  { %v2416_v62 = vpop.eup %2415 }
 0x104   :  { %v2418_v63 = vpop.eup %2417  ;;  %v295_v1 = vadd.f32 1.0, %v2416_v62 }
 0x105   :  { %320 = vrot.lane.b32.xlu1 %v2418_v63, %s2483_s3 }
 0x106   :  { %2421 = vrcp.f32 %v295_v1  ;;  %v452_v1 = vld [vmem:[%s3120_s1 + $0x30] sm:$0xff] }
 0x107   :  { %2423 = vrcp.f32 %v298_v2 }
 0x108   :  { %2425 = vtanh.f32 %v269_v43 }
 0x109   :  { %473 = vrot.lane.b32.xlu1 %v471_v13, %s2484_s30  ;;  %2427 = vtanh.f32 %v270_v51 }
 0x10a   :  { %2429 = vtanh.f32 %v2644_v28 }
 0x10b   :  { %2431 = vtanh.f32 %v2647_v34  ;;  %v448_v34 = vld [vmem:[%s3120_s1 + $0x10] sm:$0xff] }
 0x10c   :  { %v2420_v4 = vpop.eup %2419  ;;  %2433 = vtanh.f32 %v2650_v42 }
 0x10d   :  { %314 = vrot.lane.b32.xlu0 %v2420_v4, %s2483_s3  ;;  %653 = vrot.lane.b32.xlu1 %v651_v15, %s2485_s16 }
 0x110   :  { %v2422_v5 = vpop.eup %2421 }
 0x111   :  { %316 = vrot.lane.b32.xlu0 %v2422_v5, %s2483_s3  ;;  %v2424_v7 = vpop.eup %2423 }
 0x112   :  { %v2426_v17 = vpop.eup %2425 }
 0x113   :  { %v2428_v20 = vpop.eup %2427 }
 0x114   :  { %v2430_v24 = vpop.eup %2429 }
 0x115   :  { %322 = vrot.lane.b32.xlu0 %v2424_v7, %s2483_s3  ;;  %v2432_v27 = vpop.eup %2431 }
 0x116   :  { %v2434_v30 = vpop.eup %2433 }
 0x119   :  { %489 = vrot.lane.b32.xlu0 %v487_v14, %s2484_s30 }
 0x11d   :  { %637 = vrot.lane.b32.xlu0 %v635_v16, %s2485_s16 }
 0x173   :  { %v319_v21 = vpop.permute.xlu1 %318 }
 0x174   :  { %v331_v25 = vmul.f32 %v2430_v24, %v319_v21 }
 0x177   :  { %v321_v26 = vpop.permute.xlu1 %320 }
 0x178   :  { %v332_v28 = vmul.f32 %v2432_v27, %v321_v26 }
 0x17b   :  { %v2696_v37 = vpop.permute.xlu1 %473 }
 0x17f   :  { %v315_v18 = vpop.permute.xlu0 %314  ;;  %v654_v60 = vpop.permute.xlu1 %653 }
 0x180   :  { %v329_v19 = vmul.f32 %v2426_v17, %v315_v18 }
 0x182   :  { %2292 = vmatmul.mubr.msk.f32.vlgmr.msra.gmra.mrb[14].mxu0 %vm60_vm1, %v329_v19 }
 0x183   :  { %v317_v22 = vpop.permute.xlu0 %316  ;;  %2294 = vmatprep.mubr.msk.f32.mxu0 %vm2481_vm0, %v2482_v3 }
 0x184   :  { %v330_v23 = vmul.f32 %v2428_v20, %v317_v22 }
 0x186   :  { %2295 = vmatmul.mubr.msk.f32.gmra.mrb[16].mxu0 %vm60_vm1, %v330_v23 }
 0x187   :  { %2297 = vmatprep.mubr.msk.f32.mxu0 %vm2481_vm0, %v2482_v3  ;;  %v323_v29 = vpop.permute.xlu0 %322 }
 0x188   :  { %v333_v31 = vmul.f32 %v2434_v30, %v323_v29 }
 0x18a   :  { %2298 = vmatmul.mubr.msk.f32.gmra.mrb[18].mxu0 %vm60_vm1, %v331_v25 }
 0x18b   :  { %2300 = vmatprep.mubr.msk.f32.mxu0 %vm2481_vm0, %v2482_v3  ;;  %v490_v39 = vpop.permute.xlu0 %489 }
 0x18e   :  { %2301 = vmatmul.mubr.msk.f32.gmra.mrb[20].mxu0 %vm60_vm1, %v332_v28 }
 0x18f   :  { %2303 = vmatprep.mubr.msk.f32.mxu0 %vm2481_vm0, %v2482_v3  ;;  %v638_v52 = vpop.permute.xlu0 %637 }
 0x192   :  { %2304 = vmatmul.mubr.msk.f32.gmra.mrb[22].mxu0 %vm60_vm1, %v333_v31 }
 0x193   :  { %2333 = vmatprep.mubr.msk.f32.mxu0 %vm2481_vm0, %v2482_v3 }
 0x255   :  { %v424_v33 = vpop.f32.mrb[14].mxu0 }
 0x256   :  { %v2694_v35 = vadd.f32 %v2175_v32, %v424_v33  ;;  %v2293_v36 = vpop.f32.mrb[15].mxu0 }
 0x258   :  { %v453_v38 = vadd.f32 %v448_v34, %v2694_v35  ;;  %556 = vrot.lane.b32.xlu0 %v2694_v35, %s2486_s19  ;;  %v476_v44 = vmul.f32 %v2696_v37, %v2694_v35  ;;  %v492_v51 = vmul.f32 %v490_v39, %v2694_v35  ;;  %v640_v59 = vmul.f32 %v638_v52, %v2694_v35 }
 0x259   :  { %v429_v40 = vpop.f32.mrb[16].mxu0  ;;  %v656_v5 = vmul.f32 %v654_v60, %v2694_v35 }
 0x25a   :  { %459 = vst.msk [vmem:[%s3121_s15] sm:$0xff] %vm458_vm2, %v453_v38  ;;  %v2708_v42 = vadd.f32 %v2175_v32, %v429_v40  ;;  %v2296_v43 = vpop.f32.mrb[17].mxu0 }
 0x25c   :  { %v454_v45 = vadd.f32 %v449_v41, %v2708_v42  ;;  %478 = vrot.lane.b32.xlu0 %v476_v44, %s2486_s19  ;;  %v800_v46 = vmul.f32 %v2696_v37, %v2708_v42  ;;  %v947_v8 = vmul.f32 %v638_v52, %v2708_v42  ;;  %v808_v10 = vmul.f32 %v490_v39, %v2708_v42 }
 0x25d   :  { %v434_v47 = vpop.f32.mrb[18].mxu0  ;;  %v955_v13 = vmul.f32 %v654_v60, %v2708_v42 }
 0x25e   :  { %460 = vst.msk [vmem:[%s3121_s15 + $0x8] sm:$0xff] %vm458_vm2, %v454_v45  ;;  %v2723_v49 = vadd.f32 %v2175_v32, %v434_v47  ;;  %802 = vrot.lane.b32.xlu1 %v800_v46, %s2486_s19  ;;  %v2299_v50 = vpop.f32.mrb[19].mxu0 }
 0x260   :  { %v455_v53 = vadd.f32 %v450_v48, %v2723_v49  ;;  %494 = vrot.lane.b32.xlu0 %v492_v51, %s2486_s19  ;;  %v1246_v54 = vmul.f32 %v638_v52, %v2723_v49  ;;  %v1099_v62 = vmul.f32 %v2696_v37, %v2723_v49  ;;  %v1254_v15 = vmul.f32 %v654_v60, %v2723_v49 }
 0x261   :  { %v439_v55 = vpop.f32.mrb[20].mxu0  ;;  %v1107_v17 = vmul.f32 %v490_v39, %v2723_v49 }
 0x262   :  { %461 = vst.msk [vmem:[%s3121_s15 + $0x10] sm:$0xff] %vm458_vm2, %v455_v53  ;;  %v2737_v57 = vadd.f32 %v2175_v32, %v439_v55  ;;  %1248 = vrot.lane.b32.xlu1 %v1246_v54, %s2487_s27  ;;  %v2302_v58 = vpop.f32.mrb[21].mxu0 }
 0x264   :  { %v456_v61 = vadd.f32 %v451_v56, %v2737_v57  ;;  %642 = vrot.lane.b32.xlu0 %v640_v59, %s2487_s27  ;;  %v1545_v7 = vmul.f32 %v638_v52, %v2737_v57  ;;  %v1406_v9 = vmul.f32 %v490_v39, %v2737_v57  ;;  %v1553_v18 = vmul.f32 %v654_v60, %v2737_v57 }
 0x265   :  { %v444_v63 = vpop.f32.mrb[22].mxu0  ;;  %v1398_v19 = vmul.f32 %v2696_v37, %v2737_v57 }
 0x266   :  { %462 = vst.msk [vmem:[%s3121_s15 + $0x18] sm:$0xff] %vm458_vm2, %v456_v61  ;;  %v2752_v2 = vadd.f32 %v2175_v32, %v444_v63  ;;  %1101 = vrot.lane.b32.xlu1 %v1099_v62, %s2486_s19  ;;  %v2305_v4 = vpop.f32.mrb[23].mxu0 }
 0x268   :  { %v457_v6 = vadd.f32 %v452_v1, %v2752_v2  ;;  %658 = vrot.lane.b32.xlu0 %v656_v5, %s2487_s27  ;;  %v1844_v12 = vmul.f32 %v638_v52, %v2752_v2  ;;  %v1697_v14 = vmul.f32 %v2696_v37, %v2752_v2  ;;  %v1705_v16 = vmul.f32 %v490_v39, %v2752_v2 }
 0x269   :  { %v1852_v20 = vmul.f32 %v654_v60, %v2752_v2 }
 0x26a   :  { %463 = vst.msk [vmem:[%s3121_s15 + $0x20] sm:$0xff] %vm458_vm2, %v457_v6  ;;  %1547 = vrot.lane.b32.xlu1 %v1545_v7, %s2487_s27 }
 0x26c   :  { %949 = vrot.lane.b32.xlu0 %v947_v8, %s2487_s27 }
 0x26e   :  { %1408 = vrot.lane.b32.xlu1 %v1406_v9, %s2486_s19 }
 0x270   :  { %810 = vrot.lane.b32.xlu0 %v808_v10, %s2486_s19 }
 0x272   :  { %1846 = vrot.lane.b32.xlu1 %v1844_v12, %s2487_s27 }
 0x274   :  { %957 = vrot.lane.b32.xlu0 %v955_v13, %s2487_s27 }
 0x276   :  { %1699 = vrot.lane.b32.xlu1 %v1697_v14, %s2486_s19 }
 0x278   :  { %1256 = vrot.lane.b32.xlu0 %v1254_v15, %s2487_s27 }
 0x27a   :  { %1707 = vrot.lane.b32.xlu1 %v1705_v16, %s2486_s19 }
 0x27c   :  { %1109 = vrot.lane.b32.xlu0 %v1107_v17, %s2486_s19 }
 0x280   :  { %1555 = vrot.lane.b32.xlu0 %v1553_v18, %s2487_s27 }
 0x284   :  { %1400 = vrot.lane.b32.xlu0 %v1398_v19, %s2486_s19 }
 0x288   :  { %1854 = vrot.lane.b32.xlu0 %v1852_v20, %s2487_s27 }
 0x2ca   :  { %v557_v21 = vpop.permute.xlu0 %556 }
 0x2cb   :  { %2307 = vmatpush3.msra.mxu1 %v557_v21 }
 0x2cc   :  { %2311 = vmatprep.subr.mxu1 %v2482_v3 }
 0x2ce   :  { %v479_v22 = vpop.permute.xlu0 %478 }
 0x2cf   :  { %v481_v23 = vsel %vm60_vm1, %v479_v22, 0.0 }
 0x2d0   :  { %482 = vadd.xlane.f32.xlu1 %v481_v23  ;;  %v803_v24 = vpop.permute.xlu1 %802 }
 0x2d1   :  { %v805_v36 = vsel %vm60_vm1, %v803_v24, 0.0 }
 0x2d2   :  { %v495_v25 = vpop.permute.xlu0 %494 }
 0x2d3   :  { %v497_v26 = vsel %vm60_vm1, %v495_v25, 0.0 }
 0x2d4   :  { %498 = vadd.xlane.f32.xlu0 %v497_v26  ;;  %v1249_v29 = vpop.permute.xlu1 %1248 }
 0x2d5   :  { %v1251_v39 = vsel %vm60_vm1, %v1249_v29, 0.0 }
 0x2d6   :  { %v643_v27 = vpop.permute.xlu0 %642 }
 0x2d7   :  { %v645_v28 = vsel %vm60_vm1, %v643_v27, 0.0  ;;  %v2823_v27 = vld [vmem:[%s3122_s2] sm:$0xff] }
 0x2d8   :  { %646 = vadd.xlane.f32.xlu0 %v645_v28  ;;  %v1102_v32 = vpop.permute.xlu1 %1101  ;;  %vm465_vm3 = vcmp.gt.f32.partialorder %v2823_v27, 0.0 }
 0x2d9   :  { %v1104_v46 = vsel %vm60_vm1, %v1102_v32, 0.0 }
 0x2da   :  { %v659_v30 = vpop.permute.xlu0 %658 }
 0x2db   :  { %v661_v31 = vsel %vm60_vm1, %v659_v30, 0.0 }
 0x2dc   :  { %662 = vadd.xlane.f32.xlu1 %v661_v31  ;;  %v1548_v40 = vpop.permute.xlu1 %1547 }
 0x2dd   :  { %v1550_v54 = vsel %vm60_vm1, %v1548_v40, 0.0 }
 0x2de   :  { %v950_v33 = vpop.permute.xlu0 %949 }
 0x2df   :  { %v952_v34 = vsel %vm60_vm1, %v950_v33, 0.0 }
 0x2e0   :  { %953 = vadd.xlane.f32.xlu0 %v952_v34  ;;  %806 = vadd.xlane.f32.xlu1 %v805_v36  ;;  %v1409_v44 = vpop.permute.xlu1 %1408 }
 0x2e1   :  { %v1411_v51 = vsel %vm60_vm1, %v1409_v44, 0.0 }
 0x2e2   :  { %v811_v37 = vpop.permute.xlu0 %810 }
 0x2e3   :  { %v813_v38 = vsel %vm60_vm1, %v811_v37, 0.0 }
 0x2e4   :  { %814 = vadd.xlane.f32.xlu0 %v813_v38  ;;  %1252 = vadd.xlane.f32.xlu1 %v1251_v39  ;;  %v1847_v52 = vpop.permute.xlu1 %1846 }
 0x2e5   :  { %v1849_v55 = vsel %vm60_vm1, %v1847_v52, 0.0 }
 0x2e6   :  { %v958_v41 = vpop.permute.xlu0 %957 }
 0x2e7   :  { %v960_v43 = vsel %vm60_vm1, %v958_v41, 0.0 }
 0x2e8   :  { %961 = vadd.xlane.f32.xlu0 %v960_v43  ;;  %v1700_v56 = vpop.permute.xlu1 %1699 }
 0x2e9   :  { %v1702_v1 = vsel %vm60_vm1, %v1700_v56, 0.0 }
 0x2ea   :  { %v1257_v45 = vpop.permute.xlu0 %1256 }
 0x2eb   :  { %v1259_v47 = vsel %vm60_vm1, %v1257_v45, 0.0 }
 0x2ec   :  { %1105 = vadd.xlane.f32.xlu0 %v1104_v46  ;;  %1260 = vadd.xlane.f32.xlu1 %v1259_v47  ;;  %v1708_v63 = vpop.permute.xlu1 %1707 }
 0x2ed   :  { %v1710_v4 = vsel %vm60_vm1, %v1708_v63, 0.0 }
 0x2ee   :  { %v1110_v48 = vpop.permute.xlu0 %1109 }
 0x2ef   :  { %v1112_v50 = vsel %vm60_vm1, %v1110_v48, 0.0 }
 0x2f0   :  { %1113 = vadd.xlane.f32.xlu0 %v1112_v50  ;;  %1412 = vadd.xlane.f32.xlu1 %v1411_v51 }
 0x2f2   :  { %v1556_v53 = vpop.permute.xlu0 %1555 }
 0x2f3   :  { %v1558_v59 = vsel %vm60_vm1, %v1556_v53, 0.0 }
 0x2f4   :  { %1551 = vadd.xlane.f32.xlu0 %v1550_v54  ;;  %1850 = vadd.xlane.f32.xlu1 %v1849_v55 }
 0x2f6   :  { %v1401_v58 = vpop.permute.xlu0 %1400 }
 0x2f7   :  { %v1403_v61 = vsel %vm60_vm1, %v1401_v58, 0.0 }
 0x2f8   :  { %1559 = vadd.xlane.f32.xlu0 %v1558_v59 }
 0x2fa   :  { %v1855_v60 = vpop.permute.xlu0 %1854 }
 0x2fb   :  { %v1857_v62 = vsel %vm60_vm1, %v1855_v60, 0.0 }
 0x2fc   :  { %1404 = vadd.xlane.f32.xlu0 %v1403_v61  ;;  %1858 = vadd.xlane.f32.xlu1 %v1857_v62 }
 0x300   :  { %1703 = vadd.xlane.f32.xlu1 %v1702_v1  ;;  %1711 = vadd.xlane.f32.xlu0 %v1710_v4 }
 0x35d   :  { %v483_v5 = vpop.xlane.xlu1 %482 }
 0x35e   :  { %500 = vxpose.xlu1.b32.start.end [1/1] (short) (narrow) %v483_v5, 8 }
 0x361   :  { %v499_v6 = vpop.xlane.xlu0 %498 }
 0x365   :  { %v647_v7 = vpop.xlane.xlu0 %646 }
 0x366   :  { %664 = vxpose.xlu0.b32.start.end [1/1] (short) (narrow) %v647_v7, 8 }
 0x369   :  { %v663_v8 = vpop.xlane.xlu1 %662 }
 0x36d   :  { %v954_v9 = vpop.xlane.xlu0 %953  ;;  %v807_v10 = vpop.xlane.xlu1 %806 }
 0x36e   :  { %963 = vxpose.xlu1.b32.start.end [1/1] (short) (narrow) %v954_v9, 8  ;;  %816 = vxpose.xlu0.b32.start.end [1/1] (short) (narrow) %v807_v10, 8 }
 0x371   :  { %v815_v12 = vpop.xlane.xlu0 %814  ;;  %v1253_v13 = vpop.xlane.xlu1 %1252 }
 0x372   :  { %1262 = vxpose.xlu0.b32.start.end [1/1] (short) (narrow) %v1253_v13, 8 }
 0x375   :  { %v962_v14 = vpop.xlane.xlu0 %961 }
 0x379   :  { %v1106_v15 = vpop.xlane.xlu0 %1105  ;;  %v1261_v16 = vpop.xlane.xlu1 %1260 }
 0x37a   :  { %1115 = vxpose.xlu1.b32.start.end [1/1] (short) (narrow) %v1106_v15, 8 }
 0x37d   :  { %v2811_v17 = vpop.xlane.xlu0 %1113  ;;  %v2813_v18 = vpop.xlane.xlu1 %1412 }
 0x381   :  { %v1552_v19 = vpop.xlane.xlu0 %1551  ;;  %v1851_v21 = vpop.xlane.xlu1 %1850 }
 0x382   :  { %1561 = vxpose.xlu0.b32.start.end [1/1] (short) (narrow) %v1552_v19, 8 }
 0x385   :  { %v2815_v20 = vpop.xlane.xlu0 %1559 }
 0x389   :  { %v1405_v22 = vpop.xlane.xlu0 %1404  ;;  %v2817_v23 = vpop.xlane.xlu1 %1858 }
 0x38a   :  { %1414 = vxpose.xlu0.b32.start.end [1/1] (short) (narrow) %v1405_v22, 8 }
 0x38d   :  { %v1704_v24 = vpop.xlane.xlu1 %1703  ;;  %v2825_v29 = vpop.xlane.xlu0 %1711 }
 0x38e   :  { %1860 = vxpose.xlu0.b32.start.end [1/1] (short) (narrow) %v1851_v21, 8 }
 0x392   :  { %1713 = vxpose.xlu0.b32.start.end [1/1] (short) (narrow) %v1704_v24, 8 }
 0x3de   :  { %v516_v25 = vpop.trf.xlu1 }
 0x3df   :  { %v535_v26 = vrot.slane %v516_v25, %v2666_v11 }
 0x3e1   :  { %v536_v28 = vadd.f32 %v535_v26, %v499_v6 }
 0x3e3   :  { %vm537_vm4 = vcmp.ge.f32.partialorder %v536_v28, 0.0  ;;  %v538_v30 = vmul.f32 0.2, %v536_v28 }
 0x3e5   :  { %v539_v31 = vsel %vm537_vm4, %v536_v28, %v538_v30 }
 0x3e6   :  { %v680_v32 = vpop.trf.xlu0  ;;  %v2830_v33 = vsel %vm465_vm3, %v539_v31, -1e+30 }
 0x3e7   :  { %v699_v34 = vrot.slane %v680_v32, %v2666_v11  ;;  %v542_v36 = vsel %vm541_vm5, %v2830_v33, -inf }
 0x3e8   :  { %543 = vmax.xlane.f32.xlu0 %v542_v36 }
 0x3e9   :  { %v700_v37 = vadd.f32 %v699_v34, %v663_v8 }
 0x3eb   :  { %vm701_vm6 = vcmp.ge.f32.partialorder %v700_v37, 0.0  ;;  %v702_v38 = vmul.f32 0.2, %v700_v37 }
 0x3ed   :  { %v703_v39 = vsel %vm701_vm6, %v700_v37, %v702_v38 }
 0x3ee   :  { %v832_v40 = vpop.trf.xlu0  ;;  %v979_v41 = vpop.trf.xlu1  ;;  %v2837_v43 = vsel %vm465_vm3, %v703_v39, -1e+30 }
 0x3ef   :  { %v851_v44 = vrot.slane %v832_v40, %v2666_v11  ;;  %v998_v45 = vrot.slane %v979_v41, %v2666_v11  ;;  %v705_v46 = vsel %vm541_vm5, %v2837_v43, -inf }
 0x3f0   :  { %706 = vmax.xlane.f32.xlu1 %v705_v46 }
 0x3f1   :  { %v852_v47 = vadd.f32 %v851_v44, %v815_v12  ;;  %v999_v48 = vadd.f32 %v998_v45, %v962_v14 }
 0x3f2   :  { %v1278_v50 = vpop.trf.xlu0 }
 0x3f3   :  { %v1297_v51 = vrot.slane %v1278_v50, %v2666_v11  ;;  %vm853_vm7 = vcmp.ge.f32.partialorder %v852_v47, 0.0  ;;  %v854_v52 = vmul.f32 0.2, %v852_v47  ;;  %vm1000_vm8 = vcmp.ge.f32.partialorder %v999_v48, 0.0 }
 0x3f4   :  { %v1001_v53 = vmul.f32 0.2, %v999_v48 }
 0x3f5   :  { %v1298_v54 = vadd.f32 %v1297_v51, %v1261_v16  ;;  %v855_v55 = vsel %vm853_vm7, %v852_v47, %v854_v52 }
 0x3f6   :  { %v2846_v56 = vsel %vm465_vm3, %v855_v55, -1e+30  ;;  %v1002_v58 = vsel %vm1000_vm8, %v999_v48, %v1001_v53 }
 0x3f7   :  { %v857_v59 = vsel %vm541_vm5, %v2846_v56, -inf  ;;  %v2852_v60 = vsel %vm465_vm3, %v1002_v58, -1e+30  ;;  %vm1299_vm9 = vcmp.ge.f32.partialorder %v1298_v54, 0.0  ;;  %v1300_v61 = vmul.f32 0.2, %v1298_v54 }
 0x3f8   :  { %858 = vmax.xlane.f32.xlu0 %v857_v59  ;;  %v1004_v62 = vsel %vm541_vm5, %v2852_v60, -inf }
 0x3f9   :  { %1005 = vmax.xlane.f32.xlu1 %v1004_v62  ;;  %v1301_v63 = vsel %vm1299_vm9, %v1298_v54, %v1300_v61 }
 0x3fa   :  { %v1131_v1 = vpop.trf.xlu1  ;;  %v2858_v4 = vsel %vm465_vm3, %v1301_v63, -1e+30 }
 0x3fb   :  { %v1150_v5 = vrot.slane %v1131_v1, %v2666_v11  ;;  %v1303_v6 = vsel %vm541_vm5, %v2858_v4, -inf }
 0x3fc   :  { %1304 = vmax.xlane.f32.xlu0 %v1303_v6 }
 0x3fd   :  { %v1151_v7 = vadd.f32 %v1150_v5, %v2811_v17 }
 0x3ff   :  { %vm1152_vm10 = vcmp.ge.f32.partialorder %v1151_v7, 0.0  ;;  %v1153_v8 = vmul.f32 0.2, %v1151_v7 }
 0x401   :  { %v1154_v9 = vsel %vm1152_vm10, %v1151_v7, %v1153_v8 }
 0x402   :  { %v1577_v10 = vpop.trf.xlu0  ;;  %v2866_v12 = vsel %vm465_vm3, %v1154_v9, -1e+30 }
 0x403   :  { %v1596_v13 = vrot.slane %v1577_v10, %v2666_v11  ;;  %v1156_v14 = vsel %vm541_vm5, %v2866_v12, -inf }
 0x404   :  { %1157 = vmax.xlane.f32.xlu0 %v1156_v14 }
 0x405   :  { %v1597_v15 = vadd.f32 %v1596_v13, %v2815_v20 }
 0x407   :  { %vm1598_vm11 = vcmp.ge.f32.partialorder %v1597_v15, 0.0  ;;  %v1599_v16 = vmul.f32 0.2, %v1597_v15 }
 0x409   :  { %v1600_v19 = vsel %vm1598_vm11, %v1597_v15, %v1599_v16 }
 0x40a   :  { %v1430_v17 = vpop.trf.xlu0  ;;  %v2874_v21 = vsel %vm465_vm3, %v1600_v19, -1e+30 }
 0x40b   :  { %v1449_v22 = vrot.slane %v1430_v17, %v2666_v11  ;;  %v1602_v24 = vsel %vm541_vm5, %v2874_v21, -inf }
 0x40c   :  { %1603 = vmax.xlane.f32.xlu1 %v1602_v24 }
 0x40d   :  { %v1450_v25 = vadd.f32 %v1449_v22, %v2813_v18 }
 0x40e   :  { %v1876_v26 = vpop.trf.xlu0 }
 0x40f   :  { %v1895_v28 = vrot.slane %v1876_v26, %v2666_v11  ;;  %vm1451_vm12 = vcmp.ge.f32.partialorder %v1450_v25, 0.0  ;;  %v1452_v20 = vmul.f32 0.2, %v1450_v25 }
 0x411   :  { %v1896_v30 = vadd.f32 %v1895_v28, %v2817_v23  ;;  %v1453_v31 = vsel %vm1451_vm12, %v1450_v25, %v1452_v20 }
 0x412   :  { %v2884_v32 = vsel %vm465_vm3, %v1453_v31, -1e+30  ;;  %v1729_v23 = vpop.trf.xlu0 }
 0x413   :  { %v1455_v34 = vsel %vm541_vm5, %v2884_v32, -inf  ;;  %vm1897_vm13 = vcmp.ge.f32.partialorder %v1896_v30, 0.0  ;;  %v1898_v36 = vmul.f32 0.2, %v1896_v30  ;;  %v1748_v39 = vrot.slane %v1729_v23, %v2666_v11 }
 0x414   :  { %1456 = vmax.xlane.f32.xlu1 %v1455_v34 }
 0x415   :  { %v1899_v37 = vsel %vm1897_vm13, %v1896_v30, %v1898_v36  ;;  %v1749_v40 = vadd.f32 %v1748_v39, %v2825_v29 }
 0x416   :  { %v1900_v18 = vsel %vm465_vm3, %v1899_v37, -1e+30 }
 0x417   :  { %v1901_v38 = vsel %vm541_vm5, %v1900_v18, -inf  ;;  %v1751_v41 = vmul.f32 0.2, %v1749_v40  ;;  %vm1750_vm14 = vcmp.ge.f32.partialorder %v1749_v40, 0.0 }
 0x418   :  { %1902 = vmax.xlane.f32.xlu0 %v1901_v38 }
 0x419   :  { %v1752_v44 = vsel %vm1750_vm14, %v1749_v40, %v1751_v41 }
 0x41a   :  { %v2899_v45 = vsel %vm465_vm3, %v1752_v44, -1e+30 }
 0x41b   :  { %v1754_v46 = vsel %vm541_vm5, %v2899_v45, -inf }
 0x425   :  { %871 = vrot.lane.b32.xlu1 %v2708_v42, %s2486_s19 }
 0x42e   :  { %718 = vrot.lane.b32.xlu0 %v2694_v35, %s2487_s27 }
 0x449   :  { %1755 = vmax.xlane.f32.xlu1 %v1754_v46 }
 0x45a   :  { %1017 = vrot.lane.b32.xlu1 %v2708_v42, %s2487_s27 }
 0x475   :  { %v544_v35 = vpop.xlane.xlu0 %543 }
 0x476   :  { %v545_v47 = vsub.f32 %v2830_v33, %v544_v35 }
 0x478   :  { %v546_v11 = vmul.f32 1.442695, %v545_v47 }
 0x47a   :  { %2435 = vpow2.f32 %v546_v11 }
 0x47d   :  { %v707_v29 = vpop.xlane.xlu1 %706 }
 0x47e   :  { %v708_v48 = vsub.f32 %v2837_v43, %v707_v29 }
 0x480   :  { %v709_v50 = vmul.f32 1.442695, %v708_v48 }
 0x482   :  { %2437 = vpow2.f32 %v709_v50 }
 0x484   :  { %v2436_v51 = vpop.eup %2435 }
 0x485   :  { %v859_v52 = vpop.xlane.xlu0 %858  ;;  %v2909_v53 = vsel %vm465_vm3, %v2436_v51, 0.0 }
 0x486   :  { %v860_v54 = vsub.f32 %v2846_v56, %v859_v52  ;;  %v1006_v55 = vpop.xlane.xlu1 %1005  ;;  %v549_v42 = vsel %vm541_vm5, %v2909_v53, 0.0 }
 0x487   :  { %v1007_v33 = vsub.f32 %v2852_v60, %v1006_v55  ;;  %550 = vadd.xlane.f32.xlu0 %v549_v42 }
 0x488   :  { %v861_v58 = vmul.f32 1.442695, %v860_v54 }
 0x489   :  { %v1008_v59 = vmul.f32 1.442695, %v1007_v33  ;;  %v1305_v43 = vpop.xlane.xlu0 %1304 }
 0x48a   :  { %2439 = vpow2.f32 %v861_v58  ;;  %v1306_v61 = vsub.f32 %v2858_v4, %v1305_v43 }
 0x48b   :  { %2441 = vpow2.f32 %v1008_v59 }
 0x48c   :  { %v2438_v62 = vpop.eup %2437  ;;  %v1307_v63 = vmul.f32 1.442695, %v1306_v61 }
 0x48d   :  { %v2918_v1 = vsel %vm465_vm3, %v2438_v62, 0.0 }
 0x48e   :  { %2443 = vpow2.f32 %v1307_v63  ;;  %v712_v56 = vsel %vm541_vm5, %v2918_v1, 0.0 }
 0x48f   :  { %713 = vadd.xlane.f32.xlu1 %v712_v56 }
 0x491   :  { %v1158_v14 = vpop.xlane.xlu0 %1157 }
 0x492   :  { %v1159_v31 = vsub.f32 %v2866_v12, %v1158_v14 }
 0x494   :  { %v2440_v60 = vpop.eup %2439  ;;  %v1160_v34 = vmul.f32 1.442695, %v1159_v31 }
 0x495   :  { %v2442_v5 = vpop.eup %2441  ;;  %v2924_v6 = vsel %vm465_vm3, %v2440_v60, 0.0 }
 0x496   :  { %v864_v4 = vsel %vm541_vm5, %v2924_v6, 0.0  ;;  %v2930_v7 = vsel %vm465_vm3, %v2442_v5, 0.0 }
 0x497   :  { %865 = vadd.xlane.f32.xlu1 %v864_v4  ;;  %v1011_v8 = vsel %vm541_vm5, %v2930_v7, 0.0 }
 0x498   :  { %v2444_v9 = vpop.eup %2443  ;;  %1012 = vadd.xlane.f32.xlu0 %v1011_v8 }
 0x499   :  { %v2936_v10 = vsel %vm465_vm3, %v2444_v9, 0.0  ;;  %v1604_v17 = vpop.xlane.xlu1 %1603 }
 0x49a   :  { %v1310_v13 = vsel %vm541_vm5, %v2936_v10, 0.0  ;;  %v1605_v24 = vsub.f32 %v2874_v21, %v1604_v17 }
 0x49b   :  { %1311 = vadd.xlane.f32.xlu1 %v1310_v13 }
 0x49c   :  { %v1606_v28 = vmul.f32 1.442695, %v1605_v24 }
 0x4a1   :  { %v1457_v36 = vpop.xlane.xlu1 %1456 }
 0x4a2   :  { %v1458_v23 = vsub.f32 %v2884_v32, %v1457_v36 }
 0x4a4   :  { %v1459_v12 = vmul.f32 1.442695, %v1458_v23 }
 0x4a5   :  { %v1903_v15 = vpop.xlane.xlu0 %1902 }
 0x4a6   :  { %v1904_v16 = vsub.f32 %v1900_v18, %v1903_v15  ;;  %v872_v18 = vpop.permute.xlu1 %871 }
 0x4a8   :  { %v1905_v19 = vmul.f32 1.442695, %v1904_v16 }
 0x4aa   :  { %2445 = vpow2.f32 %v1905_v19 }
 0x4ab   :  { %2447 = vpow2.f32 %v1606_v28 }
 0x4ac   :  { %2449 = vpow2.f32 %v1160_v34 }
 0x4ad   :  { %2451 = vpow2.f32 %v1459_v12  ;;  %v2004_v12 = vld [vmem:[%s3123_s10 + $0x18] sm:$0xff] }
 0x4ae   :  { %1316 = vrot.lane.b32.xlu0 %v2723_v49, %s2487_s27 }
 0x4b4   :  { %v2446_v22 = vpop.eup %2445 }
 0x4b5   :  { %v2945_v25 = vsel %vm465_vm3, %v2446_v22, 0.0  ;;  %v2448_v20 = vpop.eup %2447 }
 0x4b6   :  { %v1908_v26 = vsel %vm541_vm5, %v2945_v25, 0.0  ;;  %v2953_v30 = vsel %vm465_vm3, %v2448_v20, 0.0  ;;  %v2450_v37 = vpop.eup %2449 }
 0x4b7   :  { %1909 = vadd.xlane.f32.xlu1 %v1908_v26  ;;  %v1609_v21 = vsel %vm541_vm5, %v2953_v30, 0.0  ;;  %v2962_v38 = vsel %vm465_vm3, %v2450_v37, 0.0  ;;  %v2452_v46 = vpop.eup %2451 }
 0x4b8   :  { %v1163_v40 = vsel %vm541_vm5, %v2962_v38, 0.0  ;;  %v2972_v35 = vsel %vm465_vm3, %v2452_v46, 0.0 }
 0x4b9   :  { %v1462_v47 = vsel %vm541_vm5, %v2972_v35, 0.0 }
 0x4c8   :  { %1615 = vrot.lane.b32.xlu1 %v2737_v57, %s2487_s27 }
 0x4cd   :  { %1610 = vadd.xlane.f32.xlu0 %v1609_v21 }
 0x4d6   :  { %v1756_v39 = vpop.xlane.xlu1 %1755 }
 0x4d7   :  { %v1757_v41 = vsub.f32 %v2899_v45, %v1756_v39 }
 0x4d9   :  { %v1758_v44 = vmul.f32 1.442695, %v1757_v41 }
 0x4da   :  { %v1018_v50 = vpop.permute.xlu1 %1017 }
 0x4db   :  { %2453 = vpow2.f32 %v1758_v44 }
 0x4e3   :  { %1914 = vrot.lane.b32.xlu0 %v2752_v2, %s2487_s27 }
 0x4e5   :  { %v2454_v32 = vpop.eup %2453 }
 0x4e6   :  { %v2980_v45 = vsel %vm465_vm3, %v2454_v32, 0.0 }
 0x4e7   :  { %v1761_v11 = vsel %vm541_vm5, %v2980_v45, 0.0 }
 0x4ec   :  { %1164 = vadd.xlane.f32.xlu1 %v1163_v40  ;;  %v2003_v40 = vld [vmem:[%s3123_s10 + $0x10] sm:$0xff] }
 0x4ed   :  { %v2392_v44 = vpack.c.bf16 %v2004_v12, %v2003_v40  ;;  %v2478_v40 = vld [vmem:[%s3114_s0 + $0x28] sm:$0xff] }
 0x4fd   :  { %1170 = vrot.lane.b32.xlu1 %v2723_v49, %s2486_s19  ;;  %v719_v49 = vpop.permute.xlu0 %718 }
 0x501   :  { %1768 = vrot.lane.b32.xlu1 %v2752_v2, %s2486_s19 }
 0x502   :  { %1463 = vadd.xlane.f32.xlu0 %v1462_v47 }
 0x506   :  { %1762 = vadd.xlane.f32.xlu0 %v1761_v11 }
 0x514   :  { %v551_v29 = vpop.xlane.xlu0 %550 }
 0x515   :  { %v552_v48 = vadd.f32 1e-20, %v551_v29 }
 0x517   :  { %2455 = vrcp.f32 %v552_v48 }
 0x51c   :  { %1469 = vrot.lane.b32.xlu0 %v2737_v57, %s2486_s19  ;;  %v714_v2 = vpop.xlane.xlu1 %713 }
 0x51d   :  { %v715_v51 = vadd.f32 1e-20, %v714_v2 }
 0x51f   :  { %2457 = vrcp.f32 %v715_v51 }
 0x521   :  { %v2456_v52 = vpop.eup %2455 }
 0x522   :  { %v554_v27 = vmul.f32 %v2456_v52, %v2909_v53 }
 0x524   :  { %2309 = vmatmul.mubr.msk.f32.vlgmr.msra.gmra.mrb[6].mxu1 %vm541_vm5, %v554_v27  ;;  %v866_v54 = vpop.xlane.xlu1 %865 }
 0x525   :  { %2312 = vmatpush3.msra.mxu1 %v719_v49  ;;  %v1013_v55 = vpop.xlane.xlu0 %1012  ;;  %v867_v42 = vadd.f32 1e-20, %v866_v54  ;;  %2313 = vmatprep.mubr.msk.f32.mxu1 %vm2481_vm0, %v2482_v3 }
 0x526   :  { %v1014_v33 = vadd.f32 1e-20, %v1013_v55  ;;  %2316 = vmatprep.subr.mxu1 %v2482_v3 }
 0x527   :  { %2459 = vrcp.f32 %v867_v42 }
 0x528   :  { %v1312_v57 = vpop.xlane.xlu1 %1311  ;;  %2461 = vrcp.f32 %v1014_v33 }
 0x529   :  { %v2458_v58 = vpop.eup %2457  ;;  %v1317_v59 = vpop.permute.xlu0 %1316  ;;  %v1313_v43 = vadd.f32 1e-20, %v1312_v57 }
 0x52a   :  { %2332 = vmatpush3.msra.mxu0 %v1317_v59  ;;  %v717_v53 = vmul.f32 %v2458_v58, %v2918_v1 }
 0x52b   :  { %2463 = vrcp.f32 %v1313_v43  ;;  %2341 = vmatprep.subr.mxu0 %v2482_v3 }
 0x52c   :  { %2314 = vmatmul.mubr.msk.f32.vlgmr.msra.gmra.mrb[8].mxu1 %vm541_vm5, %v717_v53 }
 0x52d   :  { %2317 = vmatpush3.msra.mxu1 %v872_v18  ;;  %2318 = vmatprep.mubr.msk.f32.mxu1 %vm2481_vm0, %v2482_v3  ;;  %v2001_v18 = vld [vmem:[%s3123_s10] sm:$0xff] }
 0x52e   :  { %2321 = vmatprep.subr.mxu1 %v2482_v3 }
 0x531   :  { %v2460_v61 = vpop.eup %2459 }
 0x532   :  { %v869_v62 = vmul.f32 %v2460_v61, %v2924_v6  ;;  %v2462_v63 = vpop.eup %2461 }
 0x533   :  { %v1016_v60 = vmul.f32 %v2462_v63, %v2930_v7 }
 0x534   :  { %2319 = vmatmul.mubr.msk.f32.vlgmr.msra.gmra.mrb[10].mxu1 %vm541_vm5, %v869_v62 }
 0x535   :  { %v2464_v56 = vpop.eup %2463  ;;  %2322 = vmatpush3.msra.mxu1 %v1018_v50  ;;  %2323 = vmatprep.mubr.msk.f32.mxu1 %vm2481_vm0, %v2482_v3 }
 0x536   :  { %v1315_v1 = vmul.f32 %v2464_v56, %v2936_v10  ;;  %2326 = vmatprep.subr.mxu1 %v2482_v3 }
 0x538   :  { %2324 = vmatmul.mubr.msk.f32.vlgmr.msra.gmra.mrb[12].mxu1 %vm541_vm5, %v1016_v60  ;;  %2334 = vmatmul.mubr.msk.f32.vlgmr.msra.gmra.mrb[24].mxu0 %vm541_vm5, %v1315_v1 }
 0x539   :  { %2343 = vmatprep.mubr.msk.f32.mxu0 %vm2481_vm0, %v2482_v3  ;;  %2328 = vmatprep.mubr.msk.f32.mxu1 %vm2481_vm0, %v2482_v3 }
 0x544   :  { %v1910_v5 = vpop.xlane.xlu1 %1909 }
 0x545   :  { %v1911_v8 = vadd.f32 1e-20, %v1910_v5 }
 0x548   :  { %v1616_v6 = vpop.permute.xlu1 %1615 }
 0x549   :  { %2342 = vmatpush3.msra.mxu0 %v1616_v6 }
 0x54a   :  { %2351 = vmatprep.subr.mxu0 %v2482_v3 }
 0x55a   :  { %v1611_v4 = vpop.xlane.xlu0 %1610 }
 0x55b   :  { %v1612_v7 = vadd.f32 1e-20, %v1611_v4 }
 0x55d   :  { %2465 = vrcp.f32 %v1612_v7 }
 0x55e   :  { %2467 = vrcp.f32 %v1911_v8  ;;  %v1915_v14 = vpop.permute.xlu0 %1914  ;;  %v2191_v8 = vld [vmem:[%s3124_s11] ss:$0 sm:$0xff] }
 0x567   :  { %v2466_v9 = vpop.eup %2465 }
 0x568   :  { %v1614_v10 = vmul.f32 %v2466_v9, %v2953_v30  ;;  %v2468_v13 = vpop.eup %2467 }
 0x569   :  { %v1913_v15 = vmul.f32 %v2468_v13, %v2945_v25  ;;  %v2197_v13 = vld [vmem:[%s3125_s12] ss:$0 sm:$0xff] }
 0x56a   :  { %2344 = vmatmul.mubr.msk.f32.vlgmr.msra.gmra.mrb[26].mxu0 %vm541_vm5, %v1614_v10 }
 0x56b   :  { %2352 = vmatpush3.msra.mxu0 %v1915_v14  ;;  %2353 = vmatprep.mubr.msk.f32.mxu0 %vm2481_vm0, %v2482_v3  ;;  %v2475_v14 = vld [vmem:[%s3114_s0 + $0x10] sm:$0xff] }
 0x56e   :  { %2354 = vmatmul.mubr.msk.f32.vlgmr.msra.gmra.mrb[28].mxu0 %vm541_vm5, %v1913_v15 }
 0x579   :  { %v1165_v16 = vpop.xlane.xlu1 %1164 }
 0x57a   :  { %v1166_v19 = vadd.f32 1e-20, %v1165_v16 }
 0x57c   :  { %2469 = vrcp.f32 %v1166_v19 }
 0x57d   :  { %v1171_v17 = vpop.permute.xlu1 %1170 }
 0x57e   :  { %2327 = vmatpush3.msra.mxu1 %v1171_v17 }
 0x57f   :  { %2336 = vmatprep.subr.mxu1 %v2482_v3 }
 0x581   :  { %v1769_v34 = vpop.permute.xlu1 %1768 }
 0x586   :  { %v2470_v22 = vpop.eup %2469 }
 0x587   :  { %v1168_v24 = vmul.f32 %v2470_v22, %v2962_v38  ;;  %v2002_v38 = vld [vmem:[%s3123_s10 + $0x8] sm:$0xff] }
 0x588   :  { %v2389_v23 = vpack.c.bf16 %v2002_v38, %v2001_v18 }
 0x589   :  { %2329 = vmatmul.mubr.msk.f32.vlgmr.msra.gmra.mrb[14].mxu1 %vm541_vm5, %v1168_v24 }
 0x58a   :  { %2338 = vmatprep.mubr.msk.f32.mxu1 %vm2481_vm0, %v2482_v3 }
 0x58f   :  { %v1464_v26 = vpop.xlane.xlu0 %1463 }
 0x590   :  { %v1465_v28 = vadd.f32 1e-20, %v1464_v26  ;;  %v2476_v26 = vld [vmem:[%s3114_s0 + $0x18] sm:$0xff] }
 0x592   :  { %2471 = vrcp.f32 %v1465_v28 }
 0x593   :  { %v1763_v25 = vpop.xlane.xlu0 %1762 }
 0x594   :  { %v1764_v20 = vadd.f32 1e-20, %v1763_v25 }
 0x596   :  { %2473 = vrcp.f32 %v1764_v20 }
 0x597   :  { %v1470_v30 = vpop.permute.xlu0 %1469 }
 0x598   :  { %2337 = vmatpush3.msra.mxu1 %v1470_v30 }
 0x599   :  { %2346 = vmatprep.subr.mxu1 %v2482_v3 }
 0x59c   :  { %v2472_v21 = vpop.eup %2471 }
 0x59d   :  { %v1467_v31 = vmul.f32 %v2472_v21, %v2972_v35 }
 0x59f   :  { %2339 = vmatmul.mubr.msk.f32.vlgmr.msra.gmra.mrb[16].mxu1 %vm541_vm5, %v1467_v31 }
 0x5a0   :  { %v2474_v36 = vpop.eup %2473  ;;  %2347 = vmatpush3.msra.mxu1 %v1769_v34  ;;  %2348 = vmatprep.mubr.msk.f32.mxu1 %vm2481_vm0, %v2482_v3  ;;  %v2477_v34 = vld [vmem:[%s3114_s0 + $0x20] sm:$0xff] }
 0x5a1   :  { %v1766_v37 = vmul.f32 %v2474_v36, %v2980_v45  ;;  %2388 = vmatprep.subr.bf16.mxu1 %v2480_v0 }
 0x5a3   :  { %2349 = vmatmul.mubr.msk.f32.vlgmr.msra.gmra.mrb[18].mxu1 %vm541_vm5, %v1766_v37 }
 0x5a4   :  { %2364 = vmatprep.mubr.msk.f32.mxu1 %vm2481_vm0, %v2482_v3  ;;  %2390 = vmatpush3.bf16.msra.mxu1 %v2389_v23 }
 0x5a5   :  { %2391 = vmatprep.subr.bf16.mxu1 %v2480_v0 }
 0x5a8   :  { %2393 = vmatpush3.bf16.msra.mxu1 %v2392_v44 }
 0x5f7   :  { %v628_v39 = vpop.f32.mrb[6].mxu1 }
 0x5f8   :  { %v2310_v41 = vpop.f32.mrb[7].mxu1 }
 0x5ff   :  { %v790_v46 = vpop.f32.mrb[8].mxu1 }
 0x600   :  { %795 = vrot.lane.b32.xlu1 %v790_v46, %s2488_s23  ;;  %v2315_v35 = vpop.f32.mrb[9].mxu1 }
 0x607   :  { %v943_v32 = vpop.f32.mrb[10].mxu1 }
 0x608   :  { %v2320_v47 = vpop.f32.mrb[11].mxu1 }
 0x609   :  { %v2479_v47 = vld [vmem:[%s3114_s0 + $0x30] sm:$0xff] }
 0x60b   :  { %v1089_v45 = vpop.f32.mrb[12].mxu1  ;;  %v1388_v11 = vpop.f32.mrb[24].mxu0 }
 0x60c   :  { %1094 = vrot.lane.b32.xlu0 %v1089_v45, %s2488_s23  ;;  %v2325_v49 = vpop.f32.mrb[13].mxu1  ;;  %1393 = vrot.lane.b32.xlu1 %v1388_v11, %s2488_s23  ;;  %v2335_v29 = vpop.f32.mrb[25].mxu0 }
 0x63d   :  { %v1687_v48 = vpop.f32.mrb[26].mxu0 }
 0x63e   :  { %1692 = vrot.lane.b32.xlu0 %v1687_v48, %s2488_s23  ;;  %v2345_v50 = vpop.f32.mrb[27].mxu0 }
 0x641   :  { %v1986_v2 = vpop.f32.mrb[28].mxu0 }
 0x642   :  { %1991 = vrot.lane.b32.xlu1 %v1986_v2, %s2488_s23  ;;  %v2355_v0 = vpop.f32.mrb[29].mxu0 }
 0x65c   :  { %v1242_v51 = vpop.f32.mrb[14].mxu1 }
 0x65d   :  { %v2330_v52 = vpop.f32.mrb[15].mxu1 }
 0x672   :  { %v1541_v27 = vpop.f32.mrb[16].mxu1  ;;  %v796_v54 = vpop.permute.xlu1 %795 }
 0x673   :  { %v2340_v55 = vpop.f32.mrb[17].mxu1  ;;  %v798_v42 = vsel %vm60_vm1, %v628_v39, %v796_v54 }
 0x674   :  { %799 = vst.msk [vmem:[#allocation2] sm:$0xff] %vm458_vm2, %v798_v42 }
 0x676   :  { %v1840_v33 = vpop.f32.mrb[18].mxu1 }
 0x677   :  { %v2350_v57 = vpop.f32.mrb[19].mxu1 }
 0x67b   :  { %v1996_v58 = vld [vmem:[#allocation2] sm:$0xff] }
 0x67c   :  { %2365 = vmatmul.mubr.msk.f32.vlgmr.msra.gmra.mrb[20].mxu1 %vm458_vm2, %v1996_v58 }
 0x67d   :  { %2367 = vmatprep.mubr.msk.f32.mxu1 %vm2481_vm0, %v2482_v3 }
 0x67e   :  { %v1095_v59 = vpop.permute.xlu0 %1094  ;;  %v1394_v43 = vpop.permute.xlu1 %1393 }
 0x67f   :  { %v1097_v53 = vsel %vm60_vm1, %v943_v32, %v1095_v59  ;;  %v1396_v61 = vsel %vm60_vm1, %v1242_v51, %v1394_v43 }
 0x680   :  { %1098 = vst.msk [vmem:[#allocation2 + $0x8] sm:$0xff] %vm458_vm2, %v1097_v53  ;;  %1397 = vst.msk [vmem:[#allocation2 + $0x10] sm:$0xff] %vm458_vm2, %v1396_v61 }
 0x687   :  { %v1997_v62 = vld [vmem:[#allocation2 + $0x8] sm:$0xff]  ;;  %v1998_v63 = vld [vmem:[#allocation2 + $0x10] sm:$0xff] }
 0x688   :  { %2368 = vmatmul.mubr.msk.f32.gmra.mrb[22].mxu1 %vm458_vm2, %v1997_v62 }
 0x689   :  { %2370 = vmatprep.mubr.msk.f32.mxu1 %vm2481_vm0, %v2482_v3 }
 0x68c   :  { %2371 = vmatmul.mubr.msk.f32.gmra.mrb[24].mxu1 %vm458_vm2, %v1998_v63 }
 0x68d   :  { %2373 = vmatprep.mubr.msk.f32.mxu1 %vm2481_vm0, %v2482_v3 }
 0x6b0   :  { %v1693_v56 = vpop.permute.xlu0 %1692 }
 0x6b1   :  { %v1695_v1 = vsel %vm60_vm1, %v1541_v27, %v1693_v56 }
 0x6b2   :  { %1696 = vst.msk [vmem:[#allocation2 + $0x18] sm:$0xff] %vm458_vm2, %v1695_v1 }
 0x6b4   :  { %v1992_v60 = vpop.permute.xlu1 %1991 }
 0x6b5   :  { %v1994_v5 = vsel %vm60_vm1, %v1840_v33, %v1992_v60 }
 0x6b6   :  { %1995 = vst.msk [vmem:[#allocation2 + $0x20] sm:$0xff] %vm458_vm2, %v1994_v5 }
 0x6b9   :  { %v1999_v6 = vld [vmem:[#allocation2 + $0x18] sm:$0xff] }
 0x6ba   :  { %2374 = vmatmul.mubr.msk.f32.gmra.mrb[26].mxu1 %vm458_vm2, %v1999_v6 }
 0x6bb   :  { %2376 = vmatprep.mubr.msk.f32.mxu1 %vm2481_vm0, %v2482_v3  ;;  %v2198_v3 = vld [vmem:[%s3126_s13] ss:$0 sm:$0xff] }
 0x6bd   :  { %v2000_v4 = vld [vmem:[#allocation2 + $0x20] sm:$0xff] }
 0x6be   :  { %2377 = vmatmul.mubr.msk.f32.gmra.mrb[28].mxu1 %vm458_vm2, %v2000_v4 }
 0x74f   :  { %v2093_v7 = vpop.f32.mrb[20].mxu1 }
 0x750   :  { %v2094_v9 = vadd.f32 %v2191_v8, %v2093_v7  ;;  %v2366_v10 = vpop.f32.mrb[21].mxu1 }
 0x752   :  { %v2117_v15 = vadd.f32 %v2475_v14, %v2094_v9 }
 0x754   :  { %v2129_v16 = vmul.f32 %v2197_v13, %v2117_v15 }
 0x756   :  { %v2141_v19 = vadd.f32 %v2198_v3, %v2129_v16 }
 0x758   :  { %2146 = vst.msk [vmem:[%s3127_s14] sm:$0xff] %vm60_vm1, %v2141_v19 }
 0x75b   :  { %v2098_v17 = vpop.f32.mrb[22].mxu1 }
 0x75c   :  { %v2099_v22 = vadd.f32 %v2191_v8, %v2098_v17  ;;  %v2369_v24 = vpop.f32.mrb[23].mxu1 }
 0x75e   :  { %v2118_v28 = vadd.f32 %v2476_v26, %v2099_v22 }
 0x75f   :  { %v2103_v25 = vpop.f32.mrb[24].mxu1 }
 0x760   :  { %v2130_v20 = vmul.f32 %v2197_v13, %v2118_v28  ;;  %v2104_v30 = vadd.f32 %v2191_v8, %v2103_v25  ;;  %v2372_v21 = vpop.f32.mrb[25].mxu1 }
 0x762   :  { %v2142_v31 = vadd.f32 %v2198_v3, %v2130_v20  ;;  %v2119_v36 = vadd.f32 %v2477_v34, %v2104_v30 }
 0x764   :  { %2147 = vst.msk [vmem:[%s3127_s14 + $0x8] sm:$0xff] %vm60_vm1, %v2142_v31  ;;  %v2131_v37 = vmul.f32 %v2197_v13, %v2119_v36 }
 0x766   :  { %v2143_v18 = vadd.f32 %v2198_v3, %v2131_v37 }
 0x768   :  { %2148 = vst.msk [vmem:[%s3127_s14 + $0x10] sm:$0xff] %vm60_vm1, %v2143_v18 }
 0x78d   :  { %v2108_v38 = vpop.f32.mrb[26].mxu1 }
 0x78e   :  { %v2109_v23 = vadd.f32 %v2191_v8, %v2108_v38  ;;  %v2375_v39 = vpop.f32.mrb[27].mxu1 }
 0x790   :  { %v2120_v12 = vadd.f32 %v2478_v40, %v2109_v23 }
 0x791   :  { %v2113_v41 = vpop.f32.mrb[28].mxu1 }
 0x792   :  { %v2132_v44 = vmul.f32 %v2197_v13, %v2120_v12  ;;  %v2114_v46 = vadd.f32 %v2191_v8, %v2113_v41  ;;  %v2378_v35 = vpop.f32.mrb[29].mxu1 }
 0x794   :  { %v2144_v32 = vadd.f32 %v2198_v3, %v2132_v44  ;;  %v2121_v45 = vadd.f32 %v2479_v47, %v2114_v46 }
 0x796   :  { %2149 = vst.msk [vmem:[%s3127_s14 + $0x18] sm:$0xff] %vm60_vm1, %v2144_v32  ;;  %v2133_v11 = vmul.f32 %v2197_v13, %v2121_v45 }
 0x798   :  { %v2145_v49 = vadd.f32 %v2198_v3, %v2133_v11 }
 0x79a   :  { %2150 = vst.msk [vmem:[%s3127_s14 + $0x20] sm:$0xff] %vm60_vm1, %v2145_v49 }

// kernel: ours_forward.10
= control target key start
LH: loop header
LB: loop body
LE: loop exit
PB: predicated region body
PF: predicated region fallthrough
CT: control target
= control target key end

     0   :  { %vm58_vm0 = vcmask 130048   ;;  %v426_v43 = vlaneseq  ;;  %s2057_s28 = smov 32   ;;  %vm417_vm1 = vcmask 261120   ;;  %s2059_s20 = smov 80   ;;  %vm499_vm4 = vcmask 64512   ;;  %s2510_s4 = inlined_call_operand.vmem [shape: f32[16,32], index: 4, kind: input, shape index: {}]   ;;  %s2511_s3 = inlined_call_operand.vmem [shape: f32[16,32], index: 3, kind: input, shape index: {}]   ;;  %s2512_s0 = inlined_call_operand.vmem [shape: f32[40,16], index: 0, kind: input, shape index: {}]   ;;  %s2513_s6 = inlined_call_operand.vmem [shape: f32[16,64], index: 6, kind: input, shape index: {}]   ;;  %s2514_s5 = inlined_call_operand.vmem [shape: f32[1,32], index: 5, kind: input, shape index: {}]   ;;  %s2515_s8 = inlined_call_operand.vmem [shape: f32[2,16], index: 8, kind: input, shape index: {}]   ;;  %s2516_s9 = inlined_call_operand.vmem [shape: f32[2,16], index: 9, kind: input, shape index: {}]   ;;  %s2517_s7 = inlined_call_operand.vmem [shape: f32[1,64], index: 7, kind: input, shape index: {}]   ;;  %s2518_s1 = inlined_call_operand.vmem [shape: f32[40,32], index: 1, kind: input, shape index: {}]   ;;  %s2519_s15 = inlined_call_operand.vmem [shape: f32[32,32], index: 15, kind: output, shape index: {1}]   ;;  %s2520_s2 = inlined_call_operand.vmem [shape: f32[8,8], index: 2, kind: input, shape index: {}]   ;;  %s2521_s10 = inlined_call_operand.vmem [shape: f32[32,16], index: 10, kind: input, shape index: {}]   ;;  %s2522_s11 = inlined_call_operand.vmem [shape: f32[1,16], index: 11, kind: input, shape index: {}]   ;;  %s2523_s12 = inlined_call_operand.vmem [shape: f32[1,16], index: 12, kind: input, shape index: {}]   ;;  %s2524_s13 = inlined_call_operand.vmem [shape: f32[1,16], index: 13, kind: input, shape index: {}]   ;;  %s2525_s14 = inlined_call_operand.vmem [shape: f32[32,16], index: 14, kind: output, shape index: {0}]  }
   0x1   :  { %v56_v0 = vld [vmem:[%s2510_s4] sm:$0xff]  ;;  %v57_v1 = vld [vmem:[%s2510_s4 + $0x8] sm:$0xff]  ;;  %v51_v8 = vld [vmem:[%s2512_s0 + $0x10] sm:$0xff]  ;;  %vm2062_vm12 = vmmov 0  }
   0x2   :  { %v54_v2 = vld [vmem:[%s2511_s3] sm:$0xff]  ;;  %v1964_v3 = vpack.c.bf16 %v57_v1, %v56_v0  ;;  %v55_v4 = vld [vmem:[%s2511_s3 + $0x8] sm:$0xff]  ;;  %v52_v9 = vld [vmem:[%s2512_s0 + $0x18] sm:$0xff]  ;;  %v427_v45 = vshrl.u32 %v426_v43, 7 }
   0x3   :  { %v50_v5 = vld [vmem:[%s2512_s0 + $0x8] sm:$0xff]  ;;  %v49_v6 = vld [vmem:[%s2512_s0] sm:$0xff]  ;;  %v1968_v7 = vpack.c.bf16 %v55_v4, %v54_v2 }
   0x4   :  { %1884 = vmatprep.mubr.msk.f32.mxu1 %vm58_vm0, %v50_v5  ;;  %1894 = vmatprep.mubr.msk.f32.mxu0 %vm58_vm0, %v49_v6  ;;  %v53_v10 = vld [vmem:[%s2512_s0 + $0x20] sm:$0xff]  ;;  %v304_v12 = vld [vmem:[%s2513_s6 + $0x8] sm:$0xff]  ;;  %v2191_v47 = vsub.s32 0, %v427_v45  ;;  %v592_v50 = vsub.s32 1, %v427_v45 }
   0x5   :  { %1965 = vmatprep.subr.bf16.mxu1 %v1964_v3  ;;  %1969 = vmatprep.subr.bf16.mxu0 %v1968_v7  ;;  %v303_v11 = vld [vmem:[%s2513_s6] sm:$0xff] }
   0x6   :  { %1967 = vmatpush3.bf16.msra.mxu1 %v1964_v3  ;;  %1971 = vmatpush3.bf16.msra.mxu0 %v1968_v7  ;;  %v1972_v13 = vpack.c.bf16 %v304_v12, %v303_v11  ;;  %v1813_v16 = vld [vmem:[%s2514_s5] ss:$0 sm:$0xff]  ;;  %s2056_s5 = smov 112  }
   0x7   :  { %v424_v46 = vld [vmem:[%s2515_s8] sm:$0x3]  ;;  %s2058_s8 = smov 48  }
   0x8   :  { %1973 = vmatprep.subr.bf16.mxu1 %v1972_v13  ;;  %v429_v51 = vrot.slane %v424_v46, %v2191_v47  ;;  %v425_v53 = vld [vmem:[%s2516_s9] sm:$0x3]  ;;  %v593_v54 = vrot.slane %v424_v46, %v592_v50 }
   0x9   :  { %1885 = vmatmul.mubr.msk.f32.vlgmr.msra.gmra.mrb[0].mxu1 %vm58_vm0, %v51_v8  ;;  %1895 = vmatmul.mubr.msk.f32.vlgmr.msra.gmra.mrb[0].mxu0 %vm58_vm0, %v50_v5  ;;  %v445_v55 = vrot.slane %v425_v53, %v2191_v47  ;;  %v609_v56 = vrot.slane %v425_v53, %v592_v50  ;;  %v1818_v7 = vld [vmem:[%s2517_s7] ss:$0 sm:$0xff] }
   0xa   :  { %1887 = vmatprep.mubr.msk.f32.mxu1 %vm58_vm0, %v52_v9  ;;  %1897 = vmatprep.mubr.msk.f32.mxu0 %vm58_vm0, %v51_v8 }
   0xb   :  { %1975 = vmatpush3.bf16.msra.mxu1 %v1972_v13  ;;  %v409_v13 = vld [vmem:[%s2518_s1 + $0x8] sm:$0xff] }
   0xd   :  { %1888 = vmatmul.mubr.msk.f32.gmra.mrb[2].mxu1 %vm58_vm0, %v53_v10  ;;  %1898 = vmatmul.mubr.msk.f32.gmra.mrb[2].mxu0 %vm58_vm0, %v52_v9  ;;  %v410_v9 = vld [vmem:[%s2518_s1 + $0x10] sm:$0xff] }
  0xdc   :  { %v1886_v14 = vpop.f32.mrb[0].mxu1  ;;  %v1896_v15 = vpop.f32.mrb[0].mxu0 }
  0xdd   :  { %v137_v17 = vpop.f32.mrb[1].mxu1  ;;  %v231_v18 = vadd.f32 %v1896_v15, %v1886_v14  ;;  %v225_v19 = vpop.f32.mrb[1].mxu0 }
  0xde   :  { %v226_v20 = vadd.f32 %v225_v19, %v137_v17 }
  0xdf   :  { %v252_v21 = vadd.f32 %v1813_v16, %v231_v18 }
  0xe0   :  { %v1889_v22 = vpop.f32.mrb[2].mxu1  ;;  %v251_v23 = vadd.f32 %v1813_v16, %v226_v20  ;;  %v1899_v24 = vpop.f32.mrb[2].mxu0 }
  0xe1   :  { %v147_v25 = vpop.f32.mrb[3].mxu1  ;;  %v1815_v26 = vmul.f32 -1.442695, %v252_v21  ;;  %v241_v27 = vadd.f32 %v1899_v24, %v1889_v22  ;;  %v235_v28 = vpop.f32.mrb[3].mxu0  ;;  %v411_v24 = vld [vmem:[%s2518_s1 + $0x18] sm:$0xff] }
  0xe2   :  { %v1814_v29 = vmul.f32 -1.442695, %v251_v23  ;;  %v236_v30 = vadd.f32 %v235_v28, %v147_v25 }
  0xe3   :  { %1996 = vpow2.f32 %v1815_v26  ;;  %v254_v31 = vadd.f32 %v1813_v16, %v241_v27 }
  0xe4   :  { %1998 = vpow2.f32 %v1814_v29  ;;  %v253_v32 = vadd.f32 %v1813_v16, %v236_v30 }
  0xe5   :  { %v1817_v33 = vmul.f32 -1.442695, %v254_v31 }
  0xe6   :  { %v1816_v34 = vmul.f32 -1.442695, %v253_v32 }
  0xe7   :  { %2000 = vpow2.f32 %v1817_v33 }
  0xe8   :  { %2002 = vpow2.f32 %v1816_v34 }
  0xed   :  { %v1997_v35 = vpop.eup %1996 }
  0xee   :  { %v1999_v36 = vpop.eup %1998  ;;  %v272_v38 = vadd.f32 1.0, %v1997_v35 }
  0xef   :  { %v271_v37 = vadd.f32 1.0, %v1999_v36 }
  0xf1   :  { %v2001_v39 = vpop.eup %2000  ;;  %2004 = vrcp.f32 %v271_v37 }
  0xf2   :  { %v2003_v40 = vpop.eup %2002  ;;  %v274_v41 = vadd.f32 1.0, %v2001_v39  ;;  %2006 = vrcp.f32 %v272_v38 }
  0xf3   :  { %v273_v42 = vadd.f32 1.0, %v2003_v40 }
  0xf5   :  { %2008 = vrcp.f32 %v273_v42 }
  0xf6   :  { %2010 = vrcp.f32 %v274_v41 }
  0xf7   :  { %2012 = vtanh.f32 %v251_v23 }
  0xf8   :  { %2014 = vtanh.f32 %v252_v21  ;;  %v412_v21 = vld [vmem:[%s2518_s1 + $0x20] sm:$0xff]  ;;  %s2060_s1 = smov 96  }
  0xf9   :  { %2016 = vtanh.f32 %v253_v32 }
  0xfa   :  { %2018 = vtanh.f32 %v254_v31 }
  0xfb   :  { %v2005_v44 = vpop.eup %2004 }
  0xfc   :  { %287 = vrot.lane.b32.xlu0 %v2005_v44, %s2056_s5  ;;  %v2007_v48 = vpop.eup %2006 }
  0xff   :  { %v2009_v49 = vpop.eup %2008 }
 0x100   :  { %291 = vrot.lane.b32.xlu1 %v2009_v49, %s2056_s5  ;;  %289 = vrot.lane.b32.xlu0 %v2007_v48, %s2056_s5  ;;  %v2011_v52 = vpop.eup %2010 }
 0x101   :  { %v2013_v57 = vpop.eup %2012 }
 0x102   :  { %v2015_v60 = vpop.eup %2014 }
 0x103   :  { %v2017_v61 = vpop.eup %2016 }
 0x104   :  { %293 = vrot.lane.b32.xlu1 %v2011_v52, %s2056_s5  ;;  %431 = vrot.lane.b32.xlu0 %v429_v51, %s2057_s28  ;;  %v2019_v2 = vpop.eup %2018 }
 0x108   :  { %595 = vrot.lane.b32.xlu1 %v593_v54, %s2058_s8  ;;  %447 = vrot.lane.b32.xlu0 %v445_v55, %s2057_s28 }
 0x10c   :  { %611 = vrot.lane.b32.xlu1 %v609_v56, %s2058_s8 }
 0x16e   :  { %v288_v58 = vpop.permute.xlu0 %287 }
 0x16f   :  { %v299_v59 = vmul.f32 %v2013_v57, %v288_v58 }
 0x171   :  { %1904 = vmatprep.mubr.msk.f32.mxu1 %vm58_vm0, %v299_v59 }
 0x172   :  { %v292_v62 = vpop.permute.xlu1 %291  ;;  %v290_v63 = vpop.permute.xlu0 %289 }
 0x173   :  { %v301_v0 = vmul.f32 %v2017_v61, %v292_v62  ;;  %v300_v1 = vmul.f32 %v2015_v60, %v290_v63 }
 0x175   :  { %1905 = vmatmul.mubr.msk.f32.vlgmr.msra.gmra.mrb[4].mxu1 %vm58_vm0, %v300_v1 }
 0x176   :  { %v294_v3 = vpop.permute.xlu1 %293  ;;  %1907 = vmatprep.mubr.msk.f32.mxu1 %vm58_vm0, %v301_v0  ;;  %v432_v6 = vpop.permute.xlu0 %431 }
 0x177   :  { %v302_v4 = vmul.f32 %v2019_v2, %v294_v3 }
 0x179   :  { %1908 = vmatmul.mubr.msk.f32.gmra.mrb[6].mxu1 %vm58_vm0, %v302_v4 }
 0x17a   :  { %v596_v5 = vpop.permute.xlu1 %595  ;;  %v448_v19 = vpop.permute.xlu0 %447 }
 0x17e   :  { %v612_v10 = vpop.permute.xlu1 %611 }
 0x248   :  { %v1906_v8 = vpop.f32.mrb[4].mxu1 }
 0x249   :  { %v2208_v11 = vadd.f32 %v1906_v8, %v1818_v7  ;;  %v390_v12 = vpop.f32.mrb[5].mxu1 }
 0x24a   :  { %v2213_v14 = vadd.f32 %v1818_v7, %v390_v12 }
 0x24b   :  { %v414_v15 = vadd.f32 %v410_v9, %v2208_v11  ;;  %v913_v16 = vmul.f32 %v612_v10, %v2208_v11  ;;  %v905_v17 = vmul.f32 %v596_v5, %v2208_v11  ;;  %v766_v27 = vmul.f32 %v448_v19, %v2208_v11 }
 0x24c   :  { %v413_v18 = vadd.f32 %v409_v13, %v2213_v14  ;;  %v1909_v20 = vpop.f32.mrb[6].mxu1  ;;  %v758_v28 = vmul.f32 %v432_v6, %v2208_v11  ;;  %v598_v30 = vmul.f32 %v596_v5, %v2213_v14  ;;  %v434_v31 = vmul.f32 %v432_v6, %v2213_v14 }
 0x24d   :  { %419 = vst.msk [vmem:[%s2519_s15 + $0x8] sm:$0xff] %vm417_vm1, %v414_v15  ;;  %v2226_v22 = vadd.f32 %v1909_v20, %v1818_v7  ;;  %915 = vrot.lane.b32.xlu1 %v913_v16, %s2059_s20  ;;  %907 = vrot.lane.b32.xlu0 %v905_v17, %s2059_s20  ;;  %v400_v23 = vpop.f32.mrb[7].mxu1  ;;  %v450_v32 = vmul.f32 %v448_v19, %v2213_v14 }
 0x24e   :  { %418 = vst.msk [vmem:[%s2519_s15] sm:$0xff] %vm417_vm1, %v413_v18  ;;  %v2237_v25 = vadd.f32 %v1818_v7, %v400_v23  ;;  %v614_v34 = vmul.f32 %v612_v10, %v2213_v14 }
 0x24f   :  { %v416_v26 = vadd.f32 %v412_v21, %v2226_v22  ;;  %v1503_v33 = vmul.f32 %v596_v5, %v2226_v22  ;;  %v1356_v35 = vmul.f32 %v432_v6, %v2226_v22  ;;  %v1511_v36 = vmul.f32 %v612_v10, %v2226_v22 }
 0x250   :  { %v415_v29 = vadd.f32 %v411_v24, %v2237_v25  ;;  %v1057_v37 = vmul.f32 %v432_v6, %v2237_v25  ;;  %v1364_v38 = vmul.f32 %v448_v19, %v2226_v22  ;;  %v1065_v39 = vmul.f32 %v448_v19, %v2237_v25 }
 0x251   :  { %421 = vst.msk [vmem:[%s2519_s15 + $0x18] sm:$0xff] %vm417_vm1, %v416_v26  ;;  %768 = vrot.lane.b32.xlu1 %v766_v27, %s2060_s1  ;;  %760 = vrot.lane.b32.xlu0 %v758_v28, %s2060_s1  ;;  %v1204_v40 = vmul.f32 %v596_v5, %v2237_v25  ;;  %v1212_v41 = vmul.f32 %v612_v10, %v2237_v25 }
 0x252   :  { %420 = vst.msk [vmem:[%s2519_s15 + $0x10] sm:$0xff] %vm417_vm1, %v415_v29 }
 0x255   :  { %600 = vrot.lane.b32.xlu1 %v598_v30, %s2059_s20  ;;  %436 = vrot.lane.b32.xlu0 %v434_v31, %s2060_s1 }
 0x259   :  { %452 = vrot.lane.b32.xlu1 %v450_v32, %s2060_s1  ;;  %1505 = vrot.lane.b32.xlu0 %v1503_v33, %s2059_s20  ;;  %v2301_v33 = vld [vmem:[%s2520_s2] sm:$0xff]  ;;  %s2063_s2 = smov 16  }
 0x25a   :  { %vm423_vm2 = vcmp.gt.f32.partialorder %v2301_v33, 0.0 }
 0x25d   :  { %616 = vrot.lane.b32.xlu1 %v614_v34, %s2059_s20  ;;  %1358 = vrot.lane.b32.xlu0 %v1356_v35, %s2060_s1 }
 0x261   :  { %1513 = vrot.lane.b32.xlu1 %v1511_v36, %s2059_s20  ;;  %1059 = vrot.lane.b32.xlu0 %v1057_v37, %s2060_s1 }
 0x265   :  { %1366 = vrot.lane.b32.xlu1 %v1364_v38, %s2060_s1  ;;  %1067 = vrot.lane.b32.xlu0 %v1065_v39, %s2060_s1 }
 0x269   :  { %1206 = vrot.lane.b32.xlu1 %v1204_v40, %s2059_s20 }
 0x26d   :  { %1214 = vrot.lane.b32.xlu1 %v1212_v41, %s2059_s20 }
 0x2bf   :  { %v916_v42 = vpop.permute.xlu1 %915  ;;  %v908_v43 = vpop.permute.xlu0 %907 }
 0x2c0   :  { %v910_v44 = vsel %vm58_vm0, %v908_v43, 0.0  ;;  %v918_v48 = vsel %vm58_vm0, %v916_v42, 0.0 }
 0x2c1   :  { %911 = vadd.xlane.f32.xlu1 %v910_v44 }
 0x2c3   :  { %v769_v45 = vpop.permute.xlu1 %768  ;;  %v761_v46 = vpop.permute.xlu0 %760 }
 0x2c4   :  { %v763_v49 = vsel %vm58_vm0, %v761_v46, 0.0  ;;  %v771_v52 = vsel %vm58_vm0, %v769_v45, 0.0 }
 0x2c5   :  { %919 = vadd.xlane.f32.xlu1 %v918_v48  ;;  %764 = vadd.xlane.f32.xlu0 %v763_v49 }
 0x2c7   :  { %v601_v50 = vpop.permute.xlu1 %600  ;;  %v437_v53 = vpop.permute.xlu0 %436 }
 0x2c8   :  { %v603_v51 = vsel %vm58_vm0, %v601_v50, 0.0  ;;  %v439_v55 = vsel %vm58_vm0, %v437_v53, 0.0 }
 0x2c9   :  { %604 = vadd.xlane.f32.xlu1 %v603_v51  ;;  %772 = vadd.xlane.f32.xlu0 %v771_v52 }
 0x2cb   :  { %v453_v54 = vpop.permute.xlu1 %452  ;;  %v1506_v56 = vpop.permute.xlu0 %1505 }
 0x2cc   :  { %v455_v59 = vsel %vm58_vm0, %v453_v54, 0.0  ;;  %v1508_v61 = vsel %vm58_vm0, %v1506_v56, 0.0 }
 0x2cd   :  { %440 = vadd.xlane.f32.xlu0 %v439_v55 }
 0x2cf   :  { %v617_v57 = vpop.permute.xlu1 %616  ;;  %v1359_v62 = vpop.permute.xlu0 %1358 }
 0x2d0   :  { %v619_v58 = vsel %vm58_vm0, %v617_v57, 0.0  ;;  %v1361_v4 = vsel %vm58_vm0, %v1359_v62, 0.0 }
 0x2d1   :  { %620 = vadd.xlane.f32.xlu1 %v619_v58  ;;  %456 = vadd.xlane.f32.xlu0 %v455_v59 }
 0x2d3   :  { %v1514_v60 = vpop.permute.xlu1 %1513  ;;  %v1060_v2 = vpop.permute.xlu0 %1059 }
 0x2d4   :  { %v1516_v1 = vsel %vm58_vm0, %v1514_v60, 0.0  ;;  %v1062_v9 = vsel %vm58_vm0, %v1060_v2, 0.0 }
 0x2d5   :  { %1509 = vadd.xlane.f32.xlu1 %v1508_v61 }
 0x2d7   :  { %v1367_v63 = vpop.permute.xlu1 %1366  ;;  %v1068_v8 = vpop.permute.xlu0 %1067 }
 0x2d8   :  { %v1369_v0 = vsel %vm58_vm0, %v1367_v63, 0.0  ;;  %v1070_v10 = vsel %vm58_vm0, %v1068_v8, 0.0 }
 0x2d9   :  { %1370 = vadd.xlane.f32.xlu0 %v1369_v0  ;;  %1517 = vadd.xlane.f32.xlu1 %v1516_v1 }
 0x2db   :  { %v1207_v3 = vpop.permute.xlu1 %1206 }
 0x2dc   :  { %v1209_v7 = vsel %vm58_vm0, %v1207_v3, 0.0 }
 0x2dd   :  { %1362 = vadd.xlane.f32.xlu1 %v1361_v4 }
 0x2df   :  { %v1215_v5 = vpop.permute.xlu1 %1214 }
 0x2e0   :  { %v1217_v6 = vsel %vm58_vm0, %v1215_v5, 0.0 }
 0x2e1   :  { %1218 = vadd.xlane.f32.xlu0 %v1217_v6  ;;  %1210 = vadd.xlane.f32.xlu1 %v1209_v7 }
 0x2e5   :  { %1063 = vadd.xlane.f32.xlu0 %v1062_v9  ;;  %1071 = vadd.xlane.f32.xlu1 %v1070_v10 }
 0x34e   :  { %v912_v12 = vpop.xlane.xlu1 %911 }
 0x34f   :  { %921 = vxpose.xlu0.b32.start.end [1/1] (short) (narrow) %v912_v12, 8 }
 0x352   :  { %v920_v13 = vpop.xlane.xlu1 %919  ;;  %v765_v15 = vpop.xlane.xlu0 %764 }
 0x353   :  { %774 = vxpose.xlu1.b32.start.end [1/1] (short) (narrow) %v765_v15, 8 }
 0x356   :  { %v605_v16 = vpop.xlane.xlu1 %604  ;;  %v773_v17 = vpop.xlane.xlu0 %772 }
 0x357   :  { %622 = vxpose.xlu1.b32.start.end [1/1] (short) (narrow) %v605_v16, 8 }
 0x35a   :  { %v441_v18 = vpop.xlane.xlu0 %440 }
 0x35b   :  { %458 = vxpose.xlu0.b32.start.end [1/1] (short) (narrow) %v441_v18, 8 }
 0x35e   :  { %v621_v19 = vpop.xlane.xlu1 %620  ;;  %v457_v21 = vpop.xlane.xlu0 %456 }
 0x362   :  { %v1510_v20 = vpop.xlane.xlu1 %1509 }
 0x363   :  { %1519 = vxpose.xlu0.b32.start.end [1/1] (short) (narrow) %v1510_v20, 8 }
 0x366   :  { %v1518_v23 = vpop.xlane.xlu1 %1517  ;;  %v2293_v24 = vpop.xlane.xlu0 %1370 }
 0x36a   :  { %v1363_v26 = vpop.xlane.xlu1 %1362 }
 0x36e   :  { %v1211_v27 = vpop.xlane.xlu1 %1210  ;;  %v2295_v28 = vpop.xlane.xlu0 %1218 }
 0x36f   :  { %1220 = vxpose.xlu0.b32.start.end [1/1] (short) (narrow) %v1211_v27, 8 }
 0x372   :  { %v1064_v29 = vpop.xlane.xlu0 %1063  ;;  %v1072_v30 = vpop.xlane.xlu1 %1071 }
 0x373   :  { %1073 = vxpose.xlu0.b32.start.end [1/1] (short) (narrow) %v1064_v29, 8 }
 0x3cf   :  { %v937_v31 = vpop.trf.xlu0 }
 0x3d0   :  { %v956_v32 = vrot.slane %v937_v31, %v2191_v47 }
 0x3d2   :  { %v957_v34 = vadd.f32 %v956_v32, %v920_v13  ;;  %v2061_v13 = vmov 0.0  }
 0x3d3   :  { %v790_v35 = vpop.trf.xlu1  ;;  %1910 = vmatprep.subr.mxu1 %v2061_v13  ;;  %1920 = vmatprep.subr.mxu0 %v2061_v13 }
 0x3d4   :  { %v809_v36 = vrot.slane %v790_v35, %v2191_v47  ;;  %vm958_vm3 = vcmp.ge.f32.partialorder %v957_v34, 0.0  ;;  %v959_v37 = vmul.f32 0.2, %v957_v34  ;;  %1912 = vmatprep.mubr.msk.f32.mxu1 %vm2062_vm12, %v2061_v13  ;;  %1922 = vmatprep.mubr.msk.f32.mxu0 %vm2062_vm12, %v2061_v13 }
 0x3d6   :  { %v810_v38 = vadd.f32 %v809_v36, %v773_v17  ;;  %v960_v39 = vsel %vm958_vm3, %v957_v34, %v959_v37 }
 0x3d7   :  { %v638_v40 = vpop.trf.xlu1  ;;  %v2307_v41 = vsel %vm423_vm2, %v960_v39, -1e+30 }
 0x3d8   :  { %v657_v42 = vrot.slane %v638_v40, %v2191_v47  ;;  %v962_v43 = vsel %vm499_vm4, %v2307_v41, -inf  ;;  %vm811_vm5 = vcmp.ge.f32.partialorder %v810_v38, 0.0  ;;  %v812_v44 = vmul.f32 0.2, %v810_v38 }
 0x3d9   :  { %963 = vmax.xlane.f32.xlu0 %v962_v43 }
 0x3da   :  { %v658_v45 = vadd.f32 %v657_v42, %v621_v19  ;;  %v813_v46 = vsel %vm811_vm5, %v810_v38, %v812_v44 }
 0x3db   :  { %v474_v48 = vpop.trf.xlu0  ;;  %v2314_v49 = vsel %vm423_vm2, %v813_v46, -1e+30 }
 0x3dc   :  { %v493_v50 = vrot.slane %v474_v48, %v2191_v47  ;;  %v815_v51 = vsel %vm499_vm4, %v2314_v49, -inf  ;;  %v660_v53 = vmul.f32 0.2, %v658_v45  ;;  %vm659_vm6 = vcmp.ge.f32.partialorder %v658_v45, 0.0 }
 0x3dd   :  { %816 = vmax.xlane.f32.xlu1 %v815_v51 }
 0x3de   :  { %v494_v52 = vadd.f32 %v493_v50, %v457_v21  ;;  %v661_v56 = vsel %vm659_vm6, %v658_v45, %v660_v53 }
 0x3df   :  { %v662_v61 = vsel %vm423_vm2, %v661_v56, -1e+30 }
 0x3e0   :  { %vm495_vm7 = vcmp.ge.f32.partialorder %v494_v52, 0.0  ;;  %v496_v54 = vmul.f32 0.2, %v494_v52  ;;  %v663_v63 = vsel %vm499_vm4, %v662_v61, -inf }
 0x3e2   :  { %v497_v55 = vsel %vm495_vm7, %v494_v52, %v496_v54 }
 0x3e3   :  { %v1535_v57 = vpop.trf.xlu0  ;;  %v498_v58 = vsel %vm423_vm2, %v497_v55, -1e+30 }
 0x3e4   :  { %v1554_v59 = vrot.slane %v1535_v57, %v2191_v47  ;;  %v500_v60 = vsel %vm499_vm4, %v498_v58, -inf }
 0x3e5   :  { %501 = vmax.xlane.f32.xlu0 %v500_v60 }
 0x3e6   :  { %v1555_v62 = vadd.f32 %v1554_v59, %v1518_v23 }
 0x3e8   :  { %vm1556_vm8 = vcmp.ge.f32.partialorder %v1555_v62, 0.0  ;;  %v1557_v0 = vmul.f32 0.2, %v1555_v62 }
 0x3e9   :  { %664 = vmax.xlane.f32.xlu0 %v663_v63 }
 0x3ea   :  { %v1558_v1 = vsel %vm1556_vm8, %v1555_v62, %v1557_v0 }
 0x3eb   :  { %v2328_v2 = vsel %vm423_vm2, %v1558_v1, -1e+30 }
 0x3ec   :  { %v1560_v3 = vsel %vm499_vm4, %v2328_v2, -inf }
 0x3ed   :  { %1561 = vmax.xlane.f32.xlu0 %v1560_v3 }
 0x3ef   :  { %v1236_v4 = vpop.trf.xlu0 }
 0x3f3   :  { %v1089_v5 = vpop.trf.xlu0 }
 0x3f4   :  { %v1108_v6 = vrot.slane %v1089_v5, %v2191_v47 }
 0x3f6   :  { %v1109_v7 = vadd.f32 %v1108_v6, %v1072_v30 }
 0x3f8   :  { %v1111_v8 = vmul.f32 0.2, %v1109_v7  ;;  %vm1110_vm9 = vcmp.ge.f32.partialorder %v1109_v7, 0.0 }
 0x3fa   :  { %v1112_v9 = vsel %vm1110_vm9, %v1109_v7, %v1111_v8 }
 0x3fb   :  { %v2335_v10 = vsel %vm423_vm2, %v1112_v9, -1e+30 }
 0x3fc   :  { %v1114_v12 = vsel %vm499_vm4, %v2335_v10, -inf }
 0x41a   :  { %1372 = vxpose.xlu0.b32.start.end [1/1] (short) (narrow) %v1363_v26, 8  ;;  %v1255_v26 = vrot.slane %v1236_v4, %v2191_v47 }
 0x41c   :  { %v1256_v29 = vadd.f32 %v1255_v26, %v2295_v28 }
 0x41e   :  { %v1258_v34 = vmul.f32 0.2, %v1256_v29  ;;  %vm1257_vm10 = vcmp.ge.f32.partialorder %v1256_v29, 0.0 }
 0x420   :  { %v1259_v37 = vsel %vm1257_vm10, %v1256_v29, %v1258_v34 }
 0x421   :  { %v1260_v28 = vsel %vm423_vm2, %v1259_v37, -1e+30 }
 0x447   :  { %1115 = vmax.xlane.f32.xlu0 %v1114_v12 }
 0x45d   :  { %514 = vrot.lane.b32.xlu0 %v2213_v14, %s2060_s1 }
 0x466   :  { %v964_v15 = vpop.xlane.xlu0 %963 }
 0x46a   :  { %v817_v57 = vpop.xlane.xlu1 %816 }
 0x46b   :  { %v818_v6 = vsub.f32 %v2314_v49, %v817_v57 }
 0x46d   :  { %v819_v8 = vmul.f32 1.442695, %v818_v6 }
 0x472   :  { %v502_v16 = vpop.xlane.xlu0 %501 }
 0x473   :  { %v503_v42 = vsub.f32 %v498_v58, %v502_v16 }
 0x475   :  { %v504_v43 = vmul.f32 1.442695, %v503_v42 }
 0x476   :  { %v665_v17 = vpop.xlane.xlu0 %664 }
 0x477   :  { %v666_v18 = vsub.f32 %v662_v61, %v665_v17 }
 0x479   :  { %v667_v19 = vmul.f32 1.442695, %v666_v18 }
 0x47a   :  { %v1562_v27 = vpop.xlane.xlu0 %1561 }
 0x47b   :  { %2020 = vpow2.f32 %v667_v19  ;;  %v1563_v52 = vsub.f32 %v2328_v2, %v1562_v27 }
 0x47d   :  { %v1564_v53 = vmul.f32 1.442695, %v1563_v52 }
 0x485   :  { %v2021_v20 = vpop.eup %2020 }
 0x486   :  { %v2345_v21 = vsel %vm423_vm2, %v2021_v20, 0.0 }
 0x487   :  { %v670_v23 = vsel %vm499_vm4, %v2345_v21, 0.0 }
 0x488   :  { %671 = vadd.xlane.f32.xlu0 %v670_v23 }
 0x49a   :  { %v1388_v30 = vpop.trf.xlu0 }
 0x49b   :  { %v1407_v31 = vrot.slane %v1388_v30, %v2191_v47  ;;  %v1261_v47 = vsel %vm499_vm4, %v1260_v28, -inf }
 0x49d   :  { %v1408_v32 = vadd.f32 %v1407_v31, %v2293_v24  ;;  %v965_v24 = vsub.f32 %v2307_v41, %v964_v15 }
 0x49f   :  { %vm1409_vm11 = vcmp.ge.f32.partialorder %v1408_v32, 0.0  ;;  %v1410_v35 = vmul.f32 0.2, %v1408_v32  ;;  %v966_v40 = vmul.f32 1.442695, %v965_v24 }
 0x4a1   :  { %v1411_v36 = vsel %vm1409_vm11, %v1408_v32, %v1410_v35  ;;  %2022 = vpow2.f32 %v966_v40 }
 0x4a2   :  { %v2355_v38 = vsel %vm423_vm2, %v1411_v36, -1e+30  ;;  %2024 = vpow2.f32 %v504_v43 }
 0x4a3   :  { %v1413_v39 = vsel %vm499_vm4, %v2355_v38, -inf  ;;  %2026 = vpow2.f32 %v1564_v53 }
 0x4a4   :  { %1414 = vmax.xlane.f32.xlu1 %v1413_v39 }
 0x4a8   :  { %1262 = vmax.xlane.f32.xlu1 %v1261_v47 }
 0x4ab   :  { %v2023_v45 = vpop.eup %2022 }
 0x4ac   :  { %v2367_v48 = vsel %vm423_vm2, %v2023_v45, 0.0  ;;  %v2025_v50 = vpop.eup %2024 }
 0x4ad   :  { %v506_v41 = vsel %vm423_vm2, %v2025_v50, 0.0  ;;  %v2027_v54 = vpop.eup %2026 }
 0x4ae   :  { %v507_v51 = vsel %vm499_vm4, %v506_v41, 0.0  ;;  %v2384_v55 = vsel %vm423_vm2, %v2027_v54, 0.0 }
 0x4af   :  { %v1567_v56 = vsel %vm499_vm4, %v2384_v55, 0.0 }
 0x4b9   :  { %676 = vrot.lane.b32.xlu1 %v2213_v14, %s2059_s20  ;;  %v969_v14 = vsel %vm499_vm4, %v2367_v48, 0.0 }
 0x4d4   :  { %v1116_v44 = vpop.xlane.xlu0 %1115 }
 0x4d5   :  { %v1117_v60 = vsub.f32 %v2335_v10, %v1116_v44 }
 0x4d7   :  { %v1118_v63 = vmul.f32 1.442695, %v1117_v60 }
 0x4d8   :  { %v515_v46 = vpop.permute.xlu0 %514 }
 0x4d9   :  { %1911 = vmatpush3.msra.mxu1 %v515_v46 }
 0x4da   :  { %1915 = vmatprep.subr.mxu1 %v2061_v13 }
 0x4dd   :  { %970 = vadd.xlane.f32.xlu1 %v969_v14 }
 0x4e1   :  { %508 = vadd.xlane.f32.xlu1 %v507_v51 }
 0x4f2   :  { %975 = vrot.lane.b32.xlu1 %v2208_v11, %s2059_s20 }
 0x515   :  { %v672_v15 = vpop.xlane.xlu0 %671 }
 0x516   :  { %1568 = vadd.xlane.f32.xlu1 %v1567_v56  ;;  %v673_v17 = vadd.f32 1e-20, %v672_v15 }
 0x527   :  { %1573 = vrot.lane.b32.xlu1 %v2226_v22, %s2059_s20 }
 0x52b   :  { %1128 = vrot.lane.b32.xlu1 %v2237_v25, %s2060_s1 }
 0x531   :  { %v1415_v58 = vpop.xlane.xlu1 %1414 }
 0x532   :  { %v1416_v9 = vsub.f32 %v2355_v38, %v1415_v58 }
 0x534   :  { %v1417_v12 = vmul.f32 1.442695, %v1416_v9 }
 0x535   :  { %v1263_v59 = vpop.xlane.xlu1 %1262 }
 0x536   :  { %v1264_v61 = vsub.f32 %v1260_v28, %v1263_v59 }
 0x538   :  { %v1265_v62 = vmul.f32 1.442695, %v1264_v61 }
 0x539   :  { %v677_v7 = vpop.permute.xlu1 %676 }
 0x53a   :  { %2028 = vpow2.f32 %v1265_v62  ;;  %v1659_v62 = vld [vmem:[%s2521_s10] sm:$0xff] }
 0x53b   :  { %2030 = vpow2.f32 %v1118_v63 }
 0x53c   :  { %2032 = vpow2.f32 %v819_v8 }
 0x53d   :  { %2034 = vpow2.f32 %v1417_v12 }
 0x544   :  { %v2029_v0 = vpop.eup %2028 }
 0x545   :  { %v1267_v1 = vsel %vm423_vm2, %v2029_v0, 0.0  ;;  %v2031_v3 = vpop.eup %2030  ;;  %v1661_v0 = vld [vmem:[%s2521_s10 + $0x10] sm:$0xff] }
 0x546   :  { %v1268_v2 = vsel %vm499_vm4, %v1267_v1, 0.0  ;;  %v2398_v4 = vsel %vm423_vm2, %v2031_v3, 0.0  ;;  %v2033_v19 = vpop.eup %2032 }
 0x547   :  { %1269 = vadd.xlane.f32.xlu0 %v1268_v2  ;;  %v1121_v5 = vsel %vm499_vm4, %v2398_v4, 0.0  ;;  %v2035_v49 = vpop.eup %2034 }
 0x548   :  { %v2413_v27 = vsel %vm423_vm2, %v2035_v49, 0.0 }
 0x549   :  { %v1420_v30 = vsel %vm499_vm4, %v2413_v27, 0.0 }
 0x54f   :  { %1122 = vadd.xlane.f32.xlu1 %v1121_v5 }
 0x55d   :  { %1274 = vrot.lane.b32.xlu0 %v2237_v25, %s2059_s20 }
 0x560   :  { %1427 = vrot.lane.b32.xlu1 %v2226_v22, %s2060_s1  ;;  %v821_v22 = vsel %vm423_vm2, %v2033_v19, 0.0 }
 0x561   :  { %v822_v23 = vsel %vm499_vm4, %v821_v22, 0.0 }
 0x56a   :  { %v971_v10 = vpop.xlane.xlu1 %970 }
 0x56b   :  { %v972_v25 = vadd.f32 1e-20, %v971_v10 }
 0x56e   :  { %v509_v16 = vpop.xlane.xlu1 %508 }
 0x56f   :  { %v510_v18 = vadd.f32 1e-20, %v509_v16 }
 0x571   :  { %2036 = vrcp.f32 %v510_v18 }
 0x572   :  { %2038 = vrcp.f32 %v673_v17  ;;  %v976_v34 = vpop.permute.xlu1 %975 }
 0x573   :  { %2040 = vrcp.f32 %v972_v25 }
 0x57b   :  { %v2037_v20 = vpop.eup %2036 }
 0x57c   :  { %v512_v26 = vmul.f32 %v2037_v20, %v506_v41  ;;  %823 = vadd.xlane.f32.xlu0 %v822_v23  ;;  %v2039_v29 = vpop.eup %2038 }
 0x57d   :  { %v675_v31 = vmul.f32 %v2039_v29, %v2345_v21  ;;  %v2041_v32 = vpop.eup %2040 }
 0x57e   :  { %1913 = vmatmul.mubr.msk.f32.vlgmr.msra.gmra.mrb[8].mxu1 %vm499_vm4, %v512_v26  ;;  %v974_v33 = vmul.f32 %v2041_v32, %v2367_v48 }
 0x57f   :  { %1916 = vmatpush3.msra.mxu1 %v677_v7  ;;  %1917 = vmatprep.mubr.msk.f32.mxu1 %vm2062_vm12, %v2061_v13 }
 0x580   :  { %1421 = vadd.xlane.f32.xlu0 %v1420_v30  ;;  %1925 = vmatprep.subr.mxu1 %v2061_v13  ;;  %v1831_v30 = vld [vmem:[%s2522_s11] ss:$0 sm:$0xff] }
 0x582   :  { %1918 = vmatmul.mubr.msk.f32.vlgmr.msra.gmra.mrb[10].mxu1 %vm499_vm4, %v675_v31 }
 0x583   :  { %1926 = vmatpush3.msra.mxu1 %v976_v34  ;;  %1927 = vmatprep.mubr.msk.f32.mxu1 %vm2062_vm12, %v2061_v13 }
 0x584   :  { %1935 = vmatprep.subr.mxu1 %v2061_v13 }
 0x586   :  { %1928 = vmatmul.mubr.msk.f32.vlgmr.msra.gmra.mrb[12].mxu1 %vm499_vm4, %v974_v33  ;;  %v1836_v33 = vld [vmem:[%s2523_s12] ss:$0 sm:$0xff] }
 0x587   :  { %1937 = vmatprep.mubr.msk.f32.mxu1 %vm2062_vm12, %v2061_v13 }
 0x596   :  { %829 = vrot.lane.b32.xlu0 %v2208_v11, %s2060_s1 }
 0x5a3   :  { %v1569_v21 = vpop.xlane.xlu1 %1568 }
 0x5a4   :  { %v1570_v36 = vadd.f32 1e-20, %v1569_v21 }
 0x5a7   :  { %v1574_v24 = vpop.permute.xlu1 %1573 }
 0x5ab   :  { %v1129_v40 = vpop.permute.xlu1 %1128 }
 0x5d4   :  { %v1270_v35 = vpop.xlane.xlu0 %1269 }
 0x5d5   :  { %v1271_v37 = vadd.f32 1e-20, %v1270_v35  ;;  %v2052_v35 = vld [vmem:[%s2512_s0 + $0x10] sm:$0xff] }
 0x5d7   :  { %2042 = vrcp.f32 %v1271_v37  ;;  %v1837_v37 = vld [vmem:[%s2524_s13] ss:$0 sm:$0xff] }
 0x5d8   :  { %v1275_v38 = vpop.permute.xlu0 %1274  ;;  %2044 = vrcp.f32 %v1570_v36 }
 0x5d9   :  { %1936 = vmatpush3.msra.mxu1 %v1275_v38  ;;  %v2053_v38 = vld [vmem:[%s2512_s0 + $0x8] sm:$0xff] }
 0x5da   :  { %1945 = vmatprep.subr.mxu1 %v2061_v13 }
 0x5dc   :  { %v1123_v42 = vpop.xlane.xlu1 %1122 }
 0x5dd   :  { %v1124_v44 = vadd.f32 1e-20, %v1123_v42 }
 0x5e0   :  { %v1428_v54 = vpop.permute.xlu1 %1427 }
 0x5e1   :  { %v2043_v39 = vpop.eup %2042 }
 0x5e2   :  { %v1273_v28 = vmul.f32 %v2043_v39, %v1267_v1  ;;  %v2045_v47 = vpop.eup %2044  ;;  %v1662_v1 = vld [vmem:[%s2521_s10 + $0x18] sm:$0xff] }
 0x5e3   :  { %v1572_v11 = vmul.f32 %v2045_v47, %v2384_v55  ;;  %v1980_v2 = vpack.c.bf16 %v1662_v1, %v1661_v0 }
 0x5e4   :  { %1938 = vmatmul.mubr.msk.f32.vlgmr.msra.gmra.mrb[14].mxu1 %vm499_vm4, %v1273_v28 }
 0x5e5   :  { %1946 = vmatpush3.msra.mxu1 %v1574_v24  ;;  %1947 = vmatprep.mubr.msk.f32.mxu1 %vm2062_vm12, %v2061_v13 }
 0x5e8   :  { %1948 = vmatmul.mubr.msk.f32.vlgmr.msra.gmra.mrb[16].mxu1 %vm499_vm4, %v1572_v11 }
 0x609   :  { %v824_v43 = vpop.xlane.xlu0 %823 }
 0x60a   :  { %v825_v45 = vadd.f32 1e-20, %v824_v43 }
 0x60c   :  { %2046 = vrcp.f32 %v825_v45  ;;  %v2054_v45 = vld [vmem:[%s2512_s0 + $0x20] sm:$0xff] }
 0x60d   :  { %v1422_v46 = vpop.xlane.xlu0 %1421  ;;  %2048 = vrcp.f32 %v1124_v44 }
 0x60e   :  { %v1423_v48 = vadd.f32 1e-20, %v1422_v46 }
 0x610   :  { %2050 = vrcp.f32 %v1423_v48  ;;  %v2055_v48 = vld [vmem:[%s2512_s0 + $0x18] sm:$0xff] }
 0x611   :  { %v830_v50 = vpop.permute.xlu0 %829 }
 0x612   :  { %1921 = vmatpush3.msra.mxu0 %v830_v50 }
 0x613   :  { %1930 = vmatprep.subr.mxu0 %v2061_v13 }
 0x616   :  { %v2047_v14 = vpop.eup %2046 }
 0x617   :  { %v827_v41 = vmul.f32 %v2047_v14, %v821_v22  ;;  %v2049_v51 = vpop.eup %2048 }
 0x618   :  { %v1126_v52 = vmul.f32 %v2049_v51, %v2398_v4 }
 0x619   :  { %1923 = vmatmul.mubr.msk.f32.vlgmr.msra.gmra.mrb[4].mxu0 %vm499_vm4, %v827_v41 }
 0x61a   :  { %1931 = vmatpush3.msra.mxu0 %v1129_v40  ;;  %1932 = vmatprep.mubr.msk.f32.mxu0 %vm2062_vm12, %v2061_v13  ;;  %v2051_v53 = vpop.eup %2050 }
 0x61b   :  { %1940 = vmatprep.subr.mxu0 %v2061_v13  ;;  %v1425_v55 = vmul.f32 %v2051_v53, %v2413_v27 }
 0x61d   :  { %1933 = vmatmul.mubr.msk.f32.vlgmr.msra.gmra.mrb[6].mxu0 %vm499_vm4, %v1126_v52 }
 0x61e   :  { %1941 = vmatpush3.msra.mxu0 %v1428_v54  ;;  %1942 = vmatprep.mubr.msk.f32.mxu0 %vm2062_vm12, %v2061_v13  ;;  %v1660_v13 = vld [vmem:[%s2521_s10 + $0x8] sm:$0xff] }
 0x61f   :  { %v1976_v63 = vpack.c.bf16 %v1660_v13, %v1659_v62 }
 0x621   :  { %1943 = vmatmul.mubr.msk.f32.vlgmr.msra.gmra.mrb[8].mxu0 %vm499_vm4, %v1425_v55  ;;  %1977 = vmatprep.subr.bf16.mxu0 %v1976_v63 }
 0x622   :  { %1979 = vmatpush3.bf16.msra.mxu0 %v1976_v63 }
 0x623   :  { %1981 = vmatprep.subr.bf16.mxu0 %v1980_v2 }
 0x626   :  { %1983 = vmatpush3.bf16.msra.mxu0 %v1980_v2 }
 0x651   :  { %v586_v56 = vpop.f32.mrb[8].mxu1 }
 0x652   :  { %v1914_v57 = vpop.f32.mrb[9].mxu1 }
 0x655   :  { %v748_v58 = vpop.f32.mrb[10].mxu1 }
 0x656   :  { %753 = vrot.lane.b32.xlu0 %v748_v58, %s2063_s2  ;;  %v1919_v59 = vpop.f32.mrb[11].mxu1 }
 0x659   :  { %v1047_v60 = vpop.f32.mrb[12].mxu1 }
 0x65a   :  { %1052 = vrot.lane.b32.xlu1 %v1047_v60, %s2063_s2  ;;  %v1929_v61 = vpop.f32.mrb[13].mxu1 }
 0x6b7   :  { %v1346_v3 = vpop.f32.mrb[14].mxu1 }
 0x6b8   :  { %1351 = vrot.lane.b32.xlu0 %v1346_v3, %s2063_s2  ;;  %v1939_v4 = vpop.f32.mrb[15].mxu1 }
 0x6bb   :  { %v1645_v5 = vpop.f32.mrb[16].mxu1 }
 0x6bc   :  { %1650 = vrot.lane.b32.xlu1 %v1645_v5, %s2063_s2  ;;  %v1949_v6 = vpop.f32.mrb[17].mxu1 }
 0x6c8   :  { %v754_v7 = vpop.permute.xlu0 %753 }
 0x6c9   :  { %v756_v8 = vsel %vm58_vm0, %v586_v56, %v754_v7 }
 0x6ca   :  { %757 = vst.msk [vmem:[#allocation2] sm:$0xff] %vm417_vm1, %v756_v8 }
 0x6cc   :  { %v1053_v10 = vpop.permute.xlu1 %1052 }
 0x6d1   :  { %v1655_v9 = vld [vmem:[#allocation2] sm:$0xff] }
 0x6d2   :  { %1958 = vmatprep.mubr.msk.f32.mxu0 %vm417_vm1, %v1655_v9 }
 0x6ec   :  { %v901_v12 = vpop.f32.mrb[4].mxu0 }
 0x6ed   :  { %v1055_v15 = vsel %vm58_vm0, %v901_v12, %v1053_v10  ;;  %v1924_v16 = vpop.f32.mrb[5].mxu0 }
 0x6ee   :  { %1056 = vst.msk [vmem:[#allocation2 + $0x8] sm:$0xff] %vm417_vm1, %v1055_v15 }
 0x6f0   :  { %v1200_v17 = vpop.f32.mrb[6].mxu0 }
 0x6f1   :  { %v1934_v18 = vpop.f32.mrb[7].mxu0 }
 0x6f4   :  { %v1499_v25 = vpop.f32.mrb[8].mxu0 }
 0x6f5   :  { %v1944_v19 = vpop.f32.mrb[9].mxu0  ;;  %v1656_v22 = vld [vmem:[#allocation2 + $0x8] sm:$0xff] }
 0x6f6   :  { %1959 = vmatmul.mubr.msk.f32.vlgmr.msra.gmra.mrb[10].mxu0 %vm417_vm1, %v1656_v22 }
 0x72a   :  { %v1352_v49 = vpop.permute.xlu0 %1351 }
 0x72b   :  { %v1354_v20 = vsel %vm58_vm0, %v1200_v17, %v1352_v49 }
 0x72c   :  { %1355 = vst.msk [vmem:[#allocation2 + $0x10] sm:$0xff] %vm417_vm1, %v1354_v20 }
 0x72e   :  { %v1651_v23 = vpop.permute.xlu1 %1650 }
 0x72f   :  { %v1653_v26 = vsel %vm58_vm0, %v1499_v25, %v1651_v23 }
 0x730   :  { %1654 = vst.msk [vmem:[#allocation2 + $0x18] sm:$0xff] %vm417_vm1, %v1653_v26 }
 0x733   :  { %v1657_v27 = vld [vmem:[#allocation2 + $0x10] sm:$0xff] }
 0x734   :  { %1961 = vmatprep.mubr.msk.f32.mxu0 %vm417_vm1, %v1657_v27 }
 0x737   :  { %v1658_v29 = vld [vmem:[#allocation2 + $0x18] sm:$0xff] }
 0x738   :  { %1962 = vmatmul.mubr.msk.f32.gmra.mrb[12].mxu0 %vm417_vm1, %v1658_v29 }
 0x7c9   :  { %v1960_v31 = vpop.f32.mrb[10].mxu0 }
 0x7ca   :  { %v1754_v32 = vadd.f32 %v1960_v31, %v1831_v30  ;;  %v1748_v34 = vpop.f32.mrb[11].mxu0 }
 0x7cb   :  { %v1749_v21 = vadd.f32 %v1831_v30, %v1748_v34 }
 0x7cc   :  { %v1768_v36 = vadd.f32 %v2052_v35, %v1754_v32 }
 0x7cd   :  { %v1767_v39 = vadd.f32 %v2053_v38, %v1749_v21 }
 0x7ce   :  { %v1779_v28 = vmul.f32 %v1836_v33, %v1768_v36 }
 0x7cf   :  { %v1778_v47 = vmul.f32 %v1836_v33, %v1767_v39 }
 0x7d0   :  { %v1790_v24 = vadd.f32 %v1837_v37, %v1779_v28 }
 0x7d1   :  { %v1789_v11 = vadd.f32 %v1837_v37, %v1778_v47 }
 0x7d2   :  { %1794 = vst.msk [vmem:[%s2525_s14 + $0x8] sm:$0xff] %vm58_vm0, %v1790_v24 }
 0x7d3   :  { %1793 = vst.msk [vmem:[%s2525_s14] sm:$0xff] %vm58_vm0, %v1789_v11 }
 0x80b   :  { %v1963_v40 = vpop.f32.mrb[12].mxu0 }
 0x80c   :  { %v1764_v42 = vadd.f32 %v1963_v40, %v1831_v30  ;;  %v1758_v43 = vpop.f32.mrb[13].mxu0 }
 0x80d   :  { %v1759_v44 = vadd.f32 %v1831_v30, %v1758_v43 }
 0x80e   :  { %v1770_v46 = vadd.f32 %v2054_v45, %v1764_v42 }
 0x80f   :  { %v1769_v50 = vadd.f32 %v2055_v48, %v1759_v44 }
 0x810   :  { %v1781_v14 = vmul.f32 %v1836_v33, %v1770_v46 }
 0x811   :  { %v1780_v41 = vmul.f32 %v1836_v33, %v1769_v50 }
 0x812   :  { %v1792_v51 = vadd.f32 %v1837_v37, %v1781_v14 }
 0x813   :  { %v1791_v52 = vadd.f32 %v1837_v37, %v1780_v41 }
 0x814   :  { %1796 = vst.msk [vmem:[%s2525_s14 + $0x18] sm:$0xff] %vm58_vm0, %v1792_v51 }
 0x815   :  { %1795 = vst.msk [vmem:[%s2525_s14 + $0x10] sm:$0xff] %vm58_vm0, %v1791_v52 }

// kernel: ours_forward.11
= control target key start
LH: loop header
LB: loop body
LE: loop exit
PB: predicated region body
PF: predicated region fallthrough
CT: control target
= control target key end

     0   :  { %vm58_vm0 = vcmask 130048   ;;  %s1600_s0 = inlined_call_operand.vmem [shape: f32[32,16], index: 0, kind: input, shape index: {}]   ;;  %s1601_s1 = inlined_call_operand.vmem [shape: f32[32,32], index: 1, kind: input, shape index: {}]   ;;  %s1602_s2 = inlined_call_operand.vmem [shape: f32[8,8], index: 2, kind: input, shape index: {}]   ;;  %s1603_s3 = inlined_call_operand.vmem [shape: f32[16,32], index: 3, kind: input, shape index: {}]   ;;  %s1604_s4 = inlined_call_operand.vmem [shape: f32[16,32], index: 4, kind: input, shape index: {}]   ;;  %s1605_s5 = inlined_call_operand.vmem [shape: f32[1,32], index: 5, kind: input, shape index: {}]   ;;  %s1606_s6 = inlined_call_operand.vmem [shape: f32[16,64], index: 6, kind: input, shape index: {}]   ;;  %s1607_s7 = inlined_call_operand.vmem [shape: f32[1,64], index: 7, kind: input, shape index: {}]   ;;  %s1608_s8 = inlined_call_operand.vmem [shape: f32[2,16], index: 8, kind: input, shape index: {}]   ;;  %s1609_s9 = inlined_call_operand.vmem [shape: f32[2,16], index: 9, kind: input, shape index: {}]   ;;  %s1610_s10 = inlined_call_operand.vmem [shape: f32[32,16], index: 10, kind: input, shape index: {}]   ;;  %s1611_s11 = inlined_call_operand.vmem [shape: f32[1,16], index: 11, kind: input, shape index: {}]   ;;  %s1612_s12 = inlined_call_operand.vmem [shape: f32[1,16], index: 12, kind: input, shape index: {}]   ;;  %s1613_s13 = inlined_call_operand.vmem [shape: f32[1,16], index: 13, kind: input, shape index: {}]   ;;  %s1614_s14 = inlined_call_operand.hbm [shape: f32[16,16], index: 14, kind: output, shape index: {0}]   ;;  %s1615_s15 = inlined_call_operand.vmem [shape: f32[16,32], index: 15, kind: output, shape index: {1}]  }
   0x1   :  { %v56_v0 = vld [vmem:[%s1604_s4] sm:$0xff]  ;;  %v57_v1 = vld [vmem:[%s1604_s4 + $0x8] sm:$0xff]  ;;  %v1404_v2 = vld [vmem:[%s1600_s0 + $0x10] sm:$0xff] }
   0x2   :  { %v1219_v3 = vpack.c.bf16 %v57_v1, %v56_v0  ;;  %1171 = vmatprep.mubr.msk.f32.mxu0 %vm58_vm0, %v1404_v2  ;;  %v54_v4 = vld [vmem:[%s1603_s3] sm:$0xff]  ;;  %v55_v5 = vld [vmem:[%s1603_s3 + $0x8] sm:$0xff] }
   0x3   :  { %v1223_v6 = vpack.c.bf16 %v55_v5, %v54_v4 }
   0x4   :  { %21 = vsyncpa [#allocation4], 0  ;;  %1220 = vmatprep.subr.bf16.mxu0 %v1219_v3  ;;  %v1417_v7 = vld [vmem:[%s1600_s0 + $0x18] sm:$0xff]  ;;  %v50_v8 = vld [vmem:[%s1600_s0] sm:$0xff]  ;;  %v355_v24 = vlaneseq  ;;  %s1305_s25 = smov 48   ;;  %vm348_vm1 = vcmask 261120  }
   0x5   :  { %1222 = vmatpush3.bf16.msra.mxu0 %v1219_v3  ;;  %v51_v9 = vld [vmem:[%s1600_s0 + $0x8] sm:$0xff]  ;;  %v1126_v10 = vld [vmem:[%s1605_s5] ss:$0 sm:$0xff]  ;;  %v345_v43 = vld [vmem:[%s1601_s1 + $0x18] sm:$0xff]  ;;  %s1308_s17 = smov 96   ;;  %vm428_vm4 = vcmask 64512  }
   0x6   :  { %1224 = vmatprep.subr.bf16.mxu0 %v1223_v6  ;;  %v254_v19 = vld [vmem:[%s1606_s6] sm:$0xff]  ;;  %v255_v20 = vld [vmem:[%s1606_s6 + $0x8] sm:$0xff]  ;;  %v356_v25 = vshrl.u32 %v355_v24, 7  ;;  %s1304_s6 = smov 112   ;;  %v344_v46 = vld [vmem:[%s1601_s1 + $0x10] sm:$0xff]  ;;  %vm1310_vm7 = vmmov 0  }
   0x7   :  { %v1227_v22 = vpack.c.bf16 %v255_v20, %v254_v19  ;;  %v353_v26 = vld [vmem:[%s1608_s8] sm:$0x3]  ;;  %s1306_s8 = smov 32   ;;  %s1312_s27 = smov [#allocation3]  }
   0x8   :  { %1172 = vmatmul.mubr.msk.f32.vlgmr.msra.gmra.mrb[0].mxu0 %vm58_vm0, %v1417_v7  ;;  %v521_v27 = vsub.s32 1, %v356_v25  ;;  %v354_v28 = vld [vmem:[%s1609_s9] sm:$0x3]  ;;  %v1444_v31 = vsub.s32 0, %v356_v25  ;;  %s1107_s4 = sshll.u32 %s1312_s27, 4  ;;  %s1108_s4 = int_to_ptr.vmem [resolvable:$true] %s1107_s4 }
   0x9   :  { %1226 = vmatpush3.bf16.msra.mxu0 %v1223_v6  ;;  %1178 = vmatprep.mubr.msk.f32.mxu0 %vm58_vm0, %v50_v8  ;;  %v1129_v41 = vld [vmem:[%s1607_s7] ss:$0 sm:$0xff]  ;;  %s1307_s7 = smov 80   ;;  %p1285_p1 = scmp.lt.s32.totalorder %s1108_s4, %s1108_s4 }
   0xa   :  { %1228 = vmatprep.subr.bf16.mxu1 %v1227_v22  ;;  %v522_v30 = vrot.slane %v353_v26, %v521_v27  ;;  %v538_v32 = vrot.slane %v354_v28, %v521_v27  ;;  %v358_v34 = vrot.slane %v353_v26, %v1444_v31  ;;  %v374_v54 = vrot.slane %v354_v28, %v1444_v31  ;;  %v1503_v27 = vld [vmem:[%s1602_s2] sm:$0xff]  ;;  %s1311_s2 = smov 16  }
   0xb   :  { %1230 = vmatpush3.bf16.msra.mxu1 %v1227_v22  ;;  %vm352_vm2 = vcmp.gt.f32.partialorder %v1503_v27, 0.0 }
   0xc   :  { %524 = vrot.lane.b32.xlu1 %v522_v30, %s1305_s25 }
  0x10   :  { %1179 = vmatmul.mubr.msk.f32.vlgmr.msra.gmra.mrb[0].mxu0 %vm58_vm0, %v51_v9  ;;  %540 = vrot.lane.b32.xlu1 %v538_v32, %s1305_s25 }
  0x7e   :  { %v525_v47 = vpop.permute.xlu1 %524 }
  0x82   :  { %v541_v56 = vpop.permute.xlu1 %540 }
  0xe3   :  { %v1180_v11 = vpop.f32.mrb[0].mxu0 }
  0xe4   :  { %v229_v12 = vadd.f32 %v1180_v11, %v1126_v10  ;;  %v212_v13 = vpop.f32.mrb[1].mxu0 }
  0xe5   :  { %v228_v14 = vadd.f32 %v1126_v10, %v212_v13 }
  0xe6   :  { %v1128_v15 = vmul.f32 -1.442695, %v229_v12 }
  0xe7   :  { %v1127_v16 = vmul.f32 -1.442695, %v228_v14 }
  0xe8   :  { %1252 = vpow2.f32 %v1128_v15 }
  0xe9   :  { %1254 = vpow2.f32 %v1127_v16 }
  0xf2   :  { %v1253_v17 = vpop.eup %1252 }
  0xf3   :  { %v1255_v18 = vpop.eup %1254  ;;  %v239_v23 = vadd.f32 1.0, %v1253_v17 }
  0xf4   :  { %v238_v21 = vadd.f32 1.0, %v1255_v18 }
  0xf6   :  { %1256 = vrcp.f32 %v238_v21 }
  0xf7   :  { %1258 = vrcp.f32 %v239_v23 }
  0xf8   :  { %1260 = vtanh.f32 %v228_v14 }
  0xf9   :  { %1262 = vtanh.f32 %v229_v12 }
 0x100   :  { %v1257_v29 = vpop.eup %1256 }
 0x101   :  { %246 = vrot.lane.b32.xlu0 %v1257_v29, %s1304_s6  ;;  %v1259_v33 = vpop.eup %1258 }
 0x102   :  { %v1261_v35 = vpop.eup %1260 }
 0x103   :  { %v1263_v38 = vpop.eup %1262 }
 0x105   :  { %248 = vrot.lane.b32.xlu0 %v1259_v33, %s1304_s6 }
 0x109   :  { %360 = vrot.lane.b32.xlu0 %v358_v34, %s1306_s8 }
 0x173   :  { %v247_v36 = vpop.permute.xlu0 %246 }
 0x174   :  { %v252_v37 = vmul.f32 %v1261_v35, %v247_v36 }
 0x176   :  { %1185 = vmatprep.mubr.msk.f32.mxu1 %vm58_vm0, %v252_v37 }
 0x177   :  { %v249_v39 = vpop.permute.xlu0 %248 }
 0x178   :  { %v253_v40 = vmul.f32 %v1263_v38, %v249_v39 }
 0x17a   :  { %1186 = vmatmul.mubr.msk.f32.vlgmr.msra.gmra.mrb[0].mxu1 %vm58_vm0, %v253_v40 }
 0x17b   :  { %v361_v51 = vpop.permute.xlu0 %360 }
 0x24d   :  { %v1187_v42 = vpop.f32.mrb[0].mxu1 }
 0x24e   :  { %v1456_v44 = vadd.f32 %v1187_v42, %v1129_v41  ;;  %v335_v45 = vpop.f32.mrb[1].mxu1 }
 0x24f   :  { %v1461_v48 = vadd.f32 %v1129_v41, %v335_v45 }
 0x250   :  { %v834_v49 = vmul.f32 %v525_v47, %v1456_v44  ;;  %v347_v50 = vadd.f32 %v345_v43, %v1456_v44  ;;  %v687_v55 = vmul.f32 %v361_v51, %v1456_v44  ;;  %v842_v57 = vmul.f32 %v541_v56, %v1456_v44 }
 0x251   :  { %v527_v52 = vmul.f32 %v525_v47, %v1461_v48  ;;  %v346_v53 = vadd.f32 %v344_v46, %v1461_v48  ;;  %v543_v62 = vmul.f32 %v541_v56, %v1461_v48  ;;  %v363_v63 = vmul.f32 %v361_v51, %v1461_v48 }
 0x252   :  { %836 = vrot.lane.b32.xlu0 %v834_v49, %s1307_s7  ;;  %350 = vst.msk [vmem:[%s1615_s15 + $0x8] sm:$0xff] %vm348_vm1, %v347_v50 }
 0x253   :  { %529 = vrot.lane.b32.xlu1 %v527_v52, %s1307_s7  ;;  %349 = vst.msk [vmem:[%s1615_s15] sm:$0xff] %vm348_vm1, %v346_v53 }
 0x256   :  { %689 = vrot.lane.b32.xlu0 %v687_v55, %s1308_s17 }
 0x257   :  { %376 = vrot.lane.b32.xlu1 %v374_v54, %s1306_s8 }
 0x25b   :  { %844 = vrot.lane.b32.xlu1 %v842_v57, %s1307_s7 }
 0x2c4   :  { %v837_v0 = vpop.permute.xlu0 %836 }
 0x2c5   :  { %v530_v58 = vpop.permute.xlu1 %529  ;;  %v839_v5 = vsel %vm58_vm0, %v837_v0, 0.0 }
 0x2c6   :  { %v532_v11 = vsel %vm58_vm0, %v530_v58, 0.0 }
 0x2c8   :  { %v690_v4 = vpop.permute.xlu0 %689 }
 0x2c9   :  { %v377_v59 = vpop.permute.xlu1 %376  ;;  %v692_v6 = vsel %vm58_vm0, %v690_v4, 0.0 }
 0x2ca   :  { %v379_v60 = vmul.f32 %v377_v59, %v1461_v48  ;;  %v695_v61 = vmul.f32 %v377_v59, %v1456_v44  ;;  %v1309_v59 = vmov 0.0  }
 0x2cb   :  { %1193 = vmatprep.subr.mxu0 %v1309_v59  ;;  %1188 = vmatprep.subr.mxu1 %v1309_v59 }
 0x2cc   :  { %697 = vrot.lane.b32.xlu0 %v695_v61, %s1308_s17  ;;  %381 = vrot.lane.b32.xlu1 %v379_v60, %s1308_s17 }
 0x2cd   :  { %v845_v1 = vpop.permute.xlu1 %844  ;;  %1195 = vmatprep.mubr.msk.f32.mxu0 %vm1310_vm7, %v1309_v59  ;;  %1190 = vmatprep.mubr.msk.f32.mxu1 %vm1310_vm7, %v1309_v59 }
 0x2ce   :  { %v847_v3 = vsel %vm58_vm0, %v845_v1, 0.0 }
 0x2d0   :  { %545 = vrot.lane.b32.xlu0 %v543_v62, %s1307_s7 }
 0x2d4   :  { %365 = vrot.lane.b32.xlu0 %v363_v63, %s1308_s17 }
 0x2f0   :  { %848 = vadd.xlane.f32.xlu1 %v847_v3 }
 0x2f3   :  { %840 = vadd.xlane.f32.xlu0 %v839_v5 }
 0x2f4   :  { %693 = vadd.xlane.f32.xlu1 %v692_v6 }
 0x33e   :  { %v698_v8 = vpop.permute.xlu0 %697  ;;  %v382_v15 = vpop.permute.xlu1 %381 }
 0x33f   :  { %v700_v9 = vsel %vm58_vm0, %v698_v8, 0.0  ;;  %v384_v16 = vsel %vm58_vm0, %v382_v15, 0.0 }
 0x340   :  { %701 = vadd.xlane.f32.xlu1 %v700_v9 }
 0x342   :  { %v546_v10 = vpop.permute.xlu0 %545 }
 0x343   :  { %v548_v12 = vsel %vm58_vm0, %v546_v10, 0.0 }
 0x344   :  { %533 = vadd.xlane.f32.xlu1 %v532_v11  ;;  %549 = vadd.xlane.f32.xlu0 %v548_v12 }
 0x346   :  { %v366_v13 = vpop.permute.xlu0 %365 }
 0x347   :  { %v368_v14 = vsel %vm58_vm0, %v366_v13, 0.0 }
 0x348   :  { %369 = vadd.xlane.f32.xlu0 %v368_v14 }
 0x34c   :  { %385 = vadd.xlane.f32.xlu0 %v384_v16 }
 0x37d   :  { %v849_v18 = vpop.xlane.xlu1 %848 }
 0x380   :  { %v841_v17 = vpop.xlane.xlu0 %840 }
 0x381   :  { %850 = vxpose.xlu0.b32.start.end [1/1] (short) (narrow) %v841_v17, 8  ;;  %v694_v19 = vpop.xlane.xlu1 %693 }
 0x3cd   :  { %v702_v20 = vpop.xlane.xlu1 %701 }
 0x3d1   :  { %v534_v21 = vpop.xlane.xlu1 %533  ;;  %v550_v22 = vpop.xlane.xlu0 %549 }
 0x3d2   :  { %551 = vxpose.xlu1.b32.start.end [1/1] (short) (narrow) %v534_v21, 8 }
 0x3d5   :  { %v370_v23 = vpop.xlane.xlu0 %369 }
 0x3d9   :  { %v386_v24 = vpop.xlane.xlu0 %385 }
 0x401   :  { %v866_v25 = vpop.trf.xlu0 }
 0x402   :  { %v885_v26 = vrot.slane %v866_v25, %v1444_v31 }
 0x404   :  { %v886_v28 = vadd.f32 %v885_v26, %v849_v18 }
 0x406   :  { %vm887_vm3 = vcmp.ge.f32.partialorder %v886_v28, 0.0  ;;  %v888_v29 = vmul.f32 0.2, %v886_v28 }
 0x408   :  { %v889_v30 = vsel %vm887_vm3, %v886_v28, %v888_v29 }
 0x409   :  { %v890_v32 = vsel %vm352_vm2, %v889_v30, -1e+30 }
 0x40a   :  { %v891_v33 = vsel %vm428_vm4, %v890_v32, -inf }
 0x40b   :  { %892 = vmax.xlane.f32.xlu0 %v891_v33 }
 0x438   :  { %703 = vxpose.xlu0.b32.start.end [1/1] (short) (narrow) %v694_v19, 8 }
 0x452   :  { %v567_v34 = vpop.trf.xlu1 }
 0x453   :  { %v586_v35 = vrot.slane %v567_v34, %v1444_v31 }
 0x455   :  { %v587_v36 = vadd.f32 %v586_v35, %v550_v22 }
 0x457   :  { %vm588_vm5 = vcmp.ge.f32.partialorder %v587_v36, 0.0  ;;  %v589_v37 = vmul.f32 0.2, %v587_v36 }
 0x459   :  { %v590_v38 = vsel %vm588_vm5, %v587_v36, %v589_v37 }
 0x45a   :  { %v591_v39 = vsel %vm352_vm2, %v590_v38, -1e+30 }
 0x45b   :  { %v592_v40 = vsel %vm428_vm4, %v591_v39, -inf }
 0x45c   :  { %593 = vmax.xlane.f32.xlu1 %v592_v40 }
 0x48f   :  { %387 = vxpose.xlu1.b32.start.end [1/1] (short) (narrow) %v370_v23, 8 }
 0x498   :  { %v893_v41 = vpop.xlane.xlu0 %892 }
 0x499   :  { %v894_v57 = vsub.f32 %v890_v32, %v893_v41 }
 0x49b   :  { %v895_v58 = vmul.f32 1.442695, %v894_v57 }
 0x4b8   :  { %v719_v42 = vpop.trf.xlu0 }
 0x4b9   :  { %v738_v43 = vrot.slane %v719_v42, %v1444_v31  ;;  %v988_v42 = vld [vmem:[%s1610_s10] sm:$0xff] }
 0x4bb   :  { %v739_v45 = vadd.f32 %v738_v43, %v702_v20  ;;  %v989_v43 = vld [vmem:[%s1610_s10 + $0x8] sm:$0xff] }
 0x4bd   :  { %vm740_vm6 = vcmp.ge.f32.partialorder %v739_v45, 0.0  ;;  %v741_v46 = vmul.f32 0.2, %v739_v45 }
 0x4bf   :  { %v742_v47 = vsel %vm740_vm6, %v739_v45, %v741_v46  ;;  %v1231_v45 = vpack.c.bf16 %v989_v43, %v988_v42  ;;  %v990_v46 = vld [vmem:[%s1610_s10 + $0x10] sm:$0xff] }
 0x4c0   :  { %v743_v49 = vsel %vm352_vm2, %v742_v47, -1e+30  ;;  %v991_v47 = vld [vmem:[%s1610_s10 + $0x18] sm:$0xff] }
 0x4c1   :  { %v744_v50 = vsel %vm428_vm4, %v743_v49, -inf }
 0x4c2   :  { %745 = vmax.xlane.f32.xlu1 %v744_v50 }
 0x4e9   :  { %v594_v51 = vpop.xlane.xlu1 %593 }
 0x4ea   :  { %v595_v52 = vsub.f32 %v591_v39, %v594_v51 }
 0x4ec   :  { %v596_v53 = vmul.f32 1.442695, %v595_v52 }
 0x4ee   :  { %1264 = vpow2.f32 %v596_v53 }
 0x4ef   :  { %1266 = vpow2.f32 %v895_v58 }
 0x4f8   :  { %v1265_v54 = vpop.eup %1264 }
 0x4f9   :  { %v598_v55 = vsel %vm352_vm2, %v1265_v54, 0.0  ;;  %v1267_v0 = vpop.eup %1266 }
 0x4fa   :  { %v599_v56 = vsel %vm428_vm4, %v598_v55, 0.0  ;;  %v897_v5 = vsel %vm352_vm2, %v1267_v0, 0.0  ;;  %v1139_v0 = vld [vmem:[%s1612_s12] ss:$0 sm:$0xff] }
 0x4fb   :  { %600 = vadd.xlane.f32.xlu1 %v599_v56  ;;  %v898_v6 = vsel %vm428_vm4, %v897_v5, 0.0 }
 0x50c   :  { %605 = vrot.lane.b32.xlu1 %v1461_v48, %s1307_s7 }
 0x50f   :  { %v403_v60 = vpop.trf.xlu1 }
 0x510   :  { %v422_v61 = vrot.slane %v403_v60, %v1444_v31  ;;  %v1136_v60 = vld [vmem:[%s1611_s11] ss:$0 sm:$0xff]  ;;  %s1280_s11 = scalar_lea.vmem %s1108_s4, 256 }
 0x511   :  { %p1281_p0 = scmp.ne.s32.totalorder %s1108_s4, %s1280_s11  ;;  %p1286_p2 = scmp.lt.s32.totalorder %s1280_s11, %s1280_s11 }
 0x512   :  { %v423_v62 = vadd.f32 %v422_v61, %v386_v24 }
 0x513   :  { %p1287_p3 = por %p1286_p2, %p1285_p1 }
 0x514   :  { %vm424_vm8 = vcmp.ge.f32.partialorder %v423_v62, 0.0  ;;  %v425_v63 = vmul.f32 0.2, %v423_v62 }
 0x515   :  { %p1288_p4 = pnand %p1287_p3, %p1281_p0 }
 0x516   :  { %v426_v1 = vsel %vm424_vm8, %v423_v62, %v425_v63 }
 0x517   :  { %v427_v3 = vsel %vm352_vm2, %v426_v1, -1e+30 }
 0x518   :  { %v429_v4 = vsel %vm428_vm4, %v427_v3, -inf }
 0x519   :  { %430 = vmax.xlane.f32.xlu0 %v429_v4  ;;  %v1140_v4 = vld [vmem:[%s1613_s13] ss:$0 sm:$0xff] }
 0x51d   :  { %899 = vadd.xlane.f32.xlu0 %v898_v6 }
 0x533   :  { %904 = vrot.lane.b32.xlu0 %v1456_v44, %s1307_s7 }
 0x54f   :  { %v746_v31 = vpop.xlane.xlu1 %745 }
 0x550   :  { %v747_v8 = vsub.f32 %v743_v49, %v746_v31  ;;  %v1235_v49 = vpack.c.bf16 %v991_v47, %v990_v46 }
 0x552   :  { %v748_v9 = vmul.f32 1.442695, %v747_v8 }
 0x554   :  { %1268 = vpow2.f32 %v748_v9 }
 0x55e   :  { %v1269_v10 = vpop.eup %1268 }
 0x55f   :  { %v750_v11 = vsel %vm352_vm2, %v1269_v10, 0.0 }
 0x560   :  { %v751_v12 = vsel %vm428_vm4, %v750_v11, 0.0 }
 0x561   :  { %752 = vadd.xlane.f32.xlu0 %v751_v12 }
 0x577   :  { %758 = vrot.lane.b32.xlu0 %v1456_v44, %s1308_s17 }
 0x588   :  { %v601_v13 = vpop.xlane.xlu1 %600 }
 0x589   :  { %v602_v14 = vadd.f32 1e-20, %v601_v13 }
 0x58b   :  { %1270 = vrcp.f32 %v602_v14 }
 0x58c   :  { %v606_v15 = vpop.permute.xlu1 %605 }
 0x58d   :  { %1194 = vmatpush3.msra.mxu0 %v606_v15 }
 0x58e   :  { %1203 = vmatprep.subr.mxu0 %v1309_v59 }
 0x595   :  { %v1271_v16 = vpop.eup %1270 }
 0x596   :  { %v604_v17 = vmul.f32 %v1271_v16, %v598_v55 }
 0x598   :  { %1196 = vmatmul.mubr.msk.f32.vlgmr.msra.gmra.mrb[2].mxu0 %vm428_vm4, %v604_v17 }
 0x599   :  { %1205 = vmatprep.mubr.msk.f32.mxu0 %vm1310_vm7, %v1309_v59 }
 0x5a6   :  { %v431_v18 = vpop.xlane.xlu0 %430 }
 0x5a7   :  { %v432_v19 = vsub.f32 %v427_v3, %v431_v18 }
 0x5a9   :  { %v433_v20 = vmul.f32 1.442695, %v432_v19 }
 0x5aa   :  { %v900_v21 = vpop.xlane.xlu0 %899 }
 0x5ab   :  { %1272 = vpow2.f32 %v433_v20  ;;  %v901_v44 = vadd.f32 1e-20, %v900_v21 }
 0x5ad   :  { %1274 = vrcp.f32 %v901_v44 }
 0x5ae   :  { %v905_v22 = vpop.permute.xlu0 %904 }
 0x5af   :  { %1204 = vmatpush3.msra.mxu0 %v905_v22 }
 0x5b5   :  { %v1273_v23 = vpop.eup %1272 }
 0x5b6   :  { %v435_v24 = vsel %vm352_vm2, %v1273_v23, 0.0 }
 0x5b7   :  { %v1275_v25 = vpop.eup %1274  ;;  %v436_v26 = vsel %vm428_vm4, %v435_v24, 0.0 }
 0x5b8   :  { %437 = vadd.xlane.f32.xlu1 %v436_v26  ;;  %v903_v28 = vmul.f32 %v1275_v25, %v897_v5 }
 0x5ba   :  { %1206 = vmatmul.mubr.msk.f32.vlgmr.msra.gmra.mrb[4].mxu0 %vm428_vm4, %v903_v28 }
 0x5c9   :  { %443 = vrot.lane.b32.xlu1 %v1461_v48, %s1308_s17 }
 0x5ee   :  { %v753_v29 = vpop.xlane.xlu0 %752 }
 0x5ef   :  { %v754_v32 = vadd.f32 1e-20, %v753_v29 }
 0x5f2   :  { %v759_v37 = vpop.permute.xlu0 %758 }
 0x645   :  { %v438_v30 = vpop.xlane.xlu1 %437 }
 0x646   :  { %v439_v33 = vadd.f32 1e-20, %v438_v30 }
 0x648   :  { %1276 = vrcp.f32 %v439_v33 }
 0x649   :  { %v444_v34 = vpop.permute.xlu1 %443  ;;  %1278 = vrcp.f32 %v754_v32 }
 0x64a   :  { %1189 = vmatpush3.msra.mxu1 %v444_v34 }
 0x64b   :  { %1198 = vmatprep.subr.mxu1 %v1309_v59 }
 0x652   :  { %v1277_v27 = vpop.eup %1276 }
 0x653   :  { %v441_v35 = vmul.f32 %v1277_v27, %v435_v24  ;;  %v1279_v36 = vpop.eup %1278 }
 0x654   :  { %v756_v48 = vmul.f32 %v1279_v36, %v750_v11 }
 0x655   :  { %1191 = vmatmul.mubr.msk.f32.vlgmr.msra.gmra.mrb[2].mxu1 %vm428_vm4, %v441_v35 }
 0x656   :  { %1199 = vmatpush3.msra.mxu1 %v759_v37  ;;  %1200 = vmatprep.mubr.msk.f32.mxu1 %vm1310_vm7, %v1309_v59 }
 0x657   :  { %1232 = vmatprep.subr.bf16.mxu1 %v1231_v45 }
 0x659   :  { %1201 = vmatmul.mubr.msk.f32.vlgmr.msra.gmra.mrb[4].mxu1 %vm428_vm4, %v756_v48 }
 0x65a   :  { %1234 = vmatpush3.bf16.msra.mxu1 %v1231_v45 }
 0x65b   :  { %1236 = vmatprep.subr.bf16.mxu1 %v1235_v49 }
 0x65e   :  { %1238 = vmatpush3.bf16.msra.mxu1 %v1235_v49 }
 0x66b   :  { %v677_v38 = vpop.f32.mrb[2].mxu0 }
 0x66c   :  { %v1197_v39 = vpop.f32.mrb[3].mxu0  ;;  %682 = vrot.lane.b32.xlu1 %v677_v38, %s1311_s2 }
 0x68d   :  { %v976_v40 = vpop.f32.mrb[4].mxu0 }
 0x68e   :  { %981 = vrot.lane.b32.xlu1 %v976_v40, %s1311_s2  ;;  %v1207_v41 = vpop.f32.mrb[5].mxu0 }
 0x6de   :  { %v683_v50 = vpop.permute.xlu1 %682 }
 0x700   :  { %v982_v54 = vpop.permute.xlu1 %981 }
 0x728   :  { %v515_v51 = vpop.f32.mrb[2].mxu1 }
 0x729   :  { %v685_v52 = vsel %vm58_vm0, %v515_v51, %v683_v50  ;;  %v1192_v53 = vpop.f32.mrb[3].mxu1 }
 0x72a   :  { %686 = vst.msk [vmem:[#allocation2] sm:$0xff] %vm348_vm1, %v685_v52 }
 0x72c   :  { %v830_v55 = vpop.f32.mrb[4].mxu1 }
 0x72d   :  { %v984_v56 = vsel %vm58_vm0, %v830_v55, %v982_v54  ;;  %v1202_v57 = vpop.f32.mrb[5].mxu1 }
 0x72e   :  { %985 = vst.msk [vmem:[#allocation2 + $0x8] sm:$0xff] %vm348_vm1, %v984_v56 }
 0x731   :  { %v986_v58 = vld [vmem:[#allocation2] sm:$0xff] }
 0x732   :  { %1216 = vmatprep.mubr.msk.f32.mxu1 %vm348_vm1, %v986_v58 }
 0x735   :  { %v987_v59 = vld [vmem:[#allocation2 + $0x8] sm:$0xff] }
 0x736   :  { %1217 = vmatmul.mubr.msk.f32.vlgmr.msra.gmra.mrb[6].mxu1 %vm348_vm1, %v987_v59 }
 0x809   :  { %v1218_v61 = vpop.f32.mrb[6].mxu1 }
 0x80a   :  { %v1077_v62 = vadd.f32 %v1218_v61, %v1136_v60  ;;  %v1071_v63 = vpop.f32.mrb[7].mxu1 }
 0x80b   :  { %v1072_v1 = vadd.f32 %v1136_v60, %v1071_v63 }
 0x80c   :  { %v1081_v3 = vadd.f32 %v1077_v62, %v1417_v7 }
 0x80d   :  { %v1080_v5 = vadd.f32 %v1072_v1, %v1404_v2 }
 0x80e   :  { %v1090_v6 = vmul.f32 %v1139_v0, %v1081_v3 }
 0x80f   :  { %v1089_v31 = vmul.f32 %v1139_v0, %v1080_v5 }
 0x810   :  { %v1099_v8 = vadd.f32 %v1140_v4, %v1090_v6 }
 0x811   :  { %v1098_v9 = vadd.f32 %v1140_v4, %v1089_v31 }
 0x812   :  { %1101 = vst.msk [vmem:[#allocation3 + $0x8] sm:$0xff] %vm58_vm0, %v1099_v8 }
 0x813   :  { %1100 = vst.msk [vmem:[#allocation3] sm:$0xff] %vm58_vm0, %v1098_v9 }
 0x814   :  { %1291 = shalt.err (!%p1288_p4)
}
 0x815   :  { %s1292_s28 = scalar_lea.hbm %s1614_s14, 256 }
 0x816   :  { %p1293_p5 = scmp.ne.s32.totalorder %s1614_s14, %s1292_s28  ;;  %p1296_p6 = scmp.lt.u32.totalorder %s1292_s28, %s1614_s14 }
 0x818   :  { %p1298_p7 = pnand %p1296_p6, %p1293_p5 }
 0x81a   :  { %1301 = shalt.err (!%p1298_p7)
}
 0x81b   :  { %s1313_s1 = smov 128   ;;  %s1314_s16 = smov 8  }
 0x81c   :  { %1113 = dma.vmem_to_hbm [thread:$0]  %s1108_s4, 256, %s1614_s14, [#allocation4], %s1313_s1, %s1313_s1, %s1314_s16  }
 0x81d   :  { %1302 = dma.done.wait [#allocation4], 256  }
 0x81e   :  { %1303 = vsyncadd [#allocation4], 4294967040 }
 0x81f   :  { %1121 = vsyncpa [#allocation4], 1 }

// kernel: ours_forward.8
= control target key start
LH: loop header
LB: loop body
LE: loop exit
PB: predicated region body
PF: predicated region fallthrough
CT: control target
= control target key end

     0   :  { %v3280_v0 = vmov 0.0|0.0   ;;  %vm3281_vm0 = vmmov 0   ;;  %v3282_v3 = vmov 0.0   ;;  %vm61_vm1 = vcmask 130048   ;;  %s3284_s17 = smov 32   ;;  %s3285_s18 = smov 48   ;;  %s4145_s4 = inlined_call_operand.vmem [shape: f32[16,32], index: 4, kind: input, shape index: {}]   ;;  %s4146_s3 = inlined_call_operand.vmem [shape: f32[16,32], index: 3, kind: input, shape index: {}]   ;;  %s4147_s0 = inlined_call_operand.vmem [shape: f32[64,16], index: 0, kind: input, shape index: {}]   ;;  %s4148_s6 = inlined_call_operand.vmem [shape: f32[16,64], index: 6, kind: input, shape index: {}]   ;;  %s4149_s5 = inlined_call_operand.vmem [shape: f32[1,32], index: 5, kind: input, shape index: {}]   ;;  %s4150_s9 = inlined_call_operand.vmem [shape: f32[2,16], index: 9, kind: input, shape index: {}]   ;;  %s4151_s8 = inlined_call_operand.vmem [shape: f32[2,16], index: 8, kind: input, shape index: {}]   ;;  %s4152_s7 = inlined_call_operand.vmem [shape: f32[1,64], index: 7, kind: input, shape index: {}]   ;;  %s4153_s1 = inlined_call_operand.vmem [shape: f32[64,32], index: 1, kind: input, shape index: {}]   ;;  %s4154_s15 = inlined_call_operand.vmem [shape: f32[56,32], index: 15, kind: output, shape index: {1}]   ;;  %s4155_s2 = inlined_call_operand.vmem [shape: f32[8,8], index: 2, kind: input, shape index: {}]   ;;  %s4156_s10 = inlined_call_operand.vmem [shape: f32[32,16], index: 10, kind: input, shape index: {}]   ;;  %s4157_s11 = inlined_call_operand.vmem [shape: f32[1,16], index: 11, kind: input, shape index: {}]   ;;  %s4158_s12 = inlined_call_operand.vmem [shape: f32[1,16], index: 12, kind: input, shape index: {}]   ;;  %s4159_s13 = inlined_call_operand.vmem [shape: f32[1,16], index: 13, kind: input, shape index: {}]   ;;  %s4160_s14 = inlined_call_operand.vmem [shape: f32[56,16], index: 14, kind: output, shape index: {0}]  }
   0x1   :  { %3149 = vmatprep.subr.bf16.mxu0 %v3280_v0  ;;  %v59_v1 = vld [vmem:[%s4145_s4] sm:$0xff]  ;;  %v60_v2 = vld [vmem:[%s4145_s4 + $0x8] sm:$0xff]  ;;  %2979 = vmatprep.mubr.msk.f32.mxu0 %vm3281_vm0, %v3282_v3  ;;  %v51_v9 = vld [vmem:[%s4147_s0 + $0x10] sm:$0xff]  ;;  %vm528_vm2 = vcmask 261120   ;;  %s3286_s21 = smov 80   ;;  %s3287_s22 = smov 96  }
   0x2   :  { %v3150_v4 = vpack.c.bf16 %v60_v2, %v59_v1  ;;  %v57_v5 = vld [vmem:[%s4146_s3] sm:$0xff]  ;;  %v58_v6 = vld [vmem:[%s4146_s3 + $0x8] sm:$0xff]  ;;  %3164 = vmatprep.subr.bf16.mxu1 %v3280_v0  ;;  %3013 = vmatprep.mubr.msk.f32.mxu1 %vm3281_vm0, %v3282_v3  ;;  %v52_v10 = vld [vmem:[%s4147_s0 + $0x18] sm:$0xff]  ;;  %vm613_vm5 = vcmask 64512  }
   0x3   :  { %v3153_v7 = vpack.c.bf16 %v58_v6, %v57_v5  ;;  %v50_v8 = vld [vmem:[%s4147_s0 + $0x8] sm:$0xff]  ;;  %v53_v11 = vld [vmem:[%s4147_s0 + $0x20] sm:$0xff]  ;;  %v55_v13 = vld [vmem:[%s4147_s0 + $0x30] sm:$0xff] }
   0x4   :  { %3151 = vmatpush3.bf16.msra.mxu0 %v3150_v4  ;;  %v54_v12 = vld [vmem:[%s4147_s0 + $0x28] sm:$0xff]  ;;  %v56_v14 = vld [vmem:[%s4147_s0 + $0x38] sm:$0xff]  ;;  %v49_v15 = vld [vmem:[%s4147_s0] sm:$0xff] }
   0x5   :  { %3152 = vmatprep.subr.bf16.mxu0 %v3280_v0  ;;  %3165 = vmatpush3.bf16.msra.mxu1 %v3153_v7  ;;  %v384_v16 = vld [vmem:[%s4148_s6] sm:$0xff]  ;;  %v385_v17 = vld [vmem:[%s4148_s6 + $0x8] sm:$0xff] }
   0x6   :  { %3050 = vmatprep.subr.mxu1 %v3282_v3  ;;  %v3156_v18 = vpack.c.bf16 %v385_v17, %v384_v16  ;;  %v2869_v46 = vld [vmem:[%s4149_s5] ss:$0 sm:$0xff]  ;;  %s3283_s5 = smov 112  }
   0x7   :  { %2980 = vmatmul.mubr.msk.f32.vlgmr.msra.gmra.mrb[0].mxu0 %vm61_vm1, %v50_v8 }
   0x8   :  { %2982 = vmatprep.mubr.msk.f32.mxu0 %vm3281_vm0, %v3282_v3  ;;  %3154 = vmatpush3.bf16.msra.mxu0 %v3153_v7 }
   0x9   :  { %3014 = vmatmul.mubr.msk.f32.vlgmr.msra.gmra.mrb[0].mxu1 %vm61_vm1, %v52_v10  ;;  %3155 = vmatprep.subr.bf16.mxu0 %v3280_v0 }
   0xa   :  { %3016 = vmatprep.mubr.msk.f32.mxu1 %vm3281_vm0, %v3282_v3 }
   0xb   :  { %2983 = vmatmul.mubr.msk.f32.gmra.mrb[2].mxu0 %vm61_vm1, %v51_v9 }
   0xc   :  { %2985 = vmatprep.mubr.msk.f32.mxu0 %vm3281_vm0, %v3282_v3 }
   0xd   :  { %3017 = vmatmul.mubr.msk.f32.gmra.mrb[2].mxu1 %vm61_vm1, %v53_v11 }
   0xe   :  { %3019 = vmatprep.mubr.msk.f32.mxu1 %vm3281_vm0, %v3282_v3 }
   0xf   :  { %2986 = vmatmul.mubr.msk.f32.gmra.mrb[4].mxu0 %vm61_vm1, %v52_v10 }
  0x10   :  { %2988 = vmatprep.mubr.msk.f32.mxu0 %vm3281_vm0, %v3282_v3 }
  0x11   :  { %3020 = vmatmul.mubr.msk.f32.gmra.mrb[4].mxu1 %vm61_vm1, %v54_v12 }
  0x12   :  { %3022 = vmatprep.mubr.msk.f32.mxu1 %vm3281_vm0, %v3282_v3 }
  0x13   :  { %2989 = vmatmul.mubr.msk.f32.gmra.mrb[6].mxu0 %vm61_vm1, %v53_v11 }
  0x14   :  { %2991 = vmatprep.mubr.msk.f32.mxu0 %vm3281_vm0, %v3282_v3 }
  0x15   :  { %3023 = vmatmul.mubr.msk.f32.gmra.mrb[6].mxu1 %vm61_vm1, %v55_v13 }
  0x16   :  { %3052 = vmatprep.mubr.msk.f32.mxu1 %vm3281_vm0, %v3282_v3 }
  0x17   :  { %2992 = vmatmul.mubr.msk.f32.gmra.mrb[8].mxu0 %vm61_vm1, %v54_v12 }
  0x18   :  { %2994 = vmatprep.mubr.msk.f32.mxu0 %vm3281_vm0, %v3282_v3 }
  0x1b   :  { %2995 = vmatmul.mubr.msk.f32.gmra.mrb[10].mxu0 %vm61_vm1, %v55_v13 }
  0x1c   :  { %2997 = vmatprep.mubr.msk.f32.mxu0 %vm3281_vm0, %v3282_v3 }
  0x1f   :  { %2998 = vmatmul.mubr.msk.f32.gmra.mrb[12].mxu0 %vm61_vm1, %v56_v14 }
  0x20   :  { %3004 = vmatprep.mubr.msk.f32.mxu0 %vm3281_vm0, %v3282_v3 }
  0x23   :  { %3005 = vmatmul.mubr.msk.f32.vlgmr.msra.gmra.mrb[14].mxu0 %vm61_vm1, %v49_v15 }
  0x24   :  { %3007 = vmatprep.mubr.msk.f32.mxu0 %vm3281_vm0, %v3282_v3  ;;  %3157 = vmatpush3.bf16.msra.mxu0 %v3156_v18 }
  0x25   :  { %3085 = vmatprep.subr.mxu0 %v3282_v3 }
  0x27   :  { %3008 = vmatmul.mubr.msk.f32.gmra.mrb[16].mxu0 %vm61_vm1, %v50_v8 }
  0x28   :  { %3010 = vmatprep.mubr.msk.f32.mxu0 %vm3281_vm0, %v3282_v3 }
  0x2b   :  { %3011 = vmatmul.mubr.msk.f32.gmra.mrb[18].mxu0 %vm61_vm1, %v51_v9 }
  0x2c   :  { %3029 = vmatprep.mubr.msk.f32.mxu0 %vm3281_vm0, %v3282_v3 }
  0xda   :  { %v149_v19 = vpop.f32.mrb[0].mxu0 }
  0xdb   :  { %v2981_v20 = vpop.f32.mrb[1].mxu0 }
  0xdc   :  { %v267_v21 = vpop.f32.mrb[0].mxu1 }
  0xdd   :  { %v3015_v22 = vpop.f32.mrb[1].mxu1 }
  0xde   :  { %v154_v23 = vpop.f32.mrb[2].mxu0 }
  0xdf   :  { %v2984_v24 = vpop.f32.mrb[3].mxu0 }
  0xe0   :  { %v272_v25 = vpop.f32.mrb[2].mxu1 }
  0xe1   :  { %v3018_v26 = vpop.f32.mrb[3].mxu1 }
  0xe2   :  { %v159_v27 = vpop.f32.mrb[4].mxu0 }
  0xe3   :  { %v2987_v28 = vpop.f32.mrb[5].mxu0 }
  0xe4   :  { %v277_v29 = vpop.f32.mrb[4].mxu1 }
  0xe5   :  { %v3021_v30 = vpop.f32.mrb[5].mxu1 }
  0xe6   :  { %v164_v31 = vpop.f32.mrb[6].mxu0  ;;  %v539_v30 = vld [vmem:[%s4150_s9] sm:$0x3] }
  0xe7   :  { %v268_v32 = vadd.f32 %v267_v21, %v164_v31  ;;  %v2990_v33 = vpop.f32.mrb[7].mxu0  ;;  %v538_v31 = vld [vmem:[%s4151_s8] sm:$0x3] }
  0xe8   :  { %v282_v34 = vpop.f32.mrb[6].mxu1 }
  0xe9   :  { %v3024_v35 = vpop.f32.mrb[7].mxu1  ;;  %v3470_v52 = vadd.f32 %v2869_v46, %v268_v32 }
  0xea   :  { %v169_v36 = vpop.f32.mrb[8].mxu0 }
  0xeb   :  { %v273_v37 = vadd.f32 %v272_v25, %v169_v36  ;;  %v2993_v38 = vpop.f32.mrb[9].mxu0  ;;  %v2873_v60 = vmul.f32 -1.442695, %v3470_v52 }
  0xed   :  { %v3466_v49 = vadd.f32 %v2869_v46, %v273_v37 }
  0xee   :  { %v174_v39 = vpop.f32.mrb[10].mxu0 }
  0xef   :  { %v278_v40 = vadd.f32 %v277_v29, %v174_v39  ;;  %v2996_v41 = vpop.f32.mrb[11].mxu0  ;;  %v2874_v56 = vmul.f32 -1.442695, %v3466_v49 }
  0xf1   :  { %v3481_v2 = vadd.f32 %v2869_v46, %v278_v40 }
  0xf2   :  { %v179_v42 = vpop.f32.mrb[12].mxu0 }
  0xf3   :  { %v283_v43 = vadd.f32 %v282_v34, %v179_v42  ;;  %v2999_v44 = vpop.f32.mrb[13].mxu0  ;;  %v2875_v6 = vmul.f32 -1.442695, %v3481_v2 }
  0xf5   :  { %v3474_v57 = vadd.f32 %v2869_v46, %v283_v43 }
  0xf6   :  { %v252_v45 = vpop.f32.mrb[14].mxu0 }
  0xf7   :  { %v253_v47 = vadd.f32 %v252_v45, %v149_v19  ;;  %v3006_v48 = vpop.f32.mrb[15].mxu0  ;;  %v2876_v1 = vmul.f32 -1.442695, %v3474_v57 }
  0xf9   :  { %v3468_v50 = vadd.f32 %v2869_v46, %v253_v47 }
  0xfa   :  { %v257_v51 = vpop.f32.mrb[16].mxu0 }
  0xfb   :  { %v2870_v53 = vmul.f32 -1.442695, %v3468_v50  ;;  %v258_v54 = vadd.f32 %v257_v51, %v154_v23  ;;  %v3009_v55 = vpop.f32.mrb[17].mxu0 }
  0xfd   :  { %3175 = vpow2.f32 %v2870_v53  ;;  %v3476_v58 = vadd.f32 %v2869_v46, %v258_v54 }
  0xfe   :  { %v262_v59 = vpop.f32.mrb[18].mxu0  ;;  %3177 = vpow2.f32 %v2874_v56 }
  0xff   :  { %v2871_v61 = vmul.f32 -1.442695, %v3476_v58  ;;  %v263_v62 = vadd.f32 %v262_v59, %v159_v27  ;;  %v3012_v63 = vpop.f32.mrb[19].mxu0  ;;  %v540_v27 = vlaneseq  ;;  %v3524_v59 = vld [vmem:[%s4152_s7] ss:$0 sm:$0xff] }
 0x101   :  { %3179 = vpow2.f32 %v2871_v61  ;;  %v295_v4 = vadd.f32 %v2869_v46, %v263_v62  ;;  %v541_v29 = vshrl.u32 %v540_v27, 7  ;;  %v514_v61 = vld [vmem:[%s4153_s1 + $0x8] sm:$0xff] }
 0x102   :  { %3181 = vpow2.f32 %v2873_v60 }
 0x103   :  { %v2872_v5 = vmul.f32 -1.442695, %v295_v4  ;;  %3183 = vpow2.f32 %v2876_v1  ;;  %v3490_v32 = vsub.s32 0, %v541_v29  ;;  %v706_v33 = vsub.s32 1, %v541_v29  ;;  %v518_v29 = vld [vmem:[%s4153_s1 + $0x28] sm:$0xff] }
 0x105   :  { %3185 = vpow2.f32 %v2872_v5  ;;  %v559_v34 = vrot.slane %v539_v30, %v3490_v32  ;;  %v543_v35 = vrot.slane %v538_v31, %v3490_v32  ;;  %v707_v36 = vrot.slane %v538_v31, %v706_v33 }
 0x106   :  { %3187 = vpow2.f32 %v2875_v6  ;;  %v723_v37 = vrot.slane %v539_v30, %v706_v33  ;;  %v515_v6 = vld [vmem:[%s4153_s1 + $0x10] sm:$0xff] }
 0x107   :  { %v3176_v7 = vpop.eup %3175 }
 0x108   :  { %v328_v8 = vadd.f32 1.0, %v3176_v7  ;;  %v3178_v9 = vpop.eup %3177 }
 0x109   :  { %v332_v13 = vadd.f32 1.0, %v3178_v9 }
 0x10a   :  { %3189 = vrcp.f32 %v328_v8 }
 0x10b   :  { %v3180_v10 = vpop.eup %3179 }
 0x10c   :  { %v329_v11 = vadd.f32 1.0, %v3180_v10  ;;  %v3182_v12 = vpop.eup %3181 }
 0x10d   :  { %v3184_v14 = vpop.eup %3183  ;;  %v331_v17 = vadd.f32 1.0, %v3182_v12 }
 0x10e   :  { %3191 = vrcp.f32 %v329_v11  ;;  %v334_v18 = vadd.f32 1.0, %v3184_v14 }
 0x10f   :  { %v3186_v15 = vpop.eup %3185  ;;  %3193 = vrcp.f32 %v332_v13  ;;  %v516_v13 = vld [vmem:[%s4153_s1 + $0x18] sm:$0xff] }
 0x110   :  { %v330_v16 = vadd.f32 1.0, %v3186_v15  ;;  %v3188_v19 = vpop.eup %3187 }
 0x111   :  { %v333_v21 = vadd.f32 1.0, %v3188_v19 }
 0x112   :  { %3195 = vrcp.f32 %v330_v16 }
 0x113   :  { %3197 = vrcp.f32 %v331_v17 }
 0x114   :  { %v3190_v20 = vpop.eup %3189  ;;  %3199 = vrcp.f32 %v334_v18 }
 0x115   :  { %356 = vrot.lane.b32.xlu0 %v3190_v20, %s3283_s5  ;;  %3201 = vrcp.f32 %v333_v21  ;;  %v517_v21 = vld [vmem:[%s4153_s1 + $0x20] sm:$0xff] }
 0x116   :  { %3203 = vtanh.f32 %v3468_v50 }
 0x117   :  { %3205 = vtanh.f32 %v3476_v58 }
 0x118   :  { %v3192_v22 = vpop.eup %3191  ;;  %3207 = vtanh.f32 %v295_v4 }
 0x119   :  { %358 = vrot.lane.b32.xlu0 %v3192_v22, %s3283_s5  ;;  %v3194_v23 = vpop.eup %3193  ;;  %3209 = vtanh.f32 %v3470_v52 }
 0x11a   :  { %3211 = vtanh.f32 %v3466_v49 }
 0x11b   :  { %3213 = vtanh.f32 %v3481_v2 }
 0x11c   :  { %v3196_v24 = vpop.eup %3195  ;;  %3215 = vtanh.f32 %v3474_v57 }
 0x11d   :  { %364 = vrot.lane.b32.xlu0 %v3194_v23, %s3283_s5  ;;  %360 = vrot.lane.b32.xlu1 %v3196_v24, %s3283_s5  ;;  %v3198_v25 = vpop.eup %3197 }
 0x11e   :  { %v3200_v26 = vpop.eup %3199 }
 0x11f   :  { %v3202_v28 = vpop.eup %3201 }
 0x120   :  { %v3204_v38 = vpop.eup %3203 }
 0x121   :  { %368 = vrot.lane.b32.xlu0 %v3200_v26, %s3283_s5  ;;  %362 = vrot.lane.b32.xlu1 %v3198_v25, %s3283_s5  ;;  %v3206_v41 = vpop.eup %3205 }
 0x122   :  { %v3208_v44 = vpop.eup %3207 }
 0x123   :  { %v3210_v47 = vpop.eup %3209 }
 0x124   :  { %v3212_v51 = vpop.eup %3211 }
 0x125   :  { %366 = vrot.lane.b32.xlu1 %v3202_v28, %s3283_s5  ;;  %561 = vrot.lane.b32.xlu0 %v559_v34, %s3284_s17  ;;  %v3214_v54 = vpop.eup %3213 }
 0x126   :  { %v3216_v57 = vpop.eup %3215 }
 0x129   :  { %545 = vrot.lane.b32.xlu1 %v543_v35, %s3284_s17  ;;  %709 = vrot.lane.b32.xlu0 %v707_v36, %s3285_s18  ;;  %v519_v36 = vld [vmem:[%s4153_s1 + $0x30] sm:$0xff] }
 0x12d   :  { %725 = vrot.lane.b32.xlu1 %v723_v37, %s3285_s18 }
 0x187   :  { %v357_v39 = vpop.permute.xlu0 %356 }
 0x188   :  { %v377_v40 = vmul.f32 %v3204_v38, %v357_v39 }
 0x18a   :  { %3030 = vmatmul.mubr.msk.f32.vlgmr.msra.gmra.mrb[20].mxu0 %vm61_vm1, %v377_v40 }
 0x18b   :  { %v359_v42 = vpop.permute.xlu0 %358  ;;  %3032 = vmatprep.mubr.msk.f32.mxu0 %vm3281_vm0, %v3282_v3 }
 0x18c   :  { %v378_v43 = vmul.f32 %v3206_v41, %v359_v42  ;;  %v520_v42 = vld [vmem:[%s4153_s1 + $0x38] sm:$0xff] }
 0x18e   :  { %3033 = vmatmul.mubr.msk.f32.gmra.mrb[22].mxu0 %vm61_vm1, %v378_v43 }
 0x18f   :  { %v361_v45 = vpop.permute.xlu1 %360  ;;  %3035 = vmatprep.mubr.msk.f32.mxu0 %vm3281_vm0, %v3282_v3  ;;  %v365_v49 = vpop.permute.xlu0 %364 }
 0x190   :  { %v379_v46 = vmul.f32 %v3208_v44, %v361_v45  ;;  %v381_v52 = vmul.f32 %v3212_v51, %v365_v49 }
 0x192   :  { %3036 = vmatmul.mubr.msk.f32.gmra.mrb[24].mxu0 %vm61_vm1, %v379_v46 }
 0x193   :  { %v363_v48 = vpop.permute.xlu1 %362  ;;  %3038 = vmatprep.mubr.msk.f32.mxu0 %vm3281_vm0, %v3282_v3  ;;  %v369_v56 = vpop.permute.xlu0 %368 }
 0x194   :  { %v380_v50 = vmul.f32 %v3210_v47, %v363_v48  ;;  %v383_v58 = vmul.f32 %v3216_v57, %v369_v56 }
 0x196   :  { %3039 = vmatmul.mubr.msk.f32.gmra.mrb[26].mxu0 %vm61_vm1, %v380_v50 }
 0x197   :  { %3041 = vmatprep.mubr.msk.f32.mxu0 %vm3281_vm0, %v3282_v3  ;;  %v367_v53 = vpop.permute.xlu1 %366  ;;  %v3530_v1 = vpop.permute.xlu0 %561 }
 0x198   :  { %v382_v55 = vmul.f32 %v3214_v54, %v367_v53 }
 0x19a   :  { %3042 = vmatmul.mubr.msk.f32.gmra.mrb[28].mxu0 %vm61_vm1, %v381_v52 }
 0x19b   :  { %3044 = vmatprep.mubr.msk.f32.mxu0 %vm3281_vm0, %v3282_v3  ;;  %v3534_v4 = vpop.permute.xlu1 %545  ;;  %v3557_v17 = vpop.permute.xlu0 %709 }
 0x19e   :  { %3045 = vmatmul.mubr.msk.f32.gmra.mrb[30].mxu0 %vm61_vm1, %v382_v55 }
 0x19f   :  { %3047 = vmatprep.mubr.msk.f32.mxu0 %vm3281_vm0, %v3282_v3  ;;  %v726_v25 = vpop.permute.xlu1 %725 }
 0x1a2   :  { %3048 = vmatmul.mubr.msk.f32.gmra.mrb[32].mxu0 %vm61_vm1, %v383_v58 }
 0x1a3   :  { %3087 = vmatprep.mubr.msk.f32.mxu0 %vm3281_vm0, %v3282_v3 }
 0x25d   :  { %v480_v60 = vpop.f32.mrb[20].mxu0 }
 0x25e   :  { %v481_v62 = vadd.f32 %v3524_v59, %v480_v60  ;;  %v3031_v63 = vpop.f32.mrb[21].mxu0 }
 0x260   :  { %v521_v2 = vadd.f32 %v514_v61, %v481_v62  ;;  %790 = vrot.lane.b32.xlu1 %v481_v62, %s3286_s21  ;;  %628 = vrot.lane.b32.xlu0 %v481_v62, %s3287_s22  ;;  %v548_v9 = vmul.f32 %v3534_v4, %v481_v62  ;;  %v564_v16 = vmul.f32 %v3530_v1, %v481_v62 }
 0x261   :  { %v485_v5 = vpop.f32.mrb[22].mxu0  ;;  %v712_v24 = vmul.f32 %v3557_v17, %v481_v62  ;;  %v728_v33 = vmul.f32 %v726_v25, %v481_v62 }
 0x262   :  { %529 = vst.msk [vmem:[%s4154_s15] sm:$0xff] %vm528_vm2, %v521_v2  ;;  %v486_v7 = vadd.f32 %v3524_v59, %v485_v5  ;;  %v3034_v8 = vpop.f32.mrb[23].mxu0 }
 0x264   :  { %v522_v10 = vadd.f32 %v515_v6, %v486_v7  ;;  %550 = vrot.lane.b32.xlu0 %v548_v9, %s3287_s22  ;;  %v872_v11 = vmul.f32 %v3534_v4, %v486_v7  ;;  %v1019_v19 = vmul.f32 %v3557_v17, %v486_v7  ;;  %v1027_v27 = vmul.f32 %v726_v25, %v486_v7 }
 0x265   :  { %v490_v12 = vpop.f32.mrb[24].mxu0  ;;  %v880_v47 = vmul.f32 %v3530_v1, %v486_v7 }
 0x266   :  { %530 = vst.msk [vmem:[%s4154_s15 + $0x8] sm:$0xff] %vm528_vm2, %v522_v10  ;;  %v491_v14 = vadd.f32 %v3524_v59, %v490_v12  ;;  %874 = vrot.lane.b32.xlu1 %v872_v11, %s3287_s22  ;;  %v3037_v15 = vpop.f32.mrb[25].mxu0 }
 0x268   :  { %v523_v18 = vadd.f32 %v516_v13, %v491_v14  ;;  %566 = vrot.lane.b32.xlu0 %v564_v16, %s3287_s22  ;;  %v1179_v40 = vmul.f32 %v3530_v1, %v491_v14  ;;  %v1326_v46 = vmul.f32 %v726_v25, %v491_v14  ;;  %v1171_v49 = vmul.f32 %v3534_v4, %v491_v14 }
 0x269   :  { %v495_v20 = vpop.f32.mrb[26].mxu0  ;;  %v1318_v52 = vmul.f32 %v3557_v17, %v491_v14 }
 0x26a   :  { %531 = vst.msk [vmem:[%s4154_s15 + $0x10] sm:$0xff] %vm528_vm2, %v523_v18  ;;  %v3569_v22 = vadd.f32 %v3524_v59, %v495_v20  ;;  %1021 = vrot.lane.b32.xlu1 %v1019_v19, %s3286_s21  ;;  %v3040_v23 = vpop.f32.mrb[27].mxu0 }
 0x26c   :  { %v524_v26 = vadd.f32 %v517_v21, %v3569_v22  ;;  %714 = vrot.lane.b32.xlu0 %v712_v24, %s3286_s21  ;;  %v1625_v48 = vmul.f32 %v726_v25, %v3569_v22  ;;  %v1470_v50 = vmul.f32 %v3534_v4, %v3569_v22  ;;  %v1617_v54 = vmul.f32 %v3557_v17, %v3569_v22 }
 0x26d   :  { %v500_v28 = vpop.f32.mrb[28].mxu0  ;;  %v1478_v56 = vmul.f32 %v3530_v1, %v3569_v22 }
 0x26e   :  { %532 = vst.msk [vmem:[%s4154_s15 + $0x18] sm:$0xff] %vm528_vm2, %v524_v26  ;;  %v3583_v30 = vadd.f32 %v3524_v59, %v500_v28  ;;  %1029 = vrot.lane.b32.xlu1 %v1027_v27, %s3286_s21  ;;  %v3043_v31 = vpop.f32.mrb[29].mxu0 }
 0x270   :  { %v525_v34 = vadd.f32 %v518_v29, %v3583_v30  ;;  %730 = vrot.lane.b32.xlu0 %v728_v33, %s3286_s21  ;;  %v1777_v51 = vmul.f32 %v3530_v1, %v3583_v30  ;;  %v1916_v58 = vmul.f32 %v3557_v17, %v3583_v30  ;;  %v1769_v60 = vmul.f32 %v3534_v4, %v3583_v30 }
 0x271   :  { %v505_v35 = vpop.f32.mrb[30].mxu0 }
 0x272   :  { %533 = vst.msk [vmem:[%s4154_s15 + $0x20] sm:$0xff] %vm528_vm2, %v525_v34  ;;  %v3596_v37 = vadd.f32 %v3524_v59, %v505_v35  ;;  %1388 = vrot.lane.b32.xlu1 %v491_v14, %s3286_s21  ;;  %v3046_v38 = vpop.f32.mrb[31].mxu0 }
 0x274   :  { %v526_v39 = vadd.f32 %v519_v36, %v3596_v37  ;;  %943 = vrot.lane.b32.xlu0 %v486_v7, %s3287_s22  ;;  %v2223_v53 = vmul.f32 %v726_v25, %v3596_v37  ;;  %v2068_v55 = vmul.f32 %v3534_v4, %v3596_v37  ;;  %v2215_v61 = vmul.f32 %v3557_v17, %v3596_v37 }
 0x275   :  { %v510_v41 = vpop.f32.mrb[32].mxu0  ;;  %v2076_v62 = vmul.f32 %v3530_v1, %v3596_v37 }
 0x276   :  { %534 = vst.msk [vmem:[%s4154_s15 + $0x28] sm:$0xff] %vm528_vm2, %v526_v39  ;;  %v3610_v43 = vadd.f32 %v3524_v59, %v510_v41  ;;  %1181 = vrot.lane.b32.xlu1 %v1179_v40, %s3287_s22  ;;  %v3049_v44 = vpop.f32.mrb[33].mxu0  ;;  %v1924_v59 = vmul.f32 %v726_v25, %v3583_v30 }
 0x278   :  { %v527_v45 = vadd.f32 %v520_v42, %v3610_v43  ;;  %1089 = vrot.lane.b32.xlu0 %v486_v7, %s3286_s21  ;;  %v2522_v57 = vmul.f32 %v726_v25, %v3610_v43  ;;  %v2514_v63 = vmul.f32 %v3557_v17, %v3610_v43  ;;  %v2367_v2 = vmul.f32 %v3534_v4, %v3610_v43 }
 0x279   :  { %v2375_v5 = vmul.f32 %v3530_v1, %v3610_v43 }
 0x27a   :  { %535 = vst.msk [vmem:[%s4154_s15 + $0x30] sm:$0xff] %vm528_vm2, %v527_v45  ;;  %1328 = vrot.lane.b32.xlu1 %v1326_v46, %s3286_s21 }
 0x27c   :  { %882 = vrot.lane.b32.xlu0 %v880_v47, %s3287_s22 }
 0x27e   :  { %1627 = vrot.lane.b32.xlu1 %v1625_v48, %s3286_s21 }
 0x280   :  { %1242 = vrot.lane.b32.xlu0 %v491_v14, %s3287_s22 }
 0x282   :  { %1472 = vrot.lane.b32.xlu1 %v1470_v50, %s3287_s22 }
 0x284   :  { %1173 = vrot.lane.b32.xlu0 %v1171_v49, %s3287_s22 }
 0x286   :  { %1779 = vrot.lane.b32.xlu1 %v1777_v51, %s3287_s22 }
 0x288   :  { %1320 = vrot.lane.b32.xlu0 %v1318_v52, %s3286_s21 }
 0x28a   :  { %2225 = vrot.lane.b32.xlu1 %v2223_v53, %s3286_s21 }
 0x28c   :  { %1619 = vrot.lane.b32.xlu0 %v1617_v54, %s3286_s21 }
 0x28e   :  { %2070 = vrot.lane.b32.xlu1 %v2068_v55, %s3287_s22 }
 0x290   :  { %1480 = vrot.lane.b32.xlu0 %v1478_v56, %s3287_s22 }
 0x292   :  { %2524 = vrot.lane.b32.xlu1 %v2522_v57, %s3286_s21 }
 0x294   :  { %1918 = vrot.lane.b32.xlu0 %v1916_v58, %s3286_s21 }
 0x298   :  { %1926 = vrot.lane.b32.xlu0 %v1924_v59, %s3286_s21 }
 0x29c   :  { %1771 = vrot.lane.b32.xlu0 %v1769_v60, %s3287_s22 }
 0x2a0   :  { %2217 = vrot.lane.b32.xlu0 %v2215_v61, %s3286_s21 }
 0x2a4   :  { %2078 = vrot.lane.b32.xlu0 %v2076_v62, %s3287_s22 }
 0x2a8   :  { %2516 = vrot.lane.b32.xlu0 %v2514_v63, %s3286_s21 }
 0x2ac   :  { %2369 = vrot.lane.b32.xlu0 %v2367_v2, %s3287_s22 }
 0x2b0   :  { %2377 = vrot.lane.b32.xlu0 %v2375_v5, %s3287_s22 }
 0x2d2   :  { %v629_v6 = vpop.permute.xlu0 %628  ;;  %v3671_v7 = vpop.permute.xlu1 %790 }
 0x2d3   :  { %3051 = vmatpush3.msra.mxu1 %v629_v6 }
 0x2d4   :  { %3055 = vmatprep.subr.mxu1 %v3282_v3 }
 0x2d6   :  { %v551_v8 = vpop.permute.xlu0 %550 }
 0x2d7   :  { %v553_v9 = vsel %vm61_vm1, %v551_v8, 0.0 }
 0x2d8   :  { %v875_v10 = vpop.permute.xlu1 %874  ;;  %554 = vadd.xlane.f32.xlu1 %v553_v9 }
 0x2d9   :  { %v877_v18 = vsel %vm61_vm1, %v875_v10, 0.0 }
 0x2da   :  { %v567_v11 = vpop.permute.xlu0 %566 }
 0x2db   :  { %v569_v4 = vsel %vm61_vm1, %v567_v11, 0.0 }
 0x2dc   :  { %v1022_v12 = vpop.permute.xlu1 %1021  ;;  %570 = vadd.xlane.f32.xlu0 %v569_v4 }
 0x2dd   :  { %v1024_v26 = vsel %vm61_vm1, %v1022_v12, 0.0 }
 0x2de   :  { %v715_v13 = vpop.permute.xlu0 %714 }
 0x2df   :  { %v717_v1 = vsel %vm61_vm1, %v715_v13, 0.0 }
 0x2e0   :  { %718 = vadd.xlane.f32.xlu0 %v717_v1  ;;  %v1030_v14 = vpop.permute.xlu1 %1029 }
 0x2e1   :  { %v1032_v29 = vsel %vm61_vm1, %v1030_v14, 0.0 }
 0x2e2   :  { %v731_v15 = vpop.permute.xlu0 %730 }
 0x2e3   :  { %v733_v16 = vsel %vm61_vm1, %v731_v15, 0.0 }
 0x2e4   :  { %734 = vadd.xlane.f32.xlu1 %v733_v16  ;;  %v3681_v19 = vpop.permute.xlu1 %1388 }
 0x2e6   :  { %v3678_v17 = vpop.permute.xlu0 %943 }
 0x2e8   :  { %878 = vadd.xlane.f32.xlu1 %v877_v18  ;;  %v1182_v21 = vpop.permute.xlu1 %1181 }
 0x2e9   :  { %v1184_v38 = vsel %vm61_vm1, %v1182_v21, 0.0 }
 0x2ea   :  { %v3683_v20 = vpop.permute.xlu0 %1089 }
 0x2ec   :  { %v1329_v27 = vpop.permute.xlu1 %1328 }
 0x2ed   :  { %v1331_v45 = vsel %vm61_vm1, %v1329_v27, 0.0 }
 0x2ee   :  { %v883_v23 = vpop.permute.xlu0 %882 }
 0x2ef   :  { %v885_v24 = vsel %vm61_vm1, %v883_v23, 0.0 }
 0x2f0   :  { %886 = vadd.xlane.f32.xlu0 %v885_v24  ;;  %v1628_v31 = vpop.permute.xlu1 %1627 }
 0x2f1   :  { %v1630_v48 = vsel %vm61_vm1, %v1628_v31, 0.0 }
 0x2f2   :  { %v3686_v25 = vpop.permute.xlu0 %1242 }
 0x2f4   :  { %1025 = vadd.xlane.f32.xlu0 %v1024_v26  ;;  %v1473_v39 = vpop.permute.xlu1 %1472 }
 0x2f5   :  { %v1475_v41 = vsel %vm61_vm1, %v1473_v39, 0.0 }
 0x2f6   :  { %v1174_v28 = vpop.permute.xlu0 %1173 }
 0x2f7   :  { %v1176_v34 = vsel %vm61_vm1, %v1174_v28, 0.0 }
 0x2f8   :  { %1033 = vadd.xlane.f32.xlu0 %v1032_v29  ;;  %v1780_v46 = vpop.permute.xlu1 %1779 }
 0x2f9   :  { %v1782_v54 = vsel %vm61_vm1, %v1780_v46, 0.0 }
 0x2fa   :  { %v1321_v33 = vpop.permute.xlu0 %1320 }
 0x2fb   :  { %v1323_v42 = vsel %vm61_vm1, %v1321_v33, 0.0 }
 0x2fc   :  { %1177 = vadd.xlane.f32.xlu0 %v1176_v34  ;;  %v2226_v52 = vpop.permute.xlu1 %2225 }
 0x2fd   :  { %v2228_v58 = vsel %vm61_vm1, %v2226_v52, 0.0 }
 0x2fe   :  { %v1620_v35 = vpop.permute.xlu0 %1619 }
 0x2ff   :  { %v1622_v36 = vsel %vm61_vm1, %v1620_v35, 0.0 }
 0x300   :  { %1623 = vadd.xlane.f32.xlu1 %v1622_v36  ;;  %1185 = vadd.xlane.f32.xlu0 %v1184_v38  ;;  %v2071_v56 = vpop.permute.xlu1 %2070 }
 0x301   :  { %v2073_v60 = vsel %vm61_vm1, %v2071_v56, 0.0 }
 0x302   :  { %v1481_v40 = vpop.permute.xlu0 %1480 }
 0x303   :  { %v1483_v51 = vsel %vm61_vm1, %v1481_v40, 0.0 }
 0x304   :  { %1476 = vadd.xlane.f32.xlu1 %v1475_v41  ;;  %1324 = vadd.xlane.f32.xlu0 %v1323_v42  ;;  %v2525_v62 = vpop.permute.xlu1 %2524 }
 0x305   :  { %v2527_v5 = vsel %vm61_vm1, %v2525_v62, 0.0 }
 0x306   :  { %v1919_v44 = vpop.permute.xlu0 %1918 }
 0x307   :  { %v1921_v55 = vsel %vm61_vm1, %v1919_v44, 0.0 }
 0x308   :  { %1332 = vadd.xlane.f32.xlu0 %v1331_v45 }
 0x30a   :  { %v1927_v47 = vpop.permute.xlu0 %1926 }
 0x30b   :  { %v1929_v59 = vsel %vm61_vm1, %v1927_v47, 0.0 }
 0x30c   :  { %1631 = vadd.xlane.f32.xlu0 %v1630_v48  ;;  %v3734_v48 = vld [vmem:[%s4155_s2] sm:$0xff]  ;;  %s3288_s2 = smov 16  }
 0x30d   :  { %vm537_vm3 = vcmp.gt.f32.partialorder %v3734_v48, 0.0 }
 0x30e   :  { %v1772_v50 = vpop.permute.xlu0 %1771 }
 0x30f   :  { %v1774_v49 = vsel %vm61_vm1, %v1772_v50, 0.0 }
 0x310   :  { %1775 = vadd.xlane.f32.xlu1 %v1774_v49  ;;  %1484 = vadd.xlane.f32.xlu0 %v1483_v51 }
 0x312   :  { %v2218_v53 = vpop.permute.xlu0 %2217 }
 0x313   :  { %v2220_v61 = vsel %vm61_vm1, %v2218_v53, 0.0 }
 0x314   :  { %1783 = vadd.xlane.f32.xlu1 %v1782_v54  ;;  %1922 = vadd.xlane.f32.xlu0 %v1921_v55 }
 0x316   :  { %v2079_v57 = vpop.permute.xlu0 %2078 }
 0x317   :  { %v2081_v2 = vsel %vm61_vm1, %v2079_v57, 0.0 }
 0x318   :  { %2229 = vadd.xlane.f32.xlu1 %v2228_v58  ;;  %1930 = vadd.xlane.f32.xlu0 %v1929_v59 }
 0x31a   :  { %v2517_v63 = vpop.permute.xlu0 %2516 }
 0x31b   :  { %v2519_v8 = vsel %vm61_vm1, %v2517_v63, 0.0 }
 0x31c   :  { %2074 = vadd.xlane.f32.xlu1 %v2073_v60  ;;  %2221 = vadd.xlane.f32.xlu0 %v2220_v61 }
 0x31e   :  { %v2370_v6 = vpop.permute.xlu0 %2369 }
 0x31f   :  { %v2372_v9 = vsel %vm61_vm1, %v2370_v6, 0.0 }
 0x320   :  { %2082 = vadd.xlane.f32.xlu1 %v2081_v2  ;;  %2528 = vadd.xlane.f32.xlu0 %v2527_v5 }
 0x322   :  { %v2378_v10 = vpop.permute.xlu0 %2377 }
 0x323   :  { %v2380_v11 = vsel %vm61_vm1, %v2378_v10, 0.0 }
 0x324   :  { %2520 = vadd.xlane.f32.xlu1 %v2519_v8 }
 0x328   :  { %2373 = vadd.xlane.f32.xlu1 %v2372_v9 }
 0x32c   :  { %2381 = vadd.xlane.f32.xlu1 %v2380_v11 }
 0x365   :  { %v555_v4 = vpop.xlane.xlu1 %554 }
 0x366   :  { %572 = vxpose.xlu1.b32.start.end [1/1] (short) (narrow) %v555_v4, 8 }
 0x369   :  { %v571_v12 = vpop.xlane.xlu0 %570 }
 0x36d   :  { %v719_v13 = vpop.xlane.xlu0 %718 }
 0x36e   :  { %736 = vxpose.xlu0.b32.start.end [1/1] (short) (narrow) %v719_v13, 8 }
 0x371   :  { %v735_v1 = vpop.xlane.xlu1 %734 }
 0x375   :  { %v879_v14 = vpop.xlane.xlu1 %878 }
 0x376   :  { %888 = vxpose.xlu1.b32.start.end [1/1] (short) (narrow) %v879_v14, 8 }
 0x37d   :  { %v887_v15 = vpop.xlane.xlu0 %886 }
 0x381   :  { %v1026_v16 = vpop.xlane.xlu0 %1025 }
 0x382   :  { %1035 = vxpose.xlu1.b32.start.end [1/1] (short) (narrow) %v1026_v16, 8 }
 0x385   :  { %v3710_v18 = vpop.xlane.xlu0 %1033 }
 0x389   :  { %v1178_v21 = vpop.xlane.xlu0 %1177 }
 0x38a   :  { %1187 = vxpose.xlu1.b32.start.end [1/1] (short) (narrow) %v1178_v21, 8 }
 0x38d   :  { %v1624_v23 = vpop.xlane.xlu1 %1623  ;;  %v3712_v24 = vpop.xlane.xlu0 %1185 }
 0x391   :  { %v1477_v26 = vpop.xlane.xlu1 %1476  ;;  %v1325_v27 = vpop.xlane.xlu0 %1324 }
 0x392   :  { %1486 = vxpose.xlu0.b32.start.end [1/1] (short) (narrow) %v1477_v26, 8  ;;  %1334 = vxpose.xlu1.b32.start.end [1/1] (short) (narrow) %v1325_v27, 8 }
 0x395   :  { %v3714_v28 = vpop.xlane.xlu0 %1332 }
 0x396   :  { %1633 = vxpose.xlu1.b32.start.end [1/1] (short) (narrow) %v1624_v23, 8 }
 0x399   :  { %v3716_v29 = vpop.xlane.xlu0 %1631 }
 0x39d   :  { %v1776_v31 = vpop.xlane.xlu1 %1775  ;;  %v3718_v33 = vpop.xlane.xlu0 %1484 }
 0x39e   :  { %1785 = vxpose.xlu1.b32.start.end [1/1] (short) (narrow) %v1776_v31, 8 }
 0x3a1   :  { %v3720_v34 = vpop.xlane.xlu1 %1783  ;;  %v1923_v35 = vpop.xlane.xlu0 %1922 }
 0x3a2   :  { %1932 = vxpose.xlu0.b32.start.end [1/1] (short) (narrow) %v1923_v35, 8 }
 0x3a5   :  { %v3722_v36 = vpop.xlane.xlu1 %2229  ;;  %v3724_v38 = vpop.xlane.xlu0 %1930 }
 0x3a9   :  { %v2075_v39 = vpop.xlane.xlu1 %2074  ;;  %v2222_v40 = vpop.xlane.xlu0 %2221 }
 0x3aa   :  { %2231 = vxpose.xlu0.b32.start.end [1/1] (short) (narrow) %v2222_v40, 8 }
 0x3ad   :  { %v3726_v41 = vpop.xlane.xlu1 %2082  ;;  %v3736_v49 = vpop.xlane.xlu0 %2528 }
 0x3ae   :  { %2084 = vxpose.xlu0.b32.start.end [1/1] (short) (narrow) %v2075_v39, 8 }
 0x3b1   :  { %v2521_v42 = vpop.xlane.xlu1 %2520 }
 0x3b2   :  { %2530 = vxpose.xlu1.b32.start.end [1/1] (short) (narrow) %v2521_v42, 8 }
 0x3b5   :  { %v2374_v44 = vpop.xlane.xlu1 %2373 }
 0x3b6   :  { %2383 = vxpose.xlu0.b32.start.end [1/1] (short) (narrow) %v2374_v44, 8 }
 0x3b9   :  { %v3728_v45 = vpop.xlane.xlu1 %2381 }
 0x3e6   :  { %v588_v46 = vpop.trf.xlu1 }
 0x3e7   :  { %v607_v47 = vrot.slane %v588_v46, %v3490_v32 }
 0x3e9   :  { %v608_v50 = vadd.f32 %v607_v47, %v571_v12 }
 0x3eb   :  { %vm609_vm4 = vcmp.ge.f32.partialorder %v608_v50, 0.0  ;;  %v610_v51 = vmul.f32 0.2, %v608_v50 }
 0x3ed   :  { %v611_v52 = vsel %vm609_vm4, %v608_v50, %v610_v51 }
 0x3ee   :  { %v752_v53 = vpop.trf.xlu0  ;;  %v3741_v54 = vsel %vm537_vm3, %v611_v52, -1e+30 }
 0x3ef   :  { %v771_v55 = vrot.slane %v752_v53, %v3490_v32  ;;  %v614_v56 = vsel %vm613_vm5, %v3741_v54, -inf }
 0x3f0   :  { %615 = vmax.xlane.f32.xlu0 %v614_v56 }
 0x3f1   :  { %v772_v57 = vadd.f32 %v771_v55, %v735_v1 }
 0x3f3   :  { %vm773_vm6 = vcmp.ge.f32.partialorder %v772_v57, 0.0  ;;  %v774_v58 = vmul.f32 0.2, %v772_v57 }
 0x3f5   :  { %v775_v59 = vsel %vm773_vm6, %v772_v57, %v774_v58 }
 0x3f6   :  { %v904_v60 = vpop.trf.xlu1  ;;  %v3748_v61 = vsel %vm537_vm3, %v775_v59, -1e+30 }
 0x3f7   :  { %v923_v62 = vrot.slane %v904_v60, %v3490_v32  ;;  %v777_v63 = vsel %vm613_vm5, %v3748_v61, -inf }
 0x3f8   :  { %778 = vmax.xlane.f32.xlu1 %v777_v63 }
 0x3f9   :  { %v924_v2 = vadd.f32 %v923_v62, %v887_v15 }
 0x3fb   :  { %v926_v5 = vmul.f32 0.2, %v924_v2  ;;  %vm925_vm7 = vcmp.ge.f32.partialorder %v924_v2, 0.0 }
 0x3fd   :  { %v927_v6 = vsel %vm925_vm7, %v924_v2, %v926_v5 }
 0x3fe   :  { %v3755_v8 = vsel %vm537_vm3, %v927_v6, -1e+30 }
 0x3ff   :  { %v929_v9 = vsel %vm613_vm5, %v3755_v8, -inf }
 0x400   :  { %930 = vmax.xlane.f32.xlu0 %v929_v9 }
 0x402   :  { %v1051_v10 = vpop.trf.xlu1 }
 0x403   :  { %v1070_v11 = vrot.slane %v1051_v10, %v3490_v32 }
 0x405   :  { %v1071_v4 = vadd.f32 %v1070_v11, %v3710_v18 }
 0x407   :  { %v1073_v12 = vmul.f32 0.2, %v1071_v4  ;;  %vm1072_vm8 = vcmp.ge.f32.partialorder %v1071_v4, 0.0 }
 0x409   :  { %v1074_v13 = vsel %vm1072_vm8, %v1071_v4, %v1073_v12 }
 0x40a   :  { %v1203_v1 = vpop.trf.xlu1  ;;  %v3763_v14 = vsel %vm537_vm3, %v1074_v13, -1e+30 }
 0x40b   :  { %v1222_v15 = vrot.slane %v1203_v1, %v3490_v32  ;;  %v1076_v16 = vsel %vm613_vm5, %v3763_v14, -inf }
 0x40c   :  { %1077 = vmax.xlane.f32.xlu0 %v1076_v16 }
 0x40d   :  { %v1223_v21 = vadd.f32 %v1222_v15, %v3712_v24 }
 0x40f   :  { %v1225_v23 = vmul.f32 0.2, %v1223_v21  ;;  %vm1224_vm9 = vcmp.ge.f32.partialorder %v1223_v21, 0.0 }
 0x411   :  { %v1226_v26 = vsel %vm1224_vm9, %v1223_v21, %v1225_v23 }
 0x412   :  { %v1350_v18 = vpop.trf.xlu1  ;;  %v1502_v27 = vpop.trf.xlu0  ;;  %v3771_v31 = vsel %vm537_vm3, %v1226_v26, -1e+30 }
 0x413   :  { %v1369_v35 = vrot.slane %v1350_v18, %v3490_v32  ;;  %v1521_v39 = vrot.slane %v1502_v27, %v3490_v32  ;;  %v1228_v40 = vsel %vm613_vm5, %v3771_v31, -inf }
 0x414   :  { %1229 = vmax.xlane.f32.xlu0 %v1228_v40 }
 0x415   :  { %v1370_v42 = vadd.f32 %v1369_v35, %v3714_v28  ;;  %v1522_v24 = vadd.f32 %v1521_v39, %v3718_v33 }
 0x416   :  { %v1649_v44 = vpop.trf.xlu1 }
 0x417   :  { %v1372_v46 = vmul.f32 0.2, %v1370_v42  ;;  %v1668_v47 = vrot.slane %v1649_v44, %v3490_v32  ;;  %vm1371_vm10 = vcmp.ge.f32.partialorder %v1370_v42, 0.0  ;;  %v1524_v50 = vmul.f32 0.2, %v1522_v24 }
 0x418   :  { %vm1523_vm11 = vcmp.ge.f32.partialorder %v1522_v24, 0.0 }
 0x419   :  { %v1669_v51 = vadd.f32 %v1668_v47, %v3716_v29  ;;  %v1373_v52 = vsel %vm1371_vm10, %v1370_v42, %v1372_v46  ;;  %v1525_v56 = vsel %vm1523_vm11, %v1522_v24, %v1524_v50 }
 0x41a   :  { %v3783_v53 = vsel %vm537_vm3, %v1373_v52, -1e+30  ;;  %v3796_v60 = vsel %vm537_vm3, %v1525_v56, -1e+30 }
 0x41b   :  { %v1671_v55 = vmul.f32 0.2, %v1669_v51  ;;  %v1375_v28 = vsel %vm613_vm5, %v3783_v53, -inf  ;;  %vm1670_vm12 = vcmp.ge.f32.partialorder %v1669_v51, 0.0  ;;  %v1527_v5 = vsel %vm613_vm5, %v3796_v60, -inf }
 0x41c   :  { %1376 = vmax.xlane.f32.xlu0 %v1375_v28 }
 0x41d   :  { %v1672_v33 = vsel %vm1670_vm12, %v1669_v51, %v1671_v55 }
 0x41e   :  { %v1801_v57 = vpop.trf.xlu1  ;;  %v3789_v58 = vsel %vm537_vm3, %v1672_v33, -1e+30 }
 0x41f   :  { %v1820_v29 = vrot.slane %v1801_v57, %v3490_v32  ;;  %v1674_v59 = vsel %vm613_vm5, %v3789_v58, -inf }
 0x420   :  { %1675 = vmax.xlane.f32.xlu0 %v1674_v59 }
 0x421   :  { %v1821_v62 = vadd.f32 %v1820_v29, %v3720_v34 }
 0x422   :  { %v1948_v63 = vpop.trf.xlu0 }
 0x423   :  { %v1967_v2 = vrot.slane %v1948_v63, %v3490_v32  ;;  %v1823_v9 = vmul.f32 0.2, %v1821_v62  ;;  %vm1822_vm13 = vcmp.ge.f32.partialorder %v1821_v62, 0.0 }
 0x424   :  { %1528 = vmax.xlane.f32.xlu0 %v1527_v5 }
 0x425   :  { %v1968_v6 = vadd.f32 %v1967_v2, %v3724_v38  ;;  %v1824_v4 = vsel %vm1822_vm13, %v1821_v62, %v1823_v9 }
 0x426   :  { %v3812_v38 = vsel %vm537_vm3, %v1824_v4, -1e+30 }
 0x427   :  { %vm1969_vm14 = vcmp.ge.f32.partialorder %v1968_v6, 0.0  ;;  %v1970_v10 = vmul.f32 0.2, %v1968_v6  ;;  %v1826_v26 = vsel %vm613_vm5, %v3812_v38, -inf }
 0x429   :  { %v1971_v11 = vsel %vm1969_vm14, %v1968_v6, %v1970_v10 }
 0x42a   :  { %v2247_v12 = vpop.trf.xlu0  ;;  %v3805_v13 = vsel %vm537_vm3, %v1971_v11, -1e+30 }
 0x42b   :  { %v2266_v34 = vrot.slane %v2247_v12, %v3490_v32  ;;  %v1973_v1 = vsel %vm613_vm5, %v3805_v13, -inf }
 0x42c   :  { %1974 = vmax.xlane.f32.xlu1 %v1973_v1 }
 0x42d   :  { %v2267_v15 = vadd.f32 %v2266_v34, %v3722_v36 }
 0x42e   :  { %v2100_v16 = vpop.trf.xlu0 }
 0x42f   :  { %v2269_v21 = vmul.f32 0.2, %v2267_v15  ;;  %v2119_v23 = vrot.slane %v2100_v16, %v3490_v32  ;;  %vm2268_vm15 = vcmp.ge.f32.partialorder %v2267_v15, 0.0 }
 0x430   :  { %1827 = vmax.xlane.f32.xlu1 %v1826_v26 }
 0x431   :  { %v2120_v18 = vadd.f32 %v2119_v23, %v3726_v41  ;;  %v2270_v27 = vsel %vm2268_vm15, %v2267_v15, %v2269_v21 }
 0x432   :  { %v2546_v35 = vpop.trf.xlu1  ;;  %v3821_v39 = vsel %vm537_vm3, %v2270_v27, -1e+30 }
 0x433   :  { %v2565_v40 = vrot.slane %v2546_v35, %v3490_v32  ;;  %v2272_v36 = vsel %vm613_vm5, %v3821_v39, -inf  ;;  %vm2121_vm4 = vcmp.ge.f32.partialorder %v2120_v18, 0.0  ;;  %v2122_v42 = vmul.f32 0.2, %v2120_v18 }
 0x434   :  { %2273 = vmax.xlane.f32.xlu0 %v2272_v36 }
 0x435   :  { %v2566_v24 = vadd.f32 %v2565_v40, %v3736_v49  ;;  %v2123_v44 = vsel %vm2121_vm4, %v2120_v18, %v2122_v42 }
 0x436   :  { %v3829_v41 = vsel %vm537_vm3, %v2123_v44, -1e+30  ;;  %v2399_v49 = vpop.trf.xlu0 }
 0x437   :  { %v2125_v46 = vsel %vm613_vm5, %v3829_v41, -inf  ;;  %vm2567_vm6 = vcmp.ge.f32.partialorder %v2566_v24, 0.0  ;;  %v2568_v47 = vmul.f32 0.2, %v2566_v24  ;;  %v2418_v55 = vrot.slane %v2399_v49, %v3490_v32 }
 0x438   :  { %2126 = vmax.xlane.f32.xlu1 %v2125_v46 }
 0x439   :  { %v2569_v50 = vsel %vm2567_vm6, %v2566_v24, %v2568_v47  ;;  %v2419_v28 = vadd.f32 %v2418_v55, %v3728_v45 }
 0x43a   :  { %v3835_v51 = vsel %vm537_vm3, %v2569_v50, -1e+30 }
 0x43b   :  { %v2571_v52 = vsel %vm613_vm5, %v3835_v51, -inf  ;;  %v2421_v33 = vmul.f32 0.2, %v2419_v28  ;;  %vm2420_vm7 = vcmp.ge.f32.partialorder %v2419_v28, 0.0 }
 0x43c   :  { %2572 = vmax.xlane.f32.xlu1 %v2571_v52 }
 0x43d   :  { %v2422_v56 = vsel %vm2420_vm7, %v2419_v28, %v2421_v33 }
 0x43e   :  { %v3847_v57 = vsel %vm537_vm3, %v2422_v56, -1e+30 }
 0x43f   :  { %v2424_v29 = vsel %vm613_vm5, %v3847_v57, -inf }
 0x44a   :  { %1687 = vrot.lane.b32.xlu0 %v3569_v22, %s3286_s21 }
 0x44d   :  { %1986 = vrot.lane.b32.xlu1 %v3583_v30, %s3286_s21 }
 0x471   :  { %2425 = vmax.xlane.f32.xlu1 %v2424_v29 }
 0x47d   :  { %v616_v59 = vpop.xlane.xlu0 %615 }
 0x47e   :  { %v617_v62 = vsub.f32 %v3741_v54, %v616_v59 }
 0x480   :  { %v618_v63 = vmul.f32 1.442695, %v617_v62 }
 0x482   :  { %3217 = vpow2.f32 %v618_v63 }
 0x485   :  { %v779_v2 = vpop.xlane.xlu1 %778 }
 0x486   :  { %v780_v32 = vsub.f32 %v3748_v61, %v779_v2 }
 0x488   :  { %v781_v45 = vmul.f32 1.442695, %v780_v32 }
 0x48a   :  { %3219 = vpow2.f32 %v781_v45 }
 0x48c   :  { %v3218_v5 = vpop.eup %3217 }
 0x48d   :  { %v3855_v6 = vsel %vm537_vm3, %v3218_v5, 0.0  ;;  %v931_v61 = vpop.xlane.xlu0 %930 }
 0x48e   :  { %v621_v9 = vsel %vm613_vm5, %v3855_v6, 0.0  ;;  %v932_v1 = vsub.f32 %v3755_v8, %v931_v61 }
 0x48f   :  { %622 = vadd.xlane.f32.xlu0 %v621_v9 }
 0x490   :  { %v933_v16 = vmul.f32 1.442695, %v932_v1 }
 0x492   :  { %3221 = vpow2.f32 %v933_v16 }
 0x494   :  { %v3220_v10 = vpop.eup %3219 }
 0x495   :  { %v3861_v54 = vsel %vm537_vm3, %v3220_v10, 0.0 }
 0x496   :  { %v784_v11 = vsel %vm613_vm5, %v3861_v54, 0.0 }
 0x497   :  { %785 = vadd.xlane.f32.xlu1 %v784_v11 }
 0x499   :  { %v1078_v4 = vpop.xlane.xlu0 %1077 }
 0x49a   :  { %v1079_v21 = vsub.f32 %v3763_v14, %v1078_v4 }
 0x49c   :  { %v1080_v18 = vmul.f32 1.442695, %v1079_v21  ;;  %v3222_v46 = vpop.eup %3221 }
 0x49e   :  { %3223 = vpow2.f32 %v1080_v18 }
 0x4a1   :  { %v1230_v12 = vpop.xlane.xlu0 %1229 }
 0x4a2   :  { %v1231_v26 = vsub.f32 %v3771_v31, %v1230_v12 }
 0x4a4   :  { %v1232_v35 = vmul.f32 1.442695, %v1231_v26 }
 0x4a5   :  { %2584 = vrot.lane.b32.xlu0 %v3610_v43, %s3286_s21 }
 0x4a6   :  { %3225 = vpow2.f32 %v1232_v35 }
 0x4a8   :  { %2285 = vrot.lane.b32.xlu1 %v3596_v37, %s3286_s21  ;;  %v3224_v50 = vpop.eup %3223 }
 0x4a9   :  { %v1377_v34 = vpop.xlane.xlu0 %1376  ;;  %v3886_v28 = vsel %vm537_vm3, %v3224_v50, 0.0 }
 0x4aa   :  { %v1378_v40 = vsub.f32 %v3783_v53, %v1377_v34  ;;  %v3879_v53 = vsel %vm537_vm3, %v3222_v46, 0.0  ;;  %v1083_v59 = vsel %vm613_vm5, %v3886_v28, 0.0 }
 0x4ac   :  { %v1379_v24 = vmul.f32 1.442695, %v1378_v40 }
 0x4ad   :  { %v1676_v15 = vpop.xlane.xlu0 %1675 }
 0x4ae   :  { %v1677_v44 = vsub.f32 %v3789_v58, %v1676_v15  ;;  %v936_v58 = vsel %vm613_vm5, %v3879_v53, 0.0 }
 0x4b0   :  { %v1678_v47 = vmul.f32 1.442695, %v1677_v44  ;;  %v3226_v55 = vpop.eup %3225 }
 0x4b1   :  { %v1529_v23 = vpop.xlane.xlu0 %1528  ;;  %v3893_v62 = vsel %vm537_vm3, %v3226_v55, 0.0 }
 0x4b2   :  { %v1530_v27 = vsub.f32 %v3796_v60, %v1529_v23  ;;  %v1235_v5 = vsel %vm613_vm5, %v3893_v62, 0.0 }
 0x4b4   :  { %v1531_v36 = vmul.f32 1.442695, %v1530_v27 }
 0x4b6   :  { %3227 = vpow2.f32 %v1531_v36 }
 0x4b7   :  { %3229 = vpow2.f32 %v1379_v24 }
 0x4b9   :  { %v1975_v42 = vpop.xlane.xlu1 %1974 }
 0x4ba   :  { %v1976_v8 = vsub.f32 %v3805_v13, %v1975_v42 }
 0x4bc   :  { %v1977_v14 = vmul.f32 1.442695, %v1976_v8 }
 0x4bd   :  { %v1828_v31 = vpop.xlane.xlu1 %1827 }
 0x4be   :  { %3231 = vpow2.f32 %v1977_v14  ;;  %v1829_v60 = vsub.f32 %v3812_v38, %v1828_v31 }
 0x4bf   :  { %3233 = vpow2.f32 %v1678_v47 }
 0x4c0   :  { %v1830_v49 = vmul.f32 1.442695, %v1829_v60  ;;  %v3228_v38 = vpop.eup %3227 }
 0x4c1   :  { %v2274_v52 = vpop.xlane.xlu0 %2273  ;;  %v3897_v63 = vsel %vm537_vm3, %v3228_v38, 0.0 }
 0x4c2   :  { %v2275_v13 = vsub.f32 %v3821_v39, %v2274_v52  ;;  %3235 = vpow2.f32 %v1830_v49  ;;  %v3230_v39 = vpop.eup %3229  ;;  %v1534_v9 = vsel %vm613_vm5, %v3897_v63, 0.0 }
 0x4c3   :  { %v3906_v11 = vsel %vm537_vm3, %v3230_v39, 0.0 }
 0x4c4   :  { %937 = vadd.xlane.f32.xlu0 %v936_v58  ;;  %v2276_v29 = vmul.f32 1.442695, %v2275_v13 }
 0x4c5   :  { %v2127_v33 = vpop.xlane.xlu1 %2126  ;;  %v1688_v56 = vpop.permute.xlu0 %1687 }
 0x4c6   :  { %3086 = vmatpush3.msra.mxu0 %v1688_v56  ;;  %3237 = vpow2.f32 %v2276_v29  ;;  %v2128_v36 = vsub.f32 %v3829_v41, %v2127_v33 }
 0x4c7   :  { %3095 = vmatprep.subr.mxu0 %v3282_v3 }
 0x4c8   :  { %1084 = vadd.xlane.f32.xlu0 %v1083_v59  ;;  %v3232_v2 = vpop.eup %3231  ;;  %v2129_v24 = vmul.f32 1.442695, %v2128_v36 }
 0x4c9   :  { %v2573_v32 = vpop.xlane.xlu1 %2572  ;;  %v3910_v61 = vsel %vm537_vm3, %v3232_v2, 0.0  ;;  %v3234_v4 = vpop.eup %3233 }
 0x4ca   :  { %v2574_v45 = vsub.f32 %v3835_v51, %v2573_v32  ;;  %v1382_v51 = vsel %vm613_vm5, %v3906_v11, 0.0  ;;  %v1980_v12 = vsel %vm613_vm5, %v3910_v61, 0.0  ;;  %v3918_v34 = vsel %vm537_vm3, %v3234_v4, 0.0 }
 0x4cb   :  { %v1681_v15 = vsel %vm613_vm5, %v3918_v34, 0.0 }
 0x4cc   :  { %v2575_v10 = vmul.f32 1.442695, %v2574_v45  ;;  %1236 = vadd.xlane.f32.xlu0 %v1235_v5  ;;  %1535 = vadd.xlane.f32.xlu1 %v1534_v9  ;;  %v3236_v1 = vpop.eup %3235 }
 0x4cd   :  { %v3924_v16 = vsel %vm537_vm3, %v3236_v1, 0.0  ;;  %v3945_v42 = vpop.permute.xlu1 %1986 }
 0x4ce   :  { %3239 = vpow2.f32 %v2575_v10  ;;  %v1833_v23 = vsel %vm613_vm5, %v3924_v16, 0.0 }
 0x4cf   :  { %3241 = vpow2.f32 %v2129_v24 }
 0x4d0   :  { %1383 = vadd.xlane.f32.xlu0 %v1382_v51  ;;  %1981 = vadd.xlane.f32.xlu1 %v1980_v12  ;;  %v3238_v21 = vpop.eup %3237 }
 0x4d1   :  { %v3930_v18 = vsel %vm537_vm3, %v3238_v21, 0.0 }
 0x4d2   :  { %v2279_v40 = vsel %vm613_vm5, %v3930_v18, 0.0 }
 0x4d4   :  { %1682 = vadd.xlane.f32.xlu0 %v1681_v15 }
 0x4d8   :  { %v3240_v26 = vpop.eup %3239  ;;  %1834 = vadd.xlane.f32.xlu0 %v1833_v23 }
 0x4d9   :  { %v3934_v27 = vsel %vm537_vm3, %v3240_v26, 0.0  ;;  %v3242_v46 = vpop.eup %3241 }
 0x4da   :  { %v2578_v35 = vsel %vm613_vm5, %v3934_v27, 0.0  ;;  %v3950_v47 = vsel %vm537_vm3, %v3242_v46, 0.0 }
 0x4db   :  { %2579 = vadd.xlane.f32.xlu1 %v2578_v35  ;;  %v2132_v41 = vsel %vm613_vm5, %v3950_v47, 0.0 }
 0x4dc   :  { %2280 = vadd.xlane.f32.xlu0 %v2279_v40 }
 0x4ec   :  { %1840 = vrot.lane.b32.xlu1 %v3583_v30, %s3287_s22 }
 0x4f2   :  { %1541 = vrot.lane.b32.xlu0 %v3569_v22, %s3287_s22 }
 0x4fe   :  { %v2426_v8 = vpop.xlane.xlu1 %2425 }
 0x4ff   :  { %v2427_v44 = vsub.f32 %v3847_v57, %v2426_v8 }
 0x501   :  { %v2428_v14 = vmul.f32 1.442695, %v2427_v44 }
 0x503   :  { %3243 = vpow2.f32 %v2428_v14 }
 0x50d   :  { %v3244_v31 = vpop.eup %3243 }
 0x50e   :  { %v3954_v22 = vsel %vm537_vm3, %v3244_v31, 0.0 }
 0x50f   :  { %v2431_v30 = vsel %vm613_vm5, %v3954_v22, 0.0 }
 0x510   :  { %2432 = vadd.xlane.f32.xlu1 %v2431_v30 }
 0x511   :  { %2133 = vadd.xlane.f32.xlu0 %v2132_v41 }
 0x51c   :  { %v623_v57 = vpop.xlane.xlu0 %622 }
 0x51d   :  { %v624_v60 = vadd.f32 1e-20, %v623_v57 }
 0x51f   :  { %3245 = vrcp.f32 %v624_v60 }
 0x521   :  { %2139 = vrot.lane.b32.xlu1 %v3596_v37, %s3287_s22  ;;  %v3974_v37 = vpop.permute.xlu0 %2584 }
 0x524   :  { %v786_v50 = vpop.xlane.xlu1 %785 }
 0x525   :  { %v787_v52 = vadd.f32 1e-20, %v786_v50 }
 0x527   :  { %3247 = vrcp.f32 %v787_v52 }
 0x528   :  { %v3976_v55 = vpop.permute.xlu1 %2285 }
 0x529   :  { %v3246_v48 = vpop.eup %3245 }
 0x52a   :  { %v626_v49 = vmul.f32 %v3246_v48, %v3855_v6 }
 0x52c   :  { %3053 = vmatmul.mubr.msk.f32.vlgmr.msra.gmra.mrb[8].mxu1 %vm613_vm5, %v626_v49 }
 0x52d   :  { %3056 = vmatpush3.msra.mxu1 %v3671_v7  ;;  %3057 = vmatprep.mubr.msk.f32.mxu1 %vm3281_vm0, %v3282_v3 }
 0x52e   :  { %3060 = vmatprep.subr.mxu1 %v3282_v3 }
 0x531   :  { %v3248_v13 = vpop.eup %3247 }
 0x532   :  { %v789_v58 = vmul.f32 %v3248_v13, %v3861_v54 }
 0x534   :  { %3058 = vmatmul.mubr.msk.f32.vlgmr.msra.gmra.mrb[10].mxu1 %vm613_vm5, %v789_v58 }
 0x535   :  { %3061 = vmatpush3.msra.mxu1 %v3678_v17  ;;  %3062 = vmatprep.mubr.msk.f32.mxu1 %vm3281_vm0, %v3282_v3 }
 0x536   :  { %3065 = vmatprep.subr.mxu1 %v3282_v3 }
 0x551   :  { %v938_v7 = vpop.xlane.xlu0 %937 }
 0x552   :  { %v939_v6 = vadd.f32 1e-20, %v938_v7 }
 0x554   :  { %3249 = vrcp.f32 %v939_v6 }
 0x555   :  { %v1085_v38 = vpop.xlane.xlu0 %1084 }
 0x556   :  { %v1086_v33 = vadd.f32 1e-20, %v1085_v38 }
 0x558   :  { %3251 = vrcp.f32 %v1086_v33 }
 0x559   :  { %v1536_v54 = vpop.xlane.xlu1 %1535  ;;  %v1237_v56 = vpop.xlane.xlu0 %1236 }
 0x55a   :  { %v1238_v29 = vadd.f32 1e-20, %v1237_v56  ;;  %v1537_v2 = vadd.f32 1e-20, %v1536_v54 }
 0x55c   :  { %3253 = vrcp.f32 %v1238_v29 }
 0x55d   :  { %v1384_v17 = vpop.xlane.xlu0 %1383  ;;  %v1982_v32 = vpop.xlane.xlu1 %1981 }
 0x55e   :  { %v3250_v59 = vpop.eup %3249  ;;  %v1385_v39 = vadd.f32 1e-20, %v1384_v17  ;;  %v1983_v10 = vadd.f32 1e-20, %v1982_v32 }
 0x55f   :  { %v941_v45 = vmul.f32 %v3250_v59, %v3879_v53 }
 0x560   :  { %3255 = vrcp.f32 %v1385_v39 }
 0x561   :  { %3063 = vmatmul.mubr.msk.f32.vlgmr.msra.gmra.mrb[12].mxu1 %vm613_vm5, %v941_v45  ;;  %v1683_v5 = vpop.xlane.xlu0 %1682  ;;  %3257 = vrcp.f32 %v1537_v2 }
 0x562   :  { %v3252_v9 = vpop.eup %3251  ;;  %3066 = vmatpush3.msra.mxu1 %v3683_v20  ;;  %v1684_v4 = vadd.f32 1e-20, %v1683_v5  ;;  %3067 = vmatprep.mubr.msk.f32.mxu1 %vm3281_vm0, %v3282_v3 }
 0x563   :  { %3070 = vmatprep.subr.mxu1 %v3282_v3  ;;  %v1088_v51 = vmul.f32 %v3252_v9, %v3886_v28 }
 0x564   :  { %3259 = vrcp.f32 %v1684_v4 }
 0x565   :  { %3068 = vmatmul.mubr.msk.f32.vlgmr.msra.gmra.mrb[14].mxu1 %vm613_vm5, %v1088_v51  ;;  %v1835_v53 = vpop.xlane.xlu0 %1834  ;;  %3261 = vrcp.f32 %v1983_v10  ;;  %v2673_v51 = vld [vmem:[%s4156_s10] sm:$0xff] }
 0x566   :  { %3071 = vmatpush3.msra.mxu1 %v3686_v25  ;;  %v1836_v12 = vadd.f32 1e-20, %v1835_v53  ;;  %3072 = vmatprep.mubr.msk.f32.mxu1 %vm3281_vm0, %v3282_v3  ;;  %v3254_v20 = vpop.eup %3253  ;;  %v2674_v53 = vld [vmem:[%s4156_s10 + $0x8] sm:$0xff] }
 0x567   :  { %3075 = vmatprep.subr.mxu1 %v3282_v3  ;;  %v1240_v15 = vmul.f32 %v3254_v20, %v3893_v62 }
 0x568   :  { %3263 = vrcp.f32 %v1836_v12  ;;  %v2580_v1 = vpop.xlane.xlu1 %2579 }
 0x569   :  { %v2281_v21 = vpop.xlane.xlu0 %2280  ;;  %v2581_v28 = vadd.f32 1e-20, %v2580_v1  ;;  %3073 = vmatmul.mubr.msk.f32.vlgmr.msra.gmra.mrb[16].mxu1 %vm613_vm5, %v1240_v15  ;;  %v3159_v1 = vpack.c.bf16 %v2674_v53, %v2673_v51 }
 0x56a   :  { %v2282_v23 = vadd.f32 1e-20, %v2281_v21  ;;  %v3256_v26 = vpop.eup %3255  ;;  %3076 = vmatpush3.msra.mxu1 %v3681_v19  ;;  %3077 = vmatprep.mubr.msk.f32.mxu1 %vm3281_vm0, %v3282_v3 }
 0x56b   :  { %v1387_v25 = vmul.f32 %v3256_v26, %v3906_v11  ;;  %3080 = vmatprep.subr.mxu1 %v3282_v3  ;;  %v3258_v35 = vpop.eup %3257 }
 0x56c   :  { %3265 = vrcp.f32 %v2282_v23  ;;  %v1539_v24 = vmul.f32 %v3258_v35, %v3897_v63  ;;  %v1841_v8 = vpop.permute.xlu1 %1840  ;;  %v2676_v23 = vld [vmem:[%s4156_s10 + $0x18] sm:$0xff] }
 0x56d   :  { %v1542_v40 = vpop.permute.xlu0 %1541  ;;  %3267 = vrcp.f32 %v2581_v28  ;;  %3078 = vmatmul.mubr.msk.f32.vlgmr.msra.gmra.mrb[18].mxu1 %vm613_vm5, %v1387_v25  ;;  %v2675_v28 = vld [vmem:[%s4156_s10 + $0x10] sm:$0xff] }
 0x56e   :  { %v3260_v36 = vpop.eup %3259  ;;  %3081 = vmatpush3.msra.mxu1 %v1542_v40  ;;  %3082 = vmatprep.mubr.msk.f32.mxu1 %vm3281_vm0, %v3282_v3  ;;  %v3162_v26 = vpack.c.bf16 %v2676_v23, %v2675_v28 }
 0x56f   :  { %v1686_v62 = vmul.f32 %v3260_v36, %v3918_v34  ;;  %v3262_v19 = vpop.eup %3261  ;;  %3090 = vmatprep.subr.mxu1 %v3282_v3 }
 0x570   :  { %v1985_v44 = vmul.f32 %v3262_v19, %v3910_v61 }
 0x571   :  { %3088 = vmatmul.mubr.msk.f32.vlgmr.msra.gmra.mrb[34].mxu0 %vm613_vm5, %v1686_v62  ;;  %3083 = vmatmul.mubr.msk.f32.vlgmr.msra.gmra.mrb[20].mxu1 %vm613_vm5, %v1539_v24 }
 0x572   :  { %v3264_v11 = vpop.eup %3263  ;;  %3096 = vmatpush3.msra.mxu0 %v3945_v42  ;;  %3091 = vmatpush3.msra.mxu1 %v1841_v8 }
 0x573   :  { %3092 = vmatprep.mubr.msk.f32.mxu1 %vm3281_vm0, %v3282_v3  ;;  %v1838_v34 = vmul.f32 %v3264_v11, %v3924_v16  ;;  %3097 = vmatprep.mubr.msk.f32.mxu0 %vm3281_vm0, %v3282_v3 }
 0x574   :  { %3105 = vmatprep.subr.mxu0 %v3282_v3  ;;  %3100 = vmatprep.subr.mxu1 %v3282_v3 }
 0x575   :  { %3098 = vmatmul.mubr.msk.f32.vlgmr.msra.gmra.mrb[36].mxu0 %vm613_vm5, %v1985_v44  ;;  %3093 = vmatmul.mubr.msk.f32.vlgmr.msra.gmra.mrb[22].mxu1 %vm613_vm5, %v1838_v34 }
 0x576   :  { %v3266_v63 = vpop.eup %3265  ;;  %3106 = vmatpush3.msra.mxu0 %v3976_v55  ;;  %3107 = vmatprep.mubr.msk.f32.mxu0 %vm3281_vm0, %v3282_v3 }
 0x577   :  { %3115 = vmatprep.subr.mxu0 %v3282_v3  ;;  %v2284_v61 = vmul.f32 %v3266_v63, %v3930_v18  ;;  %v3268_v16 = vpop.eup %3267  ;;  %3102 = vmatprep.mubr.msk.f32.mxu1 %vm3281_vm0, %v3282_v3 }
 0x578   :  { %v2583_v42 = vmul.f32 %v3268_v16, %v3934_v27 }
 0x579   :  { %3108 = vmatmul.mubr.msk.f32.vlgmr.msra.gmra.mrb[38].mxu0 %vm613_vm5, %v2284_v61 }
 0x57a   :  { %3116 = vmatpush3.msra.mxu0 %v3974_v37  ;;  %3117 = vmatprep.mubr.msk.f32.mxu0 %vm3281_vm0, %v3282_v3 }
 0x57d   :  { %3118 = vmatmul.mubr.msk.f32.vlgmr.msra.gmra.mrb[40].mxu0 %vm613_vm5, %v2583_v42 }
 0x59d   :  { %v2433_v14 = vpop.xlane.xlu1 %2432 }
 0x59e   :  { %v2134_v46 = vpop.xlane.xlu0 %2133  ;;  %v2434_v10 = vadd.f32 1e-20, %v2433_v14 }
 0x59f   :  { %v2135_v31 = vadd.f32 1e-20, %v2134_v46  ;;  %v2899_v46 = vld [vmem:[%s4157_s11] ss:$0 sm:$0xff] }
 0x5a1   :  { %3269 = vrcp.f32 %v2135_v31  ;;  %v2140_v18 = vpop.permute.xlu1 %2139 }
 0x5a2   :  { %3101 = vmatpush3.msra.mxu1 %v2140_v18  ;;  %3271 = vrcp.f32 %v2434_v10 }
 0x5a3   :  { %3110 = vmatprep.subr.mxu1 %v3282_v3 }
 0x5ab   :  { %v3270_v30 = vpop.eup %3269 }
 0x5ac   :  { %v2137_v41 = vmul.f32 %v3270_v30, %v3950_v47  ;;  %v3272_v12 = vpop.eup %3271 }
 0x5ad   :  { %v2436_v21 = vmul.f32 %v3272_v12, %v3954_v22 }
 0x5ae   :  { %3103 = vmatmul.mubr.msk.f32.vlgmr.msra.gmra.mrb[24].mxu1 %vm613_vm5, %v2137_v41 }
 0x5af   :  { %3112 = vmatprep.mubr.msk.f32.mxu1 %vm3281_vm0, %v3282_v3 }
 0x5ff   :  { %v700_v57 = vpop.f32.mrb[8].mxu1 }
 0x600   :  { %v3054_v27 = vpop.f32.mrb[9].mxu1 }
 0x607   :  { %v862_v60 = vpop.f32.mrb[10].mxu1 }
 0x608   :  { %867 = vrot.lane.b32.xlu0 %v862_v60, %s3288_s2  ;;  %v3059_v50 = vpop.f32.mrb[11].mxu1  ;;  %v2908_v60 = vld [vmem:[%s4159_s13] ss:$0 sm:$0xff] }
 0x634   :  { %v1015_v52 = vpop.f32.mrb[12].mxu1 }
 0x635   :  { %v3064_v48 = vpop.f32.mrb[13].mxu1 }
 0x638   :  { %v1161_v49 = vpop.f32.mrb[14].mxu1 }
 0x639   :  { %1166 = vrot.lane.b32.xlu0 %v1161_v49, %s3288_s2  ;;  %v3069_v13 = vpop.f32.mrb[15].mxu1 }
 0x63c   :  { %v1314_v58 = vpop.f32.mrb[16].mxu1 }
 0x63d   :  { %2438 = vrot.lane.b32.xlu0 %v3610_v43, %s3287_s22  ;;  %v3074_v47 = vpop.f32.mrb[17].mxu1 }
 0x640   :  { %v1460_v37 = vpop.f32.mrb[18].mxu1 }
 0x641   :  { %1465 = vrot.lane.b32.xlu1 %v1460_v37, %s3288_s2  ;;  %v3079_v7 = vpop.f32.mrb[19].mxu1 }
 0x644   :  { %v1759_v6 = vpop.f32.mrb[34].mxu0  ;;  %v1613_v55 = vpop.f32.mrb[20].mxu1 }
 0x645   :  { %1764 = vrot.lane.b32.xlu0 %v1759_v6, %s3288_s2  ;;  %v3089_v38 = vpop.f32.mrb[35].mxu0  ;;  %v3084_v33 = vpop.f32.mrb[21].mxu1 }
 0x646   :  { %v3275_v33 = vld [vmem:[%s4147_s0 + $0x18] sm:$0xff] }
 0x648   :  { %v2058_v54 = vpop.f32.mrb[36].mxu0  ;;  %v1912_v56 = vpop.f32.mrb[22].mxu1 }
 0x649   :  { %2063 = vrot.lane.b32.xlu1 %v2058_v54, %s3288_s2  ;;  %v3099_v29 = vpop.f32.mrb[37].mxu0  ;;  %v3094_v17 = vpop.f32.mrb[23].mxu1 }
 0x64c   :  { %v2357_v59 = vpop.f32.mrb[38].mxu0 }
 0x64d   :  { %2362 = vrot.lane.b32.xlu0 %v2357_v59, %s3288_s2  ;;  %v3109_v39 = vpop.f32.mrb[39].mxu0 }
 0x650   :  { %v2656_v2 = vpop.f32.mrb[40].mxu0 }
 0x651   :  { %2661 = vrot.lane.b32.xlu1 %v2656_v2, %s3288_s2  ;;  %v3119_v43 = vpop.f32.mrb[41].mxu0  ;;  %v3276_v2 = vld [vmem:[%s4147_s0 + $0x20] sm:$0xff] }
 0x67a   :  { %v868_v32 = vpop.permute.xlu0 %867 }
 0x67b   :  { %v870_v45 = vsel %vm61_vm1, %v700_v57, %v868_v32  ;;  %v2907_v57 = vld [vmem:[%s4158_s12] ss:$0 sm:$0xff] }
 0x67c   :  { %871 = vst.msk [vmem:[#allocation2] sm:$0xff] %vm528_vm2, %v870_v45 }
 0x681   :  { %v2211_v5 = vpop.f32.mrb[24].mxu1 }
 0x682   :  { %v3104_v9 = vpop.f32.mrb[25].mxu1 }
 0x683   :  { %v2666_v36 = vld [vmem:[#allocation2] sm:$0xff] }
 0x6ab   :  { %v1167_v4 = vpop.permute.xlu0 %1166 }
 0x6ac   :  { %v1169_v20 = vsel %vm61_vm1, %v1015_v52, %v1167_v4  ;;  %v3277_v4 = vld [vmem:[%s4147_s0 + $0x28] sm:$0xff] }
 0x6ad   :  { %1170 = vst.msk [vmem:[#allocation2 + $0x8] sm:$0xff] %vm528_vm2, %v1169_v20 }
 0x6af   :  { %v2439_v15 = vpop.permute.xlu0 %2438 }
 0x6b0   :  { %3111 = vmatpush3.msra.mxu1 %v2439_v15 }
 0x6b1   :  { %3113 = vmatmul.mubr.msk.f32.vlgmr.msra.gmra.mrb[26].mxu1 %vm613_vm5, %v2436_v21  ;;  %3158 = vmatprep.subr.bf16.mxu1 %v3280_v0  ;;  %v3278_v21 = vld [vmem:[%s4147_s0 + $0x30] sm:$0xff] }
 0x6b2   :  { %3160 = vmatpush3.bf16.msra.mxu1 %v3159_v1  ;;  %3128 = vmatprep.mubr.msk.f32.mxu1 %vm3281_vm0, %v3282_v3 }
 0x6b3   :  { %3161 = vmatprep.subr.bf16.mxu1 %v3280_v0  ;;  %v1466_v22 = vpop.permute.xlu1 %1465 }
 0x6b4   :  { %v1468_v25 = vsel %vm61_vm1, %v1314_v58, %v1466_v22  ;;  %v2667_v19 = vld [vmem:[#allocation2 + $0x8] sm:$0xff]  ;;  %v3274_v58 = vld [vmem:[%s4147_s0 + $0x10] sm:$0xff] }
 0x6b5   :  { %1469 = vst.msk [vmem:[#allocation2 + $0x10] sm:$0xff] %vm528_vm2, %v1468_v25 }
 0x6b6   :  { %3163 = vmatpush3.bf16.msra.mxu1 %v3162_v26 }
 0x6b7   :  { %v1765_v35 = vpop.permute.xlu0 %1764 }
 0x6b8   :  { %v1767_v40 = vsel %vm61_vm1, %v1613_v55, %v1765_v35 }
 0x6b9   :  { %1768 = vst.msk [vmem:[#allocation2 + $0x18] sm:$0xff] %vm528_vm2, %v1767_v40  ;;  %3129 = vmatmul.mubr.msk.f32.vlgmr.msra.gmra.mrb[28].mxu1 %vm528_vm2, %v2666_v36  ;;  %v3279_v40 = vld [vmem:[%s4147_s0 + $0x38] sm:$0xff] }
 0x6ba   :  { %3131 = vmatprep.mubr.msk.f32.mxu1 %vm3281_vm0, %v3282_v3 }
 0x6bb   :  { %v2064_v62 = vpop.permute.xlu1 %2063 }
 0x6bc   :  { %v2066_v0 = vsel %vm61_vm1, %v1912_v56, %v2064_v62  ;;  %v2668_v8 = vld [vmem:[#allocation2 + $0x10] sm:$0xff] }
 0x6bd   :  { %2067 = vst.msk [vmem:[#allocation2 + $0x20] sm:$0xff] %vm528_vm2, %v2066_v0  ;;  %3132 = vmatmul.mubr.msk.f32.gmra.mrb[30].mxu1 %vm528_vm2, %v2667_v19 }
 0x6be   :  { %3134 = vmatprep.mubr.msk.f32.mxu1 %vm3281_vm0, %v3282_v3 }
 0x6bf   :  { %v2363_v24 = vpop.permute.xlu0 %2362 }
 0x6c0   :  { %v2365_v11 = vsel %vm61_vm1, %v2211_v5, %v2363_v24  ;;  %v2669_v34 = vld [vmem:[#allocation2 + $0x18] sm:$0xff] }
 0x6c1   :  { %2366 = vst.msk [vmem:[#allocation2 + $0x28] sm:$0xff] %vm528_vm2, %v2365_v11  ;;  %3135 = vmatmul.mubr.msk.f32.gmra.mrb[32].mxu1 %vm528_vm2, %v2668_v8 }
 0x6c2   :  { %3137 = vmatprep.mubr.msk.f32.mxu1 %vm3281_vm0, %v3282_v3 }
 0x6c3   :  { %v2662_v61 = vpop.permute.xlu1 %2661 }
 0x6c4   :  { %v2670_v44 = vld [vmem:[#allocation2 + $0x20] sm:$0xff] }
 0x6c5   :  { %3138 = vmatmul.mubr.msk.f32.gmra.mrb[34].mxu1 %vm528_vm2, %v2669_v34 }
 0x6c6   :  { %3140 = vmatprep.mubr.msk.f32.mxu1 %vm3281_vm0, %v3282_v3 }
 0x6c8   :  { %v2671_v63 = vld [vmem:[#allocation2 + $0x28] sm:$0xff] }
 0x6c9   :  { %3141 = vmatmul.mubr.msk.f32.gmra.mrb[36].mxu1 %vm528_vm2, %v2670_v44 }
 0x6ca   :  { %3143 = vmatprep.mubr.msk.f32.mxu1 %vm3281_vm0, %v3282_v3 }
 0x6cd   :  { %3144 = vmatmul.mubr.msk.f32.gmra.mrb[38].mxu1 %vm528_vm2, %v2671_v63 }
 0x6ce   :  { %3146 = vmatprep.mubr.msk.f32.mxu1 %vm3281_vm0, %v3282_v3  ;;  %v3273_v3 = vld [vmem:[%s4147_s0 + $0x8] sm:$0xff] }
 0x784   :  { %v2510_v16 = vpop.f32.mrb[26].mxu1 }
 0x785   :  { %v2664_v42 = vsel %vm61_vm1, %v2510_v16, %v2662_v61  ;;  %v3114_v14 = vpop.f32.mrb[27].mxu1 }
 0x786   :  { %2665 = vst.msk [vmem:[#allocation2 + $0x30] sm:$0xff] %vm528_vm2, %v2664_v42 }
 0x78c   :  { %v2771_v31 = vpop.f32.mrb[28].mxu1 }
 0x78d   :  { %v2772_v18 = vadd.f32 %v2899_v46, %v2771_v31  ;;  %v3130_v30 = vpop.f32.mrb[29].mxu1  ;;  %v2672_v41 = vld [vmem:[#allocation2 + $0x30] sm:$0xff] }
 0x78e   :  { %3147 = vmatmul.mubr.msk.f32.gmra.mrb[40].mxu1 %vm528_vm2, %v2672_v41 }
 0x78f   :  { %v2805_v27 = vadd.f32 %v3273_v3, %v2772_v18 }
 0x790   :  { %v2776_v50 = vpop.f32.mrb[30].mxu1 }
 0x791   :  { %v2819_v52 = vmul.f32 %v2907_v57, %v2805_v27  ;;  %v2777_v48 = vadd.f32 %v2899_v46, %v2776_v50  ;;  %v3133_v49 = vpop.f32.mrb[31].mxu1 }
 0x793   :  { %v2833_v13 = vadd.f32 %v2908_v60, %v2819_v52  ;;  %v2806_v47 = vadd.f32 %v3274_v58, %v2777_v48 }
 0x794   :  { %v2781_v37 = vpop.f32.mrb[32].mxu1 }
 0x795   :  { %2840 = vst.msk [vmem:[%s4160_s14] sm:$0xff] %vm61_vm1, %v2833_v13  ;;  %v2820_v7 = vmul.f32 %v2907_v57, %v2806_v47  ;;  %v2782_v6 = vadd.f32 %v2899_v46, %v2781_v37  ;;  %v3136_v55 = vpop.f32.mrb[33].mxu1 }
 0x797   :  { %v2834_v38 = vadd.f32 %v2908_v60, %v2820_v7  ;;  %v2807_v54 = vadd.f32 %v3275_v33, %v2782_v6 }
 0x798   :  { %v2786_v56 = vpop.f32.mrb[34].mxu1 }
 0x799   :  { %2841 = vst.msk [vmem:[%s4160_s14 + $0x8] sm:$0xff] %vm61_vm1, %v2834_v38  ;;  %v2821_v29 = vmul.f32 %v2907_v57, %v2807_v54  ;;  %v2787_v17 = vadd.f32 %v2899_v46, %v2786_v56  ;;  %v3139_v59 = vpop.f32.mrb[35].mxu1 }
 0x79b   :  { %v2835_v39 = vadd.f32 %v2908_v60, %v2821_v29  ;;  %v2808_v43 = vadd.f32 %v3276_v2, %v2787_v17 }
 0x79c   :  { %v2791_v32 = vpop.f32.mrb[36].mxu1 }
 0x79d   :  { %2842 = vst.msk [vmem:[%s4160_s14 + $0x10] sm:$0xff] %vm61_vm1, %v2835_v39  ;;  %v2822_v45 = vmul.f32 %v2907_v57, %v2808_v43  ;;  %v2792_v5 = vadd.f32 %v2899_v46, %v2791_v32  ;;  %v3142_v9 = vpop.f32.mrb[37].mxu1 }
 0x79f   :  { %v2836_v10 = vadd.f32 %v2908_v60, %v2822_v45  ;;  %v2809_v51 = vadd.f32 %v3277_v4, %v2792_v5 }
 0x7a0   :  { %v2796_v53 = vpop.f32.mrb[38].mxu1 }
 0x7a1   :  { %2843 = vst.msk [vmem:[%s4160_s14 + $0x18] sm:$0xff] %vm61_vm1, %v2836_v10  ;;  %v2823_v12 = vmul.f32 %v2907_v57, %v2809_v51  ;;  %v2797_v20 = vadd.f32 %v2899_v46, %v2796_v53  ;;  %v3145_v1 = vpop.f32.mrb[39].mxu1 }
 0x7a3   :  { %v2837_v15 = vadd.f32 %v2908_v60, %v2823_v12  ;;  %v2810_v28 = vadd.f32 %v3278_v21, %v2797_v20 }
 0x7a5   :  { %2844 = vst.msk [vmem:[%s4160_s14 + $0x20] sm:$0xff] %vm61_vm1, %v2837_v15  ;;  %v2824_v23 = vmul.f32 %v2907_v57, %v2810_v28 }
 0x7a7   :  { %v2838_v26 = vadd.f32 %v2908_v60, %v2824_v23 }
 0x7a9   :  { %2845 = vst.msk [vmem:[%s4160_s14 + $0x28] sm:$0xff] %vm61_vm1, %v2838_v26 }
 0x861   :  { %v2801_v22 = vpop.f32.mrb[40].mxu1 }
 0x862   :  { %v2802_v25 = vadd.f32 %v2899_v46, %v2801_v22  ;;  %v3148_v35 = vpop.f32.mrb[41].mxu1 }
 0x864   :  { %v2811_v36 = vadd.f32 %v3279_v40, %v2802_v25 }
 0x866   :  { %v2825_v62 = vmul.f32 %v2907_v57, %v2811_v36 }
 0x868   :  { %v2839_v0 = vadd.f32 %v2908_v60, %v2825_v62 }
 0x86a   :  { %2846 = vst.msk [vmem:[%s4160_s14 + $0x30] sm:$0xff] %vm61_vm1, %v2839_v0 }

// kernel: ours_forward.12
= control target key start
LH: loop header
LB: loop body
LE: loop exit
PB: predicated region body
PF: predicated region fallthrough
CT: control target
= control target key end

     0   :  { %v492_v3 = vmov 0.0   ;;  %vm82_vm0 = vcmask 130048   ;;  %v493_v29 = vmov 0.0|0.0   ;;  %vm494_vm1 = vmmov 0   ;;  %s610_s1 = inlined_call_operand.vmem [shape: f32[16,1056], index: 1, kind: input, shape index: {}]   ;;  %s611_s0 = inlined_call_operand.vmem [shape: f32[8,16], index: 0, kind: input, shape index: {}]   ;;  %s612_s2 = inlined_call_operand.vmem [shape: f32[1,1056], index: 2, kind: input, shape index: {}]   ;;  %s613_s3 = inlined_call_operand.vmem [shape: f32[8,1056], index: 3, kind: output, shape index: {}]  }
   0x1   :  { %v16_v0 = vld [vmem:[%s610_s1 + $0x8] sm:$0xff]  ;;  %v25_v1 = vld [vmem:[%s610_s1 + $0x50] sm:$0xff]  ;;  %v15_v2 = vld [vmem:[%s610_s1] sm:$0xff]  ;;  %150 = vmatprep.mubr.f32.mxu0 %v492_v3  ;;  %221 = vmatprep.mubr.f32.mxu1 %v492_v3  ;;  %v37_v30 = vlaneseq  ;;  %vm448_vm2 = vcmask 261120  }
   0x2   :  { %v470_v4 = vpack.c.bf16 %v25_v1, %v16_v0  ;;  %v24_v5 = vld [vmem:[%s610_s1 + $0x48] sm:$0xff]  ;;  %v18_v6 = vld [vmem:[%s610_s1 + $0x18] sm:$0xff]  ;;  %v27_v7 = vld [vmem:[%s610_s1 + $0x60] sm:$0xff] }
   0x3   :  { %v472_v8 = vpack.c.bf16 %v24_v5, %v15_v2  ;;  %v474_v9 = vpack.c.bf16 %v27_v7, %v18_v6  ;;  %v14_v10 = vld [vmem:[%s611_s0] sm:$0xff]  ;;  %v17_v11 = vld [vmem:[%s610_s1 + $0x10] sm:$0xff]  ;;  %v26_v12 = vld [vmem:[%s610_s1 + $0x58] sm:$0xff]  ;;  %v38_v31 = vshrl.u32 %v37_v30, 7 }
   0x4   :  { %471 = vmatprep.subr.bf16.mxu0 %v470_v4  ;;  %v476_v13 = vpack.c.bf16 %v26_v12, %v17_v11  ;;  %v20_v14 = vld [vmem:[%s610_s1 + $0x28] sm:$0xff]  ;;  %v29_v15 = vld [vmem:[%s610_s1 + $0x70] sm:$0xff]  ;;  %v19_v16 = vld [vmem:[%s610_s1 + $0x20] sm:$0xff] }
   0x5   :  { %473 = vmatpush1.bf16.msra.mxu0 %v472_v8  ;;  %475 = vmatprep.subr.bf16.mxu1 %v474_v9  ;;  %v478_v17 = vpack.c.bf16 %v29_v15, %v20_v14  ;;  %v28_v18 = vld [vmem:[%s610_s1 + $0x68] sm:$0xff]  ;;  %v22_v19 = vld [vmem:[%s610_s1 + $0x38] sm:$0xff]  ;;  %v31_v20 = vld [vmem:[%s610_s1 + $0x80] sm:$0xff]  ;;  %v39_v32 = vsub.s32 0, %v38_v31  ;;  %v43_v34 = vsub.s32 1, %v38_v31  ;;  %v47_v35 = vsub.s32 2, %v38_v31 }
   0x6   :  { %477 = vmatpush1.bf16.msra.mxu1 %v476_v13  ;;  %v480_v21 = vpack.c.bf16 %v28_v18, %v19_v16  ;;  %v482_v22 = vpack.c.bf16 %v31_v20, %v22_v19  ;;  %v21_v23 = vld [vmem:[%s610_s1 + $0x30] sm:$0xff]  ;;  %v30_v24 = vld [vmem:[%s610_s1 + $0x78] sm:$0xff]  ;;  %v23_v25 = vld [vmem:[%s610_s1 + $0x40] sm:$0xff]  ;;  %v51_v36 = vsub.s32 3, %v38_v31  ;;  %v55_v38 = vsub.s32 4, %v38_v31 }
   0x7   :  { %479 = vmatprep.subr.bf16.mxu0 %v478_v17  ;;  %v484_v26 = vpack.c.bf16 %v30_v24, %v21_v23  ;;  %v32_v27 = vld [vmem:[%s610_s1 + $0x88] sm:$0xff]  ;;  %v33_v33 = vld [vmem:[%s612_s2] sm:$0xff]  ;;  %v59_v41 = vsub.s32 5, %v38_v31  ;;  %v63_v42 = vsub.s32 6, %v38_v31  ;;  %v67_v44 = vsub.s32 7, %v38_v31 }
   0x8   :  { %455 = vmatmul.mubr.msk.f32.vlgmr.msra.gmra.mrb[0].mxu0 %vm82_vm0, %v14_v10  ;;  %483 = vmatprep.subr.bf16.mxu1 %v482_v22  ;;  %v487_v28 = vpack.c.bf16 %v32_v27, %v23_v25  ;;  %v40_v37 = vrot.slane %v33_v33, %v39_v32  ;;  %v44_v39 = vrot.slane %v33_v33, %v43_v34  ;;  %v454_v0 = vld [vmem:[%s612_s2 + $0x8] ss:$0 sm:$0xff] }
   0x9   :  { %481 = vmatpush1.bf16.msra.mxu0 %v480_v21  ;;  %456 = vmatmul.mubr.msk.f32.vlgmr.msra.gmra.mrb[0].mxu1 %vm82_vm0, %v14_v10  ;;  %v48_v40 = vrot.slane %v33_v33, %v47_v35  ;;  %v52_v43 = vrot.slane %v33_v33, %v51_v36  ;;  %v56_v49 = vrot.slane %v33_v33, %v55_v38 }
   0xa   :  { %292 = vmatprep.mubr.f32.mxu0 %v492_v3  ;;  %485 = vmatpush1.bf16.msra.mxu1 %v484_v26  ;;  %v60_v53 = vrot.slane %v33_v33, %v59_v41  ;;  %v64_v54 = vrot.slane %v33_v33, %v63_v42  ;;  %v68_v56 = vrot.slane %v33_v33, %v67_v44 }
   0xb   :  { %486 = vmatprep.subr.bf16.mxu0 %v493_v29  ;;  %363 = vmatprep.mubr.f32.mxu1 %v492_v3 }
   0xc   :  { %457 = vmatmul.mubr.msk.f32.vlgmr.msra.gmra.mrb[2].mxu0 %vm82_vm0, %v14_v10 }
   0xd   :  { %488 = vmatpush3.bf16.msra.mxu0 %v487_v28  ;;  %458 = vmatmul.mubr.msk.f32.vlgmr.msra.gmra.mrb[2].mxu1 %vm82_vm0, %v14_v10 }
   0xe   :  { %467 = vmatprep.mubr.msk.f32.mxu0 %vm494_vm1, %v492_v3 }
  0x10   :  { %468 = vmatmul.mubr.msk.f32.vlgmr.msra.gmra.mrb[4].mxu0 %vm82_vm0, %v14_v10 }
  0xdb   :  { %v152_v45 = vpop.f32.mrb[0].mxu0 }
  0xdc   :  { %v153_v46 = vadd.f32 %v152_v45, %v40_v37  ;;  %v154_v47 = vpop.f32.mrb[1].mxu0  ;;  %v223_v48 = vpop.f32.mrb[0].mxu1 }
  0xdd   :  { %v155_v50 = vadd.f32 %v154_v47, %v44_v39  ;;  %v224_v51 = vadd.f32 %v223_v48, %v48_v40  ;;  %v225_v52 = vpop.f32.mrb[1].mxu1 }
  0xde   :  { %440 = vst [vmem:[%s613_s3] sm:$0xff] %v153_v46  ;;  %v226_v55 = vadd.f32 %v225_v52, %v52_v43 }
  0xdf   :  { %441 = vst [vmem:[%s613_s3 + $0x8] sm:$0xff] %v155_v50  ;;  %442 = vst [vmem:[%s613_s3 + $0x10] sm:$0xff] %v224_v51  ;;  %v294_v57 = vpop.f32.mrb[2].mxu0 }
  0xe0   :  { %443 = vst [vmem:[%s613_s3 + $0x18] sm:$0xff] %v226_v55  ;;  %v295_v58 = vadd.f32 %v294_v57, %v56_v49  ;;  %v296_v59 = vpop.f32.mrb[3].mxu0  ;;  %v365_v60 = vpop.f32.mrb[2].mxu1 }
  0xe1   :  { %v297_v61 = vadd.f32 %v296_v59, %v60_v53  ;;  %v366_v62 = vadd.f32 %v365_v60, %v64_v54  ;;  %v367_v63 = vpop.f32.mrb[3].mxu1 }
  0xe2   :  { %444 = vst [vmem:[%s613_s3 + $0x20] sm:$0xff] %v295_v58  ;;  %v368_v1 = vadd.f32 %v367_v63, %v68_v56 }
  0xe3   :  { %445 = vst [vmem:[%s613_s3 + $0x28] sm:$0xff] %v297_v61  ;;  %446 = vst [vmem:[%s613_s3 + $0x30] sm:$0xff] %v366_v62  ;;  %v436_v2 = vpop.f32.mrb[4].mxu0 }
  0xe4   :  { %447 = vst [vmem:[%s613_s3 + $0x38] sm:$0xff] %v368_v1  ;;  %v437_v3 = vadd.f32 %v454_v0, %v436_v2  ;;  %v469_v4 = vpop.f32.mrb[5].mxu0 }
  0xe6   :  { %449 = vst.msk [vmem:[%s613_s3 + $0x40] sm:$0xff] %vm448_vm2, %v437_v3 }

// kernel: ours_forward.13
= control target key start
LH: loop header
LB: loop body
LE: loop exit
PB: predicated region body
PF: predicated region fallthrough
CT: control target
= control target key end

     0   :  { %v1216_v0 = vmov 0.0|0.0   ;;  %vm1217_vm0 = vmmov 0   ;;  %v1218_v8 = vmov 0.0   ;;  %vm37_vm1 = vcmask 261120   ;;  %s1501_s1 = inlined_call_operand.vmem [shape: f32[8,32,32], index: 1, kind: input, shape index: {}]   ;;  %s1502_s0 = inlined_call_operand.vmem [shape: f32[16,32], index: 0, kind: input, shape index: {}]   ;;  %s1503_s3 = inlined_call_operand.vmem [shape: f32[32,64], index: 3, kind: input, shape index: {}]   ;;  %s1504_s5 = inlined_call_operand.vmem [shape: f32[64,8], index: 5, kind: input, shape index: {}]   ;;  %s1505_s2 = inlined_call_operand.vmem [shape: f32[8,32], index: 2, kind: input, shape index: {}]   ;;  %s1506_s4 = inlined_call_operand.vmem [shape: f32[1,64], index: 4, kind: input, shape index: {}]   ;;  %s1507_s6 = inlined_call_operand.vmem [shape: f32[1,8], index: 6, kind: input, shape index: {}]   ;;  %s1508_s7 = inlined_call_operand.vmem [shape: f32[16,8], index: 7, kind: output, shape index: {}]  }
   0x1   :  { %1141 = vmatprep.subr.bf16.mxu0 %v1216_v0  ;;  %1147 = vmatprep.subr.bf16.mxu1 %v1216_v0  ;;  %v28_v1 = vld [vmem:[%s1501_s1] sm:$0xff]  ;;  %v29_v2 = vld [vmem:[%s1501_s1 + $0x8] sm:$0xff]  ;;  %v30_v6 = vld [vmem:[%s1501_s1 + $0x10] sm:$0xff]  ;;  %vm111_vm2 = vcmask 254976   ;;  %vm828_vm3 = vcmask 523264   ;;  %vm910_vm4 = vcmask 64512  }
   0x2   :  { %v919_v3 = vld [vmem:[%s1501_s1 + $0x20] sm:$0xff]  ;;  %v1142_v4 = vpack.c.bf16 %v29_v2, %v28_v1  ;;  %v920_v5 = vld [vmem:[%s1501_s1 + $0x28] sm:$0xff]  ;;  %v31_v7 = vld [vmem:[%s1501_s1 + $0x18] sm:$0xff]  ;;  %1031 = vmatprep.mubr.msk.f32.mxu0 %vm1217_vm0, %v1218_v8  ;;  %1042 = vmatprep.mubr.msk.f32.mxu1 %vm1217_vm0, %v1218_v8 }
   0x3   :  { %v1148_v9 = vpack.c.bf16 %v920_v5, %v919_v3  ;;  %v921_v10 = vld [vmem:[%s1501_s1 + $0x30] sm:$0xff]  ;;  %v922_v11 = vld [vmem:[%s1501_s1 + $0x38] sm:$0xff]  ;;  %v1145_v12 = vpack.c.bf16 %v31_v7, %v30_v6  ;;  %v26_v13 = vld [vmem:[%s1502_s0] sm:$0x3] }
   0x4   :  { %1143 = vmatpush3.bf16.msra.mxu0 %v1142_v4  ;;  %v1151_v14 = vpack.c.bf16 %v922_v11, %v921_v10  ;;  %v113_v15 = vld [vmem:[%s1502_s0 + $0x2] sm:$0x3]  ;;  %v926_v17 = vld [vmem:[%s1501_s1 + $0x48] sm:$0xff]  ;;  %v27_v20 = vmax.f32 %v26_v13, 0.0  ;;  %v927_v24 = vld [vmem:[%s1501_s1 + $0x50] sm:$0xff] }
   0x5   :  { %1149 = vmatpush3.bf16.msra.mxu1 %v1148_v9  ;;  %1144 = vmatprep.subr.bf16.mxu0 %v1216_v0  ;;  %v925_v16 = vld [vmem:[%s1501_s1 + $0x40] sm:$0xff]  ;;  %v932_v19 = vld [vmem:[%s1501_s1 + $0x68] sm:$0xff]  ;;  %v114_v21 = vmax.f32 %v113_v15, 0.0  ;;  %v928_v25 = vld [vmem:[%s1501_s1 + $0x58] sm:$0xff] }
   0x6   :  { %1150 = vmatprep.subr.bf16.mxu1 %v1216_v0  ;;  %v931_v18 = vld [vmem:[%s1501_s1 + $0x60] sm:$0xff]  ;;  %v1154_v22 = vpack.c.bf16 %v926_v17, %v925_v16  ;;  %v933_v26 = vld [vmem:[%s1501_s1 + $0x70] sm:$0xff]  ;;  %v934_v27 = vld [vmem:[%s1501_s1 + $0x78] sm:$0xff]  ;;  %v1157_v28 = vpack.c.bf16 %v928_v25, %v927_v24 }
   0x7   :  { %v1160_v23 = vpack.c.bf16 %v932_v19, %v931_v18  ;;  %v199_v29 = vld [vmem:[%s1502_s0 + $0x4] sm:$0x3]  ;;  %v1163_v30 = vpack.c.bf16 %v934_v27, %v933_v26  ;;  %v285_v31 = vld [vmem:[%s1502_s0 + $0x6] sm:$0x3]  ;;  %v938_v33 = vld [vmem:[%s1501_s1 + $0x88] sm:$0xff] }
   0x8   :  { %1146 = vmatpush3.bf16.msra.mxu0 %v1145_v12  ;;  %v937_v32 = vld [vmem:[%s1501_s1 + $0x80] sm:$0xff]  ;;  %v944_v35 = vld [vmem:[%s1501_s1 + $0xa8] sm:$0xff]  ;;  %v200_v36 = vmax.f32 %v199_v29, 0.0  ;;  %v286_v37 = vmax.f32 %v285_v31, 0.0  ;;  %v939_v40 = vld [vmem:[%s1501_s1 + $0x90] sm:$0xff] }
   0x9   :  { %1152 = vmatpush3.bf16.msra.mxu1 %v1151_v14  ;;  %1153 = vmatprep.subr.bf16.mxu0 %v1216_v0  ;;  %v943_v34 = vld [vmem:[%s1501_s1 + $0xa0] sm:$0xff]  ;;  %v1166_v38 = vpack.c.bf16 %v938_v33, %v937_v32  ;;  %v940_v41 = vld [vmem:[%s1501_s1 + $0x98] sm:$0xff]  ;;  %v945_v42 = vld [vmem:[%s1501_s1 + $0xb0] sm:$0xff] }
   0xa   :  { %1159 = vmatprep.subr.bf16.mxu1 %v1216_v0  ;;  %v1172_v39 = vpack.c.bf16 %v944_v35, %v943_v34  ;;  %v946_v43 = vld [vmem:[%s1501_s1 + $0xb8] sm:$0xff]  ;;  %v1169_v44 = vpack.c.bf16 %v940_v41, %v939_v40  ;;  %v371_v45 = vld [vmem:[%s1502_s0 + $0x8] sm:$0x3]  ;;  %v457_v47 = vld [vmem:[%s1502_s0 + $0xa] sm:$0x3] }
   0xb   :  { %1032 = vmatmul.mubr.msk.f32.vlgmr.msra.gmra.mrb[0].mxu0 %vm37_vm1, %v27_v20  ;;  %v1175_v46 = vpack.c.bf16 %v946_v43, %v945_v42  ;;  %v949_v48 = vld [vmem:[%s1501_s1 + $0xc0] sm:$0xff]  ;;  %v950_v49 = vld [vmem:[%s1501_s1 + $0xc8] sm:$0xff]  ;;  %v372_v52 = vmax.f32 %v371_v45, 0.0  ;;  %v458_v53 = vmax.f32 %v457_v47, 0.0  ;;  %v951_v56 = vld [vmem:[%s1501_s1 + $0xd0] sm:$0xff] }
   0xc   :  { %1043 = vmatmul.mubr.msk.f32.vlgmr.msra.gmra.mrb[0].mxu1 %vm37_vm1, %v114_v21  ;;  %1155 = vmatpush3.bf16.msra.mxu0 %v1154_v22  ;;  %v955_v50 = vld [vmem:[%s1501_s1 + $0xe0] sm:$0xff]  ;;  %v956_v51 = vld [vmem:[%s1501_s1 + $0xe8] sm:$0xff]  ;;  %v1178_v54 = vpack.c.bf16 %v950_v49, %v949_v48  ;;  %v952_v57 = vld [vmem:[%s1501_s1 + $0xd8] sm:$0xff] }
   0xd   :  { %1161 = vmatpush3.bf16.msra.mxu1 %v1160_v23  ;;  %1156 = vmatprep.subr.bf16.mxu0 %v1216_v0  ;;  %v1184_v55 = vpack.c.bf16 %v956_v51, %v955_v50  ;;  %v957_v58 = vld [vmem:[%s1501_s1 + $0xf0] sm:$0xff]  ;;  %v958_v59 = vld [vmem:[%s1501_s1 + $0xf8] sm:$0xff]  ;;  %v1181_v60 = vpack.c.bf16 %v952_v57, %v951_v56  ;;  %v543_v61 = vld [vmem:[%s1502_s0 + $0xc] sm:$0x3] }
   0xe   :  { %1162 = vmatprep.subr.bf16.mxu1 %v1216_v0  ;;  %1053 = vmatprep.mubr.msk.f32.mxu0 %vm1217_vm0, %v1218_v8  ;;  %v1187_v62 = vpack.c.bf16 %v958_v59, %v957_v58  ;;  %v629_v63 = vld [vmem:[%s1502_s0 + $0xe] sm:$0x3]  ;;  %v544_v1 = vmax.f32 %v543_v61, 0.0  ;;  %v719_v3 = vld [vmem:[%s1503_s3] sm:$0xff]  ;;  %v721_v5 = vld [vmem:[%s1503_s3 + $0x10] sm:$0xff] }
   0xf   :  { %1064 = vmatprep.mubr.msk.f32.mxu1 %vm1217_vm0, %v1218_v8  ;;  %v630_v2 = vmax.f32 %v629_v63, 0.0  ;;  %v722_v6 = vld [vmem:[%s1503_s3 + $0x18] sm:$0xff]  ;;  %v814_v9 = vld [vmem:[%s1504_s5 + $0x8] sm:$0xff]  ;;  %v815_v10 = vld [vmem:[%s1504_s5 + $0x10] sm:$0xff] }
  0x10   :  { %1158 = vmatpush3.bf16.msra.mxu0 %v1157_v28  ;;  %v1193_v7 = vpack.c.bf16 %v722_v6, %v721_v5  ;;  %v816_v12 = vld [vmem:[%s1504_s5 + $0x18] sm:$0xff]  ;;  %v817_v14 = vld [vmem:[%s1504_s5 + $0x20] sm:$0xff]  ;;  %v818_v15 = vld [vmem:[%s1504_s5 + $0x28] sm:$0xff] }
  0x11   :  { %1164 = vmatpush3.bf16.msra.mxu1 %v1163_v30  ;;  %1165 = vmatprep.subr.bf16.mxu0 %v1216_v0  ;;  %v1201_v13 = vpack.c.bf16 %v816_v12, %v815_v10  ;;  %v1205_v16 = vpack.c.bf16 %v818_v15, %v817_v14  ;;  %v917_v17 = vld [vmem:[%s1505_s2] ss:$0 sm:$0xff]  ;;  %v923_v18 = vld [vmem:[%s1505_s2 + $0x1] ss:$0 sm:$0xff]  ;;  %v929_v25 = vld [vmem:[%s1505_s2 + $0x2] ss:$0 sm:$0xff] }
  0x12   :  { %1171 = vmatprep.subr.bf16.mxu1 %v1216_v0  ;;  %v935_v26 = vld [vmem:[%s1505_s2 + $0x3] ss:$0 sm:$0xff]  ;;  %v941_v33 = vld [vmem:[%s1505_s2 + $0x4] ss:$0 sm:$0xff]  ;;  %v947_v34 = vld [vmem:[%s1505_s2 + $0x5] ss:$0 sm:$0xff] }
  0x13   :  { %1054 = vmatmul.mubr.msk.f32.vlgmr.msra.gmra.mrb[2].mxu0 %vm37_vm1, %v200_v36  ;;  %v953_v43 = vld [vmem:[%s1505_s2 + $0x6] ss:$0 sm:$0xff]  ;;  %v961_v56 = vld [vmem:[%s1506_s4] ss:$0 sm:$0xff] }
  0x14   :  { %1065 = vmatmul.mubr.msk.f32.vlgmr.msra.gmra.mrb[2].mxu1 %vm37_vm1, %v286_v37  ;;  %1167 = vmatpush3.bf16.msra.mxu0 %v1166_v38  ;;  %v964_v63 = vld [vmem:[%s1507_s6] ss:$0 sm:$0xff] }
  0x15   :  { %1173 = vmatpush3.bf16.msra.mxu1 %v1172_v39  ;;  %1168 = vmatprep.subr.bf16.mxu0 %v1216_v0 }
  0x16   :  { %1174 = vmatprep.subr.bf16.mxu1 %v1216_v0  ;;  %1075 = vmatprep.mubr.msk.f32.mxu0 %vm1217_vm0, %v1218_v8 }
  0x17   :  { %1086 = vmatprep.mubr.msk.f32.mxu1 %vm1217_vm0, %v1218_v8 }
  0x18   :  { %1170 = vmatpush3.bf16.msra.mxu0 %v1169_v44  ;;  %v959_v44 = vld [vmem:[%s1505_s2 + $0x7] ss:$0 sm:$0xff] }
  0x19   :  { %1176 = vmatpush3.bf16.msra.mxu1 %v1175_v46  ;;  %1177 = vmatprep.subr.bf16.mxu0 %v1216_v0 }
  0x1a   :  { %1183 = vmatprep.subr.bf16.mxu1 %v1216_v0 }
  0x1b   :  { %1076 = vmatmul.mubr.msk.f32.vlgmr.msra.gmra.mrb[4].mxu0 %vm37_vm1, %v372_v52 }
  0x1c   :  { %1087 = vmatmul.mubr.msk.f32.vlgmr.msra.gmra.mrb[4].mxu1 %vm37_vm1, %v458_v53  ;;  %1179 = vmatpush3.bf16.msra.mxu0 %v1178_v54  ;;  %v819_v53 = vld [vmem:[%s1504_s5 + $0x30] sm:$0xff]  ;;  %v820_v54 = vld [vmem:[%s1504_s5 + $0x38] sm:$0xff] }
  0x1d   :  { %1185 = vmatpush3.bf16.msra.mxu1 %v1184_v55  ;;  %1180 = vmatprep.subr.bf16.mxu0 %v1216_v0  ;;  %v1209_v55 = vpack.c.bf16 %v820_v54, %v819_v53 }
  0x1e   :  { %1186 = vmatprep.subr.bf16.mxu1 %v1216_v0  ;;  %1097 = vmatprep.mubr.msk.f32.mxu0 %vm1217_vm0, %v1218_v8  ;;  %v720_v0 = vld [vmem:[%s1503_s3 + $0x8] sm:$0xff] }
  0x1f   :  { %1108 = vmatprep.mubr.msk.f32.mxu1 %vm1217_vm0, %v1218_v8  ;;  %v1189_v4 = vpack.c.bf16 %v720_v0, %v719_v3  ;;  %v813_v8 = vld [vmem:[%s1504_s5] sm:$0xff] }
  0x20   :  { %1182 = vmatpush3.bf16.msra.mxu0 %v1181_v60  ;;  %v1197_v11 = vpack.c.bf16 %v814_v9, %v813_v8 }
  0x21   :  { %1188 = vmatpush3.bf16.msra.mxu1 %v1187_v62  ;;  %1190 = vmatprep.subr.bf16.mxu0 %v1189_v4 }
  0x22   :  { %1198 = vmatprep.subr.bf16.mxu1 %v1197_v11 }
  0x23   :  { %1098 = vmatmul.mubr.msk.f32.vlgmr.msra.gmra.mrb[6].mxu0 %vm37_vm1, %v544_v1 }
  0x24   :  { %1109 = vmatmul.mubr.msk.f32.vlgmr.msra.gmra.mrb[6].mxu1 %vm37_vm1, %v630_v2  ;;  %1192 = vmatpush3.bf16.msra.mxu0 %v1189_v4 }
  0x25   :  { %1194 = vmatprep.subr.bf16.mxu0 %v1193_v7  ;;  %1200 = vmatpush3.bf16.msra.mxu1 %v1197_v11 }
  0x26   :  { %1202 = vmatprep.subr.bf16.mxu1 %v1201_v13 }
  0x28   :  { %1196 = vmatpush3.bf16.msra.mxu0 %v1193_v7 }
  0x29   :  { %1204 = vmatpush3.bf16.msra.mxu1 %v1201_v13 }
  0x2a   :  { %1206 = vmatprep.subr.bf16.mxu1 %v1205_v16 }
  0x2d   :  { %1208 = vmatpush3.bf16.msra.mxu1 %v1205_v16 }
  0x2e   :  { %1210 = vmatprep.subr.bf16.mxu1 %v1209_v55 }
  0x31   :  { %1212 = vmatpush3.bf16.msra.mxu1 %v1209_v55 }
  0xde   :  { %v107_v19 = vpop.f32.mrb[0].mxu0 }
  0xdf   :  { %v108_v20 = vadd.f32 %v917_v17, %v107_v19  ;;  %v194_v21 = vpop.f32.mrb[0].mxu1  ;;  %v1033_v22 = vpop.f32.mrb[1].mxu0 }
  0xe0   :  { %v195_v23 = vadd.f32 %v923_v18, %v194_v21  ;;  %v1044_v24 = vpop.f32.mrb[1].mxu1 }
  0xe1   :  { %112 = vst.msk [vmem:[#allocation2] sm:$0x3] %vm111_vm2, %v108_v20 }
  0xe2   :  { %198 = vst.msk [vmem:[#allocation2 + $0x2] sm:$0x3] %vm111_vm2, %v195_v23 }
  0xe6   :  { %v280_v27 = vpop.f32.mrb[2].mxu0 }
  0xe7   :  { %v281_v28 = vadd.f32 %v929_v25, %v280_v27  ;;  %v366_v29 = vpop.f32.mrb[2].mxu1  ;;  %v1055_v30 = vpop.f32.mrb[3].mxu0 }
  0xe8   :  { %v367_v31 = vadd.f32 %v935_v26, %v366_v29  ;;  %v1066_v32 = vpop.f32.mrb[3].mxu1 }
  0xe9   :  { %284 = vst.msk [vmem:[#allocation2 + $0x4] sm:$0x3] %vm111_vm2, %v281_v28 }
  0xea   :  { %370 = vst.msk [vmem:[#allocation2 + $0x6] sm:$0x3] %vm111_vm2, %v367_v31 }
  0xee   :  { %v452_v35 = vpop.f32.mrb[4].mxu0 }
  0xef   :  { %v453_v36 = vadd.f32 %v941_v33, %v452_v35  ;;  %v538_v37 = vpop.f32.mrb[4].mxu1  ;;  %v1077_v38 = vpop.f32.mrb[5].mxu0 }
  0xf0   :  { %v539_v39 = vadd.f32 %v947_v34, %v538_v37  ;;  %v1088_v40 = vpop.f32.mrb[5].mxu1 }
  0xf1   :  { %456 = vst.msk [vmem:[#allocation2 + $0x8] sm:$0x3] %vm111_vm2, %v453_v36  ;;  %v715_v41 = vld [vmem:[#allocation2] sm:$0xff] }
  0xf2   :  { %542 = vst.msk [vmem:[#allocation2 + $0xa] sm:$0x3] %vm111_vm2, %v539_v39  ;;  %v717_v42 = vmax.f32 %v715_v41, 0.0 }
  0xf4   :  { %1119 = vmatprep.mubr.msk.f32.mxu0 %vm37_vm1, %v717_v42 }
  0xf6   :  { %v624_v45 = vpop.f32.mrb[6].mxu0 }
  0xf7   :  { %v625_v46 = vadd.f32 %v953_v43, %v624_v45  ;;  %v710_v47 = vpop.f32.mrb[6].mxu1  ;;  %v1099_v48 = vpop.f32.mrb[7].mxu0 }
  0xf8   :  { %v711_v49 = vadd.f32 %v959_v44, %v710_v47  ;;  %v1110_v50 = vpop.f32.mrb[7].mxu1 }
  0xf9   :  { %628 = vst.msk [vmem:[#allocation2 + $0xc] sm:$0x3] %vm111_vm2, %v625_v46 }
  0xfa   :  { %714 = vst.msk [vmem:[#allocation2 + $0xe] sm:$0x3] %vm111_vm2, %v711_v49 }
 0x101   :  { %v716_v51 = vld [vmem:[#allocation2 + $0x8] sm:$0xff] }
 0x102   :  { %v718_v52 = vmax.f32 %v716_v51, 0.0 }
 0x104   :  { %1120 = vmatmul.mubr.msk.f32.vlgmr.msra.gmra.mrb[8].mxu0 %vm37_vm1, %v718_v52 }
 0x1d7   :  { %v1121_v57 = vpop.f32.mrb[8].mxu0 }
 0x1d8   :  { %v808_v58 = vadd.f32 %v1121_v57, %v961_v56  ;;  %v802_v59 = vpop.f32.mrb[9].mxu0 }
 0x1d9   :  { %v803_v60 = vadd.f32 %v961_v56, %v802_v59 }
 0x1da   :  { %v812_v62 = vmax.f32 %v808_v58, 0.0 }
 0x1db   :  { %v811_v61 = vmax.f32 %v803_v60, 0.0 }
 0x1dd   :  { %1138 = vmatprep.mubr.msk.f32.mxu1 %vm828_vm3, %v811_v61 }
 0x1de   :  { %1139 = vmatmul.mubr.msk.f32.vlgmr.msra.gmra.mrb[8].mxu1 %vm828_vm3, %v812_v62 }
 0x2b1   :  { %v1140_v1 = vpop.f32.mrb[8].mxu1 }
 0x2b2   :  { %v907_v2 = vadd.f32 %v1140_v1, %v964_v63  ;;  %v901_v3 = vpop.f32.mrb[9].mxu1 }
 0x2b3   :  { %v902_v0 = vadd.f32 %v964_v63, %v901_v3 }
 0x2b4   :  { %912 = vst.msk [vmem:[%s1508_s7 + $0x8] sm:$0xff] %vm910_vm4, %v907_v2 }
 0x2b5   :  { %911 = vst.msk [vmem:[%s1508_s7] sm:$0xff] %vm910_vm4, %v902_v0 }

</bundles_post_ra>
